<compile_context>
chip_gen: v6e
topology: v6e:2x2x1
jax: 0.10.0
libtpu: 0.0.40
codegen_flags: <defaults>
</compile_context>

<pallas_src>
import math
import functools

import jax
import jax.numpy as jnp
from jax import lax
from jax.experimental import pallas as pl
from jax.experimental.pallas import tpu as pltpu

# ---- Hyper-parameters (GNNEncoder.__init__ defaults, small synthetic vocab) ----
NODE_VOCAB = 32          # node_vocab_size (small for the synthetic test)
HID = 32                 # node_hidden_size
N_LAYERS = 8             # n_message_passes
EDGE_DIM = 64            # edge_emb_dim
NUM_ACTIONS = 100        # num_actions
NUM_HEADS = 4
HEAD_DIM = HID // NUM_HEADS
NUM_FLOW = 8             # flow-type vocabulary used by EdgeEncoding
NUM_POS = 16             # position vocabulary used by EdgeEncoding
OUT_PAD = 128            # lane-dense padded action axis (sliced back to 100)


def _gnn_encoder_kernel(
    # per-graph blocks (leading graph dim squeezed away)
    node_oh_ref, fp_oh_ref, sameblk_ref, src_oh_ref, dst_oh_ref, instr_ref,
    # shared weights (resident, constant index map)
    emb_ref, w_fp_ref, w_blk_ref, b_enc_ref,
    head_pool_ref, head_pool_t_ref,
    wqkv_ref, w_eall_ref, wo_ref, bo_ref, wne_ref, be_ref,
    w1_ref, b1_ref, w2_ref, b2_ref,
    out_ref):
  f32 = jnp.float32
  bf16 = jnp.bfloat16
  dot = functools.partial(jnp.dot, preferred_element_type=f32)

  def dot_t(a, b):  # a^T @ b : contract over axis 0 of both, f32 accumulate
    return lax.dot_general(a, b, (((0,), (0,)), ((), ())),
                           preferred_element_type=f32)

  NEG = -1e30
  scale = 1.0 / math.sqrt(HEAD_DIM)

  src = src_oh_ref[...]                       # (E, N) bf16 one-hot (src gather)
  dst = dst_oh_ref[...]                       # (E, N) bf16 one-hot (dst gather/scatter)
  mask = dst.astype(f32) > 0.5                # (E, N) destination membership
  hp = head_pool_ref[...]                     # (HID, NUM_HEADS) bf16
  hpt = head_pool_t_ref[...]                  # (NUM_HEADS, HID) bf16

  # --- featurize_nodes: nn.Embedding lookup as one-hot @ table (bf16 -> f32 acc) ---
  x = dot(node_oh_ref[...], emb_ref[...])                           # (N, HID)

  # --- get_edge_encoding (EdgeEncoding) ---
  # TODO(synk): EdgeEncoding's exact definition is not in the provided source;
  # implemented as learned flow/position embeddings + a same-block indicator.
  e = (dot(fp_oh_ref[...], w_fp_ref[...])
       + sameblk_ref[...] * w_blk_ref[...]
       + b_enc_ref[...])                                            # (E, EDGE_DIM)

  # --- layers_encode: n_message_passes x EdgeAttn ---
  # TODO(synk): EdgeAttn's exact definition is not in the provided source;
  # implemented as multi-head edge-conditioned attention with node+edge update.
  for l in range(N_LAYERS):
    qkv = dot(x.astype(bf16), wqkv_ref[l])                          # (N, 3*HID) fused q|k|v
    e_proj = dot(e.astype(bf16), w_eall_ref[l])                     # (E, HID+EDGE_DIM) fused
    ep = e_proj[:, :HID]                                            # (E, HID)
    e_lin = e_proj[:, HID:]                                         # (E, EDGE_DIM)

    q_dst = dot(dst, qkv[:, :HID].astype(bf16))                     # (E, HID) gather dest q
    kv_src = dot(src, qkv[:, HID:].astype(bf16))                    # (E, 2*HID) gather src k|v
    k_src = kv_src[:, :HID]
    v_src = kv_src[:, HID:]

    prod = (q_dst * (k_src + ep)) * scale                           # (E, HID) f32
    logits_h = dot(prod.astype(bf16), hp)                           # (E, NUM_HEADS) per-head

    # per-destination, per-head max -> numerically safe scatter-softmax
    m_cols = []
    for h in range(NUM_HEADS):
      col = logits_h[:, h:h + 1]                                    # (E, 1)
      nmax = jnp.max(jnp.where(mask, col, NEG), axis=0, keepdims=True)   # (1, N)
      m_cols.append(jnp.max(jnp.where(mask, nmax, NEG), axis=1, keepdims=True))  # (E, 1)
    m_dst = jnp.concatenate(m_cols, axis=1)                         # (E, NUM_HEADS)

    ex = jnp.exp(logits_h - m_dst)                                  # (E, NUM_HEADS) f32
    node_sum = dot_t(dst, ex.astype(bf16))                          # (N, NUM_HEADS) scatter-sum
    denom = dot(dst, node_sum.astype(bf16))                         # (E, NUM_HEADS) gather back
    alpha_h = ex * pl.reciprocal(denom + 1e-30, approx=True)        # scatter-softmax
    alpha = dot(alpha_h.astype(bf16), hpt)                          # (E, HID) per-head bcast

    msg = alpha * (v_src + ep)                                      # (E, HID)
    agg = dot_t(dst, msg.astype(bf16))                              # (N, HID) scatter-sum

    x = jnp.maximum(x + dot(agg.astype(bf16), wo_ref[l]) + bo_ref[l], 0.0)
    e = jnp.maximum(e_lin + dot((k_src + q_dst).astype(bf16), wne_ref[l]) + be_ref[l], 0.0)

  # --- readout: per-graph mean over instruction nodes / edges, concat, Q head ---
  instr = instr_ref[...]                                            # (N, 1) f32 mask
  n_cnt = jnp.maximum(jnp.sum(instr, axis=0, keepdims=True), 1.0)   # (1, 1)
  g_node = jnp.sum(x * instr, axis=0, keepdims=True) / n_cnt        # (1, HID)
  g_edge = jnp.mean(e, axis=0, keepdims=True)                       # (1, EDGE_DIM)
  g_cat = jnp.concatenate([g_node, g_edge], axis=1)                 # (1, HID+EDGE_DIM)

  # Q = Linear(HID+EDGE_DIM, HID) -> ReLU -> Linear(HID, NUM_ACTIONS) (padded to 128)
  h1 = jnp.maximum(dot(g_cat.astype(bf16), w1_ref[...]) + b1_ref[...], 0.0)
  logits = dot(h1.astype(bf16), w2_ref[...]) + b2_ref[...]          # (1, OUT_PAD)

  # log_softmax (padded columns carry -1e30 bias -> contribute ~0 to the lse)
  m = jnp.max(logits, axis=-1, keepdims=True)
  lse = m + jnp.log(jnp.sum(jnp.exp(logits - m), axis=-1, keepdims=True))
  out_ref[...] = logits - lse


def _cost_estimate(operands, B, Ng, Eg):
  per_layer = (Ng * HID * 3 * HID                      # fused qkv projection
               + Eg * EDGE_DIM * (HID + EDGE_DIM)      # fused edge projection
               + Eg * Ng * 3 * HID                     # q / kv gathers
               + Eg * HID * NUM_HEADS                  # head pooling
               + 2 * Eg * Ng * NUM_HEADS               # softmax scatter/gather
               + Eg * NUM_HEADS * HID                  # alpha broadcast
               + Eg * Ng * HID                         # message scatter
               + Ng * HID * HID                        # node update
               + Eg * HID * EDGE_DIM)                  # edge update
  flops = 2 * B * (N_LAYERS * per_layer
                   + Ng * NODE_VOCAB * HID
                   + Eg * (NUM_FLOW + NUM_POS) * EDGE_DIM
                   + (HID + EDGE_DIM) * HID
                   + HID * OUT_PAD)
  transcendentals = B * (N_LAYERS * Eg * NUM_HEADS + OUT_PAD)
  bytes_accessed = (sum(int(x.size) * x.dtype.itemsize for x in operands)
                    + B * OUT_PAD * 4)
  return pl.CostEstimate(flops=int(flops), transcendentals=int(transcendentals),
                         bytes_accessed=int(bytes_accessed))


def gnn_encoder_forward(operands):
  B, Ng, _ = operands[0].shape          # node_oh (B, Ng, NODE_VOCAB)
  Eg = operands[3].shape[1]             # src_oh  (B, Eg, Ng)

  def graph_spec(shape):                # per-graph slab, leading dim squeezed
    return pl.BlockSpec((None,) + tuple(shape[1:]),
                        lambda b: (b,) + (0,) * (len(shape) - 1))

  def shared_spec(shape):               # full-array resident block
    return pl.BlockSpec(tuple(shape), lambda b: (0,) * len(shape))

  in_specs = ([graph_spec(op.shape) for op in operands[:6]]
              + [shared_spec(op.shape) for op in operands[6:]])
  out_spec = pl.BlockSpec((None, 1, OUT_PAD), lambda b: (b, 0, 0))

  out = pl.pallas_call(
      _gnn_encoder_kernel,
      out_shape=jax.ShapeDtypeStruct((B, 1, OUT_PAD), jnp.float32),
      grid_spec=pltpu.PrefetchScalarGridSpec(
          num_scalar_prefetch=0, grid=(B,),
          in_specs=in_specs, out_specs=out_spec),
      compiler_params=pltpu.CompilerParams(
          dimension_semantics=("parallel",),
          vmem_limit_bytes=64 * 1024 * 1024),
      cost_estimate=_cost_estimate(operands, B, Ng, Eg),
  )(*operands)
  return out[:, 0, :NUM_ACTIONS]        # drop the lane-padding columns


# ----------------------- parameter / input construction (glue) -----------------------
def init_params(key):
  ks = jax.random.split(key, 16)
  def nrm(k, shape, fan_in):
    return jax.random.normal(k, shape, jnp.float32) / math.sqrt(float(fan_in))
  return dict(
      emb=nrm(ks[0], (NODE_VOCAB, HID), HID),
      w_flow=nrm(ks[1], (NUM_FLOW, EDGE_DIM), NUM_FLOW),
      w_pos=nrm(ks[2], (NUM_POS, EDGE_DIM), NUM_POS),
      w_blk=nrm(ks[3], (1, EDGE_DIM), 1.0),
      b_enc=jnp.zeros((1, EDGE_DIM), jnp.float32),
      wq=nrm(ks[4], (N_LAYERS, HID, HID), HID),
      wk=nrm(ks[5], (N_LAYERS, HID, HID), HID),
      wv=nrm(ks[6], (N_LAYERS, HID, HID), HID),
      we=nrm(ks[7], (N_LAYERS, EDGE_DIM, HID), EDGE_DIM),
      wo=nrm(ks[8], (N_LAYERS, HID, HID), HID),
      bo=jnp.zeros((N_LAYERS, 1, HID), jnp.float32),
      wee=nrm(ks[9], (N_LAYERS, EDGE_DIM, EDGE_DIM), EDGE_DIM),
      wne=nrm(ks[10], (N_LAYERS, HID, EDGE_DIM), HID),
      be=jnp.zeros((N_LAYERS, 1, EDGE_DIM), jnp.float32),
      w1n=nrm(ks[11], (HID, HID), HID + EDGE_DIM),
      w1e=nrm(ks[12], (EDGE_DIM, HID), HID + EDGE_DIM),
      b1=jnp.zeros((1, HID), jnp.float32),
      w2=nrm(ks[13], (HID, NUM_ACTIONS), HID),
      b2=jnp.zeros((1, NUM_ACTIONS), jnp.float32),
  )


def make_graph(key, num_graphs=2, nodes_per_graph=8, edges_per_graph=16):
  N = num_graphs * nodes_per_graph
  E = num_graphs * edges_per_graph
  ks = jax.random.split(key, 8)
  x = jax.random.randint(ks[0], (N,), 0, NODE_VOCAB)
  ntype = jax.random.randint(ks[1], (N,), 0, 3)
  # guarantee at least one instruction node (type == 0) per graph
  ntype = ntype.at[jnp.arange(num_graphs) * nodes_per_graph].set(0)
  block = jax.random.randint(ks[2], (N,), 0, 4)
  batch = jnp.repeat(jnp.arange(num_graphs), nodes_per_graph)
  edge_graph = jnp.repeat(jnp.arange(num_graphs), edges_per_graph)
  src = jax.random.randint(ks[3], (E,), 0, nodes_per_graph) + edge_graph * nodes_per_graph
  dst = jax.random.randint(ks[4], (E,), 0, nodes_per_graph) + edge_graph * nodes_per_graph
  flow = jax.random.randint(ks[5], (E,), 0, NUM_FLOW)
  pos = jax.random.randint(ks[6], (E,), 0, NUM_POS)
  return dict(x=x, type=ntype, block=block, batch=batch,
              edge_index=jnp.stack([src, dst]), flow=flow, position=pos,
              num_graphs=num_graphs)


def build_operands(g, p):
  f32, bf16 = jnp.float32, jnp.bfloat16
  B = g["num_graphs"]
  x = g["x"]; N = x.shape[0]
  src, dst = g["edge_index"][0], g["edge_index"][1]
  E = src.shape[0]
  Ng, Eg = N // B, E // B         # toy harness packs equal-sized graphs

  # graph b owns nodes [b*Ng, (b+1)*Ng) -> local (per-graph) indices
  src_l = (src % Ng).reshape(B, Eg)
  dst_l = (dst % Ng).reshape(B, Eg)

  node_oh = jax.nn.one_hot(x.reshape(B, Ng), NODE_VOCAB, dtype=bf16)          # (B,Ng,V)
  flow_oh = jax.nn.one_hot(g["flow"].reshape(B, Eg), NUM_FLOW, dtype=bf16)
  pos_oh = jax.nn.one_hot(jnp.clip(g["position"], 0, NUM_POS - 1).reshape(B, Eg),
                          NUM_POS, dtype=bf16)
  fp_oh = jnp.concatenate([flow_oh, pos_oh], axis=-1)                         # (B,Eg,NF+NP)

  block = g["block"]
  sameblk = (block[src] == block[dst]).astype(f32).reshape(B, Eg, 1)
  src_oh = jax.nn.one_hot(src_l, Ng, dtype=bf16)                              # (B,Eg,Ng)
  dst_oh = jax.nn.one_hot(dst_l, Ng, dtype=bf16)                              # (B,Eg,Ng)
  instr = (g["type"] == 0).astype(f32).reshape(B, Ng, 1)                      # (B,Ng,1)

  head_ids = jnp.arange(HID) // HEAD_DIM
  head_pool = (head_ids[:, None] == jnp.arange(NUM_HEADS)[None, :]).astype(bf16)
  head_pool_t = head_pool.T

  # fused / padded weights (bf16 MXU operands, f32 biases)
  w_fp = jnp.concatenate([p["w_flow"], p["w_pos"]], axis=0).astype(bf16)      # (NF+NP,ED)
  wqkv = jnp.concatenate([p["wq"], p["wk"], p["wv"]], axis=-1).astype(bf16)   # (L,HID,3H)
  w_eall = jnp.concatenate([p["we"], p["wee"]], axis=-1).astype(bf16)         # (L,ED,H+ED)
  w1 = jnp.concatenate([p["w1n"], p["w1e"]], axis=0).astype(bf16)             # (H+ED,HID)
  w2p = jnp.zeros((HID, OUT_PAD), f32).at[:, :NUM_ACTIONS].set(p["w2"]).astype(bf16)
  b2p = jnp.full((1, OUT_PAD), -1e30, f32).at[:, :NUM_ACTIONS].set(p["b2"])

  return (node_oh, fp_oh, sameblk, src_oh, dst_oh, instr,
          p["emb"].astype(bf16), w_fp, p["w_blk"], p["b_enc"],
          head_pool, head_pool_t,
          wqkv, w_eall, p["wo"].astype(bf16), p["bo"],
          p["wne"].astype(bf16), p["be"],
          w1, p["b1"], w2p, b2p)


if __name__ == "__main__":
  key = jax.random.PRNGKey(0)
  kg, kp = jax.random.split(key)
  g = make_graph(kg, num_graphs=2, nodes_per_graph=8, edges_per_graph=16)
  params = init_params(kp)
  operands = build_operands(g, params)

  out = gnn_encoder_forward(operands)
  out = jax.block_until_ready(out)

  assert out.shape == (g["num_graphs"], NUM_ACTIONS)
  assert bool(jnp.all(jnp.isfinite(out)))
  # rows of log_softmax should exp-sum to ~1
  assert bool(jnp.all(jnp.abs(jnp.sum(jnp.exp(out), axis=-1) - 1.0) < 1e-3))
  print("KERNEL_OK")
</pallas_src>

<mosaic_0001>
module attributes {stable_mosaic.version = 11 : i64} {
  func.func @_gnn_encoder_kernel(%arg0: i32, %arg1: memref<1x8x32xbf16, #tpu.memory_space<vmem>>, %arg2: memref<1x16x24xbf16, #tpu.memory_space<vmem>>, %arg3: memref<1x16x1xf32, #tpu.memory_space<vmem>>, %arg4: memref<1x16x8xbf16, #tpu.memory_space<vmem>>, %arg5: memref<1x16x8xbf16, #tpu.memory_space<vmem>>, %arg6: memref<1x8x1xf32, #tpu.memory_space<vmem>>, %arg7: memref<32x32xbf16, #tpu.memory_space<vmem>>, %arg8: memref<24x64xbf16, #tpu.memory_space<vmem>>, %arg9: memref<1x64xf32, #tpu.memory_space<vmem>>, %arg10: memref<1x64xf32, #tpu.memory_space<vmem>>, %arg11: memref<32x4xbf16, #tpu.memory_space<vmem>>, %arg12: memref<4x32xbf16, #tpu.memory_space<vmem>>, %arg13: memref<8x32x96xbf16, #tpu.memory_space<vmem>>, %arg14: memref<8x64x96xbf16, #tpu.memory_space<vmem>>, %arg15: memref<8x32x32xbf16, #tpu.memory_space<vmem>>, %arg16: memref<8x1x32xf32, #tpu.memory_space<vmem>>, %arg17: memref<8x32x64xbf16, #tpu.memory_space<vmem>>, %arg18: memref<8x1x64xf32, #tpu.memory_space<vmem>>, %arg19: memref<96x32xbf16, #tpu.memory_space<vmem>>, %arg20: memref<1x32xf32, #tpu.memory_space<vmem>>, %arg21: memref<32x128xbf16, #tpu.memory_space<vmem>>, %arg22: memref<1x128xf32, #tpu.memory_space<vmem>>, %arg23: memref<1x1x128xf32, #tpu.memory_space<vmem>>) attributes {dimension_semantics = [#tpu.dimension_semantics<parallel>], iteration_bounds = array<i64: 2>, scalar_prefetch = 0 : i64, scratch_operands = 0 : i64, tpu.core_type = #tpu.core_type<tc>, window_params = [{transform_indices = @transform_0, window_bounds = array<i64: 1, 8, 32>}, {transform_indices = @transform_1, window_bounds = array<i64: 1, 16, 24>}, {transform_indices = @transform_2, window_bounds = array<i64: 1, 16, 1>}, {transform_indices = @transform_3, window_bounds = array<i64: 1, 16, 8>}, {transform_indices = @transform_4, window_bounds = array<i64: 1, 16, 8>}, {transform_indices = @transform_5, window_bounds = array<i64: 1, 8, 1>}, {pipeline_mode = #tpu.pipeline_mode<synchronous>, transform_indices = @transform_6, window_bounds = array<i64: 32, 32>}, {pipeline_mode = #tpu.pipeline_mode<synchronous>, transform_indices = @transform_7, window_bounds = array<i64: 24, 64>}, {pipeline_mode = #tpu.pipeline_mode<synchronous>, transform_indices = @transform_8, window_bounds = array<i64: 1, 64>}, {pipeline_mode = #tpu.pipeline_mode<synchronous>, transform_indices = @transform_9, window_bounds = array<i64: 1, 64>}, {pipeline_mode = #tpu.pipeline_mode<synchronous>, transform_indices = @transform_10, window_bounds = array<i64: 32, 4>}, {pipeline_mode = #tpu.pipeline_mode<synchronous>, transform_indices = @transform_11, window_bounds = array<i64: 4, 32>}, {pipeline_mode = #tpu.pipeline_mode<synchronous>, transform_indices = @transform_12, window_bounds = array<i64: 8, 32, 96>}, {pipeline_mode = #tpu.pipeline_mode<synchronous>, transform_indices = @transform_13, window_bounds = array<i64: 8, 64, 96>}, {pipeline_mode = #tpu.pipeline_mode<synchronous>, transform_indices = @transform_14, window_bounds = array<i64: 8, 32, 32>}, {pipeline_mode = #tpu.pipeline_mode<synchronous>, transform_indices = @transform_15, window_bounds = array<i64: 8, 1, 32>}, {pipeline_mode = #tpu.pipeline_mode<synchronous>, transform_indices = @transform_16, window_bounds = array<i64: 8, 32, 64>}, {pipeline_mode = #tpu.pipeline_mode<synchronous>, transform_indices = @transform_17, window_bounds = array<i64: 8, 1, 64>}, {pipeline_mode = #tpu.pipeline_mode<synchronous>, transform_indices = @transform_18, window_bounds = array<i64: 96, 32>}, {pipeline_mode = #tpu.pipeline_mode<synchronous>, transform_indices = @transform_19, window_bounds = array<i64: 1, 32>}, {pipeline_mode = #tpu.pipeline_mode<synchronous>, transform_indices = @transform_20, window_bounds = array<i64: 32, 128>}, {pipeline_mode = #tpu.pipeline_mode<synchronous>, transform_indices = @transform_21, window_bounds = array<i64: 1, 128>}, {transform_indices = @transform_22, window_bounds = array<i64: 1, 1, 128>}]} {
    %c0 = arith.constant 0 : index
    %c0_0 = arith.constant 0 : index
    %c0_1 = arith.constant 0 : index
    %0 = vector.load %arg4[%c0, %c0_0, %c0_1] : memref<1x16x8xbf16, #tpu.memory_space<vmem>>, vector<1x16x8xbf16>
    %1 = vector.shape_cast %0 : vector<1x16x8xbf16> to vector<16x8xbf16>
    %c0_2 = arith.constant 0 : index
    %c0_3 = arith.constant 0 : index
    %c0_4 = arith.constant 0 : index
    %2 = vector.load %arg5[%c0_2, %c0_3, %c0_4] : memref<1x16x8xbf16, #tpu.memory_space<vmem>>, vector<1x16x8xbf16>
    %3 = vector.shape_cast %2 : vector<1x16x8xbf16> to vector<16x8xbf16>
    %4 = arith.extf %3 : vector<16x8xbf16> to vector<16x8xf32>
    %cst = arith.constant 5.000000e-01 : f32
    %5 = vector.broadcast %cst : f32 to vector<16x8xf32>
    %6 = arith.cmpf ogt, %4, %5 : vector<16x8xf32>
    %c0_5 = arith.constant 0 : index
    %c0_6 = arith.constant 0 : index
    %7 = vector.load %arg11[%c0_5, %c0_6] : memref<32x4xbf16, #tpu.memory_space<vmem>>, vector<32x4xbf16>
    %c0_7 = arith.constant 0 : index
    %c0_8 = arith.constant 0 : index
    %8 = vector.load %arg12[%c0_7, %c0_8] : memref<4x32xbf16, #tpu.memory_space<vmem>>, vector<4x32xbf16>
    %c0_9 = arith.constant 0 : index
    %c0_10 = arith.constant 0 : index
    %c0_11 = arith.constant 0 : index
    %9 = vector.load %arg1[%c0_9, %c0_10, %c0_11] : memref<1x8x32xbf16, #tpu.memory_space<vmem>>, vector<1x8x32xbf16>
    %10 = vector.shape_cast %9 : vector<1x8x32xbf16> to vector<8x32xbf16>
    %c0_12 = arith.constant 0 : index
    %c0_13 = arith.constant 0 : index
    %11 = vector.load %arg7[%c0_12, %c0_13] : memref<32x32xbf16, #tpu.memory_space<vmem>>, vector<32x32xbf16>
    %cst_14 = arith.constant dense<0.000000e+00> : vector<8x32xf32>
    %12 = tpu.matmul %10, %11, %cst_14 {dimension_numbers = #tpu.dot_dimension_numbers<[1], [0], [0], [1], [0, 0, 1, 1], [], []>} : vector<8x32xbf16>, vector<32x32xbf16>, vector<8x32xf32> -> vector<8x32xf32>
    %c0_15 = arith.constant 0 : index
    %c0_16 = arith.constant 0 : index
    %c0_17 = arith.constant 0 : index
    %13 = vector.load %arg2[%c0_15, %c0_16, %c0_17] : memref<1x16x24xbf16, #tpu.memory_space<vmem>>, vector<1x16x24xbf16>
    %14 = vector.shape_cast %13 : vector<1x16x24xbf16> to vector<16x24xbf16>
    %c0_18 = arith.constant 0 : index
    %c0_19 = arith.constant 0 : index
    %15 = vector.load %arg8[%c0_18, %c0_19] : memref<24x64xbf16, #tpu.memory_space<vmem>>, vector<24x64xbf16>
    %cst_20 = arith.constant dense<0.000000e+00> : vector<16x64xf32>
    %16 = tpu.matmul %14, %15, %cst_20 {dimension_numbers = #tpu.dot_dimension_numbers<[1], [0], [0], [1], [0, 0, 1, 1], [], []>} : vector<16x24xbf16>, vector<24x64xbf16>, vector<16x64xf32> -> vector<16x64xf32>
    %c0_21 = arith.constant 0 : index
    %c0_22 = arith.constant 0 : index
    %c0_23 = arith.constant 0 : index
    %17 = vector.load %arg3[%c0_21, %c0_22, %c0_23] : memref<1x16x1xf32, #tpu.memory_space<vmem>>, vector<1x16x1xf32>
    %18 = vector.shape_cast %17 : vector<1x16x1xf32> to vector<16x1xf32>
    %c0_24 = arith.constant 0 : index
    %c0_25 = arith.constant 0 : index
    %19 = vector.load %arg9[%c0_24, %c0_25] : memref<1x64xf32, #tpu.memory_space<vmem>>, vector<1x64xf32>
    %20 = vector.broadcast %18 : vector<16x1xf32> to vector<16x64xf32>
    %21 = vector.broadcast %19 : vector<1x64xf32> to vector<16x64xf32>
    %22 = arith.mulf %20, %21 : vector<16x64xf32>
    %23 = arith.addf %16, %22 : vector<16x64xf32>
    %c0_26 = arith.constant 0 : index
    %c0_27 = arith.constant 0 : index
    %24 = vector.load %arg10[%c0_26, %c0_27] : memref<1x64xf32, #tpu.memory_space<vmem>>, vector<1x64xf32>
    %25 = vector.broadcast %24 : vector<1x64xf32> to vector<16x64xf32>
    %26 = arith.addf %23, %25 : vector<16x64xf32>
    %27 = arith.truncf %12 : vector<8x32xf32> to vector<8x32xbf16>
    %c0_28 = arith.constant 0 : index
    %c0_29 = arith.constant 0 : index
    %c0_30 = arith.constant 0 : index
    %28 = vector.load %arg13[%c0_28, %c0_29, %c0_30] : memref<8x32x96xbf16, #tpu.memory_space<vmem>>, vector<1x32x96xbf16>
    %29 = vector.shape_cast %28 : vector<1x32x96xbf16> to vector<32x96xbf16>
    %cst_31 = arith.constant dense<0.000000e+00> : vector<8x96xf32>
    %30 = tpu.matmul %27, %29, %cst_31 {dimension_numbers = #tpu.dot_dimension_numbers<[1], [0], [0], [1], [0, 0, 1, 1], [], []>} : vector<8x32xbf16>, vector<32x96xbf16>, vector<8x96xf32> -> vector<8x96xf32>
    %31 = arith.truncf %26 : vector<16x64xf32> to vector<16x64xbf16>
    %c0_32 = arith.constant 0 : index
    %c0_33 = arith.constant 0 : index
    %c0_34 = arith.constant 0 : index
    %32 = vector.load %arg14[%c0_32, %c0_33, %c0_34] : memref<8x64x96xbf16, #tpu.memory_space<vmem>>, vector<1x64x96xbf16>
    %33 = vector.shape_cast %32 : vector<1x64x96xbf16> to vector<64x96xbf16>
    %cst_35 = arith.constant dense<0.000000e+00> : vector<16x96xf32>
    %34 = tpu.matmul %31, %33, %cst_35 {dimension_numbers = #tpu.dot_dimension_numbers<[1], [0], [0], [1], [0, 0, 1, 1], [], []>} : vector<16x64xbf16>, vector<64x96xbf16>, vector<16x96xf32> -> vector<16x96xf32>
    %35 = vector.extract_strided_slice %34 {offsets = [0, 0], sizes = [16, 32], strides = [1, 1]} : vector<16x96xf32> to vector<16x32xf32>
    %36 = vector.extract_strided_slice %34 {offsets = [0, 32], sizes = [16, 64], strides = [1, 1]} : vector<16x96xf32> to vector<16x64xf32>
    %37 = vector.extract_strided_slice %30 {offsets = [0, 0], sizes = [8, 32], strides = [1, 1]} : vector<8x96xf32> to vector<8x32xf32>
    %38 = arith.truncf %37 : vector<8x32xf32> to vector<8x32xbf16>
    %cst_36 = arith.constant dense<0.000000e+00> : vector<16x32xf32>
    %39 = tpu.matmul %3, %38, %cst_36 {dimension_numbers = #tpu.dot_dimension_numbers<[1], [0], [0], [1], [0, 0, 1, 1], [], []>} : vector<16x8xbf16>, vector<8x32xbf16>, vector<16x32xf32> -> vector<16x32xf32>
    %40 = vector.extract_strided_slice %30 {offsets = [0, 32], sizes = [8, 64], strides = [1, 1]} : vector<8x96xf32> to vector<8x64xf32>
    %41 = arith.truncf %40 : vector<8x64xf32> to vector<8x64xbf16>
    %cst_37 = arith.constant dense<0.000000e+00> : vector<16x64xf32>
    %42 = tpu.matmul %1, %41, %cst_37 {dimension_numbers = #tpu.dot_dimension_numbers<[1], [0], [0], [1], [0, 0, 1, 1], [], []>} : vector<16x8xbf16>, vector<8x64xbf16>, vector<16x64xf32> -> vector<16x64xf32>
    %43 = vector.extract_strided_slice %42 {offsets = [0, 0], sizes = [16, 32], strides = [1, 1]} : vector<16x64xf32> to vector<16x32xf32>
    %44 = vector.extract_strided_slice %42 {offsets = [0, 32], sizes = [16, 32], strides = [1, 1]} : vector<16x64xf32> to vector<16x32xf32>
    %45 = arith.addf %43, %35 : vector<16x32xf32>
    %46 = arith.mulf %39, %45 : vector<16x32xf32>
    %cst_38 = arith.constant 0.353553385 : f32
    %47 = vector.broadcast %cst_38 : f32 to vector<16x32xf32>
    %48 = arith.mulf %46, %47 : vector<16x32xf32>
    %49 = arith.truncf %48 : vector<16x32xf32> to vector<16x32xbf16>
    %cst_39 = arith.constant dense<0.000000e+00> : vector<16x4xf32>
    %50 = tpu.matmul %49, %7, %cst_39 {dimension_numbers = #tpu.dot_dimension_numbers<[1], [0], [0], [1], [0, 0, 1, 1], [], []>} : vector<16x32xbf16>, vector<32x4xbf16>, vector<16x4xf32> -> vector<16x4xf32>
    %51 = vector.extract_strided_slice %50 {offsets = [0, 0], sizes = [16, 1], strides = [1, 1]} : vector<16x4xf32> to vector<16x1xf32>
    %cst_40 = arith.constant -1.000000e+30 : f32
    %52 = vector.shape_cast %51 : vector<16x1xf32> to vector<16x1xf32>
    %53 = vector.broadcast %52 : vector<16x1xf32> to vector<16x8xf32>
    %54 = vector.broadcast %cst_40 : f32 to vector<16x8xf32>
    %55 = arith.select %6, %53, %54 : vector<16x8xi1>, vector<16x8xf32>
    %cst_41 = arith.constant dense<0xFF800000> : vector<8xf32>
    %56 = vector.multi_reduction <maximumf>, %55, %cst_41 [0] : vector<16x8xf32> to vector<8xf32>
    %57 = vector.shape_cast %56 : vector<8xf32> to vector<1x8xf32>
    %cst_42 = arith.constant -1.000000e+30 : f32
    %58 = vector.shape_cast %57 : vector<1x8xf32> to vector<1x8xf32>
    %59 = vector.broadcast %58 : vector<1x8xf32> to vector<16x8xf32>
    %60 = vector.broadcast %cst_42 : f32 to vector<16x8xf32>
    %61 = arith.select %6, %59, %60 : vector<16x8xi1>, vector<16x8xf32>
    %cst_43 = arith.constant dense<0xFF800000> : vector<16xf32>
    %62 = vector.multi_reduction <maximumf>, %61, %cst_43 [1] : vector<16x8xf32> to vector<16xf32>
    %63 = vector.shape_cast %62 : vector<16xf32> to vector<16x1xf32>
    %64 = vector.extract_strided_slice %50 {offsets = [0, 1], sizes = [16, 1], strides = [1, 1]} : vector<16x4xf32> to vector<16x1xf32>
    %cst_44 = arith.constant -1.000000e+30 : f32
    %65 = vector.shape_cast %64 : vector<16x1xf32> to vector<16x1xf32>
    %66 = vector.broadcast %65 : vector<16x1xf32> to vector<16x8xf32>
    %67 = vector.broadcast %cst_44 : f32 to vector<16x8xf32>
    %68 = arith.select %6, %66, %67 : vector<16x8xi1>, vector<16x8xf32>
    %cst_45 = arith.constant dense<0xFF800000> : vector<8xf32>
    %69 = vector.multi_reduction <maximumf>, %68, %cst_45 [0] : vector<16x8xf32> to vector<8xf32>
    %70 = vector.shape_cast %69 : vector<8xf32> to vector<1x8xf32>
    %cst_46 = arith.constant -1.000000e+30 : f32
    %71 = vector.shape_cast %70 : vector<1x8xf32> to vector<1x8xf32>
    %72 = vector.broadcast %71 : vector<1x8xf32> to vector<16x8xf32>
    %73 = vector.broadcast %cst_46 : f32 to vector<16x8xf32>
    %74 = arith.select %6, %72, %73 : vector<16x8xi1>, vector<16x8xf32>
    %cst_47 = arith.constant dense<0xFF800000> : vector<16xf32>
    %75 = vector.multi_reduction <maximumf>, %74, %cst_47 [1] : vector<16x8xf32> to vector<16xf32>
    %76 = vector.shape_cast %75 : vector<16xf32> to vector<16x1xf32>
    %77 = vector.extract_strided_slice %50 {offsets = [0, 2], sizes = [16, 1], strides = [1, 1]} : vector<16x4xf32> to vector<16x1xf32>
    %cst_48 = arith.constant -1.000000e+30 : f32
    %78 = vector.shape_cast %77 : vector<16x1xf32> to vector<16x1xf32>
    %79 = vector.broadcast %78 : vector<16x1xf32> to vector<16x8xf32>
    %80 = vector.broadcast %cst_48 : f32 to vector<16x8xf32>
    %81 = arith.select %6, %79, %80 : vector<16x8xi1>, vector<16x8xf32>
    %cst_49 = arith.constant dense<0xFF800000> : vector<8xf32>
    %82 = vector.multi_reduction <maximumf>, %81, %cst_49 [0] : vector<16x8xf32> to vector<8xf32>
    %83 = vector.shape_cast %82 : vector<8xf32> to vector<1x8xf32>
    %cst_50 = arith.constant -1.000000e+30 : f32
    %84 = vector.shape_cast %83 : vector<1x8xf32> to vector<1x8xf32>
    %85 = vector.broadcast %84 : vector<1x8xf32> to vector<16x8xf32>
    %86 = vector.broadcast %cst_50 : f32 to vector<16x8xf32>
    %87 = arith.select %6, %85, %86 : vector<16x8xi1>, vector<16x8xf32>
    %cst_51 = arith.constant dense<0xFF800000> : vector<16xf32>
    %88 = vector.multi_reduction <maximumf>, %87, %cst_51 [1] : vector<16x8xf32> to vector<16xf32>
    %89 = vector.shape_cast %88 : vector<16xf32> to vector<16x1xf32>
    %90 = vector.extract_strided_slice %50 {offsets = [0, 3], sizes = [16, 1], strides = [1, 1]} : vector<16x4xf32> to vector<16x1xf32>
    %cst_52 = arith.constant -1.000000e+30 : f32
    %91 = vector.shape_cast %90 : vector<16x1xf32> to vector<16x1xf32>
    %92 = vector.broadcast %91 : vector<16x1xf32> to vector<16x8xf32>
    %93 = vector.broadcast %cst_52 : f32 to vector<16x8xf32>
    %94 = arith.select %6, %92, %93 : vector<16x8xi1>, vector<16x8xf32>
    %cst_53 = arith.constant dense<0xFF800000> : vector<8xf32>
    %95 = vector.multi_reduction <maximumf>, %94, %cst_53 [0] : vector<16x8xf32> to vector<8xf32>
    %96 = vector.shape_cast %95 : vector<8xf32> to vector<1x8xf32>
    %cst_54 = arith.constant -1.000000e+30 : f32
    %97 = vector.shape_cast %96 : vector<1x8xf32> to vector<1x8xf32>
    %98 = vector.broadcast %97 : vector<1x8xf32> to vector<16x8xf32>
    %99 = vector.broadcast %cst_54 : f32 to vector<16x8xf32>
    %100 = arith.select %6, %98, %99 : vector<16x8xi1>, vector<16x8xf32>
    %cst_55 = arith.constant dense<0xFF800000> : vector<16xf32>
    %101 = vector.multi_reduction <maximumf>, %100, %cst_55 [1] : vector<16x8xf32> to vector<16xf32>
    %102 = vector.shape_cast %101 : vector<16xf32> to vector<16x1xf32>
    %103 = tpu.concatenate %63, %76, %89, %102 in 1 : vector<16x1xf32>, vector<16x1xf32>, vector<16x1xf32>, vector<16x1xf32> -> vector<16x4xf32>
    %104 = arith.subf %50, %103 : vector<16x4xf32>
    %105 = math.exp %104 : vector<16x4xf32>
    %106 = arith.truncf %105 : vector<16x4xf32> to vector<16x4xbf16>
    %cst_56 = arith.constant dense<0.000000e+00> : vector<8x4xf32>
    %107 = tpu.matmul %3, %106, %cst_56 {dimension_numbers = #tpu.dot_dimension_numbers<[0], [0], [1], [1], [0, 1, 1, 1], [], []>} : vector<16x8xbf16>, vector<16x4xbf16>, vector<8x4xf32> -> vector<8x4xf32>
    %108 = arith.truncf %107 : vector<8x4xf32> to vector<8x4xbf16>
    %cst_57 = arith.constant dense<0.000000e+00> : vector<16x4xf32>
    %109 = tpu.matmul %3, %108, %cst_57 {dimension_numbers = #tpu.dot_dimension_numbers<[1], [0], [0], [1], [0, 0, 1, 1], [], []>} : vector<16x8xbf16>, vector<8x4xbf16>, vector<16x4xf32> -> vector<16x4xf32>
    %cst_58 = arith.constant 1.000000e-30 : f32
    %110 = vector.broadcast %cst_58 : f32 to vector<16x4xf32>
    %111 = arith.addf %109, %110 : vector<16x4xf32>
    %112 = tpu.reciprocal %111 {approx = true} : vector<16x4xf32> -> vector<16x4xf32>
    %113 = arith.mulf %105, %112 : vector<16x4xf32>
    %114 = arith.truncf %113 : vector<16x4xf32> to vector<16x4xbf16>
    %cst_59 = arith.constant dense<0.000000e+00> : vector<16x32xf32>
    %115 = tpu.matmul %114, %8, %cst_59 {dimension_numbers = #tpu.dot_dimension_numbers<[1], [0], [0], [1], [0, 0, 1, 1], [], []>} : vector<16x4xbf16>, vector<4x32xbf16>, vector<16x32xf32> -> vector<16x32xf32>
    %116 = arith.addf %44, %35 : vector<16x32xf32>
    %117 = arith.mulf %115, %116 : vector<16x32xf32>
    %118 = arith.truncf %117 : vector<16x32xf32> to vector<16x32xbf16>
    %cst_60 = arith.constant dense<0.000000e+00> : vector<8x32xf32>
    %119 = tpu.matmul %3, %118, %cst_60 {dimension_numbers = #tpu.dot_dimension_numbers<[0], [0], [1], [1], [0, 1, 1, 1], [], []>} : vector<16x8xbf16>, vector<16x32xbf16>, vector<8x32xf32> -> vector<8x32xf32>
    %120 = arith.truncf %119 : vector<8x32xf32> to vector<8x32xbf16>
    %c0_61 = arith.constant 0 : index
    %c0_62 = arith.constant 0 : index
    %c0_63 = arith.constant 0 : index
    %121 = vector.load %arg15[%c0_61, %c0_62, %c0_63] : memref<8x32x32xbf16, #tpu.memory_space<vmem>>, vector<1x32x32xbf16>
    %122 = vector.shape_cast %121 : vector<1x32x32xbf16> to vector<32x32xbf16>
    %cst_64 = arith.constant dense<0.000000e+00> : vector<8x32xf32>
    %123 = tpu.matmul %120, %122, %cst_64 {dimension_numbers = #tpu.dot_dimension_numbers<[1], [0], [0], [1], [0, 0, 1, 1], [], []>} : vector<8x32xbf16>, vector<32x32xbf16>, vector<8x32xf32> -> vector<8x32xf32>
    %124 = arith.addf %12, %123 : vector<8x32xf32>
    %c0_65 = arith.constant 0 : index
    %c0_66 = arith.constant 0 : index
    %c0_67 = arith.constant 0 : index
    %125 = vector.load %arg16[%c0_65, %c0_66, %c0_67] : memref<8x1x32xf32, #tpu.memory_space<vmem>>, vector<1x1x32xf32>
    %126 = vector.shape_cast %125 : vector<1x1x32xf32> to vector<1x32xf32>
    %127 = vector.broadcast %126 : vector<1x32xf32> to vector<8x32xf32>
    %128 = arith.addf %124, %127 : vector<8x32xf32>
    %cst_68 = arith.constant 0.000000e+00 : f32
    %129 = vector.broadcast %cst_68 : f32 to vector<8x32xf32>
    %130 = arith.maximumf %128, %129 : vector<8x32xf32>
    %131 = arith.addf %43, %39 : vector<16x32xf32>
    %132 = arith.truncf %131 : vector<16x32xf32> to vector<16x32xbf16>
    %c0_69 = arith.constant 0 : index
    %c0_70 = arith.constant 0 : index
    %c0_71 = arith.constant 0 : index
    %133 = vector.load %arg17[%c0_69, %c0_70, %c0_71] : memref<8x32x64xbf16, #tpu.memory_space<vmem>>, vector<1x32x64xbf16>
    %134 = vector.shape_cast %133 : vector<1x32x64xbf16> to vector<32x64xbf16>
    %cst_72 = arith.constant dense<0.000000e+00> : vector<16x64xf32>
    %135 = tpu.matmul %132, %134, %cst_72 {dimension_numbers = #tpu.dot_dimension_numbers<[1], [0], [0], [1], [0, 0, 1, 1], [], []>} : vector<16x32xbf16>, vector<32x64xbf16>, vector<16x64xf32> -> vector<16x64xf32>
    %136 = arith.addf %36, %135 : vector<16x64xf32>
    %c0_73 = arith.constant 0 : index
    %c0_74 = arith.constant 0 : index
    %c0_75 = arith.constant 0 : index
    %137 = vector.load %arg18[%c0_73, %c0_74, %c0_75] : memref<8x1x64xf32, #tpu.memory_space<vmem>>, vector<1x1x64xf32>
    %138 = vector.shape_cast %137 : vector<1x1x64xf32> to vector<1x64xf32>
    %139 = vector.broadcast %138 : vector<1x64xf32> to vector<16x64xf32>
    %140 = arith.addf %136, %139 : vector<16x64xf32>
    %cst_76 = arith.constant 0.000000e+00 : f32
    %141 = vector.broadcast %cst_76 : f32 to vector<16x64xf32>
    %142 = arith.maximumf %140, %141 : vector<16x64xf32>
    %143 = arith.truncf %130 : vector<8x32xf32> to vector<8x32xbf16>
    %c1 = arith.constant 1 : index
    %c0_77 = arith.constant 0 : index
    %c0_78 = arith.constant 0 : index
    %144 = vector.load %arg13[%c1, %c0_77, %c0_78] : memref<8x32x96xbf16, #tpu.memory_space<vmem>>, vector<1x32x96xbf16>
    %145 = vector.shape_cast %144 : vector<1x32x96xbf16> to vector<32x96xbf16>
    %cst_79 = arith.constant dense<0.000000e+00> : vector<8x96xf32>
    %146 = tpu.matmul %143, %145, %cst_79 {dimension_numbers = #tpu.dot_dimension_numbers<[1], [0], [0], [1], [0, 0, 1, 1], [], []>} : vector<8x32xbf16>, vector<32x96xbf16>, vector<8x96xf32> -> vector<8x96xf32>
    %147 = arith.truncf %142 : vector<16x64xf32> to vector<16x64xbf16>
    %c1_80 = arith.constant 1 : index
    %c0_81 = arith.constant 0 : index
    %c0_82 = arith.constant 0 : index
    %148 = vector.load %arg14[%c1_80, %c0_81, %c0_82] : memref<8x64x96xbf16, #tpu.memory_space<vmem>>, vector<1x64x96xbf16>
    %149 = vector.shape_cast %148 : vector<1x64x96xbf16> to vector<64x96xbf16>
    %cst_83 = arith.constant dense<0.000000e+00> : vector<16x96xf32>
    %150 = tpu.matmul %147, %149, %cst_83 {dimension_numbers = #tpu.dot_dimension_numbers<[1], [0], [0], [1], [0, 0, 1, 1], [], []>} : vector<16x64xbf16>, vector<64x96xbf16>, vector<16x96xf32> -> vector<16x96xf32>
    %151 = vector.extract_strided_slice %150 {offsets = [0, 0], sizes = [16, 32], strides = [1, 1]} : vector<16x96xf32> to vector<16x32xf32>
    %152 = vector.extract_strided_slice %150 {offsets = [0, 32], sizes = [16, 64], strides = [1, 1]} : vector<16x96xf32> to vector<16x64xf32>
    %153 = vector.extract_strided_slice %146 {offsets = [0, 0], sizes = [8, 32], strides = [1, 1]} : vector<8x96xf32> to vector<8x32xf32>
    %154 = arith.truncf %153 : vector<8x32xf32> to vector<8x32xbf16>
    %cst_84 = arith.constant dense<0.000000e+00> : vector<16x32xf32>
    %155 = tpu.matmul %3, %154, %cst_84 {dimension_numbers = #tpu.dot_dimension_numbers<[1], [0], [0], [1], [0, 0, 1, 1], [], []>} : vector<16x8xbf16>, vector<8x32xbf16>, vector<16x32xf32> -> vector<16x32xf32>
    %156 = vector.extract_strided_slice %146 {offsets = [0, 32], sizes = [8, 64], strides = [1, 1]} : vector<8x96xf32> to vector<8x64xf32>
    %157 = arith.truncf %156 : vector<8x64xf32> to vector<8x64xbf16>
    %cst_85 = arith.constant dense<0.000000e+00> : vector<16x64xf32>
    %158 = tpu.matmul %1, %157, %cst_85 {dimension_numbers = #tpu.dot_dimension_numbers<[1], [0], [0], [1], [0, 0, 1, 1], [], []>} : vector<16x8xbf16>, vector<8x64xbf16>, vector<16x64xf32> -> vector<16x64xf32>
    %159 = vector.extract_strided_slice %158 {offsets = [0, 0], sizes = [16, 32], strides = [1, 1]} : vector<16x64xf32> to vector<16x32xf32>
    %160 = vector.extract_strided_slice %158 {offsets = [0, 32], sizes = [16, 32], strides = [1, 1]} : vector<16x64xf32> to vector<16x32xf32>
    %161 = arith.addf %159, %151 : vector<16x32xf32>
    %162 = arith.mulf %155, %161 : vector<16x32xf32>
    %cst_86 = arith.constant 0.353553385 : f32
    %163 = vector.broadcast %cst_86 : f32 to vector<16x32xf32>
    %164 = arith.mulf %162, %163 : vector<16x32xf32>
    %165 = arith.truncf %164 : vector<16x32xf32> to vector<16x32xbf16>
    %cst_87 = arith.constant dense<0.000000e+00> : vector<16x4xf32>
    %166 = tpu.matmul %165, %7, %cst_87 {dimension_numbers = #tpu.dot_dimension_numbers<[1], [0], [0], [1], [0, 0, 1, 1], [], []>} : vector<16x32xbf16>, vector<32x4xbf16>, vector<16x4xf32> -> vector<16x4xf32>
    %167 = vector.extract_strided_slice %166 {offsets = [0, 0], sizes = [16, 1], strides = [1, 1]} : vector<16x4xf32> to vector<16x1xf32>
    %cst_88 = arith.constant -1.000000e+30 : f32
    %168 = vector.shape_cast %167 : vector<16x1xf32> to vector<16x1xf32>
    %169 = vector.broadcast %168 : vector<16x1xf32> to vector<16x8xf32>
    %170 = vector.broadcast %cst_88 : f32 to vector<16x8xf32>
    %171 = arith.select %6, %169, %170 : vector<16x8xi1>, vector<16x8xf32>
    %cst_89 = arith.constant dense<0xFF800000> : vector<8xf32>
    %172 = vector.multi_reduction <maximumf>, %171, %cst_89 [0] : vector<16x8xf32> to vector<8xf32>
    %173 = vector.shape_cast %172 : vector<8xf32> to vector<1x8xf32>
    %cst_90 = arith.constant -1.000000e+30 : f32
    %174 = vector.shape_cast %173 : vector<1x8xf32> to vector<1x8xf32>
    %175 = vector.broadcast %174 : vector<1x8xf32> to vector<16x8xf32>
    %176 = vector.broadcast %cst_90 : f32 to vector<16x8xf32>
    %177 = arith.select %6, %175, %176 : vector<16x8xi1>, vector<16x8xf32>
    %cst_91 = arith.constant dense<0xFF800000> : vector<16xf32>
    %178 = vector.multi_reduction <maximumf>, %177, %cst_91 [1] : vector<16x8xf32> to vector<16xf32>
    %179 = vector.shape_cast %178 : vector<16xf32> to vector<16x1xf32>
    %180 = vector.extract_strided_slice %166 {offsets = [0, 1], sizes = [16, 1], strides = [1, 1]} : vector<16x4xf32> to vector<16x1xf32>
    %cst_92 = arith.constant -1.000000e+30 : f32
    %181 = vector.shape_cast %180 : vector<16x1xf32> to vector<16x1xf32>
    %182 = vector.broadcast %181 : vector<16x1xf32> to vector<16x8xf32>
    %183 = vector.broadcast %cst_92 : f32 to vector<16x8xf32>
    %184 = arith.select %6, %182, %183 : vector<16x8xi1>, vector<16x8xf32>
    %cst_93 = arith.constant dense<0xFF800000> : vector<8xf32>
    %185 = vector.multi_reduction <maximumf>, %184, %cst_93 [0] : vector<16x8xf32> to vector<8xf32>
    %186 = vector.shape_cast %185 : vector<8xf32> to vector<1x8xf32>
    %cst_94 = arith.constant -1.000000e+30 : f32
    %187 = vector.shape_cast %186 : vector<1x8xf32> to vector<1x8xf32>
    %188 = vector.broadcast %187 : vector<1x8xf32> to vector<16x8xf32>
    %189 = vector.broadcast %cst_94 : f32 to vector<16x8xf32>
    %190 = arith.select %6, %188, %189 : vector<16x8xi1>, vector<16x8xf32>
    %cst_95 = arith.constant dense<0xFF800000> : vector<16xf32>
    %191 = vector.multi_reduction <maximumf>, %190, %cst_95 [1] : vector<16x8xf32> to vector<16xf32>
    %192 = vector.shape_cast %191 : vector<16xf32> to vector<16x1xf32>
    %193 = vector.extract_strided_slice %166 {offsets = [0, 2], sizes = [16, 1], strides = [1, 1]} : vector<16x4xf32> to vector<16x1xf32>
    %cst_96 = arith.constant -1.000000e+30 : f32
    %194 = vector.shape_cast %193 : vector<16x1xf32> to vector<16x1xf32>
    %195 = vector.broadcast %194 : vector<16x1xf32> to vector<16x8xf32>
    %196 = vector.broadcast %cst_96 : f32 to vector<16x8xf32>
    %197 = arith.select %6, %195, %196 : vector<16x8xi1>, vector<16x8xf32>
    %cst_97 = arith.constant dense<0xFF800000> : vector<8xf32>
    %198 = vector.multi_reduction <maximumf>, %197, %cst_97 [0] : vector<16x8xf32> to vector<8xf32>
    %199 = vector.shape_cast %198 : vector<8xf32> to vector<1x8xf32>
    %cst_98 = arith.constant -1.000000e+30 : f32
    %200 = vector.shape_cast %199 : vector<1x8xf32> to vector<1x8xf32>
    %201 = vector.broadcast %200 : vector<1x8xf32> to vector<16x8xf32>
    %202 = vector.broadcast %cst_98 : f32 to vector<16x8xf32>
    %203 = arith.select %6, %201, %202 : vector<16x8xi1>, vector<16x8xf32>
    %cst_99 = arith.constant dense<0xFF800000> : vector<16xf32>
    %204 = vector.multi_reduction <maximumf>, %203, %cst_99 [1] : vector<16x8xf32> to vector<16xf32>
    %205 = vector.shape_cast %204 : vector<16xf32> to vector<16x1xf32>
    %206 = vector.extract_strided_slice %166 {offsets = [0, 3], sizes = [16, 1], strides = [1, 1]} : vector<16x4xf32> to vector<16x1xf32>
    %cst_100 = arith.constant -1.000000e+30 : f32
    %207 = vector.shape_cast %206 : vector<16x1xf32> to vector<16x1xf32>
    %208 = vector.broadcast %207 : vector<16x1xf32> to vector<16x8xf32>
    %209 = vector.broadcast %cst_100 : f32 to vector<16x8xf32>
    %210 = arith.select %6, %208, %209 : vector<16x8xi1>, vector<16x8xf32>
    %cst_101 = arith.constant dense<0xFF800000> : vector<8xf32>
    %211 = vector.multi_reduction <maximumf>, %210, %cst_101 [0] : vector<16x8xf32> to vector<8xf32>
    %212 = vector.shape_cast %211 : vector<8xf32> to vector<1x8xf32>
    %cst_102 = arith.constant -1.000000e+30 : f32
    %213 = vector.shape_cast %212 : vector<1x8xf32> to vector<1x8xf32>
    %214 = vector.broadcast %213 : vector<1x8xf32> to vector<16x8xf32>
    %215 = vector.broadcast %cst_102 : f32 to vector<16x8xf32>
    %216 = arith.select %6, %214, %215 : vector<16x8xi1>, vector<16x8xf32>
    %cst_103 = arith.constant dense<0xFF800000> : vector<16xf32>
    %217 = vector.multi_reduction <maximumf>, %216, %cst_103 [1] : vector<16x8xf32> to vector<16xf32>
    %218 = vector.shape_cast %217 : vector<16xf32> to vector<16x1xf32>
    %219 = tpu.concatenate %179, %192, %205, %218 in 1 : vector<16x1xf32>, vector<16x1xf32>, vector<16x1xf32>, vector<16x1xf32> -> vector<16x4xf32>
    %220 = arith.subf %166, %219 : vector<16x4xf32>
    %221 = math.exp %220 : vector<16x4xf32>
    %222 = arith.truncf %221 : vector<16x4xf32> to vector<16x4xbf16>
    %cst_104 = arith.constant dense<0.000000e+00> : vector<8x4xf32>
    %223 = tpu.matmul %3, %222, %cst_104 {dimension_numbers = #tpu.dot_dimension_numbers<[0], [0], [1], [1], [0, 1, 1, 1], [], []>} : vector<16x8xbf16>, vector<16x4xbf16>, vector<8x4xf32> -> vector<8x4xf32>
    %224 = arith.truncf %223 : vector<8x4xf32> to vector<8x4xbf16>
    %cst_105 = arith.constant dense<0.000000e+00> : vector<16x4xf32>
    %225 = tpu.matmul %3, %224, %cst_105 {dimension_numbers = #tpu.dot_dimension_numbers<[1], [0], [0], [1], [0, 0, 1, 1], [], []>} : vector<16x8xbf16>, vector<8x4xbf16>, vector<16x4xf32> -> vector<16x4xf32>
    %cst_106 = arith.constant 1.000000e-30 : f32
    %226 = vector.broadcast %cst_106 : f32 to vector<16x4xf32>
    %227 = arith.addf %225, %226 : vector<16x4xf32>
    %228 = tpu.reciprocal %227 {approx = true} : vector<16x4xf32> -> vector<16x4xf32>
    %229 = arith.mulf %221, %228 : vector<16x4xf32>
    %230 = arith.truncf %229 : vector<16x4xf32> to vector<16x4xbf16>
    %cst_107 = arith.constant dense<0.000000e+00> : vector<16x32xf32>
    %231 = tpu.matmul %230, %8, %cst_107 {dimension_numbers = #tpu.dot_dimension_numbers<[1], [0], [0], [1], [0, 0, 1, 1], [], []>} : vector<16x4xbf16>, vector<4x32xbf16>, vector<16x32xf32> -> vector<16x32xf32>
    %232 = arith.addf %160, %151 : vector<16x32xf32>
    %233 = arith.mulf %231, %232 : vector<16x32xf32>
    %234 = arith.truncf %233 : vector<16x32xf32> to vector<16x32xbf16>
    %cst_108 = arith.constant dense<0.000000e+00> : vector<8x32xf32>
    %235 = tpu.matmul %3, %234, %cst_108 {dimension_numbers = #tpu.dot_dimension_numbers<[0], [0], [1], [1], [0, 1, 1, 1], [], []>} : vector<16x8xbf16>, vector<16x32xbf16>, vector<8x32xf32> -> vector<8x32xf32>
    %236 = arith.truncf %235 : vector<8x32xf32> to vector<8x32xbf16>
    %c1_109 = arith.constant 1 : index
    %c0_110 = arith.constant 0 : index
    %c0_111 = arith.constant 0 : index
    %237 = vector.load %arg15[%c1_109, %c0_110, %c0_111] : memref<8x32x32xbf16, #tpu.memory_space<vmem>>, vector<1x32x32xbf16>
    %238 = vector.shape_cast %237 : vector<1x32x32xbf16> to vector<32x32xbf16>
    %cst_112 = arith.constant dense<0.000000e+00> : vector<8x32xf32>
    %239 = tpu.matmul %236, %238, %cst_112 {dimension_numbers = #tpu.dot_dimension_numbers<[1], [0], [0], [1], [0, 0, 1, 1], [], []>} : vector<8x32xbf16>, vector<32x32xbf16>, vector<8x32xf32> -> vector<8x32xf32>
    %240 = arith.addf %130, %239 : vector<8x32xf32>
    %c1_113 = arith.constant 1 : index
    %c0_114 = arith.constant 0 : index
    %c0_115 = arith.constant 0 : index
    %241 = vector.load %arg16[%c1_113, %c0_114, %c0_115] : memref<8x1x32xf32, #tpu.memory_space<vmem>>, vector<1x1x32xf32>
    %242 = vector.shape_cast %241 : vector<1x1x32xf32> to vector<1x32xf32>
    %243 = vector.broadcast %242 : vector<1x32xf32> to vector<8x32xf32>
    %244 = arith.addf %240, %243 : vector<8x32xf32>
    %cst_116 = arith.constant 0.000000e+00 : f32
    %245 = vector.broadcast %cst_116 : f32 to vector<8x32xf32>
    %246 = arith.maximumf %244, %245 : vector<8x32xf32>
    %247 = arith.addf %159, %155 : vector<16x32xf32>
    %248 = arith.truncf %247 : vector<16x32xf32> to vector<16x32xbf16>
    %c1_117 = arith.constant 1 : index
    %c0_118 = arith.constant 0 : index
    %c0_119 = arith.constant 0 : index
    %249 = vector.load %arg17[%c1_117, %c0_118, %c0_119] : memref<8x32x64xbf16, #tpu.memory_space<vmem>>, vector<1x32x64xbf16>
    %250 = vector.shape_cast %249 : vector<1x32x64xbf16> to vector<32x64xbf16>
    %cst_120 = arith.constant dense<0.000000e+00> : vector<16x64xf32>
    %251 = tpu.matmul %248, %250, %cst_120 {dimension_numbers = #tpu.dot_dimension_numbers<[1], [0], [0], [1], [0, 0, 1, 1], [], []>} : vector<16x32xbf16>, vector<32x64xbf16>, vector<16x64xf32> -> vector<16x64xf32>
    %252 = arith.addf %152, %251 : vector<16x64xf32>
    %c1_121 = arith.constant 1 : index
    %c0_122 = arith.constant 0 : index
    %c0_123 = arith.constant 0 : index
    %253 = vector.load %arg18[%c1_121, %c0_122, %c0_123] : memref<8x1x64xf32, #tpu.memory_space<vmem>>, vector<1x1x64xf32>
    %254 = vector.shape_cast %253 : vector<1x1x64xf32> to vector<1x64xf32>
    %255 = vector.broadcast %254 : vector<1x64xf32> to vector<16x64xf32>
    %256 = arith.addf %252, %255 : vector<16x64xf32>
    %cst_124 = arith.constant 0.000000e+00 : f32
    %257 = vector.broadcast %cst_124 : f32 to vector<16x64xf32>
    %258 = arith.maximumf %256, %257 : vector<16x64xf32>
    %259 = arith.truncf %246 : vector<8x32xf32> to vector<8x32xbf16>
    %c2 = arith.constant 2 : index
    %c0_125 = arith.constant 0 : index
    %c0_126 = arith.constant 0 : index
    %260 = vector.load %arg13[%c2, %c0_125, %c0_126] : memref<8x32x96xbf16, #tpu.memory_space<vmem>>, vector<1x32x96xbf16>
    %261 = vector.shape_cast %260 : vector<1x32x96xbf16> to vector<32x96xbf16>
    %cst_127 = arith.constant dense<0.000000e+00> : vector<8x96xf32>
    %262 = tpu.matmul %259, %261, %cst_127 {dimension_numbers = #tpu.dot_dimension_numbers<[1], [0], [0], [1], [0, 0, 1, 1], [], []>} : vector<8x32xbf16>, vector<32x96xbf16>, vector<8x96xf32> -> vector<8x96xf32>
    %263 = arith.truncf %258 : vector<16x64xf32> to vector<16x64xbf16>
    %c2_128 = arith.constant 2 : index
    %c0_129 = arith.constant 0 : index
    %c0_130 = arith.constant 0 : index
    %264 = vector.load %arg14[%c2_128, %c0_129, %c0_130] : memref<8x64x96xbf16, #tpu.memory_space<vmem>>, vector<1x64x96xbf16>
    %265 = vector.shape_cast %264 : vector<1x64x96xbf16> to vector<64x96xbf16>
    %cst_131 = arith.constant dense<0.000000e+00> : vector<16x96xf32>
    %266 = tpu.matmul %263, %265, %cst_131 {dimension_numbers = #tpu.dot_dimension_numbers<[1], [0], [0], [1], [0, 0, 1, 1], [], []>} : vector<16x64xbf16>, vector<64x96xbf16>, vector<16x96xf32> -> vector<16x96xf32>
    %267 = vector.extract_strided_slice %266 {offsets = [0, 0], sizes = [16, 32], strides = [1, 1]} : vector<16x96xf32> to vector<16x32xf32>
    %268 = vector.extract_strided_slice %266 {offsets = [0, 32], sizes = [16, 64], strides = [1, 1]} : vector<16x96xf32> to vector<16x64xf32>
    %269 = vector.extract_strided_slice %262 {offsets = [0, 0], sizes = [8, 32], strides = [1, 1]} : vector<8x96xf32> to vector<8x32xf32>
    %270 = arith.truncf %269 : vector<8x32xf32> to vector<8x32xbf16>
    %cst_132 = arith.constant dense<0.000000e+00> : vector<16x32xf32>
    %271 = tpu.matmul %3, %270, %cst_132 {dimension_numbers = #tpu.dot_dimension_numbers<[1], [0], [0], [1], [0, 0, 1, 1], [], []>} : vector<16x8xbf16>, vector<8x32xbf16>, vector<16x32xf32> -> vector<16x32xf32>
    %272 = vector.extract_strided_slice %262 {offsets = [0, 32], sizes = [8, 64], strides = [1, 1]} : vector<8x96xf32> to vector<8x64xf32>
    %273 = arith.truncf %272 : vector<8x64xf32> to vector<8x64xbf16>
    %cst_133 = arith.constant dense<0.000000e+00> : vector<16x64xf32>
    %274 = tpu.matmul %1, %273, %cst_133 {dimension_numbers = #tpu.dot_dimension_numbers<[1], [0], [0], [1], [0, 0, 1, 1], [], []>} : vector<16x8xbf16>, vector<8x64xbf16>, vector<16x64xf32> -> vector<16x64xf32>
    %275 = vector.extract_strided_slice %274 {offsets = [0, 0], sizes = [16, 32], strides = [1, 1]} : vector<16x64xf32> to vector<16x32xf32>
    %276 = vector.extract_strided_slice %274 {offsets = [0, 32], sizes = [16, 32], strides = [1, 1]} : vector<16x64xf32> to vector<16x32xf32>
    %277 = arith.addf %275, %267 : vector<16x32xf32>
    %278 = arith.mulf %271, %277 : vector<16x32xf32>
    %cst_134 = arith.constant 0.353553385 : f32
    %279 = vector.broadcast %cst_134 : f32 to vector<16x32xf32>
    %280 = arith.mulf %278, %279 : vector<16x32xf32>
    %281 = arith.truncf %280 : vector<16x32xf32> to vector<16x32xbf16>
    %cst_135 = arith.constant dense<0.000000e+00> : vector<16x4xf32>
    %282 = tpu.matmul %281, %7, %cst_135 {dimension_numbers = #tpu.dot_dimension_numbers<[1], [0], [0], [1], [0, 0, 1, 1], [], []>} : vector<16x32xbf16>, vector<32x4xbf16>, vector<16x4xf32> -> vector<16x4xf32>
    %283 = vector.extract_strided_slice %282 {offsets = [0, 0], sizes = [16, 1], strides = [1, 1]} : vector<16x4xf32> to vector<16x1xf32>
    %cst_136 = arith.constant -1.000000e+30 : f32
    %284 = vector.shape_cast %283 : vector<16x1xf32> to vector<16x1xf32>
    %285 = vector.broadcast %284 : vector<16x1xf32> to vector<16x8xf32>
    %286 = vector.broadcast %cst_136 : f32 to vector<16x8xf32>
    %287 = arith.select %6, %285, %286 : vector<16x8xi1>, vector<16x8xf32>
    %cst_137 = arith.constant dense<0xFF800000> : vector<8xf32>
    %288 = vector.multi_reduction <maximumf>, %287, %cst_137 [0] : vector<16x8xf32> to vector<8xf32>
    %289 = vector.shape_cast %288 : vector<8xf32> to vector<1x8xf32>
    %cst_138 = arith.constant -1.000000e+30 : f32
    %290 = vector.shape_cast %289 : vector<1x8xf32> to vector<1x8xf32>
    %291 = vector.broadcast %290 : vector<1x8xf32> to vector<16x8xf32>
    %292 = vector.broadcast %cst_138 : f32 to vector<16x8xf32>
    %293 = arith.select %6, %291, %292 : vector<16x8xi1>, vector<16x8xf32>
    %cst_139 = arith.constant dense<0xFF800000> : vector<16xf32>
    %294 = vector.multi_reduction <maximumf>, %293, %cst_139 [1] : vector<16x8xf32> to vector<16xf32>
    %295 = vector.shape_cast %294 : vector<16xf32> to vector<16x1xf32>
    %296 = vector.extract_strided_slice %282 {offsets = [0, 1], sizes = [16, 1], strides = [1, 1]} : vector<16x4xf32> to vector<16x1xf32>
    %cst_140 = arith.constant -1.000000e+30 : f32
    %297 = vector.shape_cast %296 : vector<16x1xf32> to vector<16x1xf32>
    %298 = vector.broadcast %297 : vector<16x1xf32> to vector<16x8xf32>
    %299 = vector.broadcast %cst_140 : f32 to vector<16x8xf32>
    %300 = arith.select %6, %298, %299 : vector<16x8xi1>, vector<16x8xf32>
    %cst_141 = arith.constant dense<0xFF800000> : vector<8xf32>
    %301 = vector.multi_reduction <maximumf>, %300, %cst_141 [0] : vector<16x8xf32> to vector<8xf32>
    %302 = vector.shape_cast %301 : vector<8xf32> to vector<1x8xf32>
    %cst_142 = arith.constant -1.000000e+30 : f32
    %303 = vector.shape_cast %302 : vector<1x8xf32> to vector<1x8xf32>
    %304 = vector.broadcast %303 : vector<1x8xf32> to vector<16x8xf32>
    %305 = vector.broadcast %cst_142 : f32 to vector<16x8xf32>
    %306 = arith.select %6, %304, %305 : vector<16x8xi1>, vector<16x8xf32>
    %cst_143 = arith.constant dense<0xFF800000> : vector<16xf32>
    %307 = vector.multi_reduction <maximumf>, %306, %cst_143 [1] : vector<16x8xf32> to vector<16xf32>
    %308 = vector.shape_cast %307 : vector<16xf32> to vector<16x1xf32>
    %309 = vector.extract_strided_slice %282 {offsets = [0, 2], sizes = [16, 1], strides = [1, 1]} : vector<16x4xf32> to vector<16x1xf32>
    %cst_144 = arith.constant -1.000000e+30 : f32
    %310 = vector.shape_cast %309 : vector<16x1xf32> to vector<16x1xf32>
    %311 = vector.broadcast %310 : vector<16x1xf32> to vector<16x8xf32>
    %312 = vector.broadcast %cst_144 : f32 to vector<16x8xf32>
    %313 = arith.select %6, %311, %312 : vector<16x8xi1>, vector<16x8xf32>
    %cst_145 = arith.constant dense<0xFF800000> : vector<8xf32>
    %314 = vector.multi_reduction <maximumf>, %313, %cst_145 [0] : vector<16x8xf32> to vector<8xf32>
    %315 = vector.shape_cast %314 : vector<8xf32> to vector<1x8xf32>
    %cst_146 = arith.constant -1.000000e+30 : f32
    %316 = vector.shape_cast %315 : vector<1x8xf32> to vector<1x8xf32>
    %317 = vector.broadcast %316 : vector<1x8xf32> to vector<16x8xf32>
    %318 = vector.broadcast %cst_146 : f32 to vector<16x8xf32>
    %319 = arith.select %6, %317, %318 : vector<16x8xi1>, vector<16x8xf32>
    %cst_147 = arith.constant dense<0xFF800000> : vector<16xf32>
    %320 = vector.multi_reduction <maximumf>, %319, %cst_147 [1] : vector<16x8xf32> to vector<16xf32>
    %321 = vector.shape_cast %320 : vector<16xf32> to vector<16x1xf32>
    %322 = vector.extract_strided_slice %282 {offsets = [0, 3], sizes = [16, 1], strides = [1, 1]} : vector<16x4xf32> to vector<16x1xf32>
    %cst_148 = arith.constant -1.000000e+30 : f32
    %323 = vector.shape_cast %322 : vector<16x1xf32> to vector<16x1xf32>
    %324 = vector.broadcast %323 : vector<16x1xf32> to vector<16x8xf32>
    %325 = vector.broadcast %cst_148 : f32 to vector<16x8xf32>
    %326 = arith.select %6, %324, %325 : vector<16x8xi1>, vector<16x8xf32>
    %cst_149 = arith.constant dense<0xFF800000> : vector<8xf32>
    %327 = vector.multi_reduction <maximumf>, %326, %cst_149 [0] : vector<16x8xf32> to vector<8xf32>
    %328 = vector.shape_cast %327 : vector<8xf32> to vector<1x8xf32>
    %cst_150 = arith.constant -1.000000e+30 : f32
    %329 = vector.shape_cast %328 : vector<1x8xf32> to vector<1x8xf32>
    %330 = vector.broadcast %329 : vector<1x8xf32> to vector<16x8xf32>
    %331 = vector.broadcast %cst_150 : f32 to vector<16x8xf32>
    %332 = arith.select %6, %330, %331 : vector<16x8xi1>, vector<16x8xf32>
    %cst_151 = arith.constant dense<0xFF800000> : vector<16xf32>
    %333 = vector.multi_reduction <maximumf>, %332, %cst_151 [1] : vector<16x8xf32> to vector<16xf32>
    %334 = vector.shape_cast %333 : vector<16xf32> to vector<16x1xf32>
    %335 = tpu.concatenate %295, %308, %321, %334 in 1 : vector<16x1xf32>, vector<16x1xf32>, vector<16x1xf32>, vector<16x1xf32> -> vector<16x4xf32>
    %336 = arith.subf %282, %335 : vector<16x4xf32>
    %337 = math.exp %336 : vector<16x4xf32>
    %338 = arith.truncf %337 : vector<16x4xf32> to vector<16x4xbf16>
    %cst_152 = arith.constant dense<0.000000e+00> : vector<8x4xf32>
    %339 = tpu.matmul %3, %338, %cst_152 {dimension_numbers = #tpu.dot_dimension_numbers<[0], [0], [1], [1], [0, 1, 1, 1], [], []>} : vector<16x8xbf16>, vector<16x4xbf16>, vector<8x4xf32> -> vector<8x4xf32>
    %340 = arith.truncf %339 : vector<8x4xf32> to vector<8x4xbf16>
    %cst_153 = arith.constant dense<0.000000e+00> : vector<16x4xf32>
    %341 = tpu.matmul %3, %340, %cst_153 {dimension_numbers = #tpu.dot_dimension_numbers<[1], [0], [0], [1], [0, 0, 1, 1], [], []>} : vector<16x8xbf16>, vector<8x4xbf16>, vector<16x4xf32> -> vector<16x4xf32>
    %cst_154 = arith.constant 1.000000e-30 : f32
    %342 = vector.broadcast %cst_154 : f32 to vector<16x4xf32>
    %343 = arith.addf %341, %342 : vector<16x4xf32>
    %344 = tpu.reciprocal %343 {approx = true} : vector<16x4xf32> -> vector<16x4xf32>
    %345 = arith.mulf %337, %344 : vector<16x4xf32>
    %346 = arith.truncf %345 : vector<16x4xf32> to vector<16x4xbf16>
    %cst_155 = arith.constant dense<0.000000e+00> : vector<16x32xf32>
    %347 = tpu.matmul %346, %8, %cst_155 {dimension_numbers = #tpu.dot_dimension_numbers<[1], [0], [0], [1], [0, 0, 1, 1], [], []>} : vector<16x4xbf16>, vector<4x32xbf16>, vector<16x32xf32> -> vector<16x32xf32>
    %348 = arith.addf %276, %267 : vector<16x32xf32>
    %349 = arith.mulf %347, %348 : vector<16x32xf32>
    %350 = arith.truncf %349 : vector<16x32xf32> to vector<16x32xbf16>
    %cst_156 = arith.constant dense<0.000000e+00> : vector<8x32xf32>
    %351 = tpu.matmul %3, %350, %cst_156 {dimension_numbers = #tpu.dot_dimension_numbers<[0], [0], [1], [1], [0, 1, 1, 1], [], []>} : vector<16x8xbf16>, vector<16x32xbf16>, vector<8x32xf32> -> vector<8x32xf32>
    %352 = arith.truncf %351 : vector<8x32xf32> to vector<8x32xbf16>
    %c2_157 = arith.constant 2 : index
    %c0_158 = arith.constant 0 : index
    %c0_159 = arith.constant 0 : index
    %353 = vector.load %arg15[%c2_157, %c0_158, %c0_159] : memref<8x32x32xbf16, #tpu.memory_space<vmem>>, vector<1x32x32xbf16>
    %354 = vector.shape_cast %353 : vector<1x32x32xbf16> to vector<32x32xbf16>
    %cst_160 = arith.constant dense<0.000000e+00> : vector<8x32xf32>
    %355 = tpu.matmul %352, %354, %cst_160 {dimension_numbers = #tpu.dot_dimension_numbers<[1], [0], [0], [1], [0, 0, 1, 1], [], []>} : vector<8x32xbf16>, vector<32x32xbf16>, vector<8x32xf32> -> vector<8x32xf32>
    %356 = arith.addf %246, %355 : vector<8x32xf32>
    %c2_161 = arith.constant 2 : index
    %c0_162 = arith.constant 0 : index
    %c0_163 = arith.constant 0 : index
    %357 = vector.load %arg16[%c2_161, %c0_162, %c0_163] : memref<8x1x32xf32, #tpu.memory_space<vmem>>, vector<1x1x32xf32>
    %358 = vector.shape_cast %357 : vector<1x1x32xf32> to vector<1x32xf32>
    %359 = vector.broadcast %358 : vector<1x32xf32> to vector<8x32xf32>
    %360 = arith.addf %356, %359 : vector<8x32xf32>
    %cst_164 = arith.constant 0.000000e+00 : f32
    %361 = vector.broadcast %cst_164 : f32 to vector<8x32xf32>
    %362 = arith.maximumf %360, %361 : vector<8x32xf32>
    %363 = arith.addf %275, %271 : vector<16x32xf32>
    %364 = arith.truncf %363 : vector<16x32xf32> to vector<16x32xbf16>
    %c2_165 = arith.constant 2 : index
    %c0_166 = arith.constant 0 : index
    %c0_167 = arith.constant 0 : index
    %365 = vector.load %arg17[%c2_165, %c0_166, %c0_167] : memref<8x32x64xbf16, #tpu.memory_space<vmem>>, vector<1x32x64xbf16>
    %366 = vector.shape_cast %365 : vector<1x32x64xbf16> to vector<32x64xbf16>
    %cst_168 = arith.constant dense<0.000000e+00> : vector<16x64xf32>
    %367 = tpu.matmul %364, %366, %cst_168 {dimension_numbers = #tpu.dot_dimension_numbers<[1], [0], [0], [1], [0, 0, 1, 1], [], []>} : vector<16x32xbf16>, vector<32x64xbf16>, vector<16x64xf32> -> vector<16x64xf32>
    %368 = arith.addf %268, %367 : vector<16x64xf32>
    %c2_169 = arith.constant 2 : index
    %c0_170 = arith.constant 0 : index
    %c0_171 = arith.constant 0 : index
    %369 = vector.load %arg18[%c2_169, %c0_170, %c0_171] : memref<8x1x64xf32, #tpu.memory_space<vmem>>, vector<1x1x64xf32>
    %370 = vector.shape_cast %369 : vector<1x1x64xf32> to vector<1x64xf32>
    %371 = vector.broadcast %370 : vector<1x64xf32> to vector<16x64xf32>
    %372 = arith.addf %368, %371 : vector<16x64xf32>
    %cst_172 = arith.constant 0.000000e+00 : f32
    %373 = vector.broadcast %cst_172 : f32 to vector<16x64xf32>
    %374 = arith.maximumf %372, %373 : vector<16x64xf32>
    %375 = arith.truncf %362 : vector<8x32xf32> to vector<8x32xbf16>
    %c3 = arith.constant 3 : index
    %c0_173 = arith.constant 0 : index
    %c0_174 = arith.constant 0 : index
    %376 = vector.load %arg13[%c3, %c0_173, %c0_174] : memref<8x32x96xbf16, #tpu.memory_space<vmem>>, vector<1x32x96xbf16>
    %377 = vector.shape_cast %376 : vector<1x32x96xbf16> to vector<32x96xbf16>
    %cst_175 = arith.constant dense<0.000000e+00> : vector<8x96xf32>
    %378 = tpu.matmul %375, %377, %cst_175 {dimension_numbers = #tpu.dot_dimension_numbers<[1], [0], [0], [1], [0, 0, 1, 1], [], []>} : vector<8x32xbf16>, vector<32x96xbf16>, vector<8x96xf32> -> vector<8x96xf32>
    %379 = arith.truncf %374 : vector<16x64xf32> to vector<16x64xbf16>
    %c3_176 = arith.constant 3 : index
    %c0_177 = arith.constant 0 : index
    %c0_178 = arith.constant 0 : index
    %380 = vector.load %arg14[%c3_176, %c0_177, %c0_178] : memref<8x64x96xbf16, #tpu.memory_space<vmem>>, vector<1x64x96xbf16>
    %381 = vector.shape_cast %380 : vector<1x64x96xbf16> to vector<64x96xbf16>
    %cst_179 = arith.constant dense<0.000000e+00> : vector<16x96xf32>
    %382 = tpu.matmul %379, %381, %cst_179 {dimension_numbers = #tpu.dot_dimension_numbers<[1], [0], [0], [1], [0, 0, 1, 1], [], []>} : vector<16x64xbf16>, vector<64x96xbf16>, vector<16x96xf32> -> vector<16x96xf32>
    %383 = vector.extract_strided_slice %382 {offsets = [0, 0], sizes = [16, 32], strides = [1, 1]} : vector<16x96xf32> to vector<16x32xf32>
    %384 = vector.extract_strided_slice %382 {offsets = [0, 32], sizes = [16, 64], strides = [1, 1]} : vector<16x96xf32> to vector<16x64xf32>
    %385 = vector.extract_strided_slice %378 {offsets = [0, 0], sizes = [8, 32], strides = [1, 1]} : vector<8x96xf32> to vector<8x32xf32>
    %386 = arith.truncf %385 : vector<8x32xf32> to vector<8x32xbf16>
    %cst_180 = arith.constant dense<0.000000e+00> : vector<16x32xf32>
    %387 = tpu.matmul %3, %386, %cst_180 {dimension_numbers = #tpu.dot_dimension_numbers<[1], [0], [0], [1], [0, 0, 1, 1], [], []>} : vector<16x8xbf16>, vector<8x32xbf16>, vector<16x32xf32> -> vector<16x32xf32>
    %388 = vector.extract_strided_slice %378 {offsets = [0, 32], sizes = [8, 64], strides = [1, 1]} : vector<8x96xf32> to vector<8x64xf32>
    %389 = arith.truncf %388 : vector<8x64xf32> to vector<8x64xbf16>
    %cst_181 = arith.constant dense<0.000000e+00> : vector<16x64xf32>
    %390 = tpu.matmul %1, %389, %cst_181 {dimension_numbers = #tpu.dot_dimension_numbers<[1], [0], [0], [1], [0, 0, 1, 1], [], []>} : vector<16x8xbf16>, vector<8x64xbf16>, vector<16x64xf32> -> vector<16x64xf32>
    %391 = vector.extract_strided_slice %390 {offsets = [0, 0], sizes = [16, 32], strides = [1, 1]} : vector<16x64xf32> to vector<16x32xf32>
    %392 = vector.extract_strided_slice %390 {offsets = [0, 32], sizes = [16, 32], strides = [1, 1]} : vector<16x64xf32> to vector<16x32xf32>
    %393 = arith.addf %391, %383 : vector<16x32xf32>
    %394 = arith.mulf %387, %393 : vector<16x32xf32>
    %cst_182 = arith.constant 0.353553385 : f32
    %395 = vector.broadcast %cst_182 : f32 to vector<16x32xf32>
    %396 = arith.mulf %394, %395 : vector<16x32xf32>
    %397 = arith.truncf %396 : vector<16x32xf32> to vector<16x32xbf16>
    %cst_183 = arith.constant dense<0.000000e+00> : vector<16x4xf32>
    %398 = tpu.matmul %397, %7, %cst_183 {dimension_numbers = #tpu.dot_dimension_numbers<[1], [0], [0], [1], [0, 0, 1, 1], [], []>} : vector<16x32xbf16>, vector<32x4xbf16>, vector<16x4xf32> -> vector<16x4xf32>
    %399 = vector.extract_strided_slice %398 {offsets = [0, 0], sizes = [16, 1], strides = [1, 1]} : vector<16x4xf32> to vector<16x1xf32>
    %cst_184 = arith.constant -1.000000e+30 : f32
    %400 = vector.shape_cast %399 : vector<16x1xf32> to vector<16x1xf32>
    %401 = vector.broadcast %400 : vector<16x1xf32> to vector<16x8xf32>
    %402 = vector.broadcast %cst_184 : f32 to vector<16x8xf32>
    %403 = arith.select %6, %401, %402 : vector<16x8xi1>, vector<16x8xf32>
    %cst_185 = arith.constant dense<0xFF800000> : vector<8xf32>
    %404 = vector.multi_reduction <maximumf>, %403, %cst_185 [0] : vector<16x8xf32> to vector<8xf32>
    %405 = vector.shape_cast %404 : vector<8xf32> to vector<1x8xf32>
    %cst_186 = arith.constant -1.000000e+30 : f32
    %406 = vector.shape_cast %405 : vector<1x8xf32> to vector<1x8xf32>
    %407 = vector.broadcast %406 : vector<1x8xf32> to vector<16x8xf32>
    %408 = vector.broadcast %cst_186 : f32 to vector<16x8xf32>
    %409 = arith.select %6, %407, %408 : vector<16x8xi1>, vector<16x8xf32>
    %cst_187 = arith.constant dense<0xFF800000> : vector<16xf32>
    %410 = vector.multi_reduction <maximumf>, %409, %cst_187 [1] : vector<16x8xf32> to vector<16xf32>
    %411 = vector.shape_cast %410 : vector<16xf32> to vector<16x1xf32>
    %412 = vector.extract_strided_slice %398 {offsets = [0, 1], sizes = [16, 1], strides = [1, 1]} : vector<16x4xf32> to vector<16x1xf32>
    %cst_188 = arith.constant -1.000000e+30 : f32
    %413 = vector.shape_cast %412 : vector<16x1xf32> to vector<16x1xf32>
    %414 = vector.broadcast %413 : vector<16x1xf32> to vector<16x8xf32>
    %415 = vector.broadcast %cst_188 : f32 to vector<16x8xf32>
    %416 = arith.select %6, %414, %415 : vector<16x8xi1>, vector<16x8xf32>
    %cst_189 = arith.constant dense<0xFF800000> : vector<8xf32>
    %417 = vector.multi_reduction <maximumf>, %416, %cst_189 [0] : vector<16x8xf32> to vector<8xf32>
    %418 = vector.shape_cast %417 : vector<8xf32> to vector<1x8xf32>
    %cst_190 = arith.constant -1.000000e+30 : f32
    %419 = vector.shape_cast %418 : vector<1x8xf32> to vector<1x8xf32>
    %420 = vector.broadcast %419 : vector<1x8xf32> to vector<16x8xf32>
    %421 = vector.broadcast %cst_190 : f32 to vector<16x8xf32>
    %422 = arith.select %6, %420, %421 : vector<16x8xi1>, vector<16x8xf32>
    %cst_191 = arith.constant dense<0xFF800000> : vector<16xf32>
    %423 = vector.multi_reduction <maximumf>, %422, %cst_191 [1] : vector<16x8xf32> to vector<16xf32>
    %424 = vector.shape_cast %423 : vector<16xf32> to vector<16x1xf32>
    %425 = vector.extract_strided_slice %398 {offsets = [0, 2], sizes = [16, 1], strides = [1, 1]} : vector<16x4xf32> to vector<16x1xf32>
    %cst_192 = arith.constant -1.000000e+30 : f32
    %426 = vector.shape_cast %425 : vector<16x1xf32> to vector<16x1xf32>
    %427 = vector.broadcast %426 : vector<16x1xf32> to vector<16x8xf32>
    %428 = vector.broadcast %cst_192 : f32 to vector<16x8xf32>
    %429 = arith.select %6, %427, %428 : vector<16x8xi1>, vector<16x8xf32>
    %cst_193 = arith.constant dense<0xFF800000> : vector<8xf32>
    %430 = vector.multi_reduction <maximumf>, %429, %cst_193 [0] : vector<16x8xf32> to vector<8xf32>
    %431 = vector.shape_cast %430 : vector<8xf32> to vector<1x8xf32>
    %cst_194 = arith.constant -1.000000e+30 : f32
    %432 = vector.shape_cast %431 : vector<1x8xf32> to vector<1x8xf32>
    %433 = vector.broadcast %432 : vector<1x8xf32> to vector<16x8xf32>
    %434 = vector.broadcast %cst_194 : f32 to vector<16x8xf32>
    %435 = arith.select %6, %433, %434 : vector<16x8xi1>, vector<16x8xf32>
    %cst_195 = arith.constant dense<0xFF800000> : vector<16xf32>
    %436 = vector.multi_reduction <maximumf>, %435, %cst_195 [1] : vector<16x8xf32> to vector<16xf32>
    %437 = vector.shape_cast %436 : vector<16xf32> to vector<16x1xf32>
    %438 = vector.extract_strided_slice %398 {offsets = [0, 3], sizes = [16, 1], strides = [1, 1]} : vector<16x4xf32> to vector<16x1xf32>
    %cst_196 = arith.constant -1.000000e+30 : f32
    %439 = vector.shape_cast %438 : vector<16x1xf32> to vector<16x1xf32>
    %440 = vector.broadcast %439 : vector<16x1xf32> to vector<16x8xf32>
    %441 = vector.broadcast %cst_196 : f32 to vector<16x8xf32>
    %442 = arith.select %6, %440, %441 : vector<16x8xi1>, vector<16x8xf32>
    %cst_197 = arith.constant dense<0xFF800000> : vector<8xf32>
    %443 = vector.multi_reduction <maximumf>, %442, %cst_197 [0] : vector<16x8xf32> to vector<8xf32>
    %444 = vector.shape_cast %443 : vector<8xf32> to vector<1x8xf32>
    %cst_198 = arith.constant -1.000000e+30 : f32
    %445 = vector.shape_cast %444 : vector<1x8xf32> to vector<1x8xf32>
    %446 = vector.broadcast %445 : vector<1x8xf32> to vector<16x8xf32>
    %447 = vector.broadcast %cst_198 : f32 to vector<16x8xf32>
    %448 = arith.select %6, %446, %447 : vector<16x8xi1>, vector<16x8xf32>
    %cst_199 = arith.constant dense<0xFF800000> : vector<16xf32>
    %449 = vector.multi_reduction <maximumf>, %448, %cst_199 [1] : vector<16x8xf32> to vector<16xf32>
    %450 = vector.shape_cast %449 : vector<16xf32> to vector<16x1xf32>
    %451 = tpu.concatenate %411, %424, %437, %450 in 1 : vector<16x1xf32>, vector<16x1xf32>, vector<16x1xf32>, vector<16x1xf32> -> vector<16x4xf32>
    %452 = arith.subf %398, %451 : vector<16x4xf32>
    %453 = math.exp %452 : vector<16x4xf32>
    %454 = arith.truncf %453 : vector<16x4xf32> to vector<16x4xbf16>
    %cst_200 = arith.constant dense<0.000000e+00> : vector<8x4xf32>
    %455 = tpu.matmul %3, %454, %cst_200 {dimension_numbers = #tpu.dot_dimension_numbers<[0], [0], [1], [1], [0, 1, 1, 1], [], []>} : vector<16x8xbf16>, vector<16x4xbf16>, vector<8x4xf32> -> vector<8x4xf32>
    %456 = arith.truncf %455 : vector<8x4xf32> to vector<8x4xbf16>
    %cst_201 = arith.constant dense<0.000000e+00> : vector<16x4xf32>
    %457 = tpu.matmul %3, %456, %cst_201 {dimension_numbers = #tpu.dot_dimension_numbers<[1], [0], [0], [1], [0, 0, 1, 1], [], []>} : vector<16x8xbf16>, vector<8x4xbf16>, vector<16x4xf32> -> vector<16x4xf32>
    %cst_202 = arith.constant 1.000000e-30 : f32
    %458 = vector.broadcast %cst_202 : f32 to vector<16x4xf32>
    %459 = arith.addf %457, %458 : vector<16x4xf32>
    %460 = tpu.reciprocal %459 {approx = true} : vector<16x4xf32> -> vector<16x4xf32>
    %461 = arith.mulf %453, %460 : vector<16x4xf32>
    %462 = arith.truncf %461 : vector<16x4xf32> to vector<16x4xbf16>
    %cst_203 = arith.constant dense<0.000000e+00> : vector<16x32xf32>
    %463 = tpu.matmul %462, %8, %cst_203 {dimension_numbers = #tpu.dot_dimension_numbers<[1], [0], [0], [1], [0, 0, 1, 1], [], []>} : vector<16x4xbf16>, vector<4x32xbf16>, vector<16x32xf32> -> vector<16x32xf32>
    %464 = arith.addf %392, %383 : vector<16x32xf32>
    %465 = arith.mulf %463, %464 : vector<16x32xf32>
    %466 = arith.truncf %465 : vector<16x32xf32> to vector<16x32xbf16>
    %cst_204 = arith.constant dense<0.000000e+00> : vector<8x32xf32>
    %467 = tpu.matmul %3, %466, %cst_204 {dimension_numbers = #tpu.dot_dimension_numbers<[0], [0], [1], [1], [0, 1, 1, 1], [], []>} : vector<16x8xbf16>, vector<16x32xbf16>, vector<8x32xf32> -> vector<8x32xf32>
    %468 = arith.truncf %467 : vector<8x32xf32> to vector<8x32xbf16>
    %c3_205 = arith.constant 3 : index
    %c0_206 = arith.constant 0 : index
    %c0_207 = arith.constant 0 : index
    %469 = vector.load %arg15[%c3_205, %c0_206, %c0_207] : memref<8x32x32xbf16, #tpu.memory_space<vmem>>, vector<1x32x32xbf16>
    %470 = vector.shape_cast %469 : vector<1x32x32xbf16> to vector<32x32xbf16>
    %cst_208 = arith.constant dense<0.000000e+00> : vector<8x32xf32>
    %471 = tpu.matmul %468, %470, %cst_208 {dimension_numbers = #tpu.dot_dimension_numbers<[1], [0], [0], [1], [0, 0, 1, 1], [], []>} : vector<8x32xbf16>, vector<32x32xbf16>, vector<8x32xf32> -> vector<8x32xf32>
    %472 = arith.addf %362, %471 : vector<8x32xf32>
    %c3_209 = arith.constant 3 : index
    %c0_210 = arith.constant 0 : index
    %c0_211 = arith.constant 0 : index
    %473 = vector.load %arg16[%c3_209, %c0_210, %c0_211] : memref<8x1x32xf32, #tpu.memory_space<vmem>>, vector<1x1x32xf32>
    %474 = vector.shape_cast %473 : vector<1x1x32xf32> to vector<1x32xf32>
    %475 = vector.broadcast %474 : vector<1x32xf32> to vector<8x32xf32>
    %476 = arith.addf %472, %475 : vector<8x32xf32>
    %cst_212 = arith.constant 0.000000e+00 : f32
    %477 = vector.broadcast %cst_212 : f32 to vector<8x32xf32>
    %478 = arith.maximumf %476, %477 : vector<8x32xf32>
    %479 = arith.addf %391, %387 : vector<16x32xf32>
    %480 = arith.truncf %479 : vector<16x32xf32> to vector<16x32xbf16>
    %c3_213 = arith.constant 3 : index
    %c0_214 = arith.constant 0 : index
    %c0_215 = arith.constant 0 : index
    %481 = vector.load %arg17[%c3_213, %c0_214, %c0_215] : memref<8x32x64xbf16, #tpu.memory_space<vmem>>, vector<1x32x64xbf16>
    %482 = vector.shape_cast %481 : vector<1x32x64xbf16> to vector<32x64xbf16>
    %cst_216 = arith.constant dense<0.000000e+00> : vector<16x64xf32>
    %483 = tpu.matmul %480, %482, %cst_216 {dimension_numbers = #tpu.dot_dimension_numbers<[1], [0], [0], [1], [0, 0, 1, 1], [], []>} : vector<16x32xbf16>, vector<32x64xbf16>, vector<16x64xf32> -> vector<16x64xf32>
    %484 = arith.addf %384, %483 : vector<16x64xf32>
    %c3_217 = arith.constant 3 : index
    %c0_218 = arith.constant 0 : index
    %c0_219 = arith.constant 0 : index
    %485 = vector.load %arg18[%c3_217, %c0_218, %c0_219] : memref<8x1x64xf32, #tpu.memory_space<vmem>>, vector<1x1x64xf32>
    %486 = vector.shape_cast %485 : vector<1x1x64xf32> to vector<1x64xf32>
    %487 = vector.broadcast %486 : vector<1x64xf32> to vector<16x64xf32>
    %488 = arith.addf %484, %487 : vector<16x64xf32>
    %cst_220 = arith.constant 0.000000e+00 : f32
    %489 = vector.broadcast %cst_220 : f32 to vector<16x64xf32>
    %490 = arith.maximumf %488, %489 : vector<16x64xf32>
    %491 = arith.truncf %478 : vector<8x32xf32> to vector<8x32xbf16>
    %c4 = arith.constant 4 : index
    %c0_221 = arith.constant 0 : index
    %c0_222 = arith.constant 0 : index
    %492 = vector.load %arg13[%c4, %c0_221, %c0_222] : memref<8x32x96xbf16, #tpu.memory_space<vmem>>, vector<1x32x96xbf16>
    %493 = vector.shape_cast %492 : vector<1x32x96xbf16> to vector<32x96xbf16>
    %cst_223 = arith.constant dense<0.000000e+00> : vector<8x96xf32>
    %494 = tpu.matmul %491, %493, %cst_223 {dimension_numbers = #tpu.dot_dimension_numbers<[1], [0], [0], [1], [0, 0, 1, 1], [], []>} : vector<8x32xbf16>, vector<32x96xbf16>, vector<8x96xf32> -> vector<8x96xf32>
    %495 = arith.truncf %490 : vector<16x64xf32> to vector<16x64xbf16>
    %c4_224 = arith.constant 4 : index
    %c0_225 = arith.constant 0 : index
    %c0_226 = arith.constant 0 : index
    %496 = vector.load %arg14[%c4_224, %c0_225, %c0_226] : memref<8x64x96xbf16, #tpu.memory_space<vmem>>, vector<1x64x96xbf16>
    %497 = vector.shape_cast %496 : vector<1x64x96xbf16> to vector<64x96xbf16>
    %cst_227 = arith.constant dense<0.000000e+00> : vector<16x96xf32>
    %498 = tpu.matmul %495, %497, %cst_227 {dimension_numbers = #tpu.dot_dimension_numbers<[1], [0], [0], [1], [0, 0, 1, 1], [], []>} : vector<16x64xbf16>, vector<64x96xbf16>, vector<16x96xf32> -> vector<16x96xf32>
    %499 = vector.extract_strided_slice %498 {offsets = [0, 0], sizes = [16, 32], strides = [1, 1]} : vector<16x96xf32> to vector<16x32xf32>
    %500 = vector.extract_strided_slice %498 {offsets = [0, 32], sizes = [16, 64], strides = [1, 1]} : vector<16x96xf32> to vector<16x64xf32>
    %501 = vector.extract_strided_slice %494 {offsets = [0, 0], sizes = [8, 32], strides = [1, 1]} : vector<8x96xf32> to vector<8x32xf32>
    %502 = arith.truncf %501 : vector<8x32xf32> to vector<8x32xbf16>
    %cst_228 = arith.constant dense<0.000000e+00> : vector<16x32xf32>
    %503 = tpu.matmul %3, %502, %cst_228 {dimension_numbers = #tpu.dot_dimension_numbers<[1], [0], [0], [1], [0, 0, 1, 1], [], []>} : vector<16x8xbf16>, vector<8x32xbf16>, vector<16x32xf32> -> vector<16x32xf32>
    %504 = vector.extract_strided_slice %494 {offsets = [0, 32], sizes = [8, 64], strides = [1, 1]} : vector<8x96xf32> to vector<8x64xf32>
    %505 = arith.truncf %504 : vector<8x64xf32> to vector<8x64xbf16>
    %cst_229 = arith.constant dense<0.000000e+00> : vector<16x64xf32>
    %506 = tpu.matmul %1, %505, %cst_229 {dimension_numbers = #tpu.dot_dimension_numbers<[1], [0], [0], [1], [0, 0, 1, 1], [], []>} : vector<16x8xbf16>, vector<8x64xbf16>, vector<16x64xf32> -> vector<16x64xf32>
    %507 = vector.extract_strided_slice %506 {offsets = [0, 0], sizes = [16, 32], strides = [1, 1]} : vector<16x64xf32> to vector<16x32xf32>
    %508 = vector.extract_strided_slice %506 {offsets = [0, 32], sizes = [16, 32], strides = [1, 1]} : vector<16x64xf32> to vector<16x32xf32>
    %509 = arith.addf %507, %499 : vector<16x32xf32>
    %510 = arith.mulf %503, %509 : vector<16x32xf32>
    %cst_230 = arith.constant 0.353553385 : f32
    %511 = vector.broadcast %cst_230 : f32 to vector<16x32xf32>
    %512 = arith.mulf %510, %511 : vector<16x32xf32>
    %513 = arith.truncf %512 : vector<16x32xf32> to vector<16x32xbf16>
    %cst_231 = arith.constant dense<0.000000e+00> : vector<16x4xf32>
    %514 = tpu.matmul %513, %7, %cst_231 {dimension_numbers = #tpu.dot_dimension_numbers<[1], [0], [0], [1], [0, 0, 1, 1], [], []>} : vector<16x32xbf16>, vector<32x4xbf16>, vector<16x4xf32> -> vector<16x4xf32>
    %515 = vector.extract_strided_slice %514 {offsets = [0, 0], sizes = [16, 1], strides = [1, 1]} : vector<16x4xf32> to vector<16x1xf32>
    %cst_232 = arith.constant -1.000000e+30 : f32
    %516 = vector.shape_cast %515 : vector<16x1xf32> to vector<16x1xf32>
    %517 = vector.broadcast %516 : vector<16x1xf32> to vector<16x8xf32>
    %518 = vector.broadcast %cst_232 : f32 to vector<16x8xf32>
    %519 = arith.select %6, %517, %518 : vector<16x8xi1>, vector<16x8xf32>
    %cst_233 = arith.constant dense<0xFF800000> : vector<8xf32>
    %520 = vector.multi_reduction <maximumf>, %519, %cst_233 [0] : vector<16x8xf32> to vector<8xf32>
    %521 = vector.shape_cast %520 : vector<8xf32> to vector<1x8xf32>
    %cst_234 = arith.constant -1.000000e+30 : f32
    %522 = vector.shape_cast %521 : vector<1x8xf32> to vector<1x8xf32>
    %523 = vector.broadcast %522 : vector<1x8xf32> to vector<16x8xf32>
    %524 = vector.broadcast %cst_234 : f32 to vector<16x8xf32>
    %525 = arith.select %6, %523, %524 : vector<16x8xi1>, vector<16x8xf32>
    %cst_235 = arith.constant dense<0xFF800000> : vector<16xf32>
    %526 = vector.multi_reduction <maximumf>, %525, %cst_235 [1] : vector<16x8xf32> to vector<16xf32>
    %527 = vector.shape_cast %526 : vector<16xf32> to vector<16x1xf32>
    %528 = vector.extract_strided_slice %514 {offsets = [0, 1], sizes = [16, 1], strides = [1, 1]} : vector<16x4xf32> to vector<16x1xf32>
    %cst_236 = arith.constant -1.000000e+30 : f32
    %529 = vector.shape_cast %528 : vector<16x1xf32> to vector<16x1xf32>
    %530 = vector.broadcast %529 : vector<16x1xf32> to vector<16x8xf32>
    %531 = vector.broadcast %cst_236 : f32 to vector<16x8xf32>
    %532 = arith.select %6, %530, %531 : vector<16x8xi1>, vector<16x8xf32>
    %cst_237 = arith.constant dense<0xFF800000> : vector<8xf32>
    %533 = vector.multi_reduction <maximumf>, %532, %cst_237 [0] : vector<16x8xf32> to vector<8xf32>
    %534 = vector.shape_cast %533 : vector<8xf32> to vector<1x8xf32>
    %cst_238 = arith.constant -1.000000e+30 : f32
    %535 = vector.shape_cast %534 : vector<1x8xf32> to vector<1x8xf32>
    %536 = vector.broadcast %535 : vector<1x8xf32> to vector<16x8xf32>
    %537 = vector.broadcast %cst_238 : f32 to vector<16x8xf32>
    %538 = arith.select %6, %536, %537 : vector<16x8xi1>, vector<16x8xf32>
    %cst_239 = arith.constant dense<0xFF800000> : vector<16xf32>
    %539 = vector.multi_reduction <maximumf>, %538, %cst_239 [1] : vector<16x8xf32> to vector<16xf32>
    %540 = vector.shape_cast %539 : vector<16xf32> to vector<16x1xf32>
    %541 = vector.extract_strided_slice %514 {offsets = [0, 2], sizes = [16, 1], strides = [1, 1]} : vector<16x4xf32> to vector<16x1xf32>
    %cst_240 = arith.constant -1.000000e+30 : f32
    %542 = vector.shape_cast %541 : vector<16x1xf32> to vector<16x1xf32>
    %543 = vector.broadcast %542 : vector<16x1xf32> to vector<16x8xf32>
    %544 = vector.broadcast %cst_240 : f32 to vector<16x8xf32>
    %545 = arith.select %6, %543, %544 : vector<16x8xi1>, vector<16x8xf32>
    %cst_241 = arith.constant dense<0xFF800000> : vector<8xf32>
    %546 = vector.multi_reduction <maximumf>, %545, %cst_241 [0] : vector<16x8xf32> to vector<8xf32>
    %547 = vector.shape_cast %546 : vector<8xf32> to vector<1x8xf32>
    %cst_242 = arith.constant -1.000000e+30 : f32
    %548 = vector.shape_cast %547 : vector<1x8xf32> to vector<1x8xf32>
    %549 = vector.broadcast %548 : vector<1x8xf32> to vector<16x8xf32>
    %550 = vector.broadcast %cst_242 : f32 to vector<16x8xf32>
    %551 = arith.select %6, %549, %550 : vector<16x8xi1>, vector<16x8xf32>
    %cst_243 = arith.constant dense<0xFF800000> : vector<16xf32>
    %552 = vector.multi_reduction <maximumf>, %551, %cst_243 [1] : vector<16x8xf32> to vector<16xf32>
    %553 = vector.shape_cast %552 : vector<16xf32> to vector<16x1xf32>
    %554 = vector.extract_strided_slice %514 {offsets = [0, 3], sizes = [16, 1], strides = [1, 1]} : vector<16x4xf32> to vector<16x1xf32>
    %cst_244 = arith.constant -1.000000e+30 : f32
    %555 = vector.shape_cast %554 : vector<16x1xf32> to vector<16x1xf32>
    %556 = vector.broadcast %555 : vector<16x1xf32> to vector<16x8xf32>
    %557 = vector.broadcast %cst_244 : f32 to vector<16x8xf32>
    %558 = arith.select %6, %556, %557 : vector<16x8xi1>, vector<16x8xf32>
    %cst_245 = arith.constant dense<0xFF800000> : vector<8xf32>
    %559 = vector.multi_reduction <maximumf>, %558, %cst_245 [0] : vector<16x8xf32> to vector<8xf32>
    %560 = vector.shape_cast %559 : vector<8xf32> to vector<1x8xf32>
    %cst_246 = arith.constant -1.000000e+30 : f32
    %561 = vector.shape_cast %560 : vector<1x8xf32> to vector<1x8xf32>
    %562 = vector.broadcast %561 : vector<1x8xf32> to vector<16x8xf32>
    %563 = vector.broadcast %cst_246 : f32 to vector<16x8xf32>
    %564 = arith.select %6, %562, %563 : vector<16x8xi1>, vector<16x8xf32>
    %cst_247 = arith.constant dense<0xFF800000> : vector<16xf32>
    %565 = vector.multi_reduction <maximumf>, %564, %cst_247 [1] : vector<16x8xf32> to vector<16xf32>
    %566 = vector.shape_cast %565 : vector<16xf32> to vector<16x1xf32>
    %567 = tpu.concatenate %527, %540, %553, %566 in 1 : vector<16x1xf32>, vector<16x1xf32>, vector<16x1xf32>, vector<16x1xf32> -> vector<16x4xf32>
    %568 = arith.subf %514, %567 : vector<16x4xf32>
    %569 = math.exp %568 : vector<16x4xf32>
    %570 = arith.truncf %569 : vector<16x4xf32> to vector<16x4xbf16>
    %cst_248 = arith.constant dense<0.000000e+00> : vector<8x4xf32>
    %571 = tpu.matmul %3, %570, %cst_248 {dimension_numbers = #tpu.dot_dimension_numbers<[0], [0], [1], [1], [0, 1, 1, 1], [], []>} : vector<16x8xbf16>, vector<16x4xbf16>, vector<8x4xf32> -> vector<8x4xf32>
    %572 = arith.truncf %571 : vector<8x4xf32> to vector<8x4xbf16>
    %cst_249 = arith.constant dense<0.000000e+00> : vector<16x4xf32>
    %573 = tpu.matmul %3, %572, %cst_249 {dimension_numbers = #tpu.dot_dimension_numbers<[1], [0], [0], [1], [0, 0, 1, 1], [], []>} : vector<16x8xbf16>, vector<8x4xbf16>, vector<16x4xf32> -> vector<16x4xf32>
    %cst_250 = arith.constant 1.000000e-30 : f32
    %574 = vector.broadcast %cst_250 : f32 to vector<16x4xf32>
    %575 = arith.addf %573, %574 : vector<16x4xf32>
    %576 = tpu.reciprocal %575 {approx = true} : vector<16x4xf32> -> vector<16x4xf32>
    %577 = arith.mulf %569, %576 : vector<16x4xf32>
    %578 = arith.truncf %577 : vector<16x4xf32> to vector<16x4xbf16>
    %cst_251 = arith.constant dense<0.000000e+00> : vector<16x32xf32>
    %579 = tpu.matmul %578, %8, %cst_251 {dimension_numbers = #tpu.dot_dimension_numbers<[1], [0], [0], [1], [0, 0, 1, 1], [], []>} : vector<16x4xbf16>, vector<4x32xbf16>, vector<16x32xf32> -> vector<16x32xf32>
    %580 = arith.addf %508, %499 : vector<16x32xf32>
    %581 = arith.mulf %579, %580 : vector<16x32xf32>
    %582 = arith.truncf %581 : vector<16x32xf32> to vector<16x32xbf16>
    %cst_252 = arith.constant dense<0.000000e+00> : vector<8x32xf32>
    %583 = tpu.matmul %3, %582, %cst_252 {dimension_numbers = #tpu.dot_dimension_numbers<[0], [0], [1], [1], [0, 1, 1, 1], [], []>} : vector<16x8xbf16>, vector<16x32xbf16>, vector<8x32xf32> -> vector<8x32xf32>
    %584 = arith.truncf %583 : vector<8x32xf32> to vector<8x32xbf16>
    %c4_253 = arith.constant 4 : index
    %c0_254 = arith.constant 0 : index
    %c0_255 = arith.constant 0 : index
    %585 = vector.load %arg15[%c4_253, %c0_254, %c0_255] : memref<8x32x32xbf16, #tpu.memory_space<vmem>>, vector<1x32x32xbf16>
    %586 = vector.shape_cast %585 : vector<1x32x32xbf16> to vector<32x32xbf16>
    %cst_256 = arith.constant dense<0.000000e+00> : vector<8x32xf32>
    %587 = tpu.matmul %584, %586, %cst_256 {dimension_numbers = #tpu.dot_dimension_numbers<[1], [0], [0], [1], [0, 0, 1, 1], [], []>} : vector<8x32xbf16>, vector<32x32xbf16>, vector<8x32xf32> -> vector<8x32xf32>
    %588 = arith.addf %478, %587 : vector<8x32xf32>
    %c4_257 = arith.constant 4 : index
    %c0_258 = arith.constant 0 : index
    %c0_259 = arith.constant 0 : index
    %589 = vector.load %arg16[%c4_257, %c0_258, %c0_259] : memref<8x1x32xf32, #tpu.memory_space<vmem>>, vector<1x1x32xf32>
    %590 = vector.shape_cast %589 : vector<1x1x32xf32> to vector<1x32xf32>
    %591 = vector.broadcast %590 : vector<1x32xf32> to vector<8x32xf32>
    %592 = arith.addf %588, %591 : vector<8x32xf32>
    %cst_260 = arith.constant 0.000000e+00 : f32
    %593 = vector.broadcast %cst_260 : f32 to vector<8x32xf32>
    %594 = arith.maximumf %592, %593 : vector<8x32xf32>
    %595 = arith.addf %507, %503 : vector<16x32xf32>
    %596 = arith.truncf %595 : vector<16x32xf32> to vector<16x32xbf16>
    %c4_261 = arith.constant 4 : index
    %c0_262 = arith.constant 0 : index
    %c0_263 = arith.constant 0 : index
    %597 = vector.load %arg17[%c4_261, %c0_262, %c0_263] : memref<8x32x64xbf16, #tpu.memory_space<vmem>>, vector<1x32x64xbf16>
    %598 = vector.shape_cast %597 : vector<1x32x64xbf16> to vector<32x64xbf16>
    %cst_264 = arith.constant dense<0.000000e+00> : vector<16x64xf32>
    %599 = tpu.matmul %596, %598, %cst_264 {dimension_numbers = #tpu.dot_dimension_numbers<[1], [0], [0], [1], [0, 0, 1, 1], [], []>} : vector<16x32xbf16>, vector<32x64xbf16>, vector<16x64xf32> -> vector<16x64xf32>
    %600 = arith.addf %500, %599 : vector<16x64xf32>
    %c4_265 = arith.constant 4 : index
    %c0_266 = arith.constant 0 : index
    %c0_267 = arith.constant 0 : index
    %601 = vector.load %arg18[%c4_265, %c0_266, %c0_267] : memref<8x1x64xf32, #tpu.memory_space<vmem>>, vector<1x1x64xf32>
    %602 = vector.shape_cast %601 : vector<1x1x64xf32> to vector<1x64xf32>
    %603 = vector.broadcast %602 : vector<1x64xf32> to vector<16x64xf32>
    %604 = arith.addf %600, %603 : vector<16x64xf32>
    %cst_268 = arith.constant 0.000000e+00 : f32
    %605 = vector.broadcast %cst_268 : f32 to vector<16x64xf32>
    %606 = arith.maximumf %604, %605 : vector<16x64xf32>
    %607 = arith.truncf %594 : vector<8x32xf32> to vector<8x32xbf16>
    %c5 = arith.constant 5 : index
    %c0_269 = arith.constant 0 : index
    %c0_270 = arith.constant 0 : index
    %608 = vector.load %arg13[%c5, %c0_269, %c0_270] : memref<8x32x96xbf16, #tpu.memory_space<vmem>>, vector<1x32x96xbf16>
    %609 = vector.shape_cast %608 : vector<1x32x96xbf16> to vector<32x96xbf16>
    %cst_271 = arith.constant dense<0.000000e+00> : vector<8x96xf32>
    %610 = tpu.matmul %607, %609, %cst_271 {dimension_numbers = #tpu.dot_dimension_numbers<[1], [0], [0], [1], [0, 0, 1, 1], [], []>} : vector<8x32xbf16>, vector<32x96xbf16>, vector<8x96xf32> -> vector<8x96xf32>
    %611 = arith.truncf %606 : vector<16x64xf32> to vector<16x64xbf16>
    %c5_272 = arith.constant 5 : index
    %c0_273 = arith.constant 0 : index
    %c0_274 = arith.constant 0 : index
    %612 = vector.load %arg14[%c5_272, %c0_273, %c0_274] : memref<8x64x96xbf16, #tpu.memory_space<vmem>>, vector<1x64x96xbf16>
    %613 = vector.shape_cast %612 : vector<1x64x96xbf16> to vector<64x96xbf16>
    %cst_275 = arith.constant dense<0.000000e+00> : vector<16x96xf32>
    %614 = tpu.matmul %611, %613, %cst_275 {dimension_numbers = #tpu.dot_dimension_numbers<[1], [0], [0], [1], [0, 0, 1, 1], [], []>} : vector<16x64xbf16>, vector<64x96xbf16>, vector<16x96xf32> -> vector<16x96xf32>
    %615 = vector.extract_strided_slice %614 {offsets = [0, 0], sizes = [16, 32], strides = [1, 1]} : vector<16x96xf32> to vector<16x32xf32>
    %616 = vector.extract_strided_slice %614 {offsets = [0, 32], sizes = [16, 64], strides = [1, 1]} : vector<16x96xf32> to vector<16x64xf32>
    %617 = vector.extract_strided_slice %610 {offsets = [0, 0], sizes = [8, 32], strides = [1, 1]} : vector<8x96xf32> to vector<8x32xf32>
    %618 = arith.truncf %617 : vector<8x32xf32> to vector<8x32xbf16>
    %cst_276 = arith.constant dense<0.000000e+00> : vector<16x32xf32>
    %619 = tpu.matmul %3, %618, %cst_276 {dimension_numbers = #tpu.dot_dimension_numbers<[1], [0], [0], [1], [0, 0, 1, 1], [], []>} : vector<16x8xbf16>, vector<8x32xbf16>, vector<16x32xf32> -> vector<16x32xf32>
    %620 = vector.extract_strided_slice %610 {offsets = [0, 32], sizes = [8, 64], strides = [1, 1]} : vector<8x96xf32> to vector<8x64xf32>
    %621 = arith.truncf %620 : vector<8x64xf32> to vector<8x64xbf16>
    %cst_277 = arith.constant dense<0.000000e+00> : vector<16x64xf32>
    %622 = tpu.matmul %1, %621, %cst_277 {dimension_numbers = #tpu.dot_dimension_numbers<[1], [0], [0], [1], [0, 0, 1, 1], [], []>} : vector<16x8xbf16>, vector<8x64xbf16>, vector<16x64xf32> -> vector<16x64xf32>
    %623 = vector.extract_strided_slice %622 {offsets = [0, 0], sizes = [16, 32], strides = [1, 1]} : vector<16x64xf32> to vector<16x32xf32>
    %624 = vector.extract_strided_slice %622 {offsets = [0, 32], sizes = [16, 32], strides = [1, 1]} : vector<16x64xf32> to vector<16x32xf32>
    %625 = arith.addf %623, %615 : vector<16x32xf32>
    %626 = arith.mulf %619, %625 : vector<16x32xf32>
    %cst_278 = arith.constant 0.353553385 : f32
    %627 = vector.broadcast %cst_278 : f32 to vector<16x32xf32>
    %628 = arith.mulf %626, %627 : vector<16x32xf32>
    %629 = arith.truncf %628 : vector<16x32xf32> to vector<16x32xbf16>
    %cst_279 = arith.constant dense<0.000000e+00> : vector<16x4xf32>
    %630 = tpu.matmul %629, %7, %cst_279 {dimension_numbers = #tpu.dot_dimension_numbers<[1], [0], [0], [1], [0, 0, 1, 1], [], []>} : vector<16x32xbf16>, vector<32x4xbf16>, vector<16x4xf32> -> vector<16x4xf32>
    %631 = vector.extract_strided_slice %630 {offsets = [0, 0], sizes = [16, 1], strides = [1, 1]} : vector<16x4xf32> to vector<16x1xf32>
    %cst_280 = arith.constant -1.000000e+30 : f32
    %632 = vector.shape_cast %631 : vector<16x1xf32> to vector<16x1xf32>
    %633 = vector.broadcast %632 : vector<16x1xf32> to vector<16x8xf32>
    %634 = vector.broadcast %cst_280 : f32 to vector<16x8xf32>
    %635 = arith.select %6, %633, %634 : vector<16x8xi1>, vector<16x8xf32>
    %cst_281 = arith.constant dense<0xFF800000> : vector<8xf32>
    %636 = vector.multi_reduction <maximumf>, %635, %cst_281 [0] : vector<16x8xf32> to vector<8xf32>
    %637 = vector.shape_cast %636 : vector<8xf32> to vector<1x8xf32>
    %cst_282 = arith.constant -1.000000e+30 : f32
    %638 = vector.shape_cast %637 : vector<1x8xf32> to vector<1x8xf32>
    %639 = vector.broadcast %638 : vector<1x8xf32> to vector<16x8xf32>
    %640 = vector.broadcast %cst_282 : f32 to vector<16x8xf32>
    %641 = arith.select %6, %639, %640 : vector<16x8xi1>, vector<16x8xf32>
    %cst_283 = arith.constant dense<0xFF800000> : vector<16xf32>
    %642 = vector.multi_reduction <maximumf>, %641, %cst_283 [1] : vector<16x8xf32> to vector<16xf32>
    %643 = vector.shape_cast %642 : vector<16xf32> to vector<16x1xf32>
    %644 = vector.extract_strided_slice %630 {offsets = [0, 1], sizes = [16, 1], strides = [1, 1]} : vector<16x4xf32> to vector<16x1xf32>
    %cst_284 = arith.constant -1.000000e+30 : f32
    %645 = vector.shape_cast %644 : vector<16x1xf32> to vector<16x1xf32>
    %646 = vector.broadcast %645 : vector<16x1xf32> to vector<16x8xf32>
    %647 = vector.broadcast %cst_284 : f32 to vector<16x8xf32>
    %648 = arith.select %6, %646, %647 : vector<16x8xi1>, vector<16x8xf32>
    %cst_285 = arith.constant dense<0xFF800000> : vector<8xf32>
    %649 = vector.multi_reduction <maximumf>, %648, %cst_285 [0] : vector<16x8xf32> to vector<8xf32>
    %650 = vector.shape_cast %649 : vector<8xf32> to vector<1x8xf32>
    %cst_286 = arith.constant -1.000000e+30 : f32
    %651 = vector.shape_cast %650 : vector<1x8xf32> to vector<1x8xf32>
    %652 = vector.broadcast %651 : vector<1x8xf32> to vector<16x8xf32>
    %653 = vector.broadcast %cst_286 : f32 to vector<16x8xf32>
    %654 = arith.select %6, %652, %653 : vector<16x8xi1>, vector<16x8xf32>
    %cst_287 = arith.constant dense<0xFF800000> : vector<16xf32>
    %655 = vector.multi_reduction <maximumf>, %654, %cst_287 [1] : vector<16x8xf32> to vector<16xf32>
    %656 = vector.shape_cast %655 : vector<16xf32> to vector<16x1xf32>
    %657 = vector.extract_strided_slice %630 {offsets = [0, 2], sizes = [16, 1], strides = [1, 1]} : vector<16x4xf32> to vector<16x1xf32>
    %cst_288 = arith.constant -1.000000e+30 : f32
    %658 = vector.shape_cast %657 : vector<16x1xf32> to vector<16x1xf32>
    %659 = vector.broadcast %658 : vector<16x1xf32> to vector<16x8xf32>
    %660 = vector.broadcast %cst_288 : f32 to vector<16x8xf32>
    %661 = arith.select %6, %659, %660 : vector<16x8xi1>, vector<16x8xf32>
    %cst_289 = arith.constant dense<0xFF800000> : vector<8xf32>
    %662 = vector.multi_reduction <maximumf>, %661, %cst_289 [0] : vector<16x8xf32> to vector<8xf32>
    %663 = vector.shape_cast %662 : vector<8xf32> to vector<1x8xf32>
    %cst_290 = arith.constant -1.000000e+30 : f32
    %664 = vector.shape_cast %663 : vector<1x8xf32> to vector<1x8xf32>
    %665 = vector.broadcast %664 : vector<1x8xf32> to vector<16x8xf32>
    %666 = vector.broadcast %cst_290 : f32 to vector<16x8xf32>
    %667 = arith.select %6, %665, %666 : vector<16x8xi1>, vector<16x8xf32>
    %cst_291 = arith.constant dense<0xFF800000> : vector<16xf32>
    %668 = vector.multi_reduction <maximumf>, %667, %cst_291 [1] : vector<16x8xf32> to vector<16xf32>
    %669 = vector.shape_cast %668 : vector<16xf32> to vector<16x1xf32>
    %670 = vector.extract_strided_slice %630 {offsets = [0, 3], sizes = [16, 1], strides = [1, 1]} : vector<16x4xf32> to vector<16x1xf32>
    %cst_292 = arith.constant -1.000000e+30 : f32
    %671 = vector.shape_cast %670 : vector<16x1xf32> to vector<16x1xf32>
    %672 = vector.broadcast %671 : vector<16x1xf32> to vector<16x8xf32>
    %673 = vector.broadcast %cst_292 : f32 to vector<16x8xf32>
    %674 = arith.select %6, %672, %673 : vector<16x8xi1>, vector<16x8xf32>
    %cst_293 = arith.constant dense<0xFF800000> : vector<8xf32>
    %675 = vector.multi_reduction <maximumf>, %674, %cst_293 [0] : vector<16x8xf32> to vector<8xf32>
    %676 = vector.shape_cast %675 : vector<8xf32> to vector<1x8xf32>
    %cst_294 = arith.constant -1.000000e+30 : f32
    %677 = vector.shape_cast %676 : vector<1x8xf32> to vector<1x8xf32>
    %678 = vector.broadcast %677 : vector<1x8xf32> to vector<16x8xf32>
    %679 = vector.broadcast %cst_294 : f32 to vector<16x8xf32>
    %680 = arith.select %6, %678, %679 : vector<16x8xi1>, vector<16x8xf32>
    %cst_295 = arith.constant dense<0xFF800000> : vector<16xf32>
    %681 = vector.multi_reduction <maximumf>, %680, %cst_295 [1] : vector<16x8xf32> to vector<16xf32>
    %682 = vector.shape_cast %681 : vector<16xf32> to vector<16x1xf32>
    %683 = tpu.concatenate %643, %656, %669, %682 in 1 : vector<16x1xf32>, vector<16x1xf32>, vector<16x1xf32>, vector<16x1xf32> -> vector<16x4xf32>
    %684 = arith.subf %630, %683 : vector<16x4xf32>
    %685 = math.exp %684 : vector<16x4xf32>
    %686 = arith.truncf %685 : vector<16x4xf32> to vector<16x4xbf16>
    %cst_296 = arith.constant dense<0.000000e+00> : vector<8x4xf32>
    %687 = tpu.matmul %3, %686, %cst_296 {dimension_numbers = #tpu.dot_dimension_numbers<[0], [0], [1], [1], [0, 1, 1, 1], [], []>} : vector<16x8xbf16>, vector<16x4xbf16>, vector<8x4xf32> -> vector<8x4xf32>
    %688 = arith.truncf %687 : vector<8x4xf32> to vector<8x4xbf16>
    %cst_297 = arith.constant dense<0.000000e+00> : vector<16x4xf32>
    %689 = tpu.matmul %3, %688, %cst_297 {dimension_numbers = #tpu.dot_dimension_numbers<[1], [0], [0], [1], [0, 0, 1, 1], [], []>} : vector<16x8xbf16>, vector<8x4xbf16>, vector<16x4xf32> -> vector<16x4xf32>
    %cst_298 = arith.constant 1.000000e-30 : f32
    %690 = vector.broadcast %cst_298 : f32 to vector<16x4xf32>
    %691 = arith.addf %689, %690 : vector<16x4xf32>
    %692 = tpu.reciprocal %691 {approx = true} : vector<16x4xf32> -> vector<16x4xf32>
    %693 = arith.mulf %685, %692 : vector<16x4xf32>
    %694 = arith.truncf %693 : vector<16x4xf32> to vector<16x4xbf16>
    %cst_299 = arith.constant dense<0.000000e+00> : vector<16x32xf32>
    %695 = tpu.matmul %694, %8, %cst_299 {dimension_numbers = #tpu.dot_dimension_numbers<[1], [0], [0], [1], [0, 0, 1, 1], [], []>} : vector<16x4xbf16>, vector<4x32xbf16>, vector<16x32xf32> -> vector<16x32xf32>
    %696 = arith.addf %624, %615 : vector<16x32xf32>
    %697 = arith.mulf %695, %696 : vector<16x32xf32>
    %698 = arith.truncf %697 : vector<16x32xf32> to vector<16x32xbf16>
    %cst_300 = arith.constant dense<0.000000e+00> : vector<8x32xf32>
    %699 = tpu.matmul %3, %698, %cst_300 {dimension_numbers = #tpu.dot_dimension_numbers<[0], [0], [1], [1], [0, 1, 1, 1], [], []>} : vector<16x8xbf16>, vector<16x32xbf16>, vector<8x32xf32> -> vector<8x32xf32>
    %700 = arith.truncf %699 : vector<8x32xf32> to vector<8x32xbf16>
    %c5_301 = arith.constant 5 : index
    %c0_302 = arith.constant 0 : index
    %c0_303 = arith.constant 0 : index
    %701 = vector.load %arg15[%c5_301, %c0_302, %c0_303] : memref<8x32x32xbf16, #tpu.memory_space<vmem>>, vector<1x32x32xbf16>
    %702 = vector.shape_cast %701 : vector<1x32x32xbf16> to vector<32x32xbf16>
    %cst_304 = arith.constant dense<0.000000e+00> : vector<8x32xf32>
    %703 = tpu.matmul %700, %702, %cst_304 {dimension_numbers = #tpu.dot_dimension_numbers<[1], [0], [0], [1], [0, 0, 1, 1], [], []>} : vector<8x32xbf16>, vector<32x32xbf16>, vector<8x32xf32> -> vector<8x32xf32>
    %704 = arith.addf %594, %703 : vector<8x32xf32>
    %c5_305 = arith.constant 5 : index
    %c0_306 = arith.constant 0 : index
    %c0_307 = arith.constant 0 : index
    %705 = vector.load %arg16[%c5_305, %c0_306, %c0_307] : memref<8x1x32xf32, #tpu.memory_space<vmem>>, vector<1x1x32xf32>
    %706 = vector.shape_cast %705 : vector<1x1x32xf32> to vector<1x32xf32>
    %707 = vector.broadcast %706 : vector<1x32xf32> to vector<8x32xf32>
    %708 = arith.addf %704, %707 : vector<8x32xf32>
    %cst_308 = arith.constant 0.000000e+00 : f32
    %709 = vector.broadcast %cst_308 : f32 to vector<8x32xf32>
    %710 = arith.maximumf %708, %709 : vector<8x32xf32>
    %711 = arith.addf %623, %619 : vector<16x32xf32>
    %712 = arith.truncf %711 : vector<16x32xf32> to vector<16x32xbf16>
    %c5_309 = arith.constant 5 : index
    %c0_310 = arith.constant 0 : index
    %c0_311 = arith.constant 0 : index
    %713 = vector.load %arg17[%c5_309, %c0_310, %c0_311] : memref<8x32x64xbf16, #tpu.memory_space<vmem>>, vector<1x32x64xbf16>
    %714 = vector.shape_cast %713 : vector<1x32x64xbf16> to vector<32x64xbf16>
    %cst_312 = arith.constant dense<0.000000e+00> : vector<16x64xf32>
    %715 = tpu.matmul %712, %714, %cst_312 {dimension_numbers = #tpu.dot_dimension_numbers<[1], [0], [0], [1], [0, 0, 1, 1], [], []>} : vector<16x32xbf16>, vector<32x64xbf16>, vector<16x64xf32> -> vector<16x64xf32>
    %716 = arith.addf %616, %715 : vector<16x64xf32>
    %c5_313 = arith.constant 5 : index
    %c0_314 = arith.constant 0 : index
    %c0_315 = arith.constant 0 : index
    %717 = vector.load %arg18[%c5_313, %c0_314, %c0_315] : memref<8x1x64xf32, #tpu.memory_space<vmem>>, vector<1x1x64xf32>
    %718 = vector.shape_cast %717 : vector<1x1x64xf32> to vector<1x64xf32>
    %719 = vector.broadcast %718 : vector<1x64xf32> to vector<16x64xf32>
    %720 = arith.addf %716, %719 : vector<16x64xf32>
    %cst_316 = arith.constant 0.000000e+00 : f32
    %721 = vector.broadcast %cst_316 : f32 to vector<16x64xf32>
    %722 = arith.maximumf %720, %721 : vector<16x64xf32>
    %723 = arith.truncf %710 : vector<8x32xf32> to vector<8x32xbf16>
    %c6 = arith.constant 6 : index
    %c0_317 = arith.constant 0 : index
    %c0_318 = arith.constant 0 : index
    %724 = vector.load %arg13[%c6, %c0_317, %c0_318] : memref<8x32x96xbf16, #tpu.memory_space<vmem>>, vector<1x32x96xbf16>
    %725 = vector.shape_cast %724 : vector<1x32x96xbf16> to vector<32x96xbf16>
    %cst_319 = arith.constant dense<0.000000e+00> : vector<8x96xf32>
    %726 = tpu.matmul %723, %725, %cst_319 {dimension_numbers = #tpu.dot_dimension_numbers<[1], [0], [0], [1], [0, 0, 1, 1], [], []>} : vector<8x32xbf16>, vector<32x96xbf16>, vector<8x96xf32> -> vector<8x96xf32>
    %727 = arith.truncf %722 : vector<16x64xf32> to vector<16x64xbf16>
    %c6_320 = arith.constant 6 : index
    %c0_321 = arith.constant 0 : index
    %c0_322 = arith.constant 0 : index
    %728 = vector.load %arg14[%c6_320, %c0_321, %c0_322] : memref<8x64x96xbf16, #tpu.memory_space<vmem>>, vector<1x64x96xbf16>
    %729 = vector.shape_cast %728 : vector<1x64x96xbf16> to vector<64x96xbf16>
    %cst_323 = arith.constant dense<0.000000e+00> : vector<16x96xf32>
    %730 = tpu.matmul %727, %729, %cst_323 {dimension_numbers = #tpu.dot_dimension_numbers<[1], [0], [0], [1], [0, 0, 1, 1], [], []>} : vector<16x64xbf16>, vector<64x96xbf16>, vector<16x96xf32> -> vector<16x96xf32>
    %731 = vector.extract_strided_slice %730 {offsets = [0, 0], sizes = [16, 32], strides = [1, 1]} : vector<16x96xf32> to vector<16x32xf32>
    %732 = vector.extract_strided_slice %730 {offsets = [0, 32], sizes = [16, 64], strides = [1, 1]} : vector<16x96xf32> to vector<16x64xf32>
    %733 = vector.extract_strided_slice %726 {offsets = [0, 0], sizes = [8, 32], strides = [1, 1]} : vector<8x96xf32> to vector<8x32xf32>
    %734 = arith.truncf %733 : vector<8x32xf32> to vector<8x32xbf16>
    %cst_324 = arith.constant dense<0.000000e+00> : vector<16x32xf32>
    %735 = tpu.matmul %3, %734, %cst_324 {dimension_numbers = #tpu.dot_dimension_numbers<[1], [0], [0], [1], [0, 0, 1, 1], [], []>} : vector<16x8xbf16>, vector<8x32xbf16>, vector<16x32xf32> -> vector<16x32xf32>
    %736 = vector.extract_strided_slice %726 {offsets = [0, 32], sizes = [8, 64], strides = [1, 1]} : vector<8x96xf32> to vector<8x64xf32>
    %737 = arith.truncf %736 : vector<8x64xf32> to vector<8x64xbf16>
    %cst_325 = arith.constant dense<0.000000e+00> : vector<16x64xf32>
    %738 = tpu.matmul %1, %737, %cst_325 {dimension_numbers = #tpu.dot_dimension_numbers<[1], [0], [0], [1], [0, 0, 1, 1], [], []>} : vector<16x8xbf16>, vector<8x64xbf16>, vector<16x64xf32> -> vector<16x64xf32>
    %739 = vector.extract_strided_slice %738 {offsets = [0, 0], sizes = [16, 32], strides = [1, 1]} : vector<16x64xf32> to vector<16x32xf32>
    %740 = vector.extract_strided_slice %738 {offsets = [0, 32], sizes = [16, 32], strides = [1, 1]} : vector<16x64xf32> to vector<16x32xf32>
    %741 = arith.addf %739, %731 : vector<16x32xf32>
    %742 = arith.mulf %735, %741 : vector<16x32xf32>
    %cst_326 = arith.constant 0.353553385 : f32
    %743 = vector.broadcast %cst_326 : f32 to vector<16x32xf32>
    %744 = arith.mulf %742, %743 : vector<16x32xf32>
    %745 = arith.truncf %744 : vector<16x32xf32> to vector<16x32xbf16>
    %cst_327 = arith.constant dense<0.000000e+00> : vector<16x4xf32>
    %746 = tpu.matmul %745, %7, %cst_327 {dimension_numbers = #tpu.dot_dimension_numbers<[1], [0], [0], [1], [0, 0, 1, 1], [], []>} : vector<16x32xbf16>, vector<32x4xbf16>, vector<16x4xf32> -> vector<16x4xf32>
    %747 = vector.extract_strided_slice %746 {offsets = [0, 0], sizes = [16, 1], strides = [1, 1]} : vector<16x4xf32> to vector<16x1xf32>
    %cst_328 = arith.constant -1.000000e+30 : f32
    %748 = vector.shape_cast %747 : vector<16x1xf32> to vector<16x1xf32>
    %749 = vector.broadcast %748 : vector<16x1xf32> to vector<16x8xf32>
    %750 = vector.broadcast %cst_328 : f32 to vector<16x8xf32>
    %751 = arith.select %6, %749, %750 : vector<16x8xi1>, vector<16x8xf32>
    %cst_329 = arith.constant dense<0xFF800000> : vector<8xf32>
    %752 = vector.multi_reduction <maximumf>, %751, %cst_329 [0] : vector<16x8xf32> to vector<8xf32>
    %753 = vector.shape_cast %752 : vector<8xf32> to vector<1x8xf32>
    %cst_330 = arith.constant -1.000000e+30 : f32
    %754 = vector.shape_cast %753 : vector<1x8xf32> to vector<1x8xf32>
    %755 = vector.broadcast %754 : vector<1x8xf32> to vector<16x8xf32>
    %756 = vector.broadcast %cst_330 : f32 to vector<16x8xf32>
    %757 = arith.select %6, %755, %756 : vector<16x8xi1>, vector<16x8xf32>
    %cst_331 = arith.constant dense<0xFF800000> : vector<16xf32>
    %758 = vector.multi_reduction <maximumf>, %757, %cst_331 [1] : vector<16x8xf32> to vector<16xf32>
    %759 = vector.shape_cast %758 : vector<16xf32> to vector<16x1xf32>
    %760 = vector.extract_strided_slice %746 {offsets = [0, 1], sizes = [16, 1], strides = [1, 1]} : vector<16x4xf32> to vector<16x1xf32>
    %cst_332 = arith.constant -1.000000e+30 : f32
    %761 = vector.shape_cast %760 : vector<16x1xf32> to vector<16x1xf32>
    %762 = vector.broadcast %761 : vector<16x1xf32> to vector<16x8xf32>
    %763 = vector.broadcast %cst_332 : f32 to vector<16x8xf32>
    %764 = arith.select %6, %762, %763 : vector<16x8xi1>, vector<16x8xf32>
    %cst_333 = arith.constant dense<0xFF800000> : vector<8xf32>
    %765 = vector.multi_reduction <maximumf>, %764, %cst_333 [0] : vector<16x8xf32> to vector<8xf32>
    %766 = vector.shape_cast %765 : vector<8xf32> to vector<1x8xf32>
    %cst_334 = arith.constant -1.000000e+30 : f32
    %767 = vector.shape_cast %766 : vector<1x8xf32> to vector<1x8xf32>
    %768 = vector.broadcast %767 : vector<1x8xf32> to vector<16x8xf32>
    %769 = vector.broadcast %cst_334 : f32 to vector<16x8xf32>
    %770 = arith.select %6, %768, %769 : vector<16x8xi1>, vector<16x8xf32>
    %cst_335 = arith.constant dense<0xFF800000> : vector<16xf32>
    %771 = vector.multi_reduction <maximumf>, %770, %cst_335 [1] : vector<16x8xf32> to vector<16xf32>
    %772 = vector.shape_cast %771 : vector<16xf32> to vector<16x1xf32>
    %773 = vector.extract_strided_slice %746 {offsets = [0, 2], sizes = [16, 1], strides = [1, 1]} : vector<16x4xf32> to vector<16x1xf32>
    %cst_336 = arith.constant -1.000000e+30 : f32
    %774 = vector.shape_cast %773 : vector<16x1xf32> to vector<16x1xf32>
    %775 = vector.broadcast %774 : vector<16x1xf32> to vector<16x8xf32>
    %776 = vector.broadcast %cst_336 : f32 to vector<16x8xf32>
    %777 = arith.select %6, %775, %776 : vector<16x8xi1>, vector<16x8xf32>
    %cst_337 = arith.constant dense<0xFF800000> : vector<8xf32>
    %778 = vector.multi_reduction <maximumf>, %777, %cst_337 [0] : vector<16x8xf32> to vector<8xf32>
    %779 = vector.shape_cast %778 : vector<8xf32> to vector<1x8xf32>
    %cst_338 = arith.constant -1.000000e+30 : f32
    %780 = vector.shape_cast %779 : vector<1x8xf32> to vector<1x8xf32>
    %781 = vector.broadcast %780 : vector<1x8xf32> to vector<16x8xf32>
    %782 = vector.broadcast %cst_338 : f32 to vector<16x8xf32>
    %783 = arith.select %6, %781, %782 : vector<16x8xi1>, vector<16x8xf32>
    %cst_339 = arith.constant dense<0xFF800000> : vector<16xf32>
    %784 = vector.multi_reduction <maximumf>, %783, %cst_339 [1] : vector<16x8xf32> to vector<16xf32>
    %785 = vector.shape_cast %784 : vector<16xf32> to vector<16x1xf32>
    %786 = vector.extract_strided_slice %746 {offsets = [0, 3], sizes = [16, 1], strides = [1, 1]} : vector<16x4xf32> to vector<16x1xf32>
    %cst_340 = arith.constant -1.000000e+30 : f32
    %787 = vector.shape_cast %786 : vector<16x1xf32> to vector<16x1xf32>
    %788 = vector.broadcast %787 : vector<16x1xf32> to vector<16x8xf32>
    %789 = vector.broadcast %cst_340 : f32 to vector<16x8xf32>
    %790 = arith.select %6, %788, %789 : vector<16x8xi1>, vector<16x8xf32>
    %cst_341 = arith.constant dense<0xFF800000> : vector<8xf32>
    %791 = vector.multi_reduction <maximumf>, %790, %cst_341 [0] : vector<16x8xf32> to vector<8xf32>
    %792 = vector.shape_cast %791 : vector<8xf32> to vector<1x8xf32>
    %cst_342 = arith.constant -1.000000e+30 : f32
    %793 = vector.shape_cast %792 : vector<1x8xf32> to vector<1x8xf32>
    %794 = vector.broadcast %793 : vector<1x8xf32> to vector<16x8xf32>
    %795 = vector.broadcast %cst_342 : f32 to vector<16x8xf32>
    %796 = arith.select %6, %794, %795 : vector<16x8xi1>, vector<16x8xf32>
    %cst_343 = arith.constant dense<0xFF800000> : vector<16xf32>
    %797 = vector.multi_reduction <maximumf>, %796, %cst_343 [1] : vector<16x8xf32> to vector<16xf32>
    %798 = vector.shape_cast %797 : vector<16xf32> to vector<16x1xf32>
    %799 = tpu.concatenate %759, %772, %785, %798 in 1 : vector<16x1xf32>, vector<16x1xf32>, vector<16x1xf32>, vector<16x1xf32> -> vector<16x4xf32>
    %800 = arith.subf %746, %799 : vector<16x4xf32>
    %801 = math.exp %800 : vector<16x4xf32>
    %802 = arith.truncf %801 : vector<16x4xf32> to vector<16x4xbf16>
    %cst_344 = arith.constant dense<0.000000e+00> : vector<8x4xf32>
    %803 = tpu.matmul %3, %802, %cst_344 {dimension_numbers = #tpu.dot_dimension_numbers<[0], [0], [1], [1], [0, 1, 1, 1], [], []>} : vector<16x8xbf16>, vector<16x4xbf16>, vector<8x4xf32> -> vector<8x4xf32>
    %804 = arith.truncf %803 : vector<8x4xf32> to vector<8x4xbf16>
    %cst_345 = arith.constant dense<0.000000e+00> : vector<16x4xf32>
    %805 = tpu.matmul %3, %804, %cst_345 {dimension_numbers = #tpu.dot_dimension_numbers<[1], [0], [0], [1], [0, 0, 1, 1], [], []>} : vector<16x8xbf16>, vector<8x4xbf16>, vector<16x4xf32> -> vector<16x4xf32>
    %cst_346 = arith.constant 1.000000e-30 : f32
    %806 = vector.broadcast %cst_346 : f32 to vector<16x4xf32>
    %807 = arith.addf %805, %806 : vector<16x4xf32>
    %808 = tpu.reciprocal %807 {approx = true} : vector<16x4xf32> -> vector<16x4xf32>
    %809 = arith.mulf %801, %808 : vector<16x4xf32>
    %810 = arith.truncf %809 : vector<16x4xf32> to vector<16x4xbf16>
    %cst_347 = arith.constant dense<0.000000e+00> : vector<16x32xf32>
    %811 = tpu.matmul %810, %8, %cst_347 {dimension_numbers = #tpu.dot_dimension_numbers<[1], [0], [0], [1], [0, 0, 1, 1], [], []>} : vector<16x4xbf16>, vector<4x32xbf16>, vector<16x32xf32> -> vector<16x32xf32>
    %812 = arith.addf %740, %731 : vector<16x32xf32>
    %813 = arith.mulf %811, %812 : vector<16x32xf32>
    %814 = arith.truncf %813 : vector<16x32xf32> to vector<16x32xbf16>
    %cst_348 = arith.constant dense<0.000000e+00> : vector<8x32xf32>
    %815 = tpu.matmul %3, %814, %cst_348 {dimension_numbers = #tpu.dot_dimension_numbers<[0], [0], [1], [1], [0, 1, 1, 1], [], []>} : vector<16x8xbf16>, vector<16x32xbf16>, vector<8x32xf32> -> vector<8x32xf32>
    %816 = arith.truncf %815 : vector<8x32xf32> to vector<8x32xbf16>
    %c6_349 = arith.constant 6 : index
    %c0_350 = arith.constant 0 : index
    %c0_351 = arith.constant 0 : index
    %817 = vector.load %arg15[%c6_349, %c0_350, %c0_351] : memref<8x32x32xbf16, #tpu.memory_space<vmem>>, vector<1x32x32xbf16>
    %818 = vector.shape_cast %817 : vector<1x32x32xbf16> to vector<32x32xbf16>
    %cst_352 = arith.constant dense<0.000000e+00> : vector<8x32xf32>
    %819 = tpu.matmul %816, %818, %cst_352 {dimension_numbers = #tpu.dot_dimension_numbers<[1], [0], [0], [1], [0, 0, 1, 1], [], []>} : vector<8x32xbf16>, vector<32x32xbf16>, vector<8x32xf32> -> vector<8x32xf32>
    %820 = arith.addf %710, %819 : vector<8x32xf32>
    %c6_353 = arith.constant 6 : index
    %c0_354 = arith.constant 0 : index
    %c0_355 = arith.constant 0 : index
    %821 = vector.load %arg16[%c6_353, %c0_354, %c0_355] : memref<8x1x32xf32, #tpu.memory_space<vmem>>, vector<1x1x32xf32>
    %822 = vector.shape_cast %821 : vector<1x1x32xf32> to vector<1x32xf32>
    %823 = vector.broadcast %822 : vector<1x32xf32> to vector<8x32xf32>
    %824 = arith.addf %820, %823 : vector<8x32xf32>
    %cst_356 = arith.constant 0.000000e+00 : f32
    %825 = vector.broadcast %cst_356 : f32 to vector<8x32xf32>
    %826 = arith.maximumf %824, %825 : vector<8x32xf32>
    %827 = arith.addf %739, %735 : vector<16x32xf32>
    %828 = arith.truncf %827 : vector<16x32xf32> to vector<16x32xbf16>
    %c6_357 = arith.constant 6 : index
    %c0_358 = arith.constant 0 : index
    %c0_359 = arith.constant 0 : index
    %829 = vector.load %arg17[%c6_357, %c0_358, %c0_359] : memref<8x32x64xbf16, #tpu.memory_space<vmem>>, vector<1x32x64xbf16>
    %830 = vector.shape_cast %829 : vector<1x32x64xbf16> to vector<32x64xbf16>
    %cst_360 = arith.constant dense<0.000000e+00> : vector<16x64xf32>
    %831 = tpu.matmul %828, %830, %cst_360 {dimension_numbers = #tpu.dot_dimension_numbers<[1], [0], [0], [1], [0, 0, 1, 1], [], []>} : vector<16x32xbf16>, vector<32x64xbf16>, vector<16x64xf32> -> vector<16x64xf32>
    %832 = arith.addf %732, %831 : vector<16x64xf32>
    %c6_361 = arith.constant 6 : index
    %c0_362 = arith.constant 0 : index
    %c0_363 = arith.constant 0 : index
    %833 = vector.load %arg18[%c6_361, %c0_362, %c0_363] : memref<8x1x64xf32, #tpu.memory_space<vmem>>, vector<1x1x64xf32>
    %834 = vector.shape_cast %833 : vector<1x1x64xf32> to vector<1x64xf32>
    %835 = vector.broadcast %834 : vector<1x64xf32> to vector<16x64xf32>
    %836 = arith.addf %832, %835 : vector<16x64xf32>
    %cst_364 = arith.constant 0.000000e+00 : f32
    %837 = vector.broadcast %cst_364 : f32 to vector<16x64xf32>
    %838 = arith.maximumf %836, %837 : vector<16x64xf32>
    %839 = arith.truncf %826 : vector<8x32xf32> to vector<8x32xbf16>
    %c7 = arith.constant 7 : index
    %c0_365 = arith.constant 0 : index
    %c0_366 = arith.constant 0 : index
    %840 = vector.load %arg13[%c7, %c0_365, %c0_366] : memref<8x32x96xbf16, #tpu.memory_space<vmem>>, vector<1x32x96xbf16>
    %841 = vector.shape_cast %840 : vector<1x32x96xbf16> to vector<32x96xbf16>
    %cst_367 = arith.constant dense<0.000000e+00> : vector<8x96xf32>
    %842 = tpu.matmul %839, %841, %cst_367 {dimension_numbers = #tpu.dot_dimension_numbers<[1], [0], [0], [1], [0, 0, 1, 1], [], []>} : vector<8x32xbf16>, vector<32x96xbf16>, vector<8x96xf32> -> vector<8x96xf32>
    %843 = arith.truncf %838 : vector<16x64xf32> to vector<16x64xbf16>
    %c7_368 = arith.constant 7 : index
    %c0_369 = arith.constant 0 : index
    %c0_370 = arith.constant 0 : index
    %844 = vector.load %arg14[%c7_368, %c0_369, %c0_370] : memref<8x64x96xbf16, #tpu.memory_space<vmem>>, vector<1x64x96xbf16>
    %845 = vector.shape_cast %844 : vector<1x64x96xbf16> to vector<64x96xbf16>
    %cst_371 = arith.constant dense<0.000000e+00> : vector<16x96xf32>
    %846 = tpu.matmul %843, %845, %cst_371 {dimension_numbers = #tpu.dot_dimension_numbers<[1], [0], [0], [1], [0, 0, 1, 1], [], []>} : vector<16x64xbf16>, vector<64x96xbf16>, vector<16x96xf32> -> vector<16x96xf32>
    %847 = vector.extract_strided_slice %846 {offsets = [0, 0], sizes = [16, 32], strides = [1, 1]} : vector<16x96xf32> to vector<16x32xf32>
    %848 = vector.extract_strided_slice %846 {offsets = [0, 32], sizes = [16, 64], strides = [1, 1]} : vector<16x96xf32> to vector<16x64xf32>
    %849 = vector.extract_strided_slice %842 {offsets = [0, 0], sizes = [8, 32], strides = [1, 1]} : vector<8x96xf32> to vector<8x32xf32>
    %850 = arith.truncf %849 : vector<8x32xf32> to vector<8x32xbf16>
    %cst_372 = arith.constant dense<0.000000e+00> : vector<16x32xf32>
    %851 = tpu.matmul %3, %850, %cst_372 {dimension_numbers = #tpu.dot_dimension_numbers<[1], [0], [0], [1], [0, 0, 1, 1], [], []>} : vector<16x8xbf16>, vector<8x32xbf16>, vector<16x32xf32> -> vector<16x32xf32>
    %852 = vector.extract_strided_slice %842 {offsets = [0, 32], sizes = [8, 64], strides = [1, 1]} : vector<8x96xf32> to vector<8x64xf32>
    %853 = arith.truncf %852 : vector<8x64xf32> to vector<8x64xbf16>
    %cst_373 = arith.constant dense<0.000000e+00> : vector<16x64xf32>
    %854 = tpu.matmul %1, %853, %cst_373 {dimension_numbers = #tpu.dot_dimension_numbers<[1], [0], [0], [1], [0, 0, 1, 1], [], []>} : vector<16x8xbf16>, vector<8x64xbf16>, vector<16x64xf32> -> vector<16x64xf32>
    %855 = vector.extract_strided_slice %854 {offsets = [0, 0], sizes = [16, 32], strides = [1, 1]} : vector<16x64xf32> to vector<16x32xf32>
    %856 = vector.extract_strided_slice %854 {offsets = [0, 32], sizes = [16, 32], strides = [1, 1]} : vector<16x64xf32> to vector<16x32xf32>
    %857 = arith.addf %855, %847 : vector<16x32xf32>
    %858 = arith.mulf %851, %857 : vector<16x32xf32>
    %cst_374 = arith.constant 0.353553385 : f32
    %859 = vector.broadcast %cst_374 : f32 to vector<16x32xf32>
    %860 = arith.mulf %858, %859 : vector<16x32xf32>
    %861 = arith.truncf %860 : vector<16x32xf32> to vector<16x32xbf16>
    %cst_375 = arith.constant dense<0.000000e+00> : vector<16x4xf32>
    %862 = tpu.matmul %861, %7, %cst_375 {dimension_numbers = #tpu.dot_dimension_numbers<[1], [0], [0], [1], [0, 0, 1, 1], [], []>} : vector<16x32xbf16>, vector<32x4xbf16>, vector<16x4xf32> -> vector<16x4xf32>
    %863 = vector.extract_strided_slice %862 {offsets = [0, 0], sizes = [16, 1], strides = [1, 1]} : vector<16x4xf32> to vector<16x1xf32>
    %cst_376 = arith.constant -1.000000e+30 : f32
    %864 = vector.shape_cast %863 : vector<16x1xf32> to vector<16x1xf32>
    %865 = vector.broadcast %864 : vector<16x1xf32> to vector<16x8xf32>
    %866 = vector.broadcast %cst_376 : f32 to vector<16x8xf32>
    %867 = arith.select %6, %865, %866 : vector<16x8xi1>, vector<16x8xf32>
    %cst_377 = arith.constant dense<0xFF800000> : vector<8xf32>
    %868 = vector.multi_reduction <maximumf>, %867, %cst_377 [0] : vector<16x8xf32> to vector<8xf32>
    %869 = vector.shape_cast %868 : vector<8xf32> to vector<1x8xf32>
    %cst_378 = arith.constant -1.000000e+30 : f32
    %870 = vector.shape_cast %869 : vector<1x8xf32> to vector<1x8xf32>
    %871 = vector.broadcast %870 : vector<1x8xf32> to vector<16x8xf32>
    %872 = vector.broadcast %cst_378 : f32 to vector<16x8xf32>
    %873 = arith.select %6, %871, %872 : vector<16x8xi1>, vector<16x8xf32>
    %cst_379 = arith.constant dense<0xFF800000> : vector<16xf32>
    %874 = vector.multi_reduction <maximumf>, %873, %cst_379 [1] : vector<16x8xf32> to vector<16xf32>
    %875 = vector.shape_cast %874 : vector<16xf32> to vector<16x1xf32>
    %876 = vector.extract_strided_slice %862 {offsets = [0, 1], sizes = [16, 1], strides = [1, 1]} : vector<16x4xf32> to vector<16x1xf32>
    %cst_380 = arith.constant -1.000000e+30 : f32
    %877 = vector.shape_cast %876 : vector<16x1xf32> to vector<16x1xf32>
    %878 = vector.broadcast %877 : vector<16x1xf32> to vector<16x8xf32>
    %879 = vector.broadcast %cst_380 : f32 to vector<16x8xf32>
    %880 = arith.select %6, %878, %879 : vector<16x8xi1>, vector<16x8xf32>
    %cst_381 = arith.constant dense<0xFF800000> : vector<8xf32>
    %881 = vector.multi_reduction <maximumf>, %880, %cst_381 [0] : vector<16x8xf32> to vector<8xf32>
    %882 = vector.shape_cast %881 : vector<8xf32> to vector<1x8xf32>
    %cst_382 = arith.constant -1.000000e+30 : f32
    %883 = vector.shape_cast %882 : vector<1x8xf32> to vector<1x8xf32>
    %884 = vector.broadcast %883 : vector<1x8xf32> to vector<16x8xf32>
    %885 = vector.broadcast %cst_382 : f32 to vector<16x8xf32>
    %886 = arith.select %6, %884, %885 : vector<16x8xi1>, vector<16x8xf32>
    %cst_383 = arith.constant dense<0xFF800000> : vector<16xf32>
    %887 = vector.multi_reduction <maximumf>, %886, %cst_383 [1] : vector<16x8xf32> to vector<16xf32>
    %888 = vector.shape_cast %887 : vector<16xf32> to vector<16x1xf32>
    %889 = vector.extract_strided_slice %862 {offsets = [0, 2], sizes = [16, 1], strides = [1, 1]} : vector<16x4xf32> to vector<16x1xf32>
    %cst_384 = arith.constant -1.000000e+30 : f32
    %890 = vector.shape_cast %889 : vector<16x1xf32> to vector<16x1xf32>
    %891 = vector.broadcast %890 : vector<16x1xf32> to vector<16x8xf32>
    %892 = vector.broadcast %cst_384 : f32 to vector<16x8xf32>
    %893 = arith.select %6, %891, %892 : vector<16x8xi1>, vector<16x8xf32>
    %cst_385 = arith.constant dense<0xFF800000> : vector<8xf32>
    %894 = vector.multi_reduction <maximumf>, %893, %cst_385 [0] : vector<16x8xf32> to vector<8xf32>
    %895 = vector.shape_cast %894 : vector<8xf32> to vector<1x8xf32>
    %cst_386 = arith.constant -1.000000e+30 : f32
    %896 = vector.shape_cast %895 : vector<1x8xf32> to vector<1x8xf32>
    %897 = vector.broadcast %896 : vector<1x8xf32> to vector<16x8xf32>
    %898 = vector.broadcast %cst_386 : f32 to vector<16x8xf32>
    %899 = arith.select %6, %897, %898 : vector<16x8xi1>, vector<16x8xf32>
    %cst_387 = arith.constant dense<0xFF800000> : vector<16xf32>
    %900 = vector.multi_reduction <maximumf>, %899, %cst_387 [1] : vector<16x8xf32> to vector<16xf32>
    %901 = vector.shape_cast %900 : vector<16xf32> to vector<16x1xf32>
    %902 = vector.extract_strided_slice %862 {offsets = [0, 3], sizes = [16, 1], strides = [1, 1]} : vector<16x4xf32> to vector<16x1xf32>
    %cst_388 = arith.constant -1.000000e+30 : f32
    %903 = vector.shape_cast %902 : vector<16x1xf32> to vector<16x1xf32>
    %904 = vector.broadcast %903 : vector<16x1xf32> to vector<16x8xf32>
    %905 = vector.broadcast %cst_388 : f32 to vector<16x8xf32>
    %906 = arith.select %6, %904, %905 : vector<16x8xi1>, vector<16x8xf32>
    %cst_389 = arith.constant dense<0xFF800000> : vector<8xf32>
    %907 = vector.multi_reduction <maximumf>, %906, %cst_389 [0] : vector<16x8xf32> to vector<8xf32>
    %908 = vector.shape_cast %907 : vector<8xf32> to vector<1x8xf32>
    %cst_390 = arith.constant -1.000000e+30 : f32
    %909 = vector.shape_cast %908 : vector<1x8xf32> to vector<1x8xf32>
    %910 = vector.broadcast %909 : vector<1x8xf32> to vector<16x8xf32>
    %911 = vector.broadcast %cst_390 : f32 to vector<16x8xf32>
    %912 = arith.select %6, %910, %911 : vector<16x8xi1>, vector<16x8xf32>
    %cst_391 = arith.constant dense<0xFF800000> : vector<16xf32>
    %913 = vector.multi_reduction <maximumf>, %912, %cst_391 [1] : vector<16x8xf32> to vector<16xf32>
    %914 = vector.shape_cast %913 : vector<16xf32> to vector<16x1xf32>
    %915 = tpu.concatenate %875, %888, %901, %914 in 1 : vector<16x1xf32>, vector<16x1xf32>, vector<16x1xf32>, vector<16x1xf32> -> vector<16x4xf32>
    %916 = arith.subf %862, %915 : vector<16x4xf32>
    %917 = math.exp %916 : vector<16x4xf32>
    %918 = arith.truncf %917 : vector<16x4xf32> to vector<16x4xbf16>
    %cst_392 = arith.constant dense<0.000000e+00> : vector<8x4xf32>
    %919 = tpu.matmul %3, %918, %cst_392 {dimension_numbers = #tpu.dot_dimension_numbers<[0], [0], [1], [1], [0, 1, 1, 1], [], []>} : vector<16x8xbf16>, vector<16x4xbf16>, vector<8x4xf32> -> vector<8x4xf32>
    %920 = arith.truncf %919 : vector<8x4xf32> to vector<8x4xbf16>
    %cst_393 = arith.constant dense<0.000000e+00> : vector<16x4xf32>
    %921 = tpu.matmul %3, %920, %cst_393 {dimension_numbers = #tpu.dot_dimension_numbers<[1], [0], [0], [1], [0, 0, 1, 1], [], []>} : vector<16x8xbf16>, vector<8x4xbf16>, vector<16x4xf32> -> vector<16x4xf32>
    %cst_394 = arith.constant 1.000000e-30 : f32
    %922 = vector.broadcast %cst_394 : f32 to vector<16x4xf32>
    %923 = arith.addf %921, %922 : vector<16x4xf32>
    %924 = tpu.reciprocal %923 {approx = true} : vector<16x4xf32> -> vector<16x4xf32>
    %925 = arith.mulf %917, %924 : vector<16x4xf32>
    %926 = arith.truncf %925 : vector<16x4xf32> to vector<16x4xbf16>
    %cst_395 = arith.constant dense<0.000000e+00> : vector<16x32xf32>
    %927 = tpu.matmul %926, %8, %cst_395 {dimension_numbers = #tpu.dot_dimension_numbers<[1], [0], [0], [1], [0, 0, 1, 1], [], []>} : vector<16x4xbf16>, vector<4x32xbf16>, vector<16x32xf32> -> vector<16x32xf32>
    %928 = arith.addf %856, %847 : vector<16x32xf32>
    %929 = arith.mulf %927, %928 : vector<16x32xf32>
    %930 = arith.truncf %929 : vector<16x32xf32> to vector<16x32xbf16>
    %cst_396 = arith.constant dense<0.000000e+00> : vector<8x32xf32>
    %931 = tpu.matmul %3, %930, %cst_396 {dimension_numbers = #tpu.dot_dimension_numbers<[0], [0], [1], [1], [0, 1, 1, 1], [], []>} : vector<16x8xbf16>, vector<16x32xbf16>, vector<8x32xf32> -> vector<8x32xf32>
    %932 = arith.truncf %931 : vector<8x32xf32> to vector<8x32xbf16>
    %c7_397 = arith.constant 7 : index
    %c0_398 = arith.constant 0 : index
    %c0_399 = arith.constant 0 : index
    %933 = vector.load %arg15[%c7_397, %c0_398, %c0_399] : memref<8x32x32xbf16, #tpu.memory_space<vmem>>, vector<1x32x32xbf16>
    %934 = vector.shape_cast %933 : vector<1x32x32xbf16> to vector<32x32xbf16>
    %cst_400 = arith.constant dense<0.000000e+00> : vector<8x32xf32>
    %935 = tpu.matmul %932, %934, %cst_400 {dimension_numbers = #tpu.dot_dimension_numbers<[1], [0], [0], [1], [0, 0, 1, 1], [], []>} : vector<8x32xbf16>, vector<32x32xbf16>, vector<8x32xf32> -> vector<8x32xf32>
    %936 = arith.addf %826, %935 : vector<8x32xf32>
    %c7_401 = arith.constant 7 : index
    %c0_402 = arith.constant 0 : index
    %c0_403 = arith.constant 0 : index
    %937 = vector.load %arg16[%c7_401, %c0_402, %c0_403] : memref<8x1x32xf32, #tpu.memory_space<vmem>>, vector<1x1x32xf32>
    %938 = vector.shape_cast %937 : vector<1x1x32xf32> to vector<1x32xf32>
    %939 = vector.broadcast %938 : vector<1x32xf32> to vector<8x32xf32>
    %940 = arith.addf %936, %939 : vector<8x32xf32>
    %cst_404 = arith.constant 0.000000e+00 : f32
    %941 = vector.broadcast %cst_404 : f32 to vector<8x32xf32>
    %942 = arith.maximumf %940, %941 : vector<8x32xf32>
    %943 = arith.addf %855, %851 : vector<16x32xf32>
    %944 = arith.truncf %943 : vector<16x32xf32> to vector<16x32xbf16>
    %c7_405 = arith.constant 7 : index
    %c0_406 = arith.constant 0 : index
    %c0_407 = arith.constant 0 : index
    %945 = vector.load %arg17[%c7_405, %c0_406, %c0_407] : memref<8x32x64xbf16, #tpu.memory_space<vmem>>, vector<1x32x64xbf16>
    %946 = vector.shape_cast %945 : vector<1x32x64xbf16> to vector<32x64xbf16>
    %cst_408 = arith.constant dense<0.000000e+00> : vector<16x64xf32>
    %947 = tpu.matmul %944, %946, %cst_408 {dimension_numbers = #tpu.dot_dimension_numbers<[1], [0], [0], [1], [0, 0, 1, 1], [], []>} : vector<16x32xbf16>, vector<32x64xbf16>, vector<16x64xf32> -> vector<16x64xf32>
    %948 = arith.addf %848, %947 : vector<16x64xf32>
    %c7_409 = arith.constant 7 : index
    %c0_410 = arith.constant 0 : index
    %c0_411 = arith.constant 0 : index
    %949 = vector.load %arg18[%c7_409, %c0_410, %c0_411] : memref<8x1x64xf32, #tpu.memory_space<vmem>>, vector<1x1x64xf32>
    %950 = vector.shape_cast %949 : vector<1x1x64xf32> to vector<1x64xf32>
    %951 = vector.broadcast %950 : vector<1x64xf32> to vector<16x64xf32>
    %952 = arith.addf %948, %951 : vector<16x64xf32>
    %cst_412 = arith.constant 0.000000e+00 : f32
    %953 = vector.broadcast %cst_412 : f32 to vector<16x64xf32>
    %954 = arith.maximumf %952, %953 : vector<16x64xf32>
    %c0_413 = arith.constant 0 : index
    %c0_414 = arith.constant 0 : index
    %c0_415 = arith.constant 0 : index
    %955 = vector.load %arg6[%c0_413, %c0_414, %c0_415] : memref<1x8x1xf32, #tpu.memory_space<vmem>>, vector<1x8x1xf32>
    %956 = vector.shape_cast %955 : vector<1x8x1xf32> to vector<8x1xf32>
    %cst_416 = arith.constant dense<0.000000e+00> : vector<1xf32>
    %957 = vector.multi_reduction <add>, %956, %cst_416 [0] : vector<8x1xf32> to vector<1xf32>
    %958 = vector.shape_cast %957 : vector<1xf32> to vector<1x1xf32>
    %cst_417 = arith.constant 1.000000e+00 : f32
    %959 = vector.broadcast %cst_417 : f32 to vector<1x1xf32>
    %960 = arith.maximumf %958, %959 : vector<1x1xf32>
    %961 = vector.broadcast %956 : vector<8x1xf32> to vector<8x32xf32>
    %962 = arith.mulf %942, %961 : vector<8x32xf32>
    %cst_418 = arith.constant dense<0.000000e+00> : vector<32xf32>
    %963 = vector.multi_reduction <add>, %962, %cst_418 [0] : vector<8x32xf32> to vector<32xf32>
    %964 = vector.shape_cast %963 : vector<32xf32> to vector<1x32xf32>
    %965 = vector.broadcast %960 : vector<1x1xf32> to vector<1x32xf32>
    %966 = arith.divf %964, %965 : vector<1x32xf32>
    %cst_419 = arith.constant dense<0.000000e+00> : vector<64xf32>
    %967 = vector.multi_reduction <add>, %954, %cst_419 [0] : vector<16x64xf32> to vector<64xf32>
    %968 = vector.shape_cast %967 : vector<64xf32> to vector<1x64xf32>
    %cst_420 = arith.constant 1.600000e+01 : f32
    %969 = vector.broadcast %cst_420 : f32 to vector<1x64xf32>
    %970 = arith.divf %968, %969 : vector<1x64xf32>
    %971 = tpu.concatenate %966, %970 in 1 : vector<1x32xf32>, vector<1x64xf32> -> vector<1x96xf32>
    %972 = arith.truncf %971 : vector<1x96xf32> to vector<1x96xbf16>
    %c0_421 = arith.constant 0 : index
    %c0_422 = arith.constant 0 : index
    %973 = vector.load %arg19[%c0_421, %c0_422] : memref<96x32xbf16, #tpu.memory_space<vmem>>, vector<96x32xbf16>
    %cst_423 = arith.constant dense<0.000000e+00> : vector<1x32xf32>
    %974 = tpu.matmul %972, %973, %cst_423 {dimension_numbers = #tpu.dot_dimension_numbers<[1], [0], [0], [1], [0, 0, 1, 1], [], []>} : vector<1x96xbf16>, vector<96x32xbf16>, vector<1x32xf32> -> vector<1x32xf32>
    %c0_424 = arith.constant 0 : index
    %c0_425 = arith.constant 0 : index
    %975 = vector.load %arg20[%c0_424, %c0_425] : memref<1x32xf32, #tpu.memory_space<vmem>>, vector<1x32xf32>
    %976 = arith.addf %974, %975 : vector<1x32xf32>
    %cst_426 = arith.constant 0.000000e+00 : f32
    %977 = vector.broadcast %cst_426 : f32 to vector<1x32xf32>
    %978 = arith.maximumf %976, %977 : vector<1x32xf32>
    %979 = arith.truncf %978 : vector<1x32xf32> to vector<1x32xbf16>
    %c0_427 = arith.constant 0 : index
    %c0_428 = arith.constant 0 : index
    %980 = vector.load %arg21[%c0_427, %c0_428] : memref<32x128xbf16, #tpu.memory_space<vmem>>, vector<32x128xbf16>
    %cst_429 = arith.constant dense<0.000000e+00> : vector<1x128xf32>
    %981 = tpu.matmul %979, %980, %cst_429 {dimension_numbers = #tpu.dot_dimension_numbers<[1], [0], [0], [1], [0, 0, 1, 1], [], []>} : vector<1x32xbf16>, vector<32x128xbf16>, vector<1x128xf32> -> vector<1x128xf32>
    %c0_430 = arith.constant 0 : index
    %c0_431 = arith.constant 0 : index
    %982 = vector.load %arg22[%c0_430, %c0_431] : memref<1x128xf32, #tpu.memory_space<vmem>>, vector<1x128xf32>
    %983 = arith.addf %981, %982 : vector<1x128xf32>
    %cst_432 = arith.constant dense<0xFF800000> : vector<1xf32>
    %984 = vector.multi_reduction <maximumf>, %983, %cst_432 [1] : vector<1x128xf32> to vector<1xf32>
    %985 = vector.shape_cast %984 : vector<1xf32> to vector<1x1xf32>
    %986 = vector.broadcast %985 : vector<1x1xf32> to vector<1x128xf32>
    %987 = arith.subf %983, %986 : vector<1x128xf32>
    %988 = math.exp %987 : vector<1x128xf32>
    %cst_433 = arith.constant dense<0.000000e+00> : vector<1xf32>
    %989 = vector.multi_reduction <add>, %988, %cst_433 [1] : vector<1x128xf32> to vector<1xf32>
    %990 = vector.shape_cast %989 : vector<1xf32> to vector<1x1xf32>
    %991 = math.log %990 : vector<1x1xf32>
    %992 = arith.addf %985, %991 : vector<1x1xf32>
    %993 = vector.broadcast %992 : vector<1x1xf32> to vector<1x128xf32>
    %994 = arith.subf %983, %993 : vector<1x128xf32>
    %c0_434 = arith.constant 0 : index
    %c0_435 = arith.constant 0 : index
    %c0_436 = arith.constant 0 : index
    %995 = vector.load %arg23[%c0_434, %c0_435, %c0_436] : memref<1x1x128xf32, #tpu.memory_space<vmem>>, vector<1x1x128xf32>
    %996 = vector.shape_cast %995 : vector<1x1x128xf32> to vector<1x128xf32>
    %997 = vector.shape_cast %994 : vector<1x128xf32> to vector<1x1x128xf32>
    tpu.vector_store %arg23[%c0_434, %c0_435, %c0_436], %997 {strides = array<i32>} : memref<1x1x128xf32, #tpu.memory_space<vmem>>, vector<1x1x128xf32>,
    return
  }
  func.func @transform_0(%arg0: i32) -> (i32, i32, i32) {
    %c0_i32 = arith.constant 0 : i32
    %c0_i32_0 = arith.constant 0 : i32
    %c0_i32_1 = arith.constant 0 : i32
    return %arg0, %c0_i32, %c0_i32_0 : i32, i32, i32
  }
  func.func @transform_1(%arg0: i32) -> (i32, i32, i32) {
    %c0_i32 = arith.constant 0 : i32
    %c0_i32_0 = arith.constant 0 : i32
    %c0_i32_1 = arith.constant 0 : i32
    return %arg0, %c0_i32, %c0_i32_0 : i32, i32, i32
  }
  func.func @transform_2(%arg0: i32) -> (i32, i32, i32) {
    %c0_i32 = arith.constant 0 : i32
    %c0_i32_0 = arith.constant 0 : i32
    %c0_i32_1 = arith.constant 0 : i32
    return %arg0, %c0_i32, %c0_i32_0 : i32, i32, i32
  }
  func.func @transform_3(%arg0: i32) -> (i32, i32, i32) {
    %c0_i32 = arith.constant 0 : i32
    %c0_i32_0 = arith.constant 0 : i32
    %c0_i32_1 = arith.constant 0 : i32
    return %arg0, %c0_i32, %c0_i32_0 : i32, i32, i32
  }
  func.func @transform_4(%arg0: i32) -> (i32, i32, i32) {
    %c0_i32 = arith.constant 0 : i32
    %c0_i32_0 = arith.constant 0 : i32
    %c0_i32_1 = arith.constant 0 : i32
    return %arg0, %c0_i32, %c0_i32_0 : i32, i32, i32
  }
  func.func @transform_5(%arg0: i32) -> (i32, i32, i32) {
    %c0_i32 = arith.constant 0 : i32
    %c0_i32_0 = arith.constant 0 : i32
    %c0_i32_1 = arith.constant 0 : i32
    return %arg0, %c0_i32, %c0_i32_0 : i32, i32, i32
  }
  func.func @transform_6(%arg0: i32) -> (i32, i32) {
    %c0_i32 = arith.constant 0 : i32
    %c0_i32_0 = arith.constant 0 : i32
    %c0_i32_1 = arith.constant 0 : i32
    return %c0_i32, %c0_i32_0 : i32, i32
  }
  func.func @transform_7(%arg0: i32) -> (i32, i32) {
    %c0_i32 = arith.constant 0 : i32
    %c0_i32_0 = arith.constant 0 : i32
    %c0_i32_1 = arith.constant 0 : i32
    return %c0_i32, %c0_i32_0 : i32, i32
  }
  func.func @transform_8(%arg0: i32) -> (i32, i32) {
    %c0_i32 = arith.constant 0 : i32
    %c0_i32_0 = arith.constant 0 : i32
    %c0_i32_1 = arith.constant 0 : i32
    return %c0_i32, %c0_i32_0 : i32, i32
  }
  func.func @transform_9(%arg0: i32) -> (i32, i32) {
    %c0_i32 = arith.constant 0 : i32
    %c0_i32_0 = arith.constant 0 : i32
    %c0_i32_1 = arith.constant 0 : i32
    return %c0_i32, %c0_i32_0 : i32, i32
  }
  func.func @transform_10(%arg0: i32) -> (i32, i32) {
    %c0_i32 = arith.constant 0 : i32
    %c0_i32_0 = arith.constant 0 : i32
    %c0_i32_1 = arith.constant 0 : i32
    return %c0_i32, %c0_i32_0 : i32, i32
  }
  func.func @transform_11(%arg0: i32) -> (i32, i32) {
    %c0_i32 = arith.constant 0 : i32
    %c0_i32_0 = arith.constant 0 : i32
    %c0_i32_1 = arith.constant 0 : i32
    return %c0_i32, %c0_i32_0 : i32, i32
  }
  func.func @transform_12(%arg0: i32) -> (i32, i32, i32) {
    %c0_i32 = arith.constant 0 : i32
    %c0_i32_0 = arith.constant 0 : i32
    %c0_i32_1 = arith.constant 0 : i32
    %c0_i32_2 = arith.constant 0 : i32
    return %c0_i32, %c0_i32_0, %c0_i32_1 : i32, i32, i32
  }
  func.func @transform_13(%arg0: i32) -> (i32, i32, i32) {
    %c0_i32 = arith.constant 0 : i32
    %c0_i32_0 = arith.constant 0 : i32
    %c0_i32_1 = arith.constant 0 : i32
    %c0_i32_2 = arith.constant 0 : i32
    return %c0_i32, %c0_i32_0, %c0_i32_1 : i32, i32, i32
  }
  func.func @transform_14(%arg0: i32) -> (i32, i32, i32) {
    %c0_i32 = arith.constant 0 : i32
    %c0_i32_0 = arith.constant 0 : i32
    %c0_i32_1 = arith.constant 0 : i32
    %c0_i32_2 = arith.constant 0 : i32
    return %c0_i32, %c0_i32_0, %c0_i32_1 : i32, i32, i32
  }
  func.func @transform_15(%arg0: i32) -> (i32, i32, i32) {
    %c0_i32 = arith.constant 0 : i32
    %c0_i32_0 = arith.constant 0 : i32
    %c0_i32_1 = arith.constant 0 : i32
    %c0_i32_2 = arith.constant 0 : i32
    return %c0_i32, %c0_i32_0, %c0_i32_1 : i32, i32, i32
  }
  func.func @transform_16(%arg0: i32) -> (i32, i32, i32) {
    %c0_i32 = arith.constant 0 : i32
    %c0_i32_0 = arith.constant 0 : i32
    %c0_i32_1 = arith.constant 0 : i32
    %c0_i32_2 = arith.constant 0 : i32
    return %c0_i32, %c0_i32_0, %c0_i32_1 : i32, i32, i32
  }
  func.func @transform_17(%arg0: i32) -> (i32, i32, i32) {
    %c0_i32 = arith.constant 0 : i32
    %c0_i32_0 = arith.constant 0 : i32
    %c0_i32_1 = arith.constant 0 : i32
    %c0_i32_2 = arith.constant 0 : i32
    return %c0_i32, %c0_i32_0, %c0_i32_1 : i32, i32, i32
  }
  func.func @transform_18(%arg0: i32) -> (i32, i32) {
    %c0_i32 = arith.constant 0 : i32
    %c0_i32_0 = arith.constant 0 : i32
    %c0_i32_1 = arith.constant 0 : i32
    return %c0_i32, %c0_i32_0 : i32, i32
  }
  func.func @transform_19(%arg0: i32) -> (i32, i32) {
    %c0_i32 = arith.constant 0 : i32
    %c0_i32_0 = arith.constant 0 : i32
    %c0_i32_1 = arith.constant 0 : i32
    return %c0_i32, %c0_i32_0 : i32, i32
  }
  func.func @transform_20(%arg0: i32) -> (i32, i32) {
    %c0_i32 = arith.constant 0 : i32
    %c0_i32_0 = arith.constant 0 : i32
    %c0_i32_1 = arith.constant 0 : i32
    return %c0_i32, %c0_i32_0 : i32, i32
  }
  func.func @transform_21(%arg0: i32) -> (i32, i32) {
    %c0_i32 = arith.constant 0 : i32
    %c0_i32_0 = arith.constant 0 : i32
    %c0_i32_1 = arith.constant 0 : i32
    return %c0_i32, %c0_i32_0 : i32, i32
  }
  func.func @transform_22(%arg0: i32) -> (i32, i32, i32) {
    %c0_i32 = arith.constant 0 : i32
    %c0_i32_0 = arith.constant 0 : i32
    %c0_i32_1 = arith.constant 0 : i32
    return %arg0, %c0_i32, %c0_i32_0 : i32, i32, i32
  }
}

</mosaic_0001>

<bundles_post_ra>
// kernel: tpu_custom_call.1
= control target key start
LH: loop header
LB: loop body
LE: loop exit
PB: predicated region body
PF: predicated region fallthrough
CT: control target
= control target key end

     0   :  { %s11517_s0 = inlined_call_operand.hbm [shape: bf16[2,8,32], index: 0, kind: input, shape index: {}]   ;;  %s11518_s1 = inlined_call_operand.vmem [shape: bf16[2,16,24], index: 1, kind: input, shape index: {}]   ;;  %s11519_s2 = inlined_call_operand.vmem [shape: f32[2,16,1], index: 2, kind: input, shape index: {}]   ;;  %s11520_s3 = inlined_call_operand.vmem [shape: bf16[2,16,8], index: 3, kind: input, shape index: {}]   ;;  %s11521_s4 = inlined_call_operand.vmem [shape: bf16[2,16,8], index: 4, kind: input, shape index: {}]   ;;  %s11522_s5 = inlined_call_operand.vmem [shape: f32[2,8,1], index: 5, kind: input, shape index: {}]   ;;  %s11523_s6 = inlined_call_operand.vmem [shape: bf16[32,32], index: 6, kind: input, shape index: {}]   ;;  %s11524_s7 = inlined_call_operand.vmem [shape: bf16[24,64], index: 7, kind: input, shape index: {}]   ;;  %s11525_s8 = inlined_call_operand.vmem [shape: f32[1,64], index: 8, kind: input, shape index: {}]   ;;  %s11526_s9 = inlined_call_operand.hbm [shape: f32[1,64], index: 9, kind: input, shape index: {}]   ;;  %s11527_s10 = inlined_call_operand.vmem [shape: bf16[32,4], index: 10, kind: input, shape index: {}]   ;;  %s11528_s11 = inlined_call_operand.hbm [shape: bf16[4,32], index: 11, kind: input, shape index: {}]   ;;  %s11529_s12 = inlined_call_operand.vmem [shape: bf16[8,32,96], index: 12, kind: input, shape index: {}]   ;;  %s11530_s13 = inlined_call_operand.hbm [shape: bf16[8,64,96], index: 13, kind: input, shape index: {}]   ;;  %s11531_s14 = inlined_call_operand.hbm [shape: bf16[8,32,32], index: 14, kind: input, shape index: {}]   ;;  %s11532_s15 = inlined_call_operand.hbm [shape: f32[8,1,32], index: 15, kind: input, shape index: {}]   ;;  %s11533_s16 = inlined_call_operand.hbm [shape: bf16[8,32,64], index: 16, kind: input, shape index: {}]   ;;  %s11534_s17 = inlined_call_operand.hbm [shape: f32[8,1,64], index: 17, kind: input, shape index: {}]   ;;  %s11535_s18 = inlined_call_operand.vmem [shape: bf16[96,32], index: 18, kind: input, shape index: {}]   ;;  %s11536_s19 = inlined_call_operand.vmem [shape: f32[1,32], index: 19, kind: input, shape index: {}]   ;;  %s11537_s20 = inlined_call_operand.vmem [shape: bf16[32,128], index: 20, kind: input, shape index: {}]   ;;  %s11538_s21 = inlined_call_operand.vmem [shape: f32[1,128], index: 21, kind: input, shape index: {}]   ;;  %s11539_s22 = inlined_call_operand.hbm [shape: f32[2,1,128], index: 22, kind: output, shape index: {}]  }
   0x1   :  { %11555 = sst [smem:[#allocation25_spill]] %s11517_s0 }
   0x2   :  { %11556 = sst [smem:[#allocation26_spill]] %s11518_s1 }
   0x3   :  { %11557 = sst [smem:[#allocation27_spill]] %s11519_s2 }
   0x4   :  { %11558 = sst [smem:[#allocation28_spill]] %s11520_s3 }
   0x5   :  { %11559 = sst [smem:[#allocation29_spill]] %s11521_s4 }
   0x6   :  { %11560 = sst [smem:[#allocation30_spill]] %s11522_s5 }
   0x7   :  { %11561 = sst [smem:[#allocation31_spill]] %s11523_s6 }
   0x8   :  { %11562 = sst [smem:[#allocation32_spill]] %s11526_s9 }
   0x9   :  { %11563 = sst [smem:[#allocation33_spill]] %s11528_s11 }
   0xa   :  { %11564 = sst [smem:[#allocation34_spill]] %s11530_s13 }
   0xb   :  { %11565 = sst [smem:[#allocation35_spill]] %s11531_s14 }
   0xc   :  { %11566 = sst [smem:[#allocation36_spill]] %s11532_s15 }
   0xd   :  { %11567 = sst [smem:[#allocation37_spill]] %s11533_s16 }
   0xe   :  { %11568 = sst [smem:[#allocation38_spill]] %s11534_s17 }
   0xf   :  { %11569 = sst [smem:[#allocation39_spill]] %s11538_s21 }
  0x10   :  { %11570 = sst [smem:[#allocation40_spill]] %s11539_s22 }
  0x11   :  { %27 = vsyncpa [#allocation3], 0 }
  0x12   :  { %29 = vsyncpa [#allocation3 + $0x1], 0 }
  0x13   :  { %30 = vsyncpa [#allocation6], 0 }
  0x14   :  { %31 = vsyncpa [#allocation9], 0 }
  0x15   :  { %32 = vsyncpa [#allocation12], 0 }
  0x16   :  { %33 = vsyncpa [#allocation15], 0 }
  0x17   :  { %34 = vsyncpa [#allocation4], 0 }
  0x18   :  { %36 = vsyncpa [#allocation4 + $0x1], 0  ;;  %s9630_s3 = smov 0   ;;  %s9632_s28 = smov 0  }
  0x19   :  { %s9634_s29 = smov 0   ;;  %s9636_s30 = smov 0  }
  0x1a LB: > { %11571 = sst [smem:[#allocation23_spill]] %s9488_s29  ;;  %s9494_s4 = smov [#allocation5]   ;;  %s9492_s30 = sphi %s9636_s30, %s11623_s30   ;;  %s9488_s29 = sphi %s9634_s29, %s11620_s29   ;;  %s9484_s28 = sphi %s9632_s28, %s11622_s28   ;;  %s9480_s3 = sphi %s9630_s3, %s11621_s3  }
  0x1b   : > { %s587_s0 = sshll.u32 %s9494_s4, 4  ;;  %s9651_s23 = sadd.s32 4294967295, %s9492_s30   ;;  %s588_s0 = int_to_ptr.vmem [resolvable:$true] %s587_s0 }
  0x1c   : > { %p7640_p0 = scmp.ge.s32.totalorder %s9492_s30, 1  ;;  %p11547_p1 = scmp.eq.s32.totalorder %s9651_s23, 0 }
  0x1d   : > { %p565_p2 = scmp.lt.s32.totalorder %s9492_s30, 3  ;;  %s9495_s5 = smov [#allocation8]  }
  0x1e   : > { %s614_s24 = sshll.u32 %s9495_s5, 4  ;;  %s9496_s25 = smov [#allocation11]   ;;  %s9663_s24 = int_to_ptr.vmem [resolvable:$true] %s614_s24 }
  0x1f   : > { %p9656_p3 = pnand %p7640_p0, %p565_p2  ;;  %s640_s26 = sshll.u32 %s9496_s25, 4  ;;  %s9671_s26 = int_to_ptr.vmem [resolvable:$true] %s640_s26 }
  0x20   : > { %s9213_s27 = scalar_lea.vmem %s588_s0, 16  ;;  %s9220_s4 = scalar_lea.vmem %s588_s0, 32 }
  0x21   : > { %s11572_s1 = scalar_select %p9656_p3, 1, 0 }
  0x22   : > { %p8871_p5 = pneg %p9656_p3  ;;  %p9214_p8 = scmp.ne.s32.totalorder %s588_s0, %s9213_s27 }
  0x23   : > { %p9221_p11 = scmp.lt.s32.totalorder %s588_s0, %s588_s0  ;;  %p9222_p12 = scmp.lt.s32.totalorder %s9220_s4, %s9213_s27 }
  0x24   : > { %p9667_p6 = pnand %p8871_p5, %p11547_p1 }
  0x25   : > { %p9223_p13 = por %p9222_p12, %p9221_p11 }
  0x26   : > { %p9675_p7 = pneg %p9667_p6 }
  0x28   : > { %p9216_p9 = pnand %p9214_p8, %p9675_p7 }
  0x2a   : > { %p9217_p10 = pneg %p9216_p9 }
  0x2c   : > { %p9224_p0 = pnand %p9223_p13, %p9217_p10 }
  0x2e   : > { %9227 = shalt.err (!%p9224_p0)
}
  0x2f   : > { %s11575_s9 = sld [smem:[#allocation32_spill]]  ;;  %s9239_s22 = scalar_lea.vmem %s9663_s24, 4096 }
  0x30   : > { %p9240_p2 = scmp.ne.s32.totalorder %s9663_s24, %s9239_s22  ;;  %p9247_p9 = scmp.lt.s32.totalorder %s9663_s24, %s9663_s24 }
  0x31   : > { %p9248_p11 = scmp.lt.s32.totalorder %s9239_s22, %s9239_s22 }
  0x32   : > { %p9242_p5 = pnand %p9240_p2, %p9675_p7 }
  0x33   : > { %p9249_p10 = por %p9248_p11, %p9247_p9 }
  0x34   : > { %p9243_p8 = pneg %p9242_p5 }
  0x35   : > { %8874 = dma.hbm_to_vmem [thread:$0]  (!%p9667_p6), %s11575_s9, 16, %s588_s0, [#allocation6]  }
  0x36   : > { %p9250_p12 = pnand %p9249_p10, %p9243_p8 }
  0x38   : > { %9253 = shalt.err (!%p9250_p12)
}
  0x39   : > { %s11543_s27 = smov 64   ;;  %s11545_s4 = smov 4  }
  0x3a   : > { %s11576_s13 = sld [smem:[#allocation34_spill]]  ;;  %s9265_s22 = scalar_lea.vmem %s9671_s26, 128 }
  0x3b   : > { %p9266_p13 = scmp.ne.s32.totalorder %s9671_s26, %s9265_s22  ;;  %p9273_p5 = scmp.lt.s32.totalorder %s9671_s26, %s9671_s26 }
  0x3c   : > { %p9274_p8 = scmp.lt.s32.totalorder %s9265_s22, %s9265_s22 }
  0x3d   : > { %p9268_p0 = pnand %p9266_p13, %p9675_p7 }
  0x3e   : > { %p9275_p9 = por %p9274_p8, %p9273_p5 }
  0x3f   : > { %p9269_p2 = pneg %p9268_p0 }
  0x40   : > { %8880 = dma.hbm_to_vmem [thread:$0]  (!%p9667_p6), %s11576_s13, 4096, %s9663_s24, [#allocation9], %s11543_s27, %s11543_s27, %s11545_s4  }
  0x41   : > { %p9276_p11 = pnand %p9275_p9, %p9269_p2 }
  0x43   : > { %9279 = shalt.err (!%p9276_p11)
}
  0x44   : > { %s11549_s25 = smov 16   ;;  %s11550_s9 = smov 1  }
  0x45   : > { %s11577_s15 = sld [smem:[#allocation36_spill]]  ;;  %s9501_s5 = smov [#allocation7]  }
  0x46   : > { %s601_s27 = sshll.u32 %s9501_s5, 4  ;;  %s9502_s22 = smov [#allocation10]   ;;  %s602_s27 = int_to_ptr.vmem [resolvable:$true] %s601_s27 }
  0x47   : > { %s627_s4 = sshll.u32 %s9502_s22, 4  ;;  %s9291_s13 = scalar_lea.vmem %s602_s27, 32  ;;  %s628_s4 = int_to_ptr.vmem [resolvable:$true] %s627_s4 }
  0x48   : > { %p9292_p10 = scmp.ne.s32.totalorder %s602_s27, %s9291_s13  ;;  %p9299_p0 = scmp.lt.s32.totalorder %s602_s27, %s602_s27 }
  0x49   : > { %p9300_p2 = scmp.lt.s32.totalorder %s9291_s13, %s9291_s13 }
  0x4a   : > { %p9294_p12 = pnand %p9292_p10, %p9675_p7 }
  0x4b   : > { %8886 = dma.hbm_to_vmem [thread:$0]  (!%p9667_p6), %s11577_s15, 128, %s9671_s26, [#allocation12], %s11549_s25, %s11549_s25, %s11550_s9  }
  0x4c   : > { %p9295_p13 = pneg %p9294_p12  ;;  %p9301_p5 = por %p9300_p2, %p9299_p0 }
  0x4e   : > { %p9302_p8 = pnand %p9301_p5, %p9295_p13 }
  0x50   : > { %9305 = shalt.err (!%p9302_p8)
}
  0x51   : > { %s11578_s11 = sld [smem:[#allocation33_spill]]  ;;  %s9317_s26 = scalar_lea.vmem %s628_s4, 2048 }
  0x52   : > { %p9318_p9 = scmp.ne.s32.totalorder %s628_s4, %s9317_s26  ;;  %p9325_p10 = scmp.lt.s32.totalorder %s628_s4, %s628_s4 }
  0x53   : > { %p9326_p12 = scmp.lt.s32.totalorder %s9317_s26, %s9317_s26 }
  0x54   : > { %p9320_p11 = pnand %p9318_p9, %p9675_p7 }
  0x55   : > { %p9327_p1 = por %p9326_p12, %p9325_p10 }
  0x56   : > { %p9321_p4 = pneg %p9320_p11 }
  0x57   : > { %8877 = dma.hbm_to_vmem [thread:$0]  (!%p9667_p6), %s11578_s11, 32, %s602_s27, [#allocation6]  }
  0x58   : > { %p9328_p3 = pnand %p9327_p1, %p9321_p4 }
  0x5a   : > { %9331 = shalt.err (!%p9328_p3)
}
  0x5b   : > { %s11579_s13 = smov 4   ;;  %s11580_s0 = smov 64  }
  0x5c   : > { %s11581_s14 = sld [smem:[#allocation35_spill]]  ;;  %s9503_s27 = smov [#allocation13]  }
  0x5d   : > { %s653_s22 = sshll.u32 %s9503_s27, 4  ;;  %s9504_s24 = smov [#allocation14]   ;;  %s654_s22 = int_to_ptr.vmem [resolvable:$true] %s653_s22 }
  0x5e   : > { %s666_s25 = sshll.u32 %s9504_s24, 4  ;;  %s9343_s9 = scalar_lea.vmem %s654_s22, 2048  ;;  %s667_s25 = int_to_ptr.vmem [resolvable:$true] %s666_s25 }
  0x5f   : > { %p9344_p13 = scmp.ne.s32.totalorder %s654_s22, %s9343_s9  ;;  %p9351_p4 = scmp.lt.s32.totalorder %s654_s22, %s654_s22 }
  0x60   : > { %p9352_p0 = scmp.lt.s32.totalorder %s9343_s9, %s9343_s9 }
  0x61   : > { %p9346_p1 = pnand %p9344_p13, %p9675_p7 }
  0x62   : > { %8883 = dma.hbm_to_vmem [thread:$0]  (!%p9667_p6), %s11581_s14, 2048, %s628_s4, [#allocation9], %s11580_s0, %s11580_s0, %s11579_s13  }
  0x63   : > { %p9347_p3 = pneg %p9346_p1  ;;  %p9353_p2 = por %p9352_p0, %p9351_p4 }
  0x65   : > { %p9354_p5 = pnand %p9353_p2, %p9347_p3 }
  0x67   : > { %9357 = shalt.err (!%p9354_p5)
}
  0x68   : > { %s11582_s16 = sld [smem:[#allocation37_spill]]  ;;  %s9369_s5 = scalar_lea.vmem %s667_s25, 128 }
  0x69   : > { %p9370_p8 = scmp.ne.s32.totalorder %s667_s25, %s9369_s5  ;;  %p9377_p10 = scmp.lt.s32.totalorder %s667_s25, %s667_s25 }
  0x6a   : > { %p9378_p12 = scmp.lt.s32.totalorder %s9369_s5, %s9369_s5 }
  0x6b   : > { %p9372_p9 = pnand %p9370_p8, %p9675_p7 }
  0x6c   : > { %p9379_p13 = por %p9378_p12, %p9377_p10 }
  0x6d   : > { %p9373_p11 = pneg %p9372_p9 }
  0x6e   : > { %8889 = dma.hbm_to_vmem [thread:$0]  (!%p9667_p6), %s11582_s16, 2048, %s654_s22, [#allocation12], %s11580_s0, %s11580_s0, %s11579_s13  }
  0x6f   : > { %p9380_p1 = pnand %p9379_p13, %p9373_p11 }
  0x71   : > { %9383 = shalt.err (!%p9380_p1)
}
  0x72   : > { %s11583_s9 = smov 1   ;;  %s11584_s21 = smov 16  }
  0x73   : > { %s11585_s17 = sld [smem:[#allocation38_spill]]  ;;  %s7639_s6 = sadd.s32 4294967294, %s9492_s30  }
  0x74   : > { %s9755_s2 = sadd.s32 1, %s9492_s30   ;;  %s49_s13 = sadd.s32 1, %s9488_s29 }
  0x75   : > { %s46_s0 = ssub.s32 %s9492_s30, %s9755_s2  ;;  %p56_p7 = scmp.ne.s32.totalorder %s9488_s29, %s9484_s28 }
  0x76   : > { %p47_p3 = scmp.eq.s32.totalorder %s46_s0, 0  ;;  %p57_p4 = scmp.eq.s32.totalorder %s9492_s30, 0 }
  0x77   : > { %p62_p0 = scmp.ne.s32.totalorder %s9484_s28, %s9480_s3  ;;  %p552_p2 = scmp.eq.s32.totalorder %s9651_s23, 1 }
  0x78   : > { %s9767_s22 = scalar_select %p47_p3, %s9488_s29, %s49_s13  }
  0x79   : > { %8892 = dma.hbm_to_vmem [thread:$0]  (!%p9667_p6), %s11585_s17, 128, %s667_s25, [#allocation15], %s11584_s21, %s11584_s21, %s11583_s9  }
  0x7a   : > { %11586 = sst [smem:[#allocation24_spill]] %s9767_s22  ;;  %p58_p5 = por %p57_p4, %p56_p7 }
  0x7b   : > { %p11587_p8 = scmp.eq.s32.totalorder %s9651_s23, 0  ;;  %p9775_p6 = por %p552_p2, %p56_p7 }
  0x7c   : > { %p558_p11 = scmp.eq.s32.totalorder %s7639_s6, 1  ;;  %p8908_p10 = scmp.lt.s32.totalorder %s9492_s30, 2 }
  0x7d   : > { %p9771_p9 = por %p11587_p8, %p62_p0  ;;  %s692_s26 = sand.u32 1, %s9488_s29  }
  0x7e   : > { %s11589_s25 = scalar_select %p9775_p6, 1, 0 }
  0x7f   : > { %s11588_s4 = scalar_select %p9771_p9, 1, 0 }
  0x80   : > { %p9781_p12 = por %p558_p11, %p62_p0  ;;  %s7649_s9 = sshll.u32 %s692_s26, 2 }
  0x81   : > { %s7650_s21 = sshll.u32 %s9492_s30, 6  ;;  %s11591_s13 = sld [smem:[#allocation25_spill]] }
  0x82   : > { %s11590_s5 = scalar_select %p9781_p12, 1, 0 }
  0x83   : > { %s696_s11 = scalar_lea.vmem [#allocation2], %s7649_s9  ;;  %p9791_p13 = pnand %p8908_p10, %p58_p5 }
  0x84   : > { %s703_s14 = sshll.u32 %s696_s11, 4  ;;  %s693_s15 = scalar_lea.sflag [#allocation3], %s692_s26  ;;  %s704_s14 = int_to_ptr.vmem [resolvable:$true] %s703_s14 }
  0x85   : > { %p9386_p7 = pneg %p9791_p13 }
  0x87   : > { %s9789_s0 = scalar_lea.hbm %s11591_s13, %s7650_s21  ;;  %s9389_s24 = scalar_lea.hbm %s11591_s13, 128 }
  0x88   : > { %s9384_s16 = scalar_lea.hbm %s9789_s0, 64  ;;  %p9390_p0 = scmp.lt.s32.totalorder %s9789_s0, %s11591_s13 }
  0x89   : > { %p9385_p1 = scmp.ne.s32.totalorder %s9789_s0, %s9384_s16  ;;  %p9391_p2 = scmp.lt.s32.totalorder %s9389_s24, %s9384_s16 }
  0x8b   : > { %p9387_p3 = pnand %p9386_p7, %p9385_p1  ;;  %p9392_p5 = por %p9391_p2, %p9390_p0 }
  0x8d   : > { %p9388_p4 = pneg %p9387_p3 }
  0x8f   : > { %p9393_p8 = pnand %p9392_p5, %p9388_p4 }
  0x91   : > { %9396 = shalt.err (!%p9393_p8)
}
  0x92   : > { %s9397_s11 = scalar_lea.vmem %s704_s14, 64  ;;  %s9505_s26 = smov [#allocation2]  }
  0x93   : > { %p9398_p11 = scmp.ne.s32.totalorder %s704_s14, %s9397_s11  ;;  %s9402_s22 = sshll.u32 %s9505_s26, 4  ;;  %s9403_s22 = int_to_ptr.vmem [resolvable:$false] %s9402_s22 }
  0x94   : > { %s9404_s29 = scalar_lea.vmem %s9403_s22, 128  ;;  %p9405_p1 = scmp.lt.s32.totalorder %s704_s14, %s9403_s22 }
  0x95   : > { %p9400_p10 = pnand %p9398_p11, %p9386_p7  ;;  %p9406_p3 = scmp.lt.s32.totalorder %s9404_s29, %s9397_s11 }
  0x97   : > { %p9401_p12 = pneg %p9400_p10  ;;  %p9407_p6 = por %p9406_p3, %p9405_p1 }
  0x99   : > { %p9408_p9 = pnand %p9407_p6, %p9401_p12 }
  0x9b   : > { %9411 = shalt.err (!%p9408_p9)
}
  0x9c   : > { %8896 = dma.hbm_to_vmem [thread:$0]  (!%p9791_p13), %s9789_s0, 64, %s704_s14, %s693_s15  }
  0x9d   : > { %p11593_p4 = scmp.ne.s32.totalorder %s11572_s1, 0 }
  0x9e   : > { %s9812_s16 = sand.u32 (!%p11593_p4), 1, %s9484_s28   ;;  %p11594_p7 = scmp.ne.s32.totalorder (!%p11593_p4), %s11588_s4, 0 }
  0x9f   : > { %751 = sbr.rel (%p11593_p4) target bundleno = 17551 (0x448f), region = 108  ;;  %s7652_s17 = sshll.u32 (!%p11593_p4), %s9812_s16, 2 }
  0xa0   : > { %s754_s21 = scalar_lea.sflag (!%p11593_p4), [#allocation3], %s9812_s16  ;;  %s757_s22 = scalar_lea.vmem (!%p11593_p4), [#allocation2], %s7652_s17 }
  0xa4   : > { %9455 = dma.done.wait (%p11594_p7), %s754_s21, 64  }
  0xa5   : > { %9457 = vsyncadd (%p11594_p7), %s754_s21, 4294967232  ;;  %p11595_p9 = scmp.eq.s32.totalorder %s9651_s23, 0 }
  0xa7   : > { %9459 = dma.done.wait (%p11595_p9), [#allocation6], 48   ;;  %p11596_p6 = pmov %p11595_p9 }
  0xa9   : > { %9461 = vsyncadd (%p11596_p6), [#allocation6], 4294967248  ;;  %p11597_p12 = pmov %p11596_p6 }
  0xaa   : > { %p11598_p13 = pmov %p11596_p6 }
  0xab   : > { %9463 = dma.done.wait (%p11597_p12), [#allocation9], 6144  }
  0xac   : > { %9465 = vsyncadd (%p11598_p13), [#allocation9], 4294961152  ;;  %p11599_p0 = pmov %p11596_p6 }
  0xae   : > { %9467 = dma.done.wait (%p11599_p0), [#allocation12], 2176   ;;  %p11600_p2 = pmov %p11599_p0 }
  0xaf   : > { %p11601_p5 = pmov %p11599_p0 }
  0xb0   : > { %9469 = vsyncadd (%p11600_p2), [#allocation12], 4294965120 }
  0xb1   : > { %9471 = dma.done.wait (%p11601_p5), [#allocation15], 128   ;;  %p11602_p8 = pmov %p11599_p0 }
  0xb2   : > { %v9506_v0 = vmov 0.0   ;;  %vm9507_vm0 = vmmov 0   ;;  %s11603_s29 = sld [smem:[#allocation31_spill]]  ;;  %vm924_vm1 = vcmask 261120   ;;  %v9027_v3 = vld [vmem:[%s11529_s12 + $0x8] sm:$0xff]   ;;  %v9028_v5 = vld [vmem:[%s11529_s12] sm:$0xff]  }
  0xb3   : > { %9473 = vsyncadd (%p11602_p8), [#allocation15], 4294967168  ;;  %8159 = vmatprep.subr.bf16.mxu1 %v9506_v0  ;;  %8163 = vmatprep.mubr.msk.bf16.mxu1 %vm9507_vm0, %v9506_v0  ;;  %v907_v4 = vld [vmem:[%s757_s22] sm:$0xf]  ;;  %v9029_v6 = vld [vmem:[%s11524_s7 + $0x8] ss:$0 sps:$4 sm:$0xff]  }
  0xb4   : > { %8175 = vmatprep.subr.bf16.mxu0 %v9506_v0  ;;  %8179 = vmatprep.mubr.msk.bf16.mxu0 %vm9507_vm0, %v9506_v0  ;;  %vm1012_vm2 = vcmask 1043456   ;;  %p869_p11 = scmp.lt.s32.totalorder %s9651_s23, 1  ;;  %v9508_v8 = vmov 0   ;;  %v9030_v9 = vld [vmem:[%s11524_s7] sm:$0xff]   ;;  %s11605_s0 = sld [smem:[#allocation26_spill]]  ;;  %vm1008_vm3 = vcmask 195584  }
  0xb5   : > { %8176 = vmatpush3.bf16.msra.mxu0 %v9027_v3  ;;  %v1014_v7 = vsel %vm1012_vm2, %v9029_v6, 0  ;;  %8968 = vset.pattern.permute.xlu0 %v9508_v8  ;;  %s11606_s9 = sld [smem:[#allocation28_spill]]  ;;  %v9034_v18 = vld [vmem:[#allocation8 + $0x18] sm:$0xff]   ;;  %v7672_v20 = vld [vmem:[%s11525_s8] ss:$0 sm:$0xff]  ;;  %v9036_v24 = vld [vmem:[#allocation8 + $0x8] sm:$0xff]  }
  0xb6   : > { %8177 = vmatprep.subr.bf16.mxu0 %v9506_v0  ;;  %s870_s17 = scalar_select %p869_p11, %s9651_s23, 1  ;;  %8969 = vset.pattern.permute.xlu1 %v9508_v8  ;;  %v9035_v21 = vld [vmem:[#allocation8 + $0x10] sm:$0xff]   ;;  %v7677_v28 = vld [vmem:[#allocation5] ss:$0 sm:$0xff]  ;;  %v9037_v30 = vld [vmem:[#allocation8] sm:$0xff]   ;;  %vm1159_vm4 = vcmask 523264  }
  0xb7   : > { %s11607_s21 = sld [smem:[#allocation27_spill]]  ;;  %vm1210_vm5 = vcmask 64512   ;;  %v9937_v51 = vld [vmem:[%s11527_s10 + $0x8] sm:$0xff]   ;;  %v9944_v52 = vld [vmem:[%s11527_s10] sm:$0xff]   ;;  %vm1486_vm8 = vcmask 7168   ;;  %vm1489_vm9 = vcmask 15360  }
  0xb8   : > { %s11604_s1 = smov %s11603_s29  ;;  %v9025_v1 = vld [vmem:[%s11603_s29 + $0x8] sm:$0xff]   ;;  %s9873_s14 = sshll.u32 %s870_s17, 3  ;;  %vm1492_vm10 = vcmask 23552   ;;  %vm1519_vm11 = vcmask 130048   ;;  %vm1617_vm12 = vcmask 1041408   ;;  %vm1613_vm13 = vcmask 31744  }
  0xb9   : > { %8160 = vmatpush3.bf16.msra.mxu1 %v9025_v1  ;;  %v9026_v2 = vld [vmem:[%s11604_s1] sm:$0xff]   ;;  %8178 = vmatpush3.bf16.msra.mxu0 %v9028_v5  ;;  %s7908_s15 = sshll.u32 %s870_s17, 4  ;;  %s11608_s4 = sld [smem:[#allocation29_spill]]  ;;  %vm7249_vm14 = vcmask 785664   ;;  %vm7312_vm15 = vcmask 785408  }
  0xba   : > { %8161 = vmatprep.subr.bf16.mxu1 %v9506_v0  ;;  %8195 = vmatprep.subr.bf16.mxu0 %v9506_v0  ;;  %s873_s6 = scalar_lea.vmem %s11605_s0, %s9873_s14  ;;  %s11613_s27 = sld [smem:[#allocation30_spill]] }
  0xbb   : > { %s9883_s11 = scalar_lea.vmem %s11606_s9, %s9873_s14  ;;  %v9031_v10 = vld [vmem:[%s873_s6] sm:$0xff]   ;;  %s9509_s6 = smov 96  }
  0xbc   : > { %v9926_v49 = vld [vmem:[%s9883_s11] sm:$0xff]   ;;  %s11614_s17 = sld [smem:[#allocation39_spill]]  ;;  %p11616_p1 = scmp.ne.s32.totalorder %s11589_s25, 0 }
  0xbd   : > { %8162 = vmatpush3.bf16.msra.mxu1 %v9026_v2  ;;  %s878_s22 = scalar_lea.vmem %s11607_s21, %s7908_s15  ;;  %s9513_s21 = smov 32  }
  0xbe   : > { %8167 = vmatprep.subr.bf16.mxu1 %v9506_v0  ;;  %v973_v11 = vld [vmem:[%s878_s22] sm:$0xff]  ;;  %v974_v12 = vld [vmem:[%s878_s22 + $0x8] sm:$0xff] }
  0xbf   : > { %978 = vperm.xlu0 %8968, %v973_v11   ;;  %s888_s0 = scalar_lea.vmem %s11608_s4, %s9873_s14  ;;  %v9511_v11 = vmov 2  }
  0xc0   : > { %8164 = vmatmul.mubr.msk.bf16.vlgmr.msra.gmra.mxu1 %vm924_vm1, %v907_v4  ;;  %v9912_v37 = vld [vmem:[%s888_s0] sm:$0xff]   ;;  %s892_s24 = scalar_lea.vmem %s11613_s27, %s9873_s14  ;;  %s7434_s27 = scalar_lea.sflag [#allocation4], %s9812_s16 }
  0xc1   : > { %8171 = vmatprep.mubr.msk.bf16.mxu1 %vm9507_vm0, %v9506_v0  ;;  %8168 = vmatpush3.bf16.msra.mxu1 %v1014_v7  ;;  %s9514_s14 = smov [#allocation16]  }
  0xc2   : > { %8169 = vmatprep.subr.bf16.mxu1 %v9506_v0  ;;  %s9416_s9 = sshll.u32 %s9514_s14, 4  ;;  %s9417_s9 = int_to_ptr.vmem [resolvable:$false] %s9416_s9 }
  0xc3   : > { %983 = vperm.xlu0 %8968, %v974_v12   ;;  %v9512_v12 = vmov 3  }
  0xc5   : > { %8170 = vmatpush3.bf16.msra.mxu1 %v9030_v9  ;;  %v9510_v9 = vmov 1  }
  0xc6   : > { %8183 = vmatprep.subr.bf16.mxu1 %v9506_v0 }
  0xc8   : > { %8172 = vmatmul.mubr.msk.bf16.vlgmr.msra.gmra.mxu1 %vm1008_vm3, %v9031_v10 }
  0xc9   : > { %8191 = vmatprep.mubr.msk.bf16.mxu1 %vm9507_vm0, %v9506_v0  ;;  %8184 = vmatpush3.bf16.msra.mxu1 %v9034_v18 }
  0xca   : > { %8185 = vmatprep.subr.bf16.mxu1 %v9506_v0 }
  0xcd   : > { %8186 = vmatpush3.bf16.msra.mxu1 %v9035_v21 }
  0xce   : > { %8187 = vmatprep.subr.bf16.mxu1 %v9506_v0 }
  0xd1   : > { %8188 = vmatpush3.bf16.msra.mxu1 %v9036_v24 }
  0xd2   : > { %8189 = vmatprep.subr.bf16.mxu1 %v9506_v0 }
  0xd5   : > { %8190 = vmatpush3.bf16.msra.mxu1 %v9037_v30 }
  0xd6   : > { %8207 = vmatprep.subr.bf16.mxu1 %v9506_v0 }
 0x13a   : > { %v979_v19 = vpop.permute.xlu0 %978 }
 0x13b   : > { %v992_v22 = vmul.f32 %v7672_v20, %v979_v19 }
 0x13e   : > { %v984_v23 = vpop.permute.xlu0 %983 }
 0x13f   : > { %v993_v27 = vmul.f32 %v7672_v20, %v984_v23 }
 0x180   : > { %v9891_v13 = vpop.f32.mrf.mxu1 }
 0x181   : > { %v1066_v14 = vpack.c.bf16 %v9891_v13, %v9891_v13 }
 0x182   : > { %v8165_v15 = vpop.f32.mrf.mxu1 }
 0x183   : > { %8180 = vmatmul.mubr.msk.bf16.vlgmr.msra.gmra.mxu0 %vm924_vm1, %v1066_v14  ;;  %v898_v14 = vunpack.c.l.bf16 %v9912_v37  ;;  %v899_v15 = vunpack.c.h.bf16 %v9912_v37 }
 0x184   : > { %v965_v16 = vpop.f32.mrf.mxu1  ;;  %8197 = vmatprep.mubr.msk.bf16.mxu0 %vm9507_vm0, %v9506_v0 }
 0x185   : > { %vm9985_vm6 = vcmp.gt.f32.partialorder %v898_v14, 0.5  ;;  %vm9989_vm7 = vcmp.gt.f32.partialorder %v899_v15, 0.5 }
 0x186   : > { %v8166_v17 = vpop.f32.mrf.mxu1 }
 0x188   : > { %v1050_v25 = vpop.f32.mrf.mxu1 }
 0x189   : > { %v1051_v26 = vadd.f32 %v1050_v25, %v992_v22 }
 0x18a   : > { %v8173_v29 = vpop.f32.mrf.mxu1 }
 0x18b   : > { %v1064_v32 = vadd.f32 %v7677_v28, %v1051_v26 }
 0x18c   : > { %v1053_v31 = vpop.f32.mrf.mxu1 }
 0x18d   : > { %v1054_v33 = vadd.f32 %v1053_v31, %v993_v27 }
 0x18e   : > { %v8174_v34 = vpop.f32.mrf.mxu1 }
 0x18f   : > { %v1065_v35 = vadd.f32 %v7677_v28, %v1054_v33 }
 0x191   : > { %v1126_v36 = vpack.c.bf16 %v1065_v35, %v1064_v32 }
 0x193   : > { %8192 = vmatmul.mubr.msk.bf16.vlgmr.msra.gmra.mxu1 %vm1159_vm4, %v1126_v36 }
 0x194   : > { %8211 = vmatprep.mubr.msk.bf16.mxu1 %vm9507_vm0, %v9506_v0  ;;  %8208 = vmatpush3.bf16.msra.mxu1 %v9937_v51 }
 0x195   : > { %8209 = vmatprep.subr.bf16.mxu1 %v9506_v0 }
 0x198   : > { %8210 = vmatpush3.bf16.msra.mxu1 %v9944_v52 }
 0x199   : > { %8221 = vmatprep.subr.bf16.mxu1 %v9506_v0 }
 0x243   : > { %v1120_v38 = vpop.f32.mrf.mxu0 }
 0x244   : > { %v1204_v39 = vpack.c.bf16 %v1120_v38, %v1120_v38 }
 0x245   : > { %v8181_v40 = vpop.f32.mrf.mxu0 }
 0x246   : > { %v1215_v41 = vsel %vm1012_vm2, %v1204_v39, 0  ;;  %1264 = vrot.lane.b32.xlu1 %v1204_v39, %s9509_s6 }
 0x247   : > { %v1123_v42 = vpop.f32.mrf.mxu0  ;;  %8196 = vmatpush3.bf16.msra.mxu0 %v1215_v41 }
 0x248   : > { %8201 = vmatprep.subr.bf16.mxu0 %v9506_v0 }
 0x249   : > { %v8182_v43 = vpop.f32.mrf.mxu0 }
 0x24a   : > { %8198 = vmatmul.mubr.msk.bf16.vlgmr.msra.gmra.mxu0 %vm1210_vm5, %v9912_v37 }
 0x24b   : > { %8203 = vmatprep.mubr.msk.bf16.mxu0 %vm9507_vm0, %v9506_v0 }
 0x253   : > { %v9921_v44 = vpop.f32.mrf.mxu1 }
 0x255   : > { %v8193_v45 = vpop.f32.mrf.mxu1 }
 0x257   : > { %v9923_v46 = vpop.f32.mrf.mxu1 }
 0x259   : > { %v8194_v47 = vpop.f32.mrf.mxu1 }
 0x2b8   : > { %v1265_v48 = vpop.permute.xlu1 %1264 }
 0x2b9   : > { %v1270_v50 = vsel %vm1012_vm2, %v1265_v48, 0 }
 0x2ba   : > { %8202 = vmatpush3.bf16.msra.mxu0 %v1270_v50 }
 0x2bb   : > { %8215 = vmatprep.subr.bf16.mxu0 %v9506_v0 }
 0x2bd   : > { %8204 = vmatmul.mubr.msk.bf16.vlgmr.msra.gmra.mxu0 %vm1210_vm5, %v9926_v49 }
 0x2be   : > { %8217 = vmatprep.mubr.msk.bf16.mxu0 %vm9507_vm0, %v9506_v0 }
 0x30a   : > { %v9948_v53 = vpop.f32.mrf.mxu0 }
 0x30c   : > { %v8199_v54 = vpop.f32.mrf.mxu0 }
 0x30e   : > { %v9950_v55 = vpop.f32.mrf.mxu0 }
 0x310   : > { %v8200_v56 = vpop.f32.mrf.mxu0 }
 0x37d   : > { %v9952_v57 = vpop.f32.mrf.mxu0 }
 0x37e   : > { %v1313_v58 = vadd.f32 %v9952_v57, %v9921_v44 }
 0x37f   : > { %v8205_v59 = vpop.f32.mrf.mxu0 }
 0x380   : > { %v1315_v61 = vmul.f32 %v1313_v58, %v9948_v53 }
 0x381   : > { %v9956_v60 = vpop.f32.mrf.mxu0 }
 0x382   : > { %v1314_v62 = vadd.f32 %v9956_v60, %v9923_v46  ;;  %v1317_v2 = vmul.f32 0.35355338, %v1315_v61 }
 0x383   : > { %v8206_v63 = vpop.f32.mrf.mxu0 }
 0x384   : > { %v1316_v1 = vmul.f32 %v1314_v62, %v9950_v55 }
 0x386   : > { %v1318_v3 = vmul.f32 0.35355338, %v1316_v1 }
 0x388   : > { %v1319_v4 = vpack.c.bf16 %v1318_v3, %v1317_v2 }
 0x38a   : > { %8212 = vmatmul.mubr.msk.bf16.vlgmr.msra.gmra.mxu1 %vm924_vm1, %v1319_v4 }
 0x38b   : > { %8223 = vmatprep.mubr.msk.bf16.mxu1 %vm9507_vm0, %v9506_v0 }
 0x44a   : > { %v9965_v5 = vpop.f32.mrf.mxu1 }
 0x44b   : > { %1378 = vperm.xlu1 %8969, %v9965_v5  }
 0x44c   : > { %v8213_v6 = vpop.f32.mrf.mxu1 }
 0x44e   : > { %v9968_v7 = vpop.f32.mrf.mxu1 }
 0x44f   : > { %8970 = vset.pattern.permute.xlu1 %v9510_v9  ;;  %1383 = vperm.xlu0 %8968, %v9968_v7  }
 0x450   : > { %1406 = vperm.xlu1 %8970, %v9965_v5   ;;  %v8214_v10 = vpop.f32.mrf.mxu1 }
 0x453   : > { %8972 = vset.pattern.permute.xlu0 %v9510_v9 }
 0x454   : > { %8971 = vset.pattern.permute.xlu1 %v9511_v11  ;;  %1410 = vperm.xlu0 %8972, %v9968_v7  }
 0x455   : > { %1433 = vperm.xlu1 %8971, %v9965_v5  }
 0x458   : > { %8973 = vset.pattern.permute.xlu0 %v9512_v12 }
 0x459   : > { %1437 = vperm.xlu1 %8971, %v9968_v7   ;;  %1460 = vperm.xlu0 %8973, %v9965_v5  }
 0x45d   : > { %8974 = vset.pattern.permute.xlu1 %v9512_v12 }
 0x45e   : > { %1464 = vperm.xlu1 %8974, %v9968_v7  }
 0x462   : > { %8975 = vset.pattern.permute.xlu1 %v9508_v8 }
 0x4c6   : > { %v1379_v17 = vpop.permute.xlu1 %1378 }
 0x4c7   : > { %v1386_v19 = vsel %vm9985_vm6, %v1379_v17, -1e+30 }
 0x4c8   : > { %v1388_v23 = vsel %vm1210_vm5, %v1386_v19, -inf }
 0x4ca   : > { %v1384_v20 = vpop.permute.xlu0 %1383 }
 0x4cb   : > { %v1387_v21 = vsel %vm9989_vm7, %v1384_v20, -1e+30  ;;  %v1407_v22 = vpop.permute.xlu1 %1406 }
 0x4cc   : > { %v1389_v24 = vsel %vm1210_vm5, %v1387_v21, -inf  ;;  %v1413_v26 = vsel %vm9985_vm6, %v1407_v22, -1e+30 }
 0x4cd   : > { %v1390_v25 = vmax.f32 %v1388_v23, %v1389_v24  ;;  %v1415_v32 = vsel %vm1210_vm5, %v1413_v26, -inf }
 0x4cf   : > { %v1391_v27 = vrot.slane %v1390_v25, 4  ;;  %v1411_v28 = vpop.permute.xlu0 %1410 }
 0x4d0   : > { %v1414_v29 = vsel %vm9989_vm7, %v1411_v28, -1e+30  ;;  %v1434_v30 = vpop.permute.xlu1 %1433 }
 0x4d1   : > { %v1392_v31 = vmax.f32 %v1390_v25, %v1391_v27  ;;  %v1416_v33 = vsel %vm1210_vm5, %v1414_v29, -inf  ;;  %v1440_v35 = vsel %vm9985_vm6, %v1434_v30, -1e+30 }
 0x4d2   : > { %v1417_v34 = vmax.f32 %v1415_v32, %v1416_v33  ;;  %v1442_v45 = vsel %vm1210_vm5, %v1440_v35, -inf }
 0x4d3   : > { %v1393_v36 = vrot.slane %v1392_v31, 2 }
 0x4d4   : > { %v1418_v38 = vrot.slane %v1417_v34, 4  ;;  %v1438_v39 = vpop.permute.xlu1 %1437  ;;  %v1461_v40 = vpop.permute.xlu0 %1460 }
 0x4d5   : > { %v1441_v41 = vsel %vm9989_vm7, %v1438_v39, -1e+30  ;;  %v1394_v42 = vmax.f32 %v1392_v31, %v1393_v36  ;;  %v1467_v50 = vsel %vm9985_vm6, %v1461_v40, -1e+30 }
 0x4d6   : > { %v1419_v43 = vmax.f32 %v1417_v34, %v1418_v38  ;;  %v1443_v47 = vsel %vm1210_vm5, %v1441_v41, -inf  ;;  %v1469_v62 = vsel %vm1210_vm5, %v1467_v50, -inf }
 0x4d7   : > { %v1444_v48 = vmax.f32 %v1442_v45, %v1443_v47  ;;  %v1395_v54 = vrot.slane %v1394_v42, 1 }
 0x4d8   : > { %v1420_v56 = vrot.slane %v1419_v43, 2 }
 0x4d9   : > { %v1445_v58 = vrot.slane %v1444_v48, 4  ;;  %v1465_v59 = vpop.permute.xlu1 %1464  ;;  %v1396_v61 = vmax.f32 %v1394_v42, %v1395_v54 }
 0x4da   : > { %v1468_v63 = vsel %vm9989_vm7, %v1465_v59, -1e+30  ;;  %v1421_v1 = vmax.f32 %v1419_v43, %v1420_v56 }
 0x4db   : > { %v1446_v2 = vmax.f32 %v1444_v48, %v1445_v58  ;;  %v1470_v3 = vsel %vm1210_vm5, %v1468_v63, -inf  ;;  %v1398_v4 = vsel %vm9989_vm7, %v1396_v61, -1e+30  ;;  %v1397_v6 = vsel %vm9985_vm6, %v1396_v61, -1e+30 }
 0x4dc   : > { %v1471_v10 = vmax.f32 %v1469_v62, %v1470_v3  ;;  %v1402_v14 = vsel %vm1210_vm5, %v1398_v4, -inf  ;;  %v1399_v15 = vsel %vm1210_vm5, %v1397_v6, -inf  ;;  %v1422_v17 = vrot.slane %v1421_v1, 1 }
 0x4dd   : > { %1403 = vmax.xlane.f32.xlu0 %v1402_v14  ;;  %1400 = vmax.xlane.f32.xlu1 %v1399_v15  ;;  %v1447_v19 = vrot.slane %v1446_v2, 2 }
 0x4de   : > { %v1472_v20 = vrot.slane %v1471_v10, 4  ;;  %v1423_v21 = vmax.f32 %v1421_v1, %v1422_v17 }
 0x4df   : > { %v1448_v22 = vmax.f32 %v1446_v2, %v1447_v19 }
 0x4e0   : > { %v1473_v23 = vmax.f32 %v1471_v10, %v1472_v20  ;;  %v1425_v24 = vsel %vm9989_vm7, %v1423_v21, -1e+30  ;;  %v1424_v25 = vsel %vm9985_vm6, %v1423_v21, -1e+30 }
 0x4e1   : > { %v1429_v26 = vsel %vm1210_vm5, %v1425_v24, -inf  ;;  %v1426_v27 = vsel %vm1210_vm5, %v1424_v25, -inf  ;;  %v1449_v28 = vrot.slane %v1448_v22, 1 }
 0x4e2   : > { %1430 = vmax.xlane.f32.xlu1 %v1429_v26  ;;  %1427 = vmax.xlane.f32.xlu0 %v1426_v27  ;;  %v1474_v29 = vrot.slane %v1473_v23, 2 }
 0x4e3   : > { %v1450_v30 = vmax.f32 %v1448_v22, %v1449_v28  ;;  %v906_v28 = vld [vmem:[#allocation7] sm:$0x3] }
 0x4e4   : > { %v1475_v31 = vmax.f32 %v1473_v23, %v1474_v29  ;;  %v10072_v29 = vsel %vm1617_vm12, %v906_v28, 0 }
 0x4e5   : > { %v1452_v32 = vsel %vm9989_vm7, %v1450_v30, -1e+30  ;;  %v1451_v33 = vsel %vm9985_vm6, %v1450_v30, -1e+30 }
 0x4e6   : > { %v1456_v34 = vsel %vm1210_vm5, %v1452_v32, -inf  ;;  %v1453_v35 = vsel %vm1210_vm5, %v1451_v33, -inf  ;;  %v1476_v36 = vrot.slane %v1475_v31, 1 }
 0x4e7   : > { %1457 = vmax.xlane.f32.xlu1 %v1456_v34  ;;  %1454 = vmax.xlane.f32.xlu0 %v1453_v35 }
 0x4e8   : > { %v1477_v38 = vmax.f32 %v1475_v31, %v1476_v36 }
 0x4ea   : > { %v1479_v39 = vsel %vm9989_vm7, %v1477_v38, -1e+30  ;;  %v1478_v40 = vsel %vm9985_vm6, %v1477_v38, -1e+30 }
 0x4eb   : > { %v1483_v41 = vsel %vm1210_vm5, %v1479_v39, -inf  ;;  %v1480_v42 = vsel %vm1210_vm5, %v1478_v40, -inf }
 0x4ec   : > { %1484 = vmax.xlane.f32.xlu1 %v1483_v41  ;;  %1481 = vmax.xlane.f32.xlu0 %v1480_v42  ;;  %v9042_v42 = vld [vmem:[#allocation10 + $0x8] sm:$0xff]  }
 0x4fd   : > { %1664 = vrot.lane.b32.xlu1 %v9921_v44, %s9513_s21 }
 0x501   : > { %1666 = vrot.lane.b32.xlu1 %v9923_v46, %s9513_s21 }
 0x519   : > { %1503 = vxpose.xlu0.c.b16.start.end [1/1] (short) (narrow) %v9912_v37, 16 }
 0x522   : > { %8976 = vset.pattern.permute.xlu0 %v9510_v9 }
 0x566   : > { %v1401_v43 = vpop.xlane.xlu1 %1400  ;;  %v1404_v45 = vpop.xlane.xlu0 %1403 }
 0x56b   : > { %v1431_v47 = vpop.xlane.xlu1 %1430  ;;  %v1428_v48 = vpop.xlane.xlu0 %1427 }
 0x56c   : > { %v1488_v56 = vsel %vm1486_vm8, %v1404_v45, %v1431_v47  ;;  %v1487_v58 = vsel %vm1486_vm8, %v1401_v43, %v1428_v48 }
 0x570   : > { %v1458_v50 = vpop.xlane.xlu1 %1457  ;;  %v1455_v54 = vpop.xlane.xlu0 %1454 }
 0x571   : > { %v1491_v59 = vsel %vm1489_vm9, %v1488_v56, %v1458_v50  ;;  %v1490_v61 = vsel %vm1489_vm9, %v1487_v58, %v1455_v54 }
 0x575   : > { %v1485_v62 = vpop.xlane.xlu1 %1484  ;;  %v1482_v63 = vpop.xlane.xlu0 %1481 }
 0x576   : > { %v1494_v1 = vsel %vm1492_vm10, %v1491_v59, %v1485_v62  ;;  %v1493_v2 = vsel %vm1492_vm10, %v1490_v61, %v1482_v63  ;;  %v9040_v61 = vld [vmem:[#allocation13 + $0x8] sm:$0xff]   ;;  %v9041_v62 = vld [vmem:[#allocation13] sm:$0xff]   ;;  %v1794_v63 = vadd.f32 %v9956_v60, %v9950_v55 }
 0x577   : > { %v1496_v3 = vsub.f32 %v9968_v7, %v1494_v1  ;;  %v1495_v4 = vsub.f32 %v9965_v5, %v1493_v2  ;;  %v1793_v1 = vadd.f32 %v9952_v57, %v9948_v53 }
 0x579   : > { %v1499_v6 = vmul.f32 1.442695, %v1496_v3  ;;  %v1497_v10 = vmul.f32 1.442695, %v1495_v4  ;;  %v1665_v14 = vpop.permute.xlu1 %1664  ;;  %v1795_v2 = vpack.c.bf16 %v1794_v63, %v1793_v1  ;;  %v9043_v3 = vld [vmem:[#allocation10] sm:$0xff]  }
 0x57a   : > { %v1670_v15 = vadd.f32 %v1665_v14, %v9952_v57 }
 0x57b   : > { %9123 = vpow2.f32 %v1499_v6  ;;  %v10059_v7 = vpop.trf.xlu0 }
 0x57c   : > { %9125 = vpow2.f32 %v1497_v10  ;;  %1674 = vrot.lane.b32.xlu1 %v1670_v15, %s9509_s6 }
 0x57d   : > { %v1667_v17 = vpop.permute.xlu1 %1666 }
 0x57e   : > { %v1671_v19 = vadd.f32 %v1667_v17, %v9956_v60  ;;  %v7704_v17 = vld [vmem:[#allocation14] ss:$0 sm:$0xff] }
 0x580   : > { %1676 = vrot.lane.b32.xlu1 %v1671_v19, %s9509_s6  ;;  %v9044_v19 = vld [vmem:[%s11529_s12 + $0x18] sm:$0xff]  }
 0x588   : > { %v9124_v20 = vpop.eup %9123 }
 0x589   : > { %v9126_v21 = vpop.eup %9125 }
 0x58a   : > { %v1501_v22 = vpack.c.bf16 %v9124_v20, %v9126_v21 }
 0x58c   : > { %8216 = vmatpush3.bf16.msra.mxu0 %v1501_v22  ;;  %v9047_v22 = vld [vmem:[#allocation8 + $0x30] sm:$0xff]  }
 0x58d   : > { %8227 = vmatprep.subr.bf16.mxu0 %v9506_v0 }
 0x58f   : > { %8218 = vmatmul.mubr.msk.bf16.vlgmr.msra.gmra.mxu0 %vm1519_vm11, %v10059_v7 }
 0x590   : > { %8229 = vmatprep.mubr.msk.bf16.mxu0 %vm9507_vm0, %v9506_v0  ;;  %8228 = vmatpush3.bf16.msra.mxu0 %v10072_v29 }
 0x591   : > { %8239 = vmatprep.subr.bf16.mxu0 %v9506_v0 }
 0x5ee   : > { %v1675_v43 = vpop.permute.xlu1 %1674 }
 0x5f2   : > { %v1677_v48 = vpop.permute.xlu1 %1676 }
 0x64f   : > { %v1557_v5 = vpop.f32.mrf.mxu0 }
 0x650   : > { %v1563_v23 = vpack.c.bf16 %v1557_v5, %v1557_v5  ;;  %v9048_v5 = vld [vmem:[#allocation8 + $0x28] sm:$0xff]  }
 0x651   : > { %v8219_v24 = vpop.f32.mrf.mxu0 }
 0x652   : > { %v1565_v25 = vsel %vm1012_vm2, %v1563_v23, 0  ;;  %v9049_v23 = vld [vmem:[#allocation8 + $0x20] sm:$0xff]  }
 0x653   : > { %v1560_v26 = vpop.f32.mrf.mxu0  ;;  %8222 = vmatpush3.bf16.msra.mxu1 %v1565_v25 }
 0x654   : > { %8233 = vmatprep.subr.bf16.mxu1 %v9506_v0 }
 0x655   : > { %v8220_v27 = vpop.f32.mrf.mxu0 }
 0x656   : > { %8224 = vmatmul.mubr.msk.bf16.vlgmr.msra.gmra.mxu1 %vm1210_vm5, %v9912_v37 }
 0x657   : > { %8235 = vmatprep.mubr.msk.bf16.mxu1 %vm9507_vm0, %v9506_v0 }
 0x716   : > { %v1601_v30 = vpop.f32.mrf.mxu1 }
 0x717   : > { %v1602_v31 = vadd.f32 1e-30, %v1601_v30 }
 0x718   : > { %v8225_v32 = vpop.f32.mrf.mxu1 }
 0x719   : > { %9127 = vrcp.f32 %v1602_v31 }
 0x71a   : > { %v1604_v33 = vpop.f32.mrf.mxu1 }
 0x71b   : > { %v1605_v34 = vadd.f32 1e-30, %v1604_v33 }
 0x71c   : > { %v8226_v35 = vpop.f32.mrf.mxu1 }
 0x71d   : > { %9129 = vrcp.f32 %v1605_v34 }
 0x726   : > { %v9128_v36 = vpop.eup %9127 }
 0x727   : > { %v1610_v39 = vmul.f32 %v9128_v36, %v9126_v21  ;;  %v9046_v21 = vld [vmem:[#allocation8 + $0x38] sm:$0xff]   ;;  %v7700_v36 = vld [vmem:[#allocation11] ss:$0 sm:$0xff] }
 0x72a   : > { %v9130_v38 = vpop.eup %9129 }
 0x72b   : > { %v1611_v40 = vmul.f32 %v9130_v38, %v9124_v20  ;;  %v9045_v20 = vld [vmem:[%s11529_s12 + $0x10] sm:$0xff]  }
 0x72d   : > { %v1612_v41 = vpack.c.bf16 %v1611_v40, %v1610_v39 }
 0x72f   : > { %8230 = vmatmul.mubr.msk.bf16.vlgmr.msra.gmra.mxu0 %vm1613_vm13, %v1612_v41 }
 0x730   : > { %8243 = vmatprep.mubr.msk.bf16.mxu0 %vm9507_vm0, %v9506_v0  ;;  %8240 = vmatpush3.bf16.msra.mxu0 %v9042_v42 }
 0x731   : > { %8241 = vmatprep.subr.bf16.mxu0 %v9506_v0 }
 0x734   : > { %8242 = vmatpush3.bf16.msra.mxu0 %v9043_v3 }
 0x735   : > { %8255 = vmatprep.subr.bf16.mxu0 %v9506_v0 }
 0x7ef   : > { %v1655_v45 = vpop.f32.mrf.mxu0 }
 0x7f0   : > { %v1680_v54 = vmul.f32 %v1675_v43, %v1655_v45 }
 0x7f1   : > { %v8231_v47 = vpop.f32.mrf.mxu0 }
 0x7f3   : > { %v1658_v50 = vpop.f32.mrf.mxu0 }
 0x7f4   : > { %v1681_v56 = vmul.f32 %v1677_v48, %v1658_v50 }
 0x7f5   : > { %v8232_v58 = vpop.f32.mrf.mxu0 }
 0x7f6   : > { %v1682_v59 = vpack.c.bf16 %v1681_v56, %v1680_v54 }
 0x7f8   : > { %8234 = vmatpush3.bf16.msra.mxu1 %v1682_v59 }
 0x7f9   : > { %8247 = vmatprep.subr.bf16.mxu1 %v9506_v0 }
 0x7fb   : > { %8236 = vmatmul.mubr.msk.bf16.vlgmr.msra.gmra.mxu1 %vm1519_vm11, %v10059_v7 }
 0x7fc   : > { %8248 = vmatpush3.bf16.msra.mxu1 %v9040_v61  ;;  %8251 = vmatprep.mubr.msk.bf16.mxu1 %vm9507_vm0, %v9506_v0 }
 0x7fd   : > { %8249 = vmatprep.subr.bf16.mxu1 %v9506_v0 }
 0x800   : > { %8250 = vmatpush3.bf16.msra.mxu1 %v9041_v62 }
 0x801   : > { %8263 = vmatprep.subr.bf16.mxu1 %v9506_v0 }
 0x803   : > { %8252 = vmatmul.mubr.msk.bf16.vlgmr.msra.gmra.mxu1 %vm924_vm1, %v1795_v2 }
 0x804   : > { %8271 = vmatprep.mubr.msk.bf16.mxu1 %vm9507_vm0, %v9506_v0  ;;  %8264 = vmatpush3.bf16.msra.mxu1 %v9046_v21 }
 0x805   : > { %8265 = vmatprep.subr.bf16.mxu1 %v9506_v0 }
 0x808   : > { %8266 = vmatpush3.bf16.msra.mxu1 %v9047_v22 }
 0x809   : > { %8267 = vmatprep.subr.bf16.mxu1 %v9506_v0 }
 0x80c   : > { %8268 = vmatpush3.bf16.msra.mxu1 %v9048_v5 }
 0x80d   : > { %8269 = vmatprep.subr.bf16.mxu1 %v9506_v0 }
 0x810   : > { %8270 = vmatpush3.bf16.msra.mxu1 %v9049_v23 }
 0x811   : > { %8287 = vmatprep.subr.bf16.mxu1 %v9506_v0 }
 0x8bb   : > { %v1717_v4 = vpop.f32.mrf.mxu1 }
 0x8bc   : > { %v1723_v55 = vpack.c.bf16 %v1717_v4, %v1717_v4 }
 0x8bd   : > { %v8237_v60 = vpop.f32.mrf.mxu1 }
 0x8be   : > { %8244 = vmatmul.mubr.msk.bf16.vlgmr.msra.gmra.mxu0 %vm924_vm1, %v1723_v55 }
 0x8bf   : > { %v1720_v6 = vpop.f32.mrf.mxu1  ;;  %8259 = vmatprep.mubr.msk.bf16.mxu0 %vm9507_vm0, %v9506_v0  ;;  %8256 = vmatpush3.bf16.msra.mxu0 %v9044_v19 }
 0x8c0   : > { %8257 = vmatprep.subr.bf16.mxu0 %v9506_v0 }
 0x8c1   : > { %v8238_v53 = vpop.f32.mrf.mxu1 }
 0x8c3   : > { %v1849_v57 = vpop.f32.mrf.mxu1  ;;  %8258 = vmatpush3.bf16.msra.mxu0 %v9045_v20 }
 0x8c4   : > { %1858 = vrot.lane.b32.xlu1 %v1849_v57, %s9513_s21  ;;  %8275 = vmatprep.subr.bf16.mxu0 %v9506_v0 }
 0x8c5   : > { %v8253_v10 = vpop.f32.mrf.mxu1 }
 0x8c7   : > { %v1852_v14 = vpop.f32.mrf.mxu1 }
 0x8c8   : > { %1860 = vrot.lane.b32.xlu1 %v1852_v14, %s9513_s21 }
 0x8c9   : > { %v8254_v15 = vpop.f32.mrf.mxu1 }
 0x8cc   : > { %1872 = vrot.lane.b32.xlu1 %v7704_v17, %s9513_s21 }
 0x936   : > { %v1859_v24 = vpop.permute.xlu1 %1858 }
 0x937   : > { %v1864_v26 = vadd.f32 %v1859_v24, %v9921_v44 }
 0x93a   : > { %v1861_v25 = vpop.permute.xlu1 %1860 }
 0x93b   : > { %v1865_v27 = vadd.f32 %v1861_v25, %v9923_v46 }
 0x93e   : > { %v1873_v28 = vpop.permute.xlu1 %1872 }
 0x93f   : > { %v1875_v30 = vadd.f32 %v1873_v28, %v1864_v26  ;;  %v1876_v31 = vadd.f32 %v1873_v28, %v1865_v27 }
 0x941   : > { %v1877_v32 = vmax.f32 %v1875_v30, 0.0  ;;  %v1878_v33 = vmax.f32 %v1876_v31, 0.0 }
 0x943   : > { %v1940_v34 = vpack.c.bf16 %v1878_v33, %v1877_v32 }
 0x945   : > { %1951 = vrot.lane.b32.xlu0 %v1940_v34, %s9509_s6 }
 0x97e   : > { %v1777_v35 = vpop.f32.mrf.mxu0 }
 0x97f   : > { %v1783_v38 = vadd.f32 %v1777_v35, %v9891_v13 }
 0x980   : > { %v8245_v39 = vpop.f32.mrf.mxu0 }
 0x981   : > { %v1791_v40 = vadd.f32 %v7700_v36, %v1783_v38 }
 0x982   : > { %v1780_v41 = vpop.f32.mrf.mxu0 }
 0x983   : > { %v10117_v42 = vmax.f32 %v1791_v40, 0.0 }
 0x984   : > { %v8246_v44 = vpop.f32.mrf.mxu0 }
 0x985   : > { %v1879_v46 = vpack.c.bf16 %v10117_v42, %v10117_v42 }
 0x987   : > { %8260 = vmatmul.mubr.msk.bf16.vlgmr.msra.gmra.mxu0 %vm924_vm1, %v1879_v46 }
 0x988   : > { %8277 = vmatprep.mubr.msk.bf16.mxu0 %vm9507_vm0, %v9506_v0 }
 0x9b7   : > { %v1952_v43 = vpop.permute.xlu0 %1951 }
 0x9b8   : > { %8272 = vmatmul.mubr.msk.bf16.vlgmr.msra.gmra.mxu1 %vm1159_vm4, %v1952_v43 }
 0x9b9   : > { %8288 = vmatpush3.bf16.msra.mxu1 %v9937_v51  ;;  %8291 = vmatprep.mubr.msk.bf16.mxu1 %vm9507_vm0, %v9506_v0 }
 0x9ba   : > { %8289 = vmatprep.subr.bf16.mxu1 %v9506_v0 }
 0x9bd   : > { %8290 = vmatpush3.bf16.msra.mxu1 %v9944_v52 }
 0x9be   : > { %8301 = vmatprep.subr.bf16.mxu1 %v9506_v0 }
 0xa47   : > { %v1934_v13 = vpop.f32.mrf.mxu0 }
 0xa48   : > { %v2021_v45 = vpack.c.bf16 %v1934_v13, %v1934_v13 }
 0xa49   : > { %v8261_v47 = vpop.f32.mrf.mxu0 }
 0xa4a   : > { %v2023_v48 = vsel %vm1012_vm2, %v2021_v45, 0  ;;  %2067 = vrot.lane.b32.xlu1 %v2021_v45, %s9509_s6 }
 0xa4b   : > { %v1937_v50 = vpop.f32.mrf.mxu0  ;;  %8276 = vmatpush3.bf16.msra.mxu0 %v2023_v48 }
 0xa4c   : > { %8281 = vmatprep.subr.bf16.mxu0 %v9506_v0 }
 0xa4d   : > { %v8262_v51 = vpop.f32.mrf.mxu0 }
 0xa4e   : > { %8278 = vmatmul.mubr.msk.bf16.vlgmr.msra.gmra.mxu0 %vm1210_vm5, %v9912_v37 }
 0xa4f   : > { %8283 = vmatprep.mubr.msk.bf16.mxu0 %vm9507_vm0, %v9506_v0 }
 0xa78   : > { %v10138_v52 = vpop.f32.mrf.mxu1 }
 0xa7a   : > { %v8273_v54 = vpop.f32.mrf.mxu1 }
 0xa7c   : > { %v10140_v56 = vpop.f32.mrf.mxu1 }
 0xa7e   : > { %v8274_v58 = vpop.f32.mrf.mxu1 }
 0xabc   : > { %v2068_v59 = vpop.permute.xlu1 %2067 }
 0xabd   : > { %v2070_v61 = vsel %vm1012_vm2, %v2068_v59, 0 }
 0xabe   : > { %8282 = vmatpush3.bf16.msra.mxu0 %v2070_v61 }
 0xabf   : > { %8295 = vmatprep.subr.bf16.mxu0 %v9506_v0 }
 0xac1   : > { %8284 = vmatmul.mubr.msk.bf16.vlgmr.msra.gmra.mxu0 %vm1210_vm5, %v9926_v49 }
 0xac2   : > { %8297 = vmatprep.mubr.msk.bf16.mxu0 %vm9507_vm0, %v9506_v0 }
 0xb0e   : > { %v10148_v62 = vpop.f32.mrf.mxu0 }
 0xb10   : > { %v8279_v63 = vpop.f32.mrf.mxu0 }
 0xb12   : > { %v10150_v1 = vpop.f32.mrf.mxu0 }
 0xb14   : > { %v8280_v2 = vpop.f32.mrf.mxu0 }
 0xb81   : > { %v10152_v3 = vpop.f32.mrf.mxu0 }
 0xb82   : > { %v2113_v4 = vadd.f32 %v10152_v3, %v10138_v52 }
 0xb83   : > { %v8285_v55 = vpop.f32.mrf.mxu0 }
 0xb84   : > { %v2115_v6 = vmul.f32 %v2113_v4, %v10148_v62 }
 0xb85   : > { %v10156_v60 = vpop.f32.mrf.mxu0 }
 0xb86   : > { %v2114_v49 = vadd.f32 %v10156_v60, %v10140_v56  ;;  %v2117_v10 = vmul.f32 0.35355338, %v2115_v6 }
 0xb87   : > { %v8286_v53 = vpop.f32.mrf.mxu0 }
 0xb88   : > { %v2116_v57 = vmul.f32 %v2114_v49, %v10150_v1 }
 0xb8a   : > { %v2118_v14 = vmul.f32 0.35355338, %v2116_v57 }
 0xb8c   : > { %v2119_v15 = vpack.c.bf16 %v2118_v14, %v2117_v10 }
 0xb8e   : > { %8292 = vmatmul.mubr.msk.bf16.vlgmr.msra.gmra.mxu1 %vm924_vm1, %v2119_v15 }
 0xb8f   : > { %8303 = vmatprep.mubr.msk.bf16.mxu1 %vm9507_vm0, %v9506_v0 }
 0xc4e   : > { %v10165_v17 = vpop.f32.mrf.mxu1 }
 0xc4f   : > { %2194 = vperm.xlu0 %8976, %v10165_v17   ;;  %2166 = vperm.xlu1 %8975, %v10165_v17  }
 0xc50   : > { %v8293_v19 = vpop.f32.mrf.mxu1 }
 0xc52   : > { %v10169_v20 = vpop.f32.mrf.mxu1 }
 0xc53   : > { %8980 = vset.pattern.permute.xlu0 %v9511_v11  ;;  %8977 = vset.pattern.permute.xlu1 %v9511_v11 }
 0xc54   : > { %2221 = vperm.xlu1 %8977, %v10165_v17   ;;  %2225 = vperm.xlu0 %8980, %v10169_v20   ;;  %v8294_v21 = vpop.f32.mrf.mxu1 }
 0xc58   : > { %8978 = vset.pattern.permute.xlu1 %v9508_v8 }
 0xc59   : > { %2171 = vperm.xlu1 %8978, %v10169_v20  }
 0xc5d   : > { %8979 = vset.pattern.permute.xlu1 %v9510_v9 }
 0xc5e   : > { %2198 = vperm.xlu1 %8979, %v10169_v20  }
 0xc62   : > { %8981 = vset.pattern.permute.xlu1 %v9512_v12 }
 0xc63   : > { %2248 = vperm.xlu1 %8981, %v10165_v17  }
 0xc67   : > { %2252 = vperm.xlu1 %8981, %v10169_v20  }
 0xc6b   : > { %8982 = vset.pattern.permute.xlu1 %v9508_v8 }
 0xcca   : > { %v2195_v22 = vpop.permute.xlu0 %2194  ;;  %v2167_v5 = vpop.permute.xlu1 %2166 }
 0xccb   : > { %v2174_v31 = vsel %vm9985_vm6, %v2167_v5, -1e+30  ;;  %v2201_v40 = vsel %vm9985_vm6, %v2195_v22, -1e+30 }
 0xccc   : > { %v2176_v35 = vsel %vm1210_vm5, %v2174_v31, -inf  ;;  %v2203_v13 = vsel %vm1210_vm5, %v2201_v40, -inf }
 0xccf   : > { %v2222_v23 = vpop.permute.xlu1 %2221  ;;  %v2226_v24 = vpop.permute.xlu0 %2225 }
 0xcd0   : > { %v2228_v25 = vsel %vm9985_vm6, %v2222_v23, -1e+30  ;;  %v2229_v26 = vsel %vm9989_vm7, %v2226_v24, -1e+30 }
 0xcd1   : > { %v2230_v27 = vsel %vm1210_vm5, %v2228_v25, -inf  ;;  %v2231_v28 = vsel %vm1210_vm5, %v2229_v26, -inf }
 0xcd2   : > { %v2232_v30 = vmax.f32 %v2230_v27, %v2231_v28 }
 0xcd4   : > { %v2233_v32 = vrot.slane %v2232_v30, 4  ;;  %v2172_v33 = vpop.permute.xlu1 %2171 }
 0xcd5   : > { %v2175_v34 = vsel %vm9989_vm7, %v2172_v33, -1e+30 }
 0xcd6   : > { %v2234_v36 = vmax.f32 %v2232_v30, %v2233_v32  ;;  %v2177_v38 = vsel %vm1210_vm5, %v2175_v34, -inf }
 0xcd7   : > { %v2178_v39 = vmax.f32 %v2176_v35, %v2177_v38 }
 0xcd8   : > { %v2235_v41 = vrot.slane %v2234_v36, 2 }
 0xcd9   : > { %v2179_v44 = vrot.slane %v2178_v39, 4  ;;  %v2199_v46 = vpop.permute.xlu1 %2198 }
 0xcda   : > { %v2202_v43 = vsel %vm9989_vm7, %v2199_v46, -1e+30  ;;  %v2236_v48 = vmax.f32 %v2234_v36, %v2235_v41 }
 0xcdb   : > { %v2180_v45 = vmax.f32 %v2178_v39, %v2179_v44  ;;  %v2204_v47 = vsel %vm1210_vm5, %v2202_v43, -inf }
 0xcdc   : > { %v2205_v50 = vmax.f32 %v2203_v13, %v2204_v47  ;;  %v2237_v61 = vrot.slane %v2236_v48, 1 }
 0xcdd   : > { %v2181_v51 = vrot.slane %v2180_v45, 2 }
 0xcde   : > { %v2206_v54 = vrot.slane %v2205_v50, 4  ;;  %v2249_v58 = vpop.permute.xlu1 %2248  ;;  %v2238_v57 = vmax.f32 %v2236_v48, %v2237_v61 }
 0xcdf   : > { %v2182_v59 = vmax.f32 %v2180_v45, %v2181_v51  ;;  %v2255_v2 = vsel %vm9985_vm6, %v2249_v58, -1e+30 }
 0xce0   : > { %v2207_v63 = vmax.f32 %v2205_v50, %v2206_v54  ;;  %v2257_v10 = vsel %vm1210_vm5, %v2255_v2, -inf  ;;  %v2239_v26 = vsel %vm9985_vm6, %v2238_v57, -1e+30  ;;  %v2240_v39 = vsel %vm9989_vm7, %v2238_v57, -1e+30 }
 0xce1   : > { %v2183_v4 = vrot.slane %v2182_v59, 1  ;;  %v2241_v30 = vsel %vm1210_vm5, %v2239_v26, -inf  ;;  %v2244_v41 = vsel %vm1210_vm5, %v2240_v39, -inf }
 0xce2   : > { %v2253_v55 = vpop.permute.xlu1 %2252  ;;  %v2208_v6 = vrot.slane %v2207_v63, 2 }
 0xce3   : > { %v2256_v49 = vsel %vm9989_vm7, %v2253_v55, -1e+30  ;;  %v2184_v53 = vmax.f32 %v2182_v59, %v2183_v4 }
 0xce4   : > { %v2258_v14 = vsel %vm1210_vm5, %v2256_v49, -inf  ;;  %v2209_v15 = vmax.f32 %v2207_v63, %v2208_v6 }
 0xce5   : > { %v2259_v19 = vmax.f32 %v2257_v10, %v2258_v14  ;;  %v2186_v21 = vsel %vm9989_vm7, %v2184_v53, -1e+30  ;;  %v2185_v22 = vsel %vm9985_vm6, %v2184_v53, -1e+30 }
 0xce6   : > { %v2190_v5 = vsel %vm1210_vm5, %v2186_v21, -inf  ;;  %v2187_v23 = vsel %vm1210_vm5, %v2185_v22, -inf  ;;  %v2210_v24 = vrot.slane %v2209_v15, 1 }
 0xce7   : > { %v2260_v25 = vrot.slane %v2259_v19, 4  ;;  %2191 = vmax.xlane.f32.xlu1 %v2190_v5  ;;  %2188 = vmax.xlane.f32.xlu0 %v2187_v23 }
 0xce8   : > { %v2211_v27 = vmax.f32 %v2209_v15, %v2210_v24 }
 0xce9   : > { %v2261_v28 = vmax.f32 %v2259_v19, %v2260_v25 }
 0xcea   : > { %v2212_v31 = vsel %vm9985_vm6, %v2211_v27, -1e+30  ;;  %v2213_v34 = vsel %vm9989_vm7, %v2211_v27, -1e+30 }
 0xceb   : > { %2242 = vmax.xlane.f32.xlu1 %v2241_v30  ;;  %v2214_v32 = vsel %vm1210_vm5, %v2212_v31, -inf  ;;  %v2262_v33 = vrot.slane %v2261_v28, 2  ;;  %v2217_v36 = vsel %vm1210_vm5, %v2213_v34, -inf }
 0xcec   : > { %2215 = vmax.xlane.f32.xlu0 %v2214_v32 }
 0xced   : > { %v2263_v35 = vmax.f32 %v2261_v28, %v2262_v33 }
 0xcef   : > { %v2264_v38 = vrot.slane %v2263_v35, 1 }
 0xcf0   : > { %2218 = vmax.xlane.f32.xlu0 %v2217_v36 }
 0xcf1   : > { %v2265_v40 = vmax.f32 %v2263_v35, %v2264_v38 }
 0xcf3   : > { %v2266_v44 = vsel %vm9985_vm6, %v2265_v40, -1e+30  ;;  %v2267_v43 = vsel %vm9989_vm7, %v2265_v40, -1e+30 }
 0xcf4   : > { %2245 = vmax.xlane.f32.xlu0 %v2244_v41  ;;  %v2268_v46 = vsel %vm1210_vm5, %v2266_v44, -inf  ;;  %v2271_v13 = vsel %vm1210_vm5, %v2267_v43, -inf  ;;  %v9052_v41 = vld [vmem:[#allocation10 + $0x18] sm:$0xff]  }
 0xcf5   : > { %2269 = vmax.xlane.f32.xlu1 %v2268_v46 }
 0xcf8   : > { %2272 = vmax.xlane.f32.xlu0 %v2271_v13 }
 0xd06   : > { %2423 = vrot.lane.b32.xlu1 %v10138_v52, %s9513_s21 }
 0xd0e   : > { %2425 = vrot.lane.b32.xlu0 %v10140_v56, %s9513_s21 }
 0xd70   : > { %v2189_v45 = vpop.xlane.xlu0 %2188  ;;  %v2192_v47 = vpop.xlane.xlu1 %2191 }
 0xd74   : > { %v2243_v51 = vpop.xlane.xlu1 %2242 }
 0xd75   : > { %v2216_v48 = vpop.xlane.xlu0 %2215 }
 0xd76   : > { %v2274_v54 = vsel %vm1486_vm8, %v2189_v45, %v2216_v48 }
 0xd77   : > { %v2276_v59 = vsel %vm1489_vm9, %v2274_v54, %v2243_v51  ;;  %v9050_v54 = vld [vmem:[#allocation13 + $0x18] sm:$0xff]  }
 0xd79   : > { %v2219_v50 = vpop.xlane.xlu0 %2218 }
 0xd7a   : > { %v2275_v2 = vsel %vm1486_vm8, %v2192_v47, %v2219_v50 }
 0xd7d   : > { %v2246_v58 = vpop.xlane.xlu0 %2245 }
 0xd7e   : > { %v2270_v61 = vpop.xlane.xlu1 %2269  ;;  %v2277_v55 = vsel %vm1489_vm9, %v2275_v2, %v2246_v58  ;;  %v9051_v58 = vld [vmem:[#allocation13 + $0x10] sm:$0xff]   ;;  %v9053_v2 = vld [vmem:[#allocation10 + $0x10] sm:$0xff]  }
 0xd7f   : > { %v2278_v63 = vsel %vm1492_vm10, %v2276_v59, %v2270_v61  ;;  %v2555_v59 = vadd.f32 %v10156_v60, %v10150_v1  ;;  %v2554_v61 = vadd.f32 %v10152_v3, %v10148_v62 }
 0xd80   : > { %v2280_v4 = vsub.f32 %v10165_v17, %v2278_v63 }
 0xd81   : > { %v2273_v6 = vpop.xlane.xlu0 %2272  ;;  %v2556_v63 = vpack.c.bf16 %v2555_v59, %v2554_v61  ;;  %v10339_v59 = vld [vmem:[%s9883_s11] sm:$0xff]  }
 0xd82   : > { %v2282_v49 = vmul.f32 1.442695, %v2280_v4  ;;  %v2279_v53 = vsel %vm1492_vm10, %v2277_v55, %v2273_v6  ;;  %v2424_v57 = vpop.permute.xlu1 %2423 }
 0xd83   : > { %v2281_v10 = vsub.f32 %v10169_v20, %v2279_v53  ;;  %v2429_v14 = vadd.f32 %v2424_v57, %v10152_v3 }
 0xd84   : > { %9131 = vpow2.f32 %v2282_v49  ;;  %v7731_v49 = vld [vmem:[#allocation14 + $0x1] ss:$0 sm:$0xff] }
 0xd85   : > { %v2284_v15 = vmul.f32 1.442695, %v2281_v10  ;;  %v2426_v19 = vpop.permute.xlu0 %2425  ;;  %2433 = vrot.lane.b32.xlu1 %v2429_v14, %s9509_s6  ;;  %v9054_v10 = vld [vmem:[%s11529_s12 + $0x28] sm:$0xff]   ;;  %v9055_v14 = vld [vmem:[%s11529_s12 + $0x20] sm:$0xff]  }
 0xd86   : > { %v2430_v21 = vadd.f32 %v2426_v19, %v10156_v60  ;;  %v9057_v19 = vld [vmem:[#allocation8 + $0x50] sm:$0xff]  }
 0xd87   : > { %9133 = vpow2.f32 %v2284_v15  ;;  %v9056_v15 = vld [vmem:[#allocation8 + $0x58] sm:$0xff]  }
 0xd89   : > { %2435 = vrot.lane.b32.xlu1 %v2430_v21, %s9509_s6  ;;  %v9058_v21 = vld [vmem:[#allocation8 + $0x48] sm:$0xff]  }
 0xd91   : > { %v9132_v17 = vpop.eup %9131 }
 0xd94   : > { %v9134_v22 = vpop.eup %9133 }
 0xd95   : > { %v2286_v5 = vpack.c.bf16 %v9134_v22, %v9132_v17 }
 0xd97   : > { %8296 = vmatpush3.bf16.msra.mxu0 %v2286_v5 }
 0xd98   : > { %8307 = vmatprep.subr.bf16.mxu0 %v9506_v0 }
 0xd9a   : > { %8298 = vmatmul.mubr.msk.bf16.vlgmr.msra.gmra.mxu0 %vm1519_vm11, %v10059_v7 }
 0xd9b   : > { %8308 = vmatpush3.bf16.msra.mxu0 %v10072_v29  ;;  %8309 = vmatprep.mubr.msk.bf16.mxu0 %vm9507_vm0, %v9506_v0 }
 0xd9c   : > { %8319 = vmatprep.subr.bf16.mxu0 %v9506_v0 }
 0xdf7   : > { %v2434_v44 = vpop.permute.xlu1 %2433 }
 0xdfb   : > { %v2436_v13 = vpop.permute.xlu1 %2435 }
 0xe5a   : > { %v2321_v20 = vpop.f32.mrf.mxu0 }
 0xe5b   : > { %v2327_v23 = vpack.c.bf16 %v2321_v20, %v2321_v20 }
 0xe5c   : > { %v8299_v24 = vpop.f32.mrf.mxu0 }
 0xe5d   : > { %v2329_v25 = vsel %vm1012_vm2, %v2327_v23, 0 }
 0xe5e   : > { %v2324_v26 = vpop.f32.mrf.mxu0  ;;  %8302 = vmatpush3.bf16.msra.mxu1 %v2329_v25 }
 0xe5f   : > { %8313 = vmatprep.subr.bf16.mxu1 %v9506_v0 }
 0xe60   : > { %v8300_v27 = vpop.f32.mrf.mxu0 }
 0xe61   : > { %8304 = vmatmul.mubr.msk.bf16.vlgmr.msra.gmra.mxu1 %vm1210_vm5, %v9912_v37 }
 0xe62   : > { %8315 = vmatprep.mubr.msk.bf16.mxu1 %vm9507_vm0, %v9506_v0 }
 0xf21   : > { %v2365_v28 = vpop.f32.mrf.mxu1 }
 0xf22   : > { %v2366_v30 = vadd.f32 1e-30, %v2365_v28 }
 0xf23   : > { %v8305_v31 = vpop.f32.mrf.mxu1 }
 0xf24   : > { %9135 = vrcp.f32 %v2366_v30 }
 0xf25   : > { %v2368_v32 = vpop.f32.mrf.mxu1 }
 0xf26   : > { %v2369_v33 = vadd.f32 1e-30, %v2368_v32  ;;  %v7727_v32 = vld [vmem:[#allocation11 + $0x1] ss:$0 sm:$0xff] }
 0xf27   : > { %v8306_v34 = vpop.f32.mrf.mxu1 }
 0xf28   : > { %9137 = vrcp.f32 %v2369_v33 }
 0xf31   : > { %v9136_v35 = vpop.eup %9135 }
 0xf32   : > { %v2374_v38 = vmul.f32 %v9136_v35, %v9132_v17  ;;  %v9059_v17 = vld [vmem:[#allocation8 + $0x40] sm:$0xff]  }
 0xf35   : > { %v9138_v36 = vpop.eup %9137 }
 0xf36   : > { %v2375_v39 = vmul.f32 %v9138_v36, %v9134_v22 }
 0xf38   : > { %v2376_v40 = vpack.c.bf16 %v2375_v39, %v2374_v38 }
 0xf3a   : > { %8310 = vmatmul.mubr.msk.bf16.vlgmr.msra.gmra.mxu0 %vm1613_vm13, %v2376_v40  ;;  %v10321_v40 = vld [vmem:[%s11527_s10] sm:$0xff]  }
 0xf3b   : > { %8323 = vmatprep.mubr.msk.bf16.mxu0 %vm9507_vm0, %v9506_v0  ;;  %8320 = vmatpush3.bf16.msra.mxu0 %v9052_v41 }
 0xf3c   : > { %8321 = vmatprep.subr.bf16.mxu0 %v9506_v0 }
 0xf3f   : > { %8322 = vmatpush3.bf16.msra.mxu0 %v9053_v2 }
 0xf40   : > { %8335 = vmatprep.subr.bf16.mxu0 %v9506_v0 }
 0xffa   : > { %v2414_v46 = vpop.f32.mrf.mxu0 }
 0xffb   : > { %v2439_v47 = vmul.f32 %v2434_v44, %v2414_v46 }
 0xffc   : > { %v8311_v43 = vpop.f32.mrf.mxu0 }
 0xffe   : > { %v2417_v45 = vpop.f32.mrf.mxu0 }
 0xfff   : > { %v2440_v48 = vmul.f32 %v2436_v13, %v2417_v45 }
0x1000   : > { %v8312_v50 = vpop.f32.mrf.mxu0 }
0x1001   : > { %v2441_v51 = vpack.c.bf16 %v2440_v48, %v2439_v47 }
0x1003   : > { %8314 = vmatpush3.bf16.msra.mxu1 %v2441_v51 }
0x1004   : > { %8327 = vmatprep.subr.bf16.mxu1 %v9506_v0 }
0x1006   : > { %8316 = vmatmul.mubr.msk.bf16.vlgmr.msra.gmra.mxu1 %vm1519_vm11, %v10059_v7 }
0x1007   : > { %8328 = vmatpush3.bf16.msra.mxu1 %v9050_v54  ;;  %8331 = vmatprep.mubr.msk.bf16.mxu1 %vm9507_vm0, %v9506_v0 }
0x1008   : > { %8329 = vmatprep.subr.bf16.mxu1 %v9506_v0 }
0x100b   : > { %8330 = vmatpush3.bf16.msra.mxu1 %v9051_v58 }
0x100c   : > { %8343 = vmatprep.subr.bf16.mxu1 %v9506_v0 }
0x100e   : > { %8332 = vmatmul.mubr.msk.bf16.vlgmr.msra.gmra.mxu1 %vm924_vm1, %v2556_v63 }
0x100f   : > { %8351 = vmatprep.mubr.msk.bf16.mxu1 %vm9507_vm0, %v9506_v0  ;;  %8344 = vmatpush3.bf16.msra.mxu1 %v9056_v15 }
0x1010   : > { %8345 = vmatprep.subr.bf16.mxu1 %v9506_v0 }
0x1013   : > { %8346 = vmatpush3.bf16.msra.mxu1 %v9057_v19 }
0x1014   : > { %8347 = vmatprep.subr.bf16.mxu1 %v9506_v0 }
0x1017   : > { %8348 = vmatpush3.bf16.msra.mxu1 %v9058_v21 }
0x1018   : > { %8349 = vmatprep.subr.bf16.mxu1 %v9506_v0 }
0x101b   : > { %8350 = vmatpush3.bf16.msra.mxu1 %v9059_v17 }
0x101c   : > { %8367 = vmatprep.subr.bf16.mxu1 %v9506_v0 }
0x10c6   : > { %v2476_v4 = vpop.f32.mrf.mxu1 }
0x10c7   : > { %v2482_v1 = vpack.c.bf16 %v2476_v4, %v2476_v4 }
0x10c8   : > { %v8317_v60 = vpop.f32.mrf.mxu1 }
0x10c9   : > { %8324 = vmatmul.mubr.msk.bf16.vlgmr.msra.gmra.mxu0 %vm924_vm1, %v2482_v1 }
0x10ca   : > { %v2479_v55 = vpop.f32.mrf.mxu1  ;;  %8339 = vmatprep.mubr.msk.bf16.mxu0 %vm9507_vm0, %v9506_v0  ;;  %8336 = vmatpush3.bf16.msra.mxu0 %v9054_v10 }
0x10cb   : > { %8337 = vmatprep.subr.bf16.mxu0 %v9506_v0 }
0x10cc   : > { %v8318_v62 = vpop.f32.mrf.mxu1 }
0x10ce   : > { %v2611_v3 = vpop.f32.mrf.mxu1  ;;  %8338 = vmatpush3.bf16.msra.mxu0 %v9055_v14 }
0x10cf   : > { %2620 = vrot.lane.b32.xlu0 %v2611_v3, %s9513_s21  ;;  %8355 = vmatprep.subr.bf16.mxu0 %v9506_v0 }
0x10d0   : > { %v8333_v6 = vpop.f32.mrf.mxu1 }
0x10d2   : > { %v2614_v53 = vpop.f32.mrf.mxu1 }
0x10d3   : > { %2635 = vrot.lane.b32.xlu0 %v7731_v49, %s9513_s21  ;;  %2622 = vrot.lane.b32.xlu1 %v2614_v53, %s9513_s21 }
0x10d4   : > { %v8334_v57 = vpop.f32.mrf.mxu1 }
0x1141   : > { %v2621_v22 = vpop.permute.xlu0 %2620 }
0x1142   : > { %v2626_v5 = vadd.f32 %v2621_v22, %v10138_v52 }
0x1145   : > { %v2636_v20 = vpop.permute.xlu0 %2635  ;;  %v2623_v23 = vpop.permute.xlu1 %2622 }
0x1146   : > { %v2638_v24 = vadd.f32 %v2636_v20, %v2626_v5  ;;  %v2627_v25 = vadd.f32 %v2623_v23, %v10140_v56 }
0x1148   : > { %v2639_v26 = vadd.f32 %v2636_v20, %v2627_v25  ;;  %v2640_v27 = vmax.f32 %v2638_v24, 0.0 }
0x114a   : > { %v2641_v28 = vmax.f32 %v2639_v26, 0.0 }
0x114c   : > { %v2703_v30 = vpack.c.bf16 %v2641_v28, %v2640_v27 }
0x114e   : > { %2714 = vrot.lane.b32.xlu0 %v2703_v30, %s9509_s6 }
0x1189   : > { %v2537_v31 = vpop.f32.mrf.mxu0 }
0x118a   : > { %v2543_v33 = vadd.f32 %v2537_v31, %v10117_v42  ;;  %v10312_v42 = vld [vmem:[%s11527_s10 + $0x8] sm:$0xff]  }
0x118b   : > { %v8325_v34 = vpop.f32.mrf.mxu0 }
0x118c   : > { %v2552_v35 = vadd.f32 %v7727_v32, %v2543_v33 }
0x118d   : > { %v2540_v36 = vpop.f32.mrf.mxu0 }
0x118e   : > { %v10301_v38 = vmax.f32 %v2552_v35, 0.0 }
0x118f   : > { %v8326_v52 = vpop.f32.mrf.mxu0 }
0x1190   : > { %v2642_v39 = vpack.c.bf16 %v10301_v38, %v10301_v38 }
0x1192   : > { %8340 = vmatmul.mubr.msk.bf16.vlgmr.msra.gmra.mxu0 %vm924_vm1, %v2642_v39 }
0x1193   : > { %8357 = vmatprep.mubr.msk.bf16.mxu0 %vm9507_vm0, %v9506_v0 }
0x11c0   : > { %v2715_v56 = vpop.permute.xlu0 %2714 }
0x11c1   : > { %8352 = vmatmul.mubr.msk.bf16.vlgmr.msra.gmra.mxu1 %vm1159_vm4, %v2715_v56 }
0x11c2   : > { %8368 = vmatpush3.bf16.msra.mxu1 %v10312_v42  ;;  %8371 = vmatprep.mubr.msk.bf16.mxu1 %vm9507_vm0, %v9506_v0 }
0x11c3   : > { %8369 = vmatprep.subr.bf16.mxu1 %v9506_v0 }
0x11c6   : > { %8370 = vmatpush3.bf16.msra.mxu1 %v10321_v40 }
0x11c7   : > { %8381 = vmatprep.subr.bf16.mxu1 %v9506_v0 }
0x1252   : > { %v2697_v41 = vpop.f32.mrf.mxu0 }
0x1253   : > { %v2784_v44 = vpack.c.bf16 %v2697_v41, %v2697_v41 }
0x1254   : > { %v8341_v46 = vpop.f32.mrf.mxu0 }
0x1255   : > { %v2786_v43 = vsel %vm1012_vm2, %v2784_v44, 0  ;;  %2830 = vrot.lane.b32.xlu1 %v2784_v44, %s9509_s6 }
0x1256   : > { %v2700_v13 = vpop.f32.mrf.mxu0  ;;  %8356 = vmatpush3.bf16.msra.mxu0 %v2786_v43 }
0x1257   : > { %8361 = vmatprep.subr.bf16.mxu0 %v9506_v0 }
0x1258   : > { %v8342_v45 = vpop.f32.mrf.mxu0 }
0x1259   : > { %8358 = vmatmul.mubr.msk.bf16.vlgmr.msra.gmra.mxu0 %vm1210_vm5, %v9912_v37 }
0x125a   : > { %8363 = vmatprep.mubr.msk.bf16.mxu0 %vm9507_vm0, %v9506_v0 }
0x1281   : > { %v10332_v47 = vpop.f32.mrf.mxu1 }
0x1283   : > { %v8353_v48 = vpop.f32.mrf.mxu1 }
0x1285   : > { %v10334_v50 = vpop.f32.mrf.mxu1 }
0x1287   : > { %v8354_v51 = vpop.f32.mrf.mxu1 }
0x12c7   : > { %v2831_v54 = vpop.permute.xlu1 %2830 }
0x12c8   : > { %v2833_v58 = vsel %vm1012_vm2, %v2831_v54, 0 }
0x12c9   : > { %8362 = vmatpush3.bf16.msra.mxu0 %v2833_v58 }
0x12ca   : > { %8375 = vmatprep.subr.bf16.mxu0 %v9506_v0 }
0x12cc   : > { %8364 = vmatmul.mubr.msk.bf16.vlgmr.msra.gmra.mxu0 %vm1210_vm5, %v10339_v59 }
0x12cd   : > { %8377 = vmatprep.mubr.msk.bf16.mxu0 %vm9507_vm0, %v9506_v0 }
0x1319   : > { %v10345_v61 = vpop.f32.mrf.mxu0 }
0x131b   : > { %v8359_v63 = vpop.f32.mrf.mxu0 }
0x131d   : > { %v10347_v2 = vpop.f32.mrf.mxu0 }
0x131f   : > { %v8360_v4 = vpop.f32.mrf.mxu0 }
0x138c   : > { %v10349_v1 = vpop.f32.mrf.mxu0 }
0x138d   : > { %v2876_v60 = vadd.f32 %v10349_v1, %v10332_v47 }
0x138e   : > { %v8365_v55 = vpop.f32.mrf.mxu0 }
0x138f   : > { %v2878_v3 = vmul.f32 %v2876_v60, %v10345_v61 }
0x1390   : > { %v10353_v62 = vpop.f32.mrf.mxu0 }
0x1391   : > { %v2877_v6 = vadd.f32 %v10353_v62, %v10334_v50  ;;  %v2880_v57 = vmul.f32 0.35355338, %v2878_v3 }
0x1392   : > { %v8366_v49 = vpop.f32.mrf.mxu0 }
0x1393   : > { %v2879_v53 = vmul.f32 %v2877_v6, %v10347_v2 }
0x1395   : > { %v2881_v10 = vmul.f32 0.35355338, %v2879_v53 }
0x1397   : > { %v2882_v14 = vpack.c.bf16 %v2881_v10, %v2880_v57 }
0x1399   : > { %8372 = vmatmul.mubr.msk.bf16.vlgmr.msra.gmra.mxu1 %vm924_vm1, %v2882_v14 }
0x139a   : > { %8383 = vmatprep.mubr.msk.bf16.mxu1 %vm9507_vm0, %v9506_v0 }
0x1459   : > { %v10362_v15 = vpop.f32.mrf.mxu1 }
0x145a   : > { %2984 = vperm.xlu0 %8980, %v10362_v15   ;;  %2929 = vperm.xlu1 %8982, %v10362_v15  }
0x145b   : > { %v8373_v19 = vpop.f32.mrf.mxu1 }
0x145d   : > { %v10366_v21 = vpop.f32.mrf.mxu1 }
0x145e   : > { %8984 = vset.pattern.permute.xlu0 %v9508_v8  ;;  %8983 = vset.pattern.permute.xlu1 %v9510_v9 }
0x145f   : > { %2957 = vperm.xlu1 %8983, %v10362_v15   ;;  %2934 = vperm.xlu0 %8984, %v10366_v21   ;;  %v8374_v17 = vpop.f32.mrf.mxu1 }
0x1463   : > { %2961 = vperm.xlu1 %8983, %v10366_v21   ;;  %8987 = vset.pattern.permute.xlu0 %v9512_v12 }
0x1464   : > { %3015 = vperm.xlu0 %8987, %v10366_v21  }
0x1467   : > { %8985 = vset.pattern.permute.xlu1 %v9511_v11 }
0x1468   : > { %2988 = vperm.xlu1 %8985, %v10366_v21   ;;  %8990 = vset.pattern.permute.xlu0 %v9511_v11 }
0x146c   : > { %8986 = vset.pattern.permute.xlu1 %v9512_v12 }
0x146d   : > { %3011 = vperm.xlu1 %8986, %v10362_v15  }
0x1471   : > { %8988 = vset.pattern.permute.xlu1 %v9508_v8 }
0x14d5   : > { %v2985_v22 = vpop.permute.xlu0 %2984  ;;  %v2930_v5 = vpop.permute.xlu1 %2929 }
0x14d6   : > { %v2937_v20 = vsel %vm9985_vm6, %v2930_v5, -1e+30  ;;  %v2991_v39 = vsel %vm9985_vm6, %v2985_v22, -1e+30 }
0x14d7   : > { %v2939_v26 = vsel %vm1210_vm5, %v2937_v20, -inf  ;;  %v2993_v13 = vsel %vm1210_vm5, %v2991_v39, -inf }
0x14da   : > { %v2958_v23 = vpop.permute.xlu1 %2957  ;;  %v2935_v24 = vpop.permute.xlu0 %2934 }
0x14db   : > { %v2938_v25 = vsel %vm9989_vm7, %v2935_v24, -1e+30  ;;  %v2964_v28 = vsel %vm9985_vm6, %v2958_v23, -1e+30 }
0x14dc   : > { %v2940_v27 = vsel %vm1210_vm5, %v2938_v25, -inf  ;;  %v2966_v34 = vsel %vm1210_vm5, %v2964_v28, -inf }
0x14dd   : > { %v2941_v30 = vmax.f32 %v2939_v26, %v2940_v27 }
0x14de   : > { %v2962_v31 = vpop.permute.xlu1 %2961 }
0x14df   : > { %v2942_v32 = vrot.slane %v2941_v30, 4  ;;  %v2965_v33 = vsel %vm9989_vm7, %v2962_v31, -1e+30  ;;  %v3016_v46 = vpop.permute.xlu0 %3015 }
0x14e0   : > { %v2967_v35 = vsel %vm1210_vm5, %v2965_v33, -inf  ;;  %v3019_v58 = vsel %vm9989_vm7, %v3016_v46, -1e+30 }
0x14e1   : > { %v2943_v36 = vmax.f32 %v2941_v30, %v2942_v32  ;;  %v2968_v52 = vmax.f32 %v2966_v34, %v2967_v35  ;;  %v3021_v53 = vsel %vm1210_vm5, %v3019_v58, -inf }
0x14e3   : > { %v2969_v56 = vrot.slane %v2968_v52, 4  ;;  %v2989_v41 = vpop.permute.xlu1 %2988  ;;  %v2944_v44 = vrot.slane %v2943_v36, 2 }
0x14e4   : > { %v2992_v43 = vsel %vm9989_vm7, %v2989_v41, -1e+30 }
0x14e5   : > { %v2970_v45 = vmax.f32 %v2968_v52, %v2969_v56  ;;  %v2994_v48 = vsel %vm1210_vm5, %v2992_v43, -inf  ;;  %v2945_v51 = vmax.f32 %v2943_v36, %v2944_v44 }
0x14e6   : > { %v2995_v54 = vmax.f32 %v2993_v13, %v2994_v48 }
0x14e7   : > { %v2946_v63 = vrot.slane %v2945_v51, 1  ;;  %v2971_v4 = vrot.slane %v2970_v45, 2 }
0x14e8   : > { %v2996_v60 = vrot.slane %v2995_v54, 4  ;;  %v3012_v55 = vpop.permute.xlu1 %3011 }
0x14e9   : > { %v3018_v3 = vsel %vm9985_vm6, %v3012_v55, -1e+30  ;;  %v2947_v6 = vmax.f32 %v2945_v51, %v2946_v63  ;;  %v2972_v49 = vmax.f32 %v2970_v45, %v2971_v4 }
0x14ea   : > { %v2997_v57 = vmax.f32 %v2995_v54, %v2996_v60  ;;  %v3020_v10 = vsel %vm1210_vm5, %v3018_v3, -inf }
0x14eb   : > { %v3022_v14 = vmax.f32 %v3020_v10, %v3021_v53  ;;  %v2949_v19 = vsel %vm9989_vm7, %v2947_v6, -1e+30  ;;  %v2948_v17 = vsel %vm9985_vm6, %v2947_v6, -1e+30  ;;  %v2973_v22 = vrot.slane %v2972_v49, 1 }
0x14ec   : > { %v2953_v5 = vsel %vm1210_vm5, %v2949_v19, -inf  ;;  %v2950_v20 = vsel %vm1210_vm5, %v2948_v17, -inf  ;;  %v2998_v23 = vrot.slane %v2997_v57, 2 }
0x14ed   : > { %v3023_v24 = vrot.slane %v3022_v14, 4  ;;  %2954 = vmax.xlane.f32.xlu0 %v2953_v5  ;;  %2951 = vmax.xlane.f32.xlu1 %v2950_v20  ;;  %v2974_v25 = vmax.f32 %v2972_v49, %v2973_v22 }
0x14ee   : > { %v2999_v26 = vmax.f32 %v2997_v57, %v2998_v23 }
0x14ef   : > { %v3024_v27 = vmax.f32 %v3022_v14, %v3023_v24  ;;  %v2976_v28 = vsel %vm9989_vm7, %v2974_v25, -1e+30  ;;  %v2975_v30 = vsel %vm9985_vm6, %v2974_v25, -1e+30 }
0x14f0   : > { %v2980_v31 = vsel %vm1210_vm5, %v2976_v28, -inf  ;;  %v2977_v32 = vsel %vm1210_vm5, %v2975_v30, -inf  ;;  %v3000_v33 = vrot.slane %v2999_v26, 1 }
0x14f1   : > { %2981 = vmax.xlane.f32.xlu0 %v2980_v31  ;;  %2978 = vmax.xlane.f32.xlu1 %v2977_v32  ;;  %v3025_v34 = vrot.slane %v3024_v27, 2 }
0x14f2   : > { %v3001_v35 = vmax.f32 %v2999_v26, %v3000_v33 }
0x14f3   : > { %v3026_v36 = vmax.f32 %v3024_v27, %v3025_v34 }
0x14f4   : > { %v3003_v52 = vsel %vm9989_vm7, %v3001_v35, -1e+30  ;;  %v3002_v39 = vsel %vm9985_vm6, %v3001_v35, -1e+30 }
0x14f5   : > { %v3007_v56 = vsel %vm1210_vm5, %v3003_v52, -inf  ;;  %v3004_v41 = vsel %vm1210_vm5, %v3002_v39, -inf  ;;  %v3027_v44 = vrot.slane %v3026_v36, 1 }
0x14f6   : > { %3008 = vmax.xlane.f32.xlu0 %v3007_v56  ;;  %3005 = vmax.xlane.f32.xlu1 %v3004_v41 }
0x14f7   : > { %v3028_v46 = vmax.f32 %v3026_v36, %v3027_v44 }
0x14f9   : > { %v3030_v43 = vsel %vm9989_vm7, %v3028_v46, -1e+30  ;;  %v3029_v13 = vsel %vm9985_vm6, %v3028_v46, -1e+30 }
0x14fa   : > { %v3034_v45 = vsel %vm1210_vm5, %v3030_v43, -inf  ;;  %v3031_v48 = vsel %vm1210_vm5, %v3029_v13, -inf }
0x14fb   : > { %3035 = vmax.xlane.f32.xlu0 %v3034_v45  ;;  %3032 = vmax.xlane.f32.xlu1 %v3031_v48  ;;  %v9062_v45 = vld [vmem:[#allocation10 + $0x28] sm:$0xff]  }
0x150c   : > { %3186 = vrot.lane.b32.xlu1 %v10332_v47, %s9513_s21 }
0x1511   : > { %3188 = vrot.lane.b32.xlu0 %v10334_v50, %s9513_s21 }
0x1576   : > { %v2952_v51 = vpop.xlane.xlu1 %2951  ;;  %v2955_v54 = vpop.xlane.xlu0 %2954 }
0x157a   : > { %v2979_v58 = vpop.xlane.xlu1 %2978  ;;  %v2982_v63 = vpop.xlane.xlu0 %2981 }
0x157b   : > { %v3037_v55 = vsel %vm1486_vm8, %v2952_v51, %v2979_v58  ;;  %v3038_v3 = vsel %vm1486_vm8, %v2955_v54, %v2982_v63 }
0x157f   : > { %v3006_v4 = vpop.xlane.xlu1 %3005  ;;  %v3009_v60 = vpop.xlane.xlu0 %3008 }
0x1580   : > { %v3039_v6 = vsel %vm1489_vm9, %v3037_v55, %v3006_v4  ;;  %v3040_v49 = vsel %vm1489_vm9, %v3038_v3, %v3009_v60 }
0x1584   : > { %v3033_v53 = vpop.xlane.xlu1 %3032  ;;  %v3036_v57 = vpop.xlane.xlu0 %3035 }
0x1585   : > { %v3041_v10 = vsel %vm1492_vm10, %v3039_v6, %v3033_v53  ;;  %v3042_v14 = vsel %vm1492_vm10, %v3040_v49, %v3036_v57  ;;  %v9060_v6 = vld [vmem:[#allocation13 + $0x28] sm:$0xff]   ;;  %v9061_v49 = vld [vmem:[#allocation13 + $0x20] sm:$0xff]   ;;  %v3318_v53 = vadd.f32 %v10353_v62, %v10347_v2  ;;  %v3317_v57 = vadd.f32 %v10349_v1, %v10345_v61 }
0x1586   : > { %v3043_v19 = vsub.f32 %v10362_v15, %v3041_v10  ;;  %v3044_v17 = vsub.f32 %v10366_v21, %v3042_v14  ;;  %v9063_v14 = vld [vmem:[#allocation10 + $0x20] sm:$0xff]  }
0x1587   : > { %v3319_v10 = vpack.c.bf16 %v3318_v53, %v3317_v57 }
0x1588   : > { %v3045_v22 = vmul.f32 1.442695, %v3043_v19  ;;  %v3047_v5 = vmul.f32 1.442695, %v3044_v17  ;;  %v3187_v20 = vpop.permute.xlu1 %3186  ;;  %v3189_v24 = vpop.permute.xlu0 %3188 }
0x1589   : > { %v3192_v23 = vadd.f32 %v3187_v20, %v10349_v1  ;;  %v3193_v25 = vadd.f32 %v3189_v24, %v10353_v62  ;;  %v9064_v24 = vld [vmem:[%s11529_s12 + $0x38] sm:$0xff]  }
0x158a   : > { %9139 = vpow2.f32 %v3045_v22 }
0x158b   : > { %9141 = vpow2.f32 %v3047_v5  ;;  %3196 = vrot.lane.b32.xlu1 %v3192_v23, %s9509_s6  ;;  %v7758_v5 = vld [vmem:[#allocation14 + $0x2] ss:$0 sm:$0xff] }
0x158f   : > { %3198 = vrot.lane.b32.xlu1 %v3193_v25, %s9509_s6  ;;  %v9065_v25 = vld [vmem:[%s11529_s12 + $0x30] sm:$0xff]  }
0x1597   : > { %v9140_v26 = vpop.eup %9139 }
0x1598   : > { %v9142_v27 = vpop.eup %9141 }
0x1599   : > { %v3049_v28 = vpack.c.bf16 %v9142_v27, %v9140_v26 }
0x159b   : > { %8376 = vmatpush3.bf16.msra.mxu0 %v3049_v28  ;;  %v9068_v28 = vld [vmem:[#allocation8 + $0x68] sm:$0xff]  }
0x159c   : > { %8387 = vmatprep.subr.bf16.mxu0 %v9506_v0 }
0x159e   : > { %8378 = vmatmul.mubr.msk.bf16.vlgmr.msra.gmra.mxu0 %vm1519_vm11, %v10059_v7 }
0x159f   : > { %8388 = vmatpush3.bf16.msra.mxu0 %v10072_v29  ;;  %8389 = vmatprep.mubr.msk.bf16.mxu0 %vm9507_vm0, %v9506_v0 }
0x15a0   : > { %8399 = vmatprep.subr.bf16.mxu0 %v9506_v0 }
0x15fd   : > { %v3197_v48 = vpop.permute.xlu1 %3196 }
0x1601   : > { %v3199_v58 = vpop.permute.xlu1 %3198 }
0x165e   : > { %v3084_v15 = vpop.f32.mrf.mxu0 }
0x165f   : > { %v3090_v21 = vpack.c.bf16 %v3084_v15, %v3084_v15  ;;  %v9069_v15 = vld [vmem:[#allocation8 + $0x60] sm:$0xff]  }
0x1660   : > { %v8379_v30 = vpop.f32.mrf.mxu0 }
0x1661   : > { %v3092_v31 = vsel %vm1012_vm2, %v3090_v21, 0 }
0x1662   : > { %v3087_v32 = vpop.f32.mrf.mxu0  ;;  %8382 = vmatpush3.bf16.msra.mxu1 %v3092_v31 }
0x1663   : > { %8393 = vmatprep.subr.bf16.mxu1 %v9506_v0 }
0x1664   : > { %v8380_v33 = vpop.f32.mrf.mxu0 }
0x1665   : > { %8384 = vmatmul.mubr.msk.bf16.vlgmr.msra.gmra.mxu1 %vm1210_vm5, %v9912_v37 }
0x1666   : > { %8395 = vmatprep.mubr.msk.bf16.mxu1 %vm9507_vm0, %v9506_v0 }
0x1725   : > { %v3128_v34 = vpop.f32.mrf.mxu1 }
0x1726   : > { %v3129_v35 = vadd.f32 1e-30, %v3128_v34 }
0x1727   : > { %v8385_v36 = vpop.f32.mrf.mxu1 }
0x1728   : > { %9143 = vrcp.f32 %v3129_v35 }
0x1729   : > { %v3131_v52 = vpop.f32.mrf.mxu1 }
0x172a   : > { %v3132_v39 = vadd.f32 1e-30, %v3131_v52 }
0x172b   : > { %v8386_v56 = vpop.f32.mrf.mxu1 }
0x172c   : > { %9145 = vrcp.f32 %v3132_v39 }
0x1735   : > { %v9144_v41 = vpop.eup %9143 }
0x1736   : > { %v3137_v46 = vmul.f32 %v9144_v41, %v9140_v26  ;;  %v9066_v26 = vld [vmem:[#allocation8 + $0x78] sm:$0xff]   ;;  %v7754_v41 = vld [vmem:[#allocation11 + $0x2] ss:$0 sm:$0xff] }
0x1739   : > { %v9146_v44 = vpop.eup %9145 }
0x173a   : > { %v3138_v43 = vmul.f32 %v9146_v44, %v9142_v27  ;;  %v9067_v27 = vld [vmem:[#allocation8 + $0x70] sm:$0xff]  }
0x173c   : > { %v3139_v13 = vpack.c.bf16 %v3138_v43, %v3137_v46 }
0x173e   : > { %8390 = vmatmul.mubr.msk.bf16.vlgmr.msra.gmra.mxu0 %vm1613_vm13, %v3139_v13 }
0x173f   : > { %8403 = vmatprep.mubr.msk.bf16.mxu0 %vm9507_vm0, %v9506_v0  ;;  %8400 = vmatpush3.bf16.msra.mxu0 %v9062_v45 }
0x1740   : > { %8401 = vmatprep.subr.bf16.mxu0 %v9506_v0 }
0x1743   : > { %8402 = vmatpush3.bf16.msra.mxu0 %v9063_v14 }
0x1744   : > { %8415 = vmatprep.subr.bf16.mxu0 %v9506_v0 }
0x17fe   : > { %v3177_v51 = vpop.f32.mrf.mxu0 }
0x17ff   : > { %v3202_v4 = vmul.f32 %v3197_v48, %v3177_v51 }
0x1800   : > { %v8391_v54 = vpop.f32.mrf.mxu0 }
0x1802   : > { %v3180_v63 = vpop.f32.mrf.mxu0 }
0x1803   : > { %v3203_v60 = vmul.f32 %v3199_v58, %v3180_v63 }
0x1804   : > { %v8392_v55 = vpop.f32.mrf.mxu0 }
0x1805   : > { %v3204_v3 = vpack.c.bf16 %v3203_v60, %v3202_v4 }
0x1807   : > { %8394 = vmatpush3.bf16.msra.mxu1 %v3204_v3 }
0x1808   : > { %8407 = vmatprep.subr.bf16.mxu1 %v9506_v0 }
0x180a   : > { %8396 = vmatmul.mubr.msk.bf16.vlgmr.msra.gmra.mxu1 %vm1519_vm11, %v10059_v7 }
0x180b   : > { %8408 = vmatpush3.bf16.msra.mxu1 %v9060_v6  ;;  %8411 = vmatprep.mubr.msk.bf16.mxu1 %vm9507_vm0, %v9506_v0 }
0x180c   : > { %8409 = vmatprep.subr.bf16.mxu1 %v9506_v0 }
0x180f   : > { %8410 = vmatpush3.bf16.msra.mxu1 %v9061_v49 }
0x1810   : > { %8423 = vmatprep.subr.bf16.mxu1 %v9506_v0 }
0x1812   : > { %8412 = vmatmul.mubr.msk.bf16.vlgmr.msra.gmra.mxu1 %vm924_vm1, %v3319_v10 }
0x1813   : > { %8431 = vmatprep.mubr.msk.bf16.mxu1 %vm9507_vm0, %v9506_v0  ;;  %8424 = vmatpush3.bf16.msra.mxu1 %v9066_v26 }
0x1814   : > { %8425 = vmatprep.subr.bf16.mxu1 %v9506_v0 }
0x1817   : > { %8426 = vmatpush3.bf16.msra.mxu1 %v9067_v27 }
0x1818   : > { %8427 = vmatprep.subr.bf16.mxu1 %v9506_v0 }
0x181b   : > { %8428 = vmatpush3.bf16.msra.mxu1 %v9068_v28 }
0x181c   : > { %8429 = vmatprep.subr.bf16.mxu1 %v9506_v0 }
0x181f   : > { %8430 = vmatpush3.bf16.msra.mxu1 %v9069_v15 }
0x1820   : > { %8447 = vmatprep.subr.bf16.mxu1 %v9506_v0 }
0x18ca   : > { %v3239_v19 = vpop.f32.mrf.mxu1 }
0x18cb   : > { %v3245_v2 = vpack.c.bf16 %v3239_v19, %v3239_v19 }
0x18cc   : > { %v8397_v62 = vpop.f32.mrf.mxu1 }
0x18cd   : > { %8404 = vmatmul.mubr.msk.bf16.vlgmr.msra.gmra.mxu0 %vm924_vm1, %v3245_v2 }
0x18ce   : > { %v3242_v17 = vpop.f32.mrf.mxu1  ;;  %8419 = vmatprep.mubr.msk.bf16.mxu0 %vm9507_vm0, %v9506_v0  ;;  %8416 = vmatpush3.bf16.msra.mxu0 %v9064_v24 }
0x18cf   : > { %8417 = vmatprep.subr.bf16.mxu0 %v9506_v0 }
0x18d0   : > { %v8398_v61 = vpop.f32.mrf.mxu1 }
0x18d2   : > { %v3374_v1 = vpop.f32.mrf.mxu1  ;;  %8418 = vmatpush3.bf16.msra.mxu0 %v9065_v25 }
0x18d3   : > { %3383 = vrot.lane.b32.xlu0 %v3374_v1, %s9513_s21  ;;  %8435 = vmatprep.subr.bf16.mxu0 %v9506_v0 }
0x18d4   : > { %v8413_v22 = vpop.f32.mrf.mxu1 }
0x18d6   : > { %v3377_v20 = vpop.f32.mrf.mxu1 }
0x18d7   : > { %3398 = vrot.lane.b32.xlu0 %v7758_v5, %s9513_s21  ;;  %3385 = vrot.lane.b32.xlu1 %v3377_v20, %s9513_s21 }
0x18d8   : > { %v8414_v23 = vpop.f32.mrf.mxu1 }
0x1945   : > { %v3384_v21 = vpop.permute.xlu0 %3383 }
0x1946   : > { %v3389_v30 = vadd.f32 %v3384_v21, %v10332_v47 }
0x1949   : > { %v3399_v31 = vpop.permute.xlu0 %3398  ;;  %v3386_v32 = vpop.permute.xlu1 %3385 }
0x194a   : > { %v3401_v33 = vadd.f32 %v3399_v31, %v3389_v30  ;;  %v3390_v34 = vadd.f32 %v3386_v32, %v10334_v50 }
0x194c   : > { %v3402_v35 = vadd.f32 %v3399_v31, %v3390_v34  ;;  %v3403_v36 = vmax.f32 %v3401_v33, 0.0 }
0x194e   : > { %v3404_v52 = vmax.f32 %v3402_v35, 0.0 }
0x1950   : > { %v3466_v39 = vpack.c.bf16 %v3404_v52, %v3403_v36 }
0x1952   : > { %3477 = vrot.lane.b32.xlu0 %v3466_v39, %s9509_s6 }
0x198d   : > { %v3300_v56 = vpop.f32.mrf.mxu0 }
0x198e   : > { %v3306_v44 = vadd.f32 %v3300_v56, %v10301_v38 }
0x198f   : > { %v8405_v46 = vpop.f32.mrf.mxu0 }
0x1990   : > { %v3315_v43 = vadd.f32 %v7754_v41, %v3306_v44 }
0x1991   : > { %v3303_v13 = vpop.f32.mrf.mxu0 }
0x1992   : > { %v10499_v45 = vmax.f32 %v3315_v43, 0.0 }
0x1993   : > { %v8406_v47 = vpop.f32.mrf.mxu0 }
0x1994   : > { %v3405_v48 = vpack.c.bf16 %v10499_v45, %v10499_v45 }
0x1996   : > { %8420 = vmatmul.mubr.msk.bf16.vlgmr.msra.gmra.mxu0 %vm924_vm1, %v3405_v48 }
0x1997   : > { %8437 = vmatprep.mubr.msk.bf16.mxu0 %vm9507_vm0, %v9506_v0 }
0x19c4   : > { %v3478_v50 = vpop.permute.xlu0 %3477 }
0x19c5   : > { %8432 = vmatmul.mubr.msk.bf16.vlgmr.msra.gmra.mxu1 %vm1159_vm4, %v3478_v50 }
0x19c6   : > { %8448 = vmatpush3.bf16.msra.mxu1 %v10312_v42  ;;  %8451 = vmatprep.mubr.msk.bf16.mxu1 %vm9507_vm0, %v9506_v0 }
0x19c7   : > { %8449 = vmatprep.subr.bf16.mxu1 %v9506_v0 }
0x19ca   : > { %8450 = vmatpush3.bf16.msra.mxu1 %v10321_v40 }
0x19cb   : > { %8461 = vmatprep.subr.bf16.mxu1 %v9506_v0 }
0x1a56   : > { %v3460_v38 = vpop.f32.mrf.mxu0 }
0x1a57   : > { %v3547_v51 = vpack.c.bf16 %v3460_v38, %v3460_v38 }
0x1a58   : > { %v8421_v54 = vpop.f32.mrf.mxu0 }
0x1a59   : > { %v3549_v58 = vsel %vm1012_vm2, %v3547_v51, 0  ;;  %3593 = vrot.lane.b32.xlu1 %v3547_v51, %s9509_s6 }
0x1a5a   : > { %v3463_v63 = vpop.f32.mrf.mxu0  ;;  %8436 = vmatpush3.bf16.msra.mxu0 %v3549_v58 }
0x1a5b   : > { %8441 = vmatprep.subr.bf16.mxu0 %v9506_v0 }
0x1a5c   : > { %v8422_v42 = vpop.f32.mrf.mxu0 }
0x1a5d   : > { %8438 = vmatmul.mubr.msk.bf16.vlgmr.msra.gmra.mxu0 %vm1210_vm5, %v9912_v37 }
0x1a5e   : > { %8443 = vmatprep.mubr.msk.bf16.mxu0 %vm9507_vm0, %v9506_v0 }
0x1a85   : > { %v10520_v40 = vpop.f32.mrf.mxu1 }
0x1a87   : > { %v8433_v4 = vpop.f32.mrf.mxu1 }
0x1a89   : > { %v10522_v60 = vpop.f32.mrf.mxu1 }
0x1a8b   : > { %v8434_v55 = vpop.f32.mrf.mxu1 }
0x1acb   : > { %v3594_v3 = vpop.permute.xlu1 %3593 }
0x1acc   : > { %v3596_v6 = vsel %vm1012_vm2, %v3594_v3, 0 }
0x1acd   : > { %8442 = vmatpush3.bf16.msra.mxu0 %v3596_v6 }
0x1ace   : > { %8455 = vmatprep.subr.bf16.mxu0 %v9506_v0 }
0x1ad0   : > { %8444 = vmatmul.mubr.msk.bf16.vlgmr.msra.gmra.mxu0 %vm1210_vm5, %v10339_v59 }
0x1ad1   : > { %8457 = vmatprep.mubr.msk.bf16.mxu0 %vm9507_vm0, %v9506_v0 }
0x1b1d   : > { %v10530_v49 = vpop.f32.mrf.mxu0 }
0x1b1f   : > { %v8439_v53 = vpop.f32.mrf.mxu0 }
0x1b21   : > { %v10532_v57 = vpop.f32.mrf.mxu0 }
0x1b23   : > { %v8440_v10 = vpop.f32.mrf.mxu0 }
0x1b90   : > { %v10534_v14 = vpop.f32.mrf.mxu0 }
0x1b91   : > { %v3639_v19 = vadd.f32 %v10534_v14, %v10520_v40 }
0x1b92   : > { %v8445_v2 = vpop.f32.mrf.mxu0 }
0x1b93   : > { %v3641_v17 = vmul.f32 %v3639_v19, %v10530_v49 }
0x1b94   : > { %v10538_v62 = vpop.f32.mrf.mxu0 }
0x1b95   : > { %v3640_v59 = vadd.f32 %v10538_v62, %v10522_v60  ;;  %v3643_v22 = vmul.f32 0.35355338, %v3641_v17 }
0x1b96   : > { %v8446_v61 = vpop.f32.mrf.mxu0 }
0x1b97   : > { %v3642_v1 = vmul.f32 %v3640_v59, %v10532_v57 }
0x1b99   : > { %v3644_v5 = vmul.f32 0.35355338, %v3642_v1 }
0x1b9b   : > { %v3645_v20 = vpack.c.bf16 %v3644_v5, %v3643_v22 }
0x1b9d   : > { %8452 = vmatmul.mubr.msk.bf16.vlgmr.msra.gmra.mxu1 %vm924_vm1, %v3645_v20 }
0x1b9e   : > { %8463 = vmatprep.mubr.msk.bf16.mxu1 %vm9507_vm0, %v9506_v0 }
0x1c5d   : > { %v10547_v23 = vpop.f32.mrf.mxu1 }
0x1c5e   : > { %3747 = vperm.xlu0 %8990, %v10547_v23   ;;  %3692 = vperm.xlu1 %8988, %v10547_v23  }
0x1c5f   : > { %v8453_v24 = vpop.f32.mrf.mxu1 }
0x1c61   : > { %v10551_v25 = vpop.f32.mrf.mxu1 }
0x1c62   : > { %8991 = vset.pattern.permute.xlu0 %v9508_v8  ;;  %8989 = vset.pattern.permute.xlu1 %v9510_v9 }
0x1c63   : > { %3720 = vperm.xlu1 %8989, %v10547_v23   ;;  %3697 = vperm.xlu0 %8991, %v10551_v25   ;;  %v8454_v26 = vpop.f32.mrf.mxu1 }
0x1c67   : > { %3724 = vperm.xlu1 %8989, %v10551_v25   ;;  %8994 = vset.pattern.permute.xlu0 %v9512_v12 }
0x1c68   : > { %3778 = vperm.xlu0 %8994, %v10551_v25  }
0x1c6b   : > { %8992 = vset.pattern.permute.xlu1 %v9511_v11 }
0x1c6c   : > { %3751 = vperm.xlu1 %8992, %v10551_v25   ;;  %8997 = vset.pattern.permute.xlu0 %v9511_v11 }
0x1c70   : > { %8993 = vset.pattern.permute.xlu1 %v9512_v12 }
0x1c71   : > { %3774 = vperm.xlu1 %8993, %v10547_v23  }
0x1c75   : > { %8995 = vset.pattern.permute.xlu1 %v9508_v8 }
0x1cd9   : > { %v3748_v27 = vpop.permute.xlu0 %3747  ;;  %v3693_v28 = vpop.permute.xlu1 %3692 }
0x1cda   : > { %v3700_v15 = vsel %vm9985_vm6, %v3693_v28, -1e+30  ;;  %v3754_v43 = vsel %vm9985_vm6, %v3748_v27, -1e+30 }
0x1cdb   : > { %v3702_v32 = vsel %vm1210_vm5, %v3700_v15, -inf  ;;  %v3756_v51 = vsel %vm1210_vm5, %v3754_v43, -inf }
0x1cde   : > { %v3721_v21 = vpop.permute.xlu1 %3720  ;;  %v3698_v30 = vpop.permute.xlu0 %3697 }
0x1cdf   : > { %v3701_v31 = vsel %vm9989_vm7, %v3698_v30, -1e+30  ;;  %v3727_v34 = vsel %vm9985_vm6, %v3721_v21, -1e+30 }
0x1ce0   : > { %v3703_v33 = vsel %vm1210_vm5, %v3701_v31, -inf  ;;  %v3729_v56 = vsel %vm1210_vm5, %v3727_v34, -inf }
0x1ce1   : > { %v3704_v35 = vmax.f32 %v3702_v32, %v3703_v33 }
0x1ce2   : > { %v3725_v36 = vpop.permute.xlu1 %3724 }
0x1ce3   : > { %v3705_v52 = vrot.slane %v3704_v35, 4  ;;  %v3728_v39 = vsel %vm9989_vm7, %v3725_v36, -1e+30  ;;  %v3779_v50 = vpop.permute.xlu0 %3778 }
0x1ce4   : > { %v3730_v41 = vsel %vm1210_vm5, %v3728_v39, -inf  ;;  %v3782_v4 = vsel %vm9989_vm7, %v3779_v50, -1e+30 }
0x1ce5   : > { %v3706_v44 = vmax.f32 %v3704_v35, %v3705_v52  ;;  %v3731_v46 = vmax.f32 %v3729_v56, %v3730_v41  ;;  %v3784_v17 = vsel %vm1210_vm5, %v3782_v4, -inf }
0x1ce7   : > { %v3732_v13 = vrot.slane %v3731_v46, 4  ;;  %v3752_v47 = vpop.permute.xlu1 %3751  ;;  %v3707_v48 = vrot.slane %v3706_v44, 2 }
0x1ce8   : > { %v3755_v38 = vsel %vm9989_vm7, %v3752_v47, -1e+30 }
0x1ce9   : > { %v3733_v54 = vmax.f32 %v3731_v46, %v3732_v13  ;;  %v3757_v58 = vsel %vm1210_vm5, %v3755_v38, -inf  ;;  %v3708_v63 = vmax.f32 %v3706_v44, %v3707_v48 }
0x1cea   : > { %v3758_v42 = vmax.f32 %v3756_v51, %v3757_v58 }
0x1ceb   : > { %v3709_v55 = vrot.slane %v3708_v63, 1  ;;  %v3734_v3 = vrot.slane %v3733_v54, 2 }
0x1cec   : > { %v3759_v6 = vrot.slane %v3758_v42, 4  ;;  %v3775_v53 = vpop.permute.xlu1 %3774 }
0x1ced   : > { %v3781_v10 = vsel %vm9985_vm6, %v3775_v53, -1e+30  ;;  %v3710_v19 = vmax.f32 %v3708_v63, %v3709_v55  ;;  %v3735_v2 = vmax.f32 %v3733_v54, %v3734_v3 }
0x1cee   : > { %v3760_v59 = vmax.f32 %v3758_v42, %v3759_v6  ;;  %v3783_v61 = vsel %vm1210_vm5, %v3781_v10, -inf }
0x1cef   : > { %v3785_v1 = vmax.f32 %v3783_v61, %v3784_v17  ;;  %v3712_v22 = vsel %vm9989_vm7, %v3710_v19, -1e+30  ;;  %v3711_v5 = vsel %vm9985_vm6, %v3710_v19, -1e+30  ;;  %v3736_v20 = vrot.slane %v3735_v2, 1 }
0x1cf0   : > { %v3716_v24 = vsel %vm1210_vm5, %v3712_v22, -inf  ;;  %v3713_v26 = vsel %vm1210_vm5, %v3711_v5, -inf  ;;  %v3761_v27 = vrot.slane %v3760_v59, 2 }
0x1cf1   : > { %v3786_v28 = vrot.slane %v3785_v1, 4  ;;  %3717 = vmax.xlane.f32.xlu0 %v3716_v24  ;;  %3714 = vmax.xlane.f32.xlu1 %v3713_v26  ;;  %v3737_v15 = vmax.f32 %v3735_v2, %v3736_v20 }
0x1cf2   : > { %v3762_v21 = vmax.f32 %v3760_v59, %v3761_v27 }
0x1cf3   : > { %v3787_v30 = vmax.f32 %v3785_v1, %v3786_v28  ;;  %v3739_v31 = vsel %vm9989_vm7, %v3737_v15, -1e+30  ;;  %v3738_v32 = vsel %vm9985_vm6, %v3737_v15, -1e+30 }
0x1cf4   : > { %v3743_v33 = vsel %vm1210_vm5, %v3739_v31, -inf  ;;  %v3740_v34 = vsel %vm1210_vm5, %v3738_v32, -inf  ;;  %v3763_v35 = vrot.slane %v3762_v21, 1 }
0x1cf5   : > { %3744 = vmax.xlane.f32.xlu0 %v3743_v33  ;;  %3741 = vmax.xlane.f32.xlu1 %v3740_v34  ;;  %v3788_v36 = vrot.slane %v3787_v30, 2 }
0x1cf6   : > { %v3764_v52 = vmax.f32 %v3762_v21, %v3763_v35 }
0x1cf7   : > { %v3789_v39 = vmax.f32 %v3787_v30, %v3788_v36 }
0x1cf8   : > { %v3766_v56 = vsel %vm9989_vm7, %v3764_v52, -1e+30  ;;  %v3765_v41 = vsel %vm9985_vm6, %v3764_v52, -1e+30 }
0x1cf9   : > { %v3770_v44 = vsel %vm1210_vm5, %v3766_v56, -inf  ;;  %v3767_v46 = vsel %vm1210_vm5, %v3765_v41, -inf  ;;  %v3790_v43 = vrot.slane %v3789_v39, 1 }
0x1cfa   : > { %3771 = vmax.xlane.f32.xlu0 %v3770_v44  ;;  %3768 = vmax.xlane.f32.xlu1 %v3767_v46 }
0x1cfb   : > { %v3791_v13 = vmax.f32 %v3789_v39, %v3790_v43 }
0x1cfd   : > { %v3793_v47 = vsel %vm9989_vm7, %v3791_v13, -1e+30  ;;  %v3792_v48 = vsel %vm9985_vm6, %v3791_v13, -1e+30  ;;  %v9072_v13 = vld [vmem:[#allocation10 + $0x38] sm:$0xff]  }
0x1cfe   : > { %v3797_v50 = vsel %vm1210_vm5, %v3793_v47, -inf  ;;  %v3794_v38 = vsel %vm1210_vm5, %v3792_v48, -inf }
0x1cff   : > { %3798 = vmax.xlane.f32.xlu0 %v3797_v50  ;;  %3795 = vmax.xlane.f32.xlu1 %v3794_v38 }
0x1d10   : > { %3949 = vrot.lane.b32.xlu1 %v10520_v40, %s9513_s21 }
0x1d15   : > { %3951 = vrot.lane.b32.xlu0 %v10522_v60, %s9513_s21 }
0x1d7a   : > { %v3715_v51 = vpop.xlane.xlu1 %3714  ;;  %v3718_v54 = vpop.xlane.xlu0 %3717 }
0x1d7e   : > { %v3742_v58 = vpop.xlane.xlu1 %3741  ;;  %v3745_v63 = vpop.xlane.xlu0 %3744 }
0x1d7f   : > { %v3800_v55 = vsel %vm1486_vm8, %v3715_v51, %v3742_v58  ;;  %v3801_v3 = vsel %vm1486_vm8, %v3718_v54, %v3745_v63 }
0x1d83   : > { %v3769_v42 = vpop.xlane.xlu1 %3768  ;;  %v3772_v4 = vpop.xlane.xlu0 %3771 }
0x1d84   : > { %v3802_v6 = vsel %vm1489_vm9, %v3800_v55, %v3769_v42  ;;  %v3803_v53 = vsel %vm1489_vm9, %v3801_v3, %v3772_v4  ;;  %v9070_v4 = vld [vmem:[#allocation13 + $0x38] sm:$0xff]   ;;  %v9071_v55 = vld [vmem:[#allocation13 + $0x30] sm:$0xff]   ;;  %v4081_v3 = vadd.f32 %v10538_v62, %v10532_v57 }
0x1d88   : > { %v3796_v10 = vpop.xlane.xlu1 %3795  ;;  %v3799_v19 = vpop.xlane.xlu0 %3798 }
0x1d89   : > { %v3804_v2 = vsel %vm1492_vm10, %v3802_v6, %v3796_v10  ;;  %v3805_v17 = vsel %vm1492_vm10, %v3803_v53, %v3799_v19  ;;  %v4080_v6 = vadd.f32 %v10534_v14, %v10530_v49  ;;  %v9073_v10 = vld [vmem:[#allocation10 + $0x30] sm:$0xff]  }
0x1d8a   : > { %v3806_v59 = vsub.f32 %v10547_v23, %v3804_v2  ;;  %v3807_v61 = vsub.f32 %v10551_v25, %v3805_v17 }
0x1d8b   : > { %v4082_v53 = vpack.c.bf16 %v4081_v3, %v4080_v6  ;;  %v10722_v3 = vld [vmem:[%s9883_s11] sm:$0xff]  }
0x1d8c   : > { %v3808_v1 = vmul.f32 1.442695, %v3806_v59  ;;  %v3810_v22 = vmul.f32 1.442695, %v3807_v61  ;;  %v3950_v5 = vpop.permute.xlu1 %3949  ;;  %v3952_v24 = vpop.permute.xlu0 %3951  ;;  %v7785_v59 = vld [vmem:[#allocation14 + $0x3] ss:$0 sm:$0xff] }
0x1d8d   : > { %v3955_v20 = vadd.f32 %v3950_v5, %v10534_v14  ;;  %v3956_v26 = vadd.f32 %v3952_v24, %v10538_v62  ;;  %v9075_v5 = vld [vmem:[%s11529_s12 + $0x40] sm:$0xff]  }
0x1d8e   : > { %9147 = vpow2.f32 %v3808_v1  ;;  %v9077_v24 = vld [vmem:[#allocation8 + $0x90] sm:$0xff]  }
0x1d8f   : > { %9149 = vpow2.f32 %v3810_v22  ;;  %3959 = vrot.lane.b32.xlu1 %v3955_v20, %s9509_s6  ;;  %v9074_v22 = vld [vmem:[%s11529_s12 + $0x48] sm:$0xff]  }
0x1d90   : > { %v9076_v20 = vld [vmem:[#allocation8 + $0x98] sm:$0xff]  }
0x1d93   : > { %3961 = vrot.lane.b32.xlu1 %v3956_v26, %s9509_s6  ;;  %v9078_v26 = vld [vmem:[#allocation8 + $0x88] sm:$0xff]  }
0x1d9b   : > { %v9148_v27 = vpop.eup %9147 }
0x1d9c   : > { %v9150_v28 = vpop.eup %9149 }
0x1d9d   : > { %v3812_v15 = vpack.c.bf16 %v9150_v28, %v9148_v27 }
0x1d9f   : > { %8456 = vmatpush3.bf16.msra.mxu0 %v3812_v15 }
0x1da0   : > { %8467 = vmatprep.subr.bf16.mxu0 %v9506_v0 }
0x1da2   : > { %8458 = vmatmul.mubr.msk.bf16.vlgmr.msra.gmra.mxu0 %vm1519_vm11, %v10059_v7 }
0x1da3   : > { %8468 = vmatpush3.bf16.msra.mxu0 %v10072_v29  ;;  %8469 = vmatprep.mubr.msk.bf16.mxu0 %vm9507_vm0, %v9506_v0 }
0x1da4   : > { %8479 = vmatprep.subr.bf16.mxu0 %v9506_v0 }
0x1e01   : > { %v3960_v47 = vpop.permute.xlu1 %3959 }
0x1e05   : > { %v3962_v38 = vpop.permute.xlu1 %3961 }
0x1e62   : > { %v3847_v23 = vpop.f32.mrf.mxu0 }
0x1e63   : > { %v3853_v25 = vpack.c.bf16 %v3847_v23, %v3847_v23 }
0x1e64   : > { %v8459_v21 = vpop.f32.mrf.mxu0 }
0x1e65   : > { %v3855_v30 = vsel %vm1012_vm2, %v3853_v25, 0 }
0x1e66   : > { %v3850_v31 = vpop.f32.mrf.mxu0  ;;  %8462 = vmatpush3.bf16.msra.mxu1 %v3855_v30 }
0x1e67   : > { %8473 = vmatprep.subr.bf16.mxu1 %v9506_v0 }
0x1e68   : > { %v8460_v32 = vpop.f32.mrf.mxu0 }
0x1e69   : > { %8464 = vmatmul.mubr.msk.bf16.vlgmr.msra.gmra.mxu1 %vm1210_vm5, %v9912_v37 }
0x1e6a   : > { %8475 = vmatprep.mubr.msk.bf16.mxu1 %vm9507_vm0, %v9506_v0 }
0x1f29   : > { %v3891_v33 = vpop.f32.mrf.mxu1 }
0x1f2a   : > { %v3892_v34 = vadd.f32 1e-30, %v3891_v33 }
0x1f2b   : > { %v8465_v35 = vpop.f32.mrf.mxu1 }
0x1f2c   : > { %9151 = vrcp.f32 %v3892_v34 }
0x1f2d   : > { %v3894_v36 = vpop.f32.mrf.mxu1 }
0x1f2e   : > { %v3895_v52 = vadd.f32 1e-30, %v3894_v36  ;;  %v7781_v36 = vld [vmem:[#allocation11 + $0x3] ss:$0 sm:$0xff] }
0x1f2f   : > { %v8466_v39 = vpop.f32.mrf.mxu1 }
0x1f30   : > { %9153 = vrcp.f32 %v3895_v52 }
0x1f39   : > { %v9152_v56 = vpop.eup %9151 }
0x1f3a   : > { %v3900_v44 = vmul.f32 %v9152_v56, %v9148_v27  ;;  %v9079_v27 = vld [vmem:[#allocation8 + $0x80] sm:$0xff]  }
0x1f3d   : > { %v9154_v41 = vpop.eup %9153 }
0x1f3e   : > { %v3901_v46 = vmul.f32 %v9154_v41, %v9150_v28 }
0x1f40   : > { %v3902_v43 = vpack.c.bf16 %v3901_v46, %v3900_v44 }
0x1f42   : > { %8470 = vmatmul.mubr.msk.bf16.vlgmr.msra.gmra.mxu0 %vm1613_vm13, %v3902_v43  ;;  %v10704_v43 = vld [vmem:[%s11527_s10] sm:$0xff]  }
0x1f43   : > { %8483 = vmatprep.mubr.msk.bf16.mxu0 %vm9507_vm0, %v9506_v0  ;;  %8480 = vmatpush3.bf16.msra.mxu0 %v9072_v13 }
0x1f44   : > { %8481 = vmatprep.subr.bf16.mxu0 %v9506_v0 }
0x1f47   : > { %8482 = vmatpush3.bf16.msra.mxu0 %v9073_v10 }
0x1f48   : > { %8495 = vmatprep.subr.bf16.mxu0 %v9506_v0 }
0x2002   : > { %v3940_v48 = vpop.f32.mrf.mxu0 }
0x2003   : > { %v3965_v54 = vmul.f32 %v3960_v47, %v3940_v48 }
0x2004   : > { %v8471_v50 = vpop.f32.mrf.mxu0 }
0x2006   : > { %v3943_v51 = vpop.f32.mrf.mxu0 }
0x2007   : > { %v3966_v58 = vmul.f32 %v3962_v38, %v3943_v51 }
0x2008   : > { %v8472_v63 = vpop.f32.mrf.mxu0 }
0x2009   : > { %v3967_v42 = vpack.c.bf16 %v3966_v58, %v3965_v54 }
0x200b   : > { %8474 = vmatpush3.bf16.msra.mxu1 %v3967_v42 }
0x200c   : > { %8487 = vmatprep.subr.bf16.mxu1 %v9506_v0 }
0x200e   : > { %8476 = vmatmul.mubr.msk.bf16.vlgmr.msra.gmra.mxu1 %vm1519_vm11, %v10059_v7 }
0x200f   : > { %8488 = vmatpush3.bf16.msra.mxu1 %v9070_v4  ;;  %8491 = vmatprep.mubr.msk.bf16.mxu1 %vm9507_vm0, %v9506_v0 }
0x2010   : > { %8489 = vmatprep.subr.bf16.mxu1 %v9506_v0 }
0x2013   : > { %8490 = vmatpush3.bf16.msra.mxu1 %v9071_v55 }
0x2014   : > { %8503 = vmatprep.subr.bf16.mxu1 %v9506_v0 }
0x2016   : > { %8492 = vmatmul.mubr.msk.bf16.vlgmr.msra.gmra.mxu1 %vm924_vm1, %v4082_v53 }
0x2017   : > { %8511 = vmatprep.mubr.msk.bf16.mxu1 %vm9507_vm0, %v9506_v0  ;;  %8504 = vmatpush3.bf16.msra.mxu1 %v9076_v20 }
0x2018   : > { %8505 = vmatprep.subr.bf16.mxu1 %v9506_v0 }
0x201b   : > { %8506 = vmatpush3.bf16.msra.mxu1 %v9077_v24 }
0x201c   : > { %8507 = vmatprep.subr.bf16.mxu1 %v9506_v0 }
0x201f   : > { %8508 = vmatpush3.bf16.msra.mxu1 %v9078_v26 }
0x2020   : > { %8509 = vmatprep.subr.bf16.mxu1 %v9506_v0 }
0x2023   : > { %8510 = vmatpush3.bf16.msra.mxu1 %v9079_v27 }
0x2024   : > { %8527 = vmatprep.subr.bf16.mxu1 %v9506_v0 }
0x20ce   : > { %v4002_v19 = vpop.f32.mrf.mxu1 }
0x20cf   : > { %v4008_v57 = vpack.c.bf16 %v4002_v19, %v4002_v19 }
0x20d0   : > { %v8477_v62 = vpop.f32.mrf.mxu1 }
0x20d1   : > { %8484 = vmatmul.mubr.msk.bf16.vlgmr.msra.gmra.mxu0 %vm924_vm1, %v4008_v57 }
0x20d2   : > { %v4005_v2 = vpop.f32.mrf.mxu1  ;;  %8499 = vmatprep.mubr.msk.bf16.mxu0 %vm9507_vm0, %v9506_v0  ;;  %8496 = vmatpush3.bf16.msra.mxu0 %v9074_v22 }
0x20d3   : > { %8497 = vmatprep.subr.bf16.mxu0 %v9506_v0 }
0x20d4   : > { %v8478_v49 = vpop.f32.mrf.mxu1 }
0x20d6   : > { %v4137_v14 = vpop.f32.mrf.mxu1  ;;  %8498 = vmatpush3.bf16.msra.mxu0 %v9075_v5 }
0x20d7   : > { %4146 = vrot.lane.b32.xlu0 %v4137_v14, %s9513_s21  ;;  %8515 = vmatprep.subr.bf16.mxu0 %v9506_v0 }
0x20d8   : > { %v8493_v17 = vpop.f32.mrf.mxu1 }
0x20da   : > { %v4140_v61 = vpop.f32.mrf.mxu1 }
0x20db   : > { %4161 = vrot.lane.b32.xlu0 %v7785_v59, %s9513_s21  ;;  %4148 = vrot.lane.b32.xlu1 %v4140_v61, %s9513_s21 }
0x20dc   : > { %v8494_v1 = vpop.f32.mrf.mxu1 }
0x2149   : > { %v4147_v28 = vpop.permute.xlu0 %4146 }
0x214a   : > { %v4152_v15 = vadd.f32 %v4147_v28, %v10520_v40 }
0x214d   : > { %v4162_v23 = vpop.permute.xlu0 %4161  ;;  %v4149_v25 = vpop.permute.xlu1 %4148 }
0x214e   : > { %v4164_v21 = vadd.f32 %v4162_v23, %v4152_v15  ;;  %v4153_v30 = vadd.f32 %v4149_v25, %v10522_v60 }
0x2150   : > { %v4165_v31 = vadd.f32 %v4162_v23, %v4153_v30  ;;  %v4166_v32 = vmax.f32 %v4164_v21, 0.0 }
0x2152   : > { %v4167_v33 = vmax.f32 %v4165_v31, 0.0 }
0x2154   : > { %v4229_v34 = vpack.c.bf16 %v4167_v33, %v4166_v32 }
0x2156   : > { %4240 = vrot.lane.b32.xlu0 %v4229_v34, %s9509_s6 }
0x2191   : > { %v4063_v35 = vpop.f32.mrf.mxu0 }
0x2192   : > { %v4069_v52 = vadd.f32 %v4063_v35, %v10499_v45  ;;  %v10695_v45 = vld [vmem:[%s11527_s10 + $0x8] sm:$0xff]  }
0x2193   : > { %v8485_v39 = vpop.f32.mrf.mxu0 }
0x2194   : > { %v4078_v56 = vadd.f32 %v7781_v36, %v4069_v52 }
0x2195   : > { %v4066_v41 = vpop.f32.mrf.mxu0 }
0x2196   : > { %v10684_v44 = vmax.f32 %v4078_v56, 0.0 }
0x2197   : > { %v8486_v40 = vpop.f32.mrf.mxu0 }
0x2198   : > { %v4168_v46 = vpack.c.bf16 %v10684_v44, %v10684_v44 }
0x219a   : > { %8500 = vmatmul.mubr.msk.bf16.vlgmr.msra.gmra.mxu0 %vm924_vm1, %v4168_v46 }
0x219b   : > { %8517 = vmatprep.mubr.msk.bf16.mxu0 %vm9507_vm0, %v9506_v0 }
0x21c8   : > { %v4241_v60 = vpop.permute.xlu0 %4240 }
0x21c9   : > { %8512 = vmatmul.mubr.msk.bf16.vlgmr.msra.gmra.mxu1 %vm1159_vm4, %v4241_v60 }
0x21ca   : > { %8528 = vmatpush3.bf16.msra.mxu1 %v10695_v45  ;;  %8531 = vmatprep.mubr.msk.bf16.mxu1 %vm9507_vm0, %v9506_v0 }
0x21cb   : > { %8529 = vmatprep.subr.bf16.mxu1 %v9506_v0 }
0x21ce   : > { %8530 = vmatpush3.bf16.msra.mxu1 %v10704_v43 }
0x21cf   : > { %8541 = vmatprep.subr.bf16.mxu1 %v9506_v0 }
0x225a   : > { %v4223_v13 = vpop.f32.mrf.mxu0 }
0x225b   : > { %v4310_v47 = vpack.c.bf16 %v4223_v13, %v4223_v13 }
0x225c   : > { %v8501_v48 = vpop.f32.mrf.mxu0 }
0x225d   : > { %v4312_v50 = vsel %vm1012_vm2, %v4310_v47, 0  ;;  %4356 = vrot.lane.b32.xlu1 %v4310_v47, %s9509_s6 }
0x225e   : > { %v4226_v38 = vpop.f32.mrf.mxu0  ;;  %8516 = vmatpush3.bf16.msra.mxu0 %v4312_v50 }
0x225f   : > { %8521 = vmatprep.subr.bf16.mxu0 %v9506_v0 }
0x2260   : > { %v8502_v51 = vpop.f32.mrf.mxu0 }
0x2261   : > { %8518 = vmatmul.mubr.msk.bf16.vlgmr.msra.gmra.mxu0 %vm1210_vm5, %v9912_v37 }
0x2262   : > { %8523 = vmatprep.mubr.msk.bf16.mxu0 %vm9507_vm0, %v9506_v0 }
0x2289   : > { %v10715_v54 = vpop.f32.mrf.mxu1 }
0x228b   : > { %v8513_v58 = vpop.f32.mrf.mxu1 }
0x228d   : > { %v10717_v63 = vpop.f32.mrf.mxu1 }
0x228f   : > { %v8514_v42 = vpop.f32.mrf.mxu1 }
0x22cf   : > { %v4357_v4 = vpop.permute.xlu1 %4356 }
0x22d0   : > { %v4359_v55 = vsel %vm1012_vm2, %v4357_v4, 0 }
0x22d1   : > { %8522 = vmatpush3.bf16.msra.mxu0 %v4359_v55 }
0x22d2   : > { %8535 = vmatprep.subr.bf16.mxu0 %v9506_v0 }
0x22d4   : > { %8524 = vmatmul.mubr.msk.bf16.vlgmr.msra.gmra.mxu0 %vm1210_vm5, %v10722_v3 }
0x22d5   : > { %8537 = vmatprep.mubr.msk.bf16.mxu0 %vm9507_vm0, %v9506_v0 }
0x2321   : > { %v10728_v6 = vpop.f32.mrf.mxu0 }
0x2323   : > { %v8519_v53 = vpop.f32.mrf.mxu0 }
0x2325   : > { %v10730_v10 = vpop.f32.mrf.mxu0 }
0x2327   : > { %v8520_v19 = vpop.f32.mrf.mxu0 }
0x2394   : > { %v10732_v57 = vpop.f32.mrf.mxu0 }
0x2395   : > { %v4402_v62 = vadd.f32 %v10732_v57, %v10715_v54 }
0x2396   : > { %v8525_v2 = vpop.f32.mrf.mxu0 }
0x2397   : > { %v4404_v14 = vmul.f32 %v4402_v62, %v10728_v6 }
0x2398   : > { %v10736_v49 = vpop.f32.mrf.mxu0 }
0x2399   : > { %v4403_v17 = vadd.f32 %v10736_v49, %v10717_v63  ;;  %v4406_v1 = vmul.f32 0.35355338, %v4404_v14 }
0x239a   : > { %v8526_v59 = vpop.f32.mrf.mxu0 }
0x239b   : > { %v4405_v61 = vmul.f32 %v4403_v17, %v10730_v10 }
0x239d   : > { %v4407_v22 = vmul.f32 0.35355338, %v4405_v61 }
0x239f   : > { %v4408_v5 = vpack.c.bf16 %v4407_v22, %v4406_v1 }
0x23a1   : > { %8532 = vmatmul.mubr.msk.bf16.vlgmr.msra.gmra.mxu1 %vm924_vm1, %v4408_v5 }
0x23a2   : > { %8543 = vmatprep.mubr.msk.bf16.mxu1 %vm9507_vm0, %v9506_v0 }
0x2461   : > { %v10745_v20 = vpop.f32.mrf.mxu1 }
0x2462   : > { %4510 = vperm.xlu0 %8997, %v10745_v20   ;;  %4455 = vperm.xlu1 %8995, %v10745_v20  }
0x2463   : > { %v8533_v24 = vpop.f32.mrf.mxu1 }
0x2465   : > { %v10749_v26 = vpop.f32.mrf.mxu1 }
0x2466   : > { %8998 = vset.pattern.permute.xlu0 %v9508_v8  ;;  %8996 = vset.pattern.permute.xlu1 %v9510_v9 }
0x2467   : > { %4483 = vperm.xlu1 %8996, %v10745_v20   ;;  %4460 = vperm.xlu0 %8998, %v10749_v26   ;;  %v8534_v27 = vpop.f32.mrf.mxu1 }
0x246b   : > { %4487 = vperm.xlu1 %8996, %v10749_v26   ;;  %9001 = vset.pattern.permute.xlu0 %v9512_v12 }
0x246c   : > { %4541 = vperm.xlu0 %9001, %v10749_v26  }
0x246f   : > { %8999 = vset.pattern.permute.xlu1 %v9511_v11 }
0x2470   : > { %4514 = vperm.xlu1 %8999, %v10749_v26   ;;  %9004 = vset.pattern.permute.xlu0 %v9511_v11 }
0x2474   : > { %9000 = vset.pattern.permute.xlu1 %v9512_v12 }
0x2475   : > { %4537 = vperm.xlu1 %9000, %v10745_v20  }
0x2479   : > { %9002 = vset.pattern.permute.xlu1 %v9508_v8 }
0x24dd   : > { %v4511_v28 = vpop.permute.xlu0 %4510  ;;  %v4456_v15 = vpop.permute.xlu1 %4455 }
0x24de   : > { %v4463_v23 = vsel %vm9985_vm6, %v4456_v15, -1e+30  ;;  %v4517_v46 = vsel %vm9985_vm6, %v4511_v28, -1e+30 }
0x24df   : > { %v4465_v31 = vsel %vm1210_vm5, %v4463_v23, -inf  ;;  %v4519_v38 = vsel %vm1210_vm5, %v4517_v46, -inf }
0x24e2   : > { %v4484_v25 = vpop.permute.xlu1 %4483  ;;  %v4461_v21 = vpop.permute.xlu0 %4460 }
0x24e3   : > { %v4464_v30 = vsel %vm9989_vm7, %v4461_v21, -1e+30  ;;  %v4490_v33 = vsel %vm9985_vm6, %v4484_v25, -1e+30 }
0x24e4   : > { %v4466_v32 = vsel %vm1210_vm5, %v4464_v30, -inf  ;;  %v4492_v39 = vsel %vm1210_vm5, %v4490_v33, -inf }
0x24e5   : > { %v4467_v34 = vmax.f32 %v4465_v31, %v4466_v32 }
0x24e6   : > { %v4488_v35 = vpop.permute.xlu1 %4487 }
0x24e7   : > { %v4468_v36 = vrot.slane %v4467_v34, 4  ;;  %v4491_v52 = vsel %vm9989_vm7, %v4488_v35, -1e+30  ;;  %v4542_v48 = vpop.permute.xlu0 %4541 }
0x24e8   : > { %v4493_v56 = vsel %vm1210_vm5, %v4491_v52, -inf  ;;  %v4545_v55 = vsel %vm9989_vm7, %v4542_v48, -1e+30 }
0x24e9   : > { %v4469_v41 = vmax.f32 %v4467_v34, %v4468_v36  ;;  %v4494_v40 = vmax.f32 %v4492_v39, %v4493_v56  ;;  %v4547_v61 = vsel %vm1210_vm5, %v4545_v55, -inf }
0x24eb   : > { %v4470_v60 = vrot.slane %v4469_v41, 2  ;;  %v4495_v13 = vrot.slane %v4494_v40, 4  ;;  %v4515_v47 = vpop.permute.xlu1 %4514 }
0x24ec   : > { %v4518_v50 = vsel %vm9989_vm7, %v4515_v47, -1e+30 }
0x24ed   : > { %v4496_v51 = vmax.f32 %v4494_v40, %v4495_v13  ;;  %v4520_v58 = vsel %vm1210_vm5, %v4518_v50, -inf  ;;  %v4471_v42 = vmax.f32 %v4469_v41, %v4470_v60 }
0x24ee   : > { %v4521_v4 = vmax.f32 %v4519_v38, %v4520_v58 }
0x24ef   : > { %v4472_v53 = vrot.slane %v4471_v42, 1  ;;  %v4497_v19 = vrot.slane %v4496_v51, 2 }
0x24f0   : > { %v4522_v62 = vrot.slane %v4521_v4, 4  ;;  %v4538_v2 = vpop.permute.xlu1 %4537 }
0x24f1   : > { %v4544_v14 = vsel %vm9985_vm6, %v4538_v2, -1e+30  ;;  %v4473_v17 = vmax.f32 %v4471_v42, %v4472_v53  ;;  %v4498_v59 = vmax.f32 %v4496_v51, %v4497_v19 }
0x24f2   : > { %v4523_v1 = vmax.f32 %v4521_v4, %v4522_v62  ;;  %v4546_v22 = vsel %vm1210_vm5, %v4544_v14, -inf }
0x24f3   : > { %v4548_v5 = vmax.f32 %v4546_v22, %v4547_v61  ;;  %v4475_v24 = vsel %vm9989_vm7, %v4473_v17, -1e+30  ;;  %v4474_v27 = vsel %vm9985_vm6, %v4473_v17, -1e+30  ;;  %v4499_v28 = vrot.slane %v4498_v59, 1 }
0x24f4   : > { %v4524_v15 = vrot.slane %v4523_v1, 2  ;;  %v4479_v23 = vsel %vm1210_vm5, %v4475_v24, -inf  ;;  %v4476_v25 = vsel %vm1210_vm5, %v4474_v27, -inf }
0x24f5   : > { %v4549_v21 = vrot.slane %v4548_v5, 4  ;;  %4480 = vmax.xlane.f32.xlu0 %v4479_v23  ;;  %4477 = vmax.xlane.f32.xlu1 %v4476_v25  ;;  %v4500_v30 = vmax.f32 %v4498_v59, %v4499_v28 }
0x24f6   : > { %v4525_v31 = vmax.f32 %v4523_v1, %v4524_v15 }
0x24f7   : > { %v4550_v32 = vmax.f32 %v4548_v5, %v4549_v21  ;;  %v4502_v33 = vsel %vm9989_vm7, %v4500_v30, -1e+30  ;;  %v4501_v34 = vsel %vm9985_vm6, %v4500_v30, -1e+30 }
0x24f8   : > { %v4506_v35 = vsel %vm1210_vm5, %v4502_v33, -inf  ;;  %v4503_v36 = vsel %vm1210_vm5, %v4501_v34, -inf  ;;  %v4526_v52 = vrot.slane %v4525_v31, 1 }
0x24f9   : > { %v4551_v39 = vrot.slane %v4550_v32, 2  ;;  %4507 = vmax.xlane.f32.xlu0 %v4506_v35  ;;  %4504 = vmax.xlane.f32.xlu1 %v4503_v36 }
0x24fa   : > { %v4527_v56 = vmax.f32 %v4525_v31, %v4526_v52 }
0x24fb   : > { %v4552_v41 = vmax.f32 %v4550_v32, %v4551_v39 }
0x24fc   : > { %v4529_v40 = vsel %vm9989_vm7, %v4527_v56, -1e+30  ;;  %v4528_v46 = vsel %vm9985_vm6, %v4527_v56, -1e+30 }
0x24fd   : > { %v4533_v60 = vsel %vm1210_vm5, %v4529_v40, -inf  ;;  %v4530_v13 = vsel %vm1210_vm5, %v4528_v46, -inf  ;;  %v4553_v47 = vrot.slane %v4552_v41, 1 }
0x24fe   : > { %4534 = vmax.xlane.f32.xlu0 %v4533_v60  ;;  %4531 = vmax.xlane.f32.xlu1 %v4530_v13 }
0x24ff   : > { %v4554_v48 = vmax.f32 %v4552_v41, %v4553_v47 }
0x2501   : > { %v4556_v50 = vsel %vm9989_vm7, %v4554_v48, -1e+30  ;;  %v4555_v38 = vsel %vm9985_vm6, %v4554_v48, -1e+30 }
0x2502   : > { %v4560_v51 = vsel %vm1210_vm5, %v4556_v50, -inf  ;;  %v4557_v58 = vsel %vm1210_vm5, %v4555_v38, -inf }
0x2503   : > { %4561 = vmax.xlane.f32.xlu0 %v4560_v51  ;;  %4558 = vmax.xlane.f32.xlu1 %v4557_v58  ;;  %v9082_v51 = vld [vmem:[#allocation10 + $0x48] sm:$0xff]  }
0x2514   : > { %4712 = vrot.lane.b32.xlu1 %v10715_v54, %s9513_s21 }
0x2519   : > { %4714 = vrot.lane.b32.xlu0 %v10717_v63, %s9513_s21 }
0x257e   : > { %v4478_v42 = vpop.xlane.xlu1 %4477  ;;  %v4481_v4 = vpop.xlane.xlu0 %4480 }
0x2582   : > { %v4505_v55 = vpop.xlane.xlu1 %4504  ;;  %v4508_v53 = vpop.xlane.xlu0 %4507 }
0x2583   : > { %v4563_v2 = vsel %vm1486_vm8, %v4478_v42, %v4505_v55  ;;  %v4564_v14 = vsel %vm1486_vm8, %v4481_v4, %v4508_v53 }
0x2587   : > { %v4532_v19 = vpop.xlane.xlu1 %4531  ;;  %v4535_v62 = vpop.xlane.xlu0 %4534 }
0x2588   : > { %v4565_v17 = vsel %vm1489_vm9, %v4563_v2, %v4532_v19  ;;  %v4566_v59 = vsel %vm1489_vm9, %v4564_v14, %v4535_v62 }
0x258c   : > { %v4559_v61 = vpop.xlane.xlu1 %4558  ;;  %v4562_v1 = vpop.xlane.xlu0 %4561 }
0x258d   : > { %v4567_v22 = vsel %vm1492_vm10, %v4565_v17, %v4559_v61  ;;  %v4568_v5 = vsel %vm1492_vm10, %v4566_v59, %v4562_v1  ;;  %v9080_v17 = vld [vmem:[#allocation13 + $0x48] sm:$0xff]   ;;  %v9081_v59 = vld [vmem:[#allocation13 + $0x40] sm:$0xff]   ;;  %v4844_v61 = vadd.f32 %v10736_v49, %v10730_v10  ;;  %v4843_v1 = vadd.f32 %v10732_v57, %v10728_v6 }
0x258e   : > { %v4569_v24 = vsub.f32 %v10745_v20, %v4567_v22  ;;  %v4570_v27 = vsub.f32 %v10749_v26, %v4568_v5  ;;  %v9083_v5 = vld [vmem:[#allocation10 + $0x40] sm:$0xff]  }
0x258f   : > { %v4845_v22 = vpack.c.bf16 %v4844_v61, %v4843_v1 }
0x2590   : > { %v4571_v28 = vmul.f32 1.442695, %v4569_v24  ;;  %v4573_v15 = vmul.f32 1.442695, %v4570_v27  ;;  %v4713_v23 = vpop.permute.xlu1 %4712  ;;  %v4715_v21 = vpop.permute.xlu0 %4714 }
0x2591   : > { %v4718_v25 = vadd.f32 %v4713_v23, %v10732_v57  ;;  %v4719_v30 = vadd.f32 %v4715_v21, %v10736_v49  ;;  %v9084_v21 = vld [vmem:[%s11529_s12 + $0x58] sm:$0xff]  }
0x2592   : > { %9155 = vpow2.f32 %v4571_v28 }
0x2593   : > { %9157 = vpow2.f32 %v4573_v15  ;;  %4722 = vrot.lane.b32.xlu1 %v4718_v25, %s9509_s6  ;;  %v7812_v15 = vld [vmem:[#allocation14 + $0x4] ss:$0 sm:$0xff] }
0x2597   : > { %4724 = vrot.lane.b32.xlu1 %v4719_v30, %s9509_s6  ;;  %v9085_v30 = vld [vmem:[%s11529_s12 + $0x50] sm:$0xff]  }
0x259f   : > { %v9156_v31 = vpop.eup %9155 }
0x25a0   : > { %v9158_v32 = vpop.eup %9157 }
0x25a1   : > { %v4575_v33 = vpack.c.bf16 %v9158_v32, %v9156_v31 }
0x25a3   : > { %8536 = vmatpush3.bf16.msra.mxu0 %v4575_v33  ;;  %v9088_v33 = vld [vmem:[#allocation8 + $0xa8] sm:$0xff]  }
0x25a4   : > { %8547 = vmatprep.subr.bf16.mxu0 %v9506_v0 }
0x25a6   : > { %8538 = vmatmul.mubr.msk.bf16.vlgmr.msra.gmra.mxu0 %vm1519_vm11, %v10059_v7 }
0x25a7   : > { %8548 = vmatpush3.bf16.msra.mxu0 %v10072_v29  ;;  %8549 = vmatprep.mubr.msk.bf16.mxu0 %vm9507_vm0, %v9506_v0 }
0x25a8   : > { %8559 = vmatprep.subr.bf16.mxu0 %v9506_v0 }
0x2605   : > { %v4723_v58 = vpop.permute.xlu1 %4722 }
0x2609   : > { %v4725_v55 = vpop.permute.xlu1 %4724 }
0x2666   : > { %v4610_v20 = vpop.f32.mrf.mxu0 }
0x2667   : > { %v4616_v26 = vpack.c.bf16 %v4610_v20, %v4610_v20  ;;  %v9089_v20 = vld [vmem:[#allocation8 + $0xa0] sm:$0xff]  }
0x2668   : > { %v8539_v34 = vpop.f32.mrf.mxu0 }
0x2669   : > { %v4618_v35 = vsel %vm1012_vm2, %v4616_v26, 0 }
0x266a   : > { %v4613_v36 = vpop.f32.mrf.mxu0  ;;  %8542 = vmatpush3.bf16.msra.mxu1 %v4618_v35 }
0x266b   : > { %8553 = vmatprep.subr.bf16.mxu1 %v9506_v0 }
0x266c   : > { %v8540_v52 = vpop.f32.mrf.mxu0 }
0x266d   : > { %8544 = vmatmul.mubr.msk.bf16.vlgmr.msra.gmra.mxu1 %vm1210_vm5, %v9912_v37 }
0x266e   : > { %8555 = vmatprep.mubr.msk.bf16.mxu1 %vm9507_vm0, %v9506_v0 }
0x272d   : > { %v4654_v39 = vpop.f32.mrf.mxu1 }
0x272e   : > { %v4655_v56 = vadd.f32 1e-30, %v4654_v39 }
0x272f   : > { %v8545_v41 = vpop.f32.mrf.mxu1 }
0x2730   : > { %9159 = vrcp.f32 %v4655_v56 }
0x2731   : > { %v4657_v40 = vpop.f32.mrf.mxu1 }
0x2732   : > { %v4658_v46 = vadd.f32 1e-30, %v4657_v40 }
0x2733   : > { %v8546_v60 = vpop.f32.mrf.mxu1 }
0x2734   : > { %9161 = vrcp.f32 %v4658_v46 }
0x273d   : > { %v9160_v13 = vpop.eup %9159 }
0x273e   : > { %v4663_v48 = vmul.f32 %v9160_v13, %v9156_v31  ;;  %v9086_v31 = vld [vmem:[#allocation8 + $0xb8] sm:$0xff]   ;;  %v7808_v13 = vld [vmem:[#allocation11 + $0x4] ss:$0 sm:$0xff] }
0x2741   : > { %v9162_v47 = vpop.eup %9161 }
0x2742   : > { %v4664_v50 = vmul.f32 %v9162_v47, %v9158_v32  ;;  %v9087_v32 = vld [vmem:[#allocation8 + $0xb0] sm:$0xff]  }
0x2744   : > { %v4665_v38 = vpack.c.bf16 %v4664_v50, %v4663_v48 }
0x2746   : > { %8550 = vmatmul.mubr.msk.bf16.vlgmr.msra.gmra.mxu0 %vm1613_vm13, %v4665_v38 }
0x2747   : > { %8563 = vmatprep.mubr.msk.bf16.mxu0 %vm9507_vm0, %v9506_v0  ;;  %8560 = vmatpush3.bf16.msra.mxu0 %v9082_v51 }
0x2748   : > { %8561 = vmatprep.subr.bf16.mxu0 %v9506_v0 }
0x274b   : > { %8562 = vmatpush3.bf16.msra.mxu0 %v9083_v5 }
0x274c   : > { %8575 = vmatprep.subr.bf16.mxu0 %v9506_v0 }
0x2806   : > { %v4703_v42 = vpop.f32.mrf.mxu0 }
0x2807   : > { %v4728_v19 = vmul.f32 %v4723_v58, %v4703_v42 }
0x2808   : > { %v8551_v4 = vpop.f32.mrf.mxu0 }
0x280a   : > { %v4706_v53 = vpop.f32.mrf.mxu0 }
0x280b   : > { %v4729_v62 = vmul.f32 %v4725_v55, %v4706_v53 }
0x280c   : > { %v8552_v2 = vpop.f32.mrf.mxu0 }
0x280d   : > { %v4730_v14 = vpack.c.bf16 %v4729_v62, %v4728_v19 }
0x280f   : > { %8554 = vmatpush3.bf16.msra.mxu1 %v4730_v14 }
0x2810   : > { %8567 = vmatprep.subr.bf16.mxu1 %v9506_v0 }
0x2812   : > { %8556 = vmatmul.mubr.msk.bf16.vlgmr.msra.gmra.mxu1 %vm1519_vm11, %v10059_v7 }
0x2813   : > { %8568 = vmatpush3.bf16.msra.mxu1 %v9080_v17  ;;  %8571 = vmatprep.mubr.msk.bf16.mxu1 %vm9507_vm0, %v9506_v0 }
0x2814   : > { %8569 = vmatprep.subr.bf16.mxu1 %v9506_v0 }
0x2817   : > { %8570 = vmatpush3.bf16.msra.mxu1 %v9081_v59 }
0x2818   : > { %8583 = vmatprep.subr.bf16.mxu1 %v9506_v0 }
0x281a   : > { %8572 = vmatmul.mubr.msk.bf16.vlgmr.msra.gmra.mxu1 %vm924_vm1, %v4845_v22 }
0x281b   : > { %8591 = vmatprep.mubr.msk.bf16.mxu1 %vm9507_vm0, %v9506_v0  ;;  %8584 = vmatpush3.bf16.msra.mxu1 %v9086_v31 }
0x281c   : > { %8585 = vmatprep.subr.bf16.mxu1 %v9506_v0 }
0x281f   : > { %8586 = vmatpush3.bf16.msra.mxu1 %v9087_v32 }
0x2820   : > { %8587 = vmatprep.subr.bf16.mxu1 %v9506_v0 }
0x2823   : > { %8588 = vmatpush3.bf16.msra.mxu1 %v9088_v33 }
0x2824   : > { %8589 = vmatprep.subr.bf16.mxu1 %v9506_v0 }
0x2827   : > { %8590 = vmatpush3.bf16.msra.mxu1 %v9089_v20 }
0x2828   : > { %8607 = vmatprep.subr.bf16.mxu1 %v9506_v0 }
0x28d2   : > { %v4765_v24 = vpop.f32.mrf.mxu1 }
0x28d3   : > { %v4771_v10 = vpack.c.bf16 %v4765_v24, %v4765_v24 }
0x28d4   : > { %v8557_v49 = vpop.f32.mrf.mxu1 }
0x28d5   : > { %8564 = vmatmul.mubr.msk.bf16.vlgmr.msra.gmra.mxu0 %vm924_vm1, %v4771_v10 }
0x28d6   : > { %v4768_v27 = vpop.f32.mrf.mxu1  ;;  %8579 = vmatprep.mubr.msk.bf16.mxu0 %vm9507_vm0, %v9506_v0  ;;  %8576 = vmatpush3.bf16.msra.mxu0 %v9084_v21 }
0x28d7   : > { %8577 = vmatprep.subr.bf16.mxu0 %v9506_v0 }
0x28d8   : > { %v8558_v6 = vpop.f32.mrf.mxu1 }
0x28da   : > { %v4900_v57 = vpop.f32.mrf.mxu1  ;;  %8578 = vmatpush3.bf16.msra.mxu0 %v9085_v30 }
0x28db   : > { %4909 = vrot.lane.b32.xlu0 %v4900_v57, %s9513_s21  ;;  %8595 = vmatprep.subr.bf16.mxu0 %v9506_v0 }
0x28dc   : > { %v8573_v28 = vpop.f32.mrf.mxu1 }
0x28de   : > { %v4903_v23 = vpop.f32.mrf.mxu1 }
0x28df   : > { %4924 = vrot.lane.b32.xlu0 %v7812_v15, %s9513_s21  ;;  %4911 = vrot.lane.b32.xlu1 %v4903_v23, %s9513_s21 }
0x28e0   : > { %v8574_v25 = vpop.f32.mrf.mxu1 }
0x294d   : > { %v4910_v26 = vpop.permute.xlu0 %4909 }
0x294e   : > { %v4915_v34 = vadd.f32 %v4910_v26, %v10715_v54 }
0x2951   : > { %v4925_v35 = vpop.permute.xlu0 %4924  ;;  %v4912_v36 = vpop.permute.xlu1 %4911 }
0x2952   : > { %v4927_v52 = vadd.f32 %v4925_v35, %v4915_v34  ;;  %v4916_v39 = vadd.f32 %v4912_v36, %v10717_v63 }
0x2954   : > { %v4928_v56 = vadd.f32 %v4925_v35, %v4916_v39  ;;  %v4929_v41 = vmax.f32 %v4927_v52, 0.0 }
0x2956   : > { %v4930_v40 = vmax.f32 %v4928_v56, 0.0 }
0x2958   : > { %v4992_v46 = vpack.c.bf16 %v4930_v40, %v4929_v41 }
0x295a   : > { %5003 = vrot.lane.b32.xlu0 %v4992_v46, %s9509_s6 }
0x2995   : > { %v4826_v60 = vpop.f32.mrf.mxu0 }
0x2996   : > { %v4832_v47 = vadd.f32 %v4826_v60, %v10684_v44 }
0x2997   : > { %v8565_v48 = vpop.f32.mrf.mxu0 }
0x2998   : > { %v4841_v50 = vadd.f32 %v7808_v13, %v4832_v47 }
0x2999   : > { %v4829_v38 = vpop.f32.mrf.mxu0 }
0x299a   : > { %v10882_v51 = vmax.f32 %v4841_v50, 0.0 }
0x299b   : > { %v8566_v54 = vpop.f32.mrf.mxu0 }
0x299c   : > { %v4931_v58 = vpack.c.bf16 %v10882_v51, %v10882_v51 }
0x299e   : > { %8580 = vmatmul.mubr.msk.bf16.vlgmr.msra.gmra.mxu0 %vm924_vm1, %v4931_v58 }
0x299f   : > { %8597 = vmatprep.mubr.msk.bf16.mxu0 %vm9507_vm0, %v9506_v0 }
0x29cc   : > { %v5004_v63 = vpop.permute.xlu0 %5003 }
0x29cd   : > { %8592 = vmatmul.mubr.msk.bf16.vlgmr.msra.gmra.mxu1 %vm1159_vm4, %v5004_v63 }
0x29ce   : > { %8608 = vmatpush3.bf16.msra.mxu1 %v10695_v45  ;;  %8611 = vmatprep.mubr.msk.bf16.mxu1 %vm9507_vm0, %v9506_v0 }
0x29cf   : > { %8609 = vmatprep.subr.bf16.mxu1 %v9506_v0 }
0x29d2   : > { %8610 = vmatpush3.bf16.msra.mxu1 %v10704_v43 }
0x29d3   : > { %8621 = vmatprep.subr.bf16.mxu1 %v9506_v0 }
0x2a5e   : > { %v4986_v44 = vpop.f32.mrf.mxu0 }
0x2a5f   : > { %v5073_v42 = vpack.c.bf16 %v4986_v44, %v4986_v44 }
0x2a60   : > { %v8581_v4 = vpop.f32.mrf.mxu0 }
0x2a61   : > { %v5075_v55 = vsel %vm1012_vm2, %v5073_v42, 0  ;;  %5119 = vrot.lane.b32.xlu1 %v5073_v42, %s9509_s6 }
0x2a62   : > { %v4989_v53 = vpop.f32.mrf.mxu0  ;;  %8596 = vmatpush3.bf16.msra.mxu0 %v5075_v55 }
0x2a63   : > { %8601 = vmatprep.subr.bf16.mxu0 %v9506_v0 }
0x2a64   : > { %v8582_v45 = vpop.f32.mrf.mxu0 }
0x2a65   : > { %8598 = vmatmul.mubr.msk.bf16.vlgmr.msra.gmra.mxu0 %vm1210_vm5, %v9912_v37 }
0x2a66   : > { %8603 = vmatprep.mubr.msk.bf16.mxu0 %vm9507_vm0, %v9506_v0 }
0x2a8d   : > { %v10903_v43 = vpop.f32.mrf.mxu1 }
0x2a8f   : > { %v8593_v19 = vpop.f32.mrf.mxu1 }
0x2a91   : > { %v10905_v62 = vpop.f32.mrf.mxu1 }
0x2a93   : > { %v8594_v2 = vpop.f32.mrf.mxu1 }
0x2ad3   : > { %v5120_v14 = vpop.permute.xlu1 %5119 }
0x2ad4   : > { %v5122_v17 = vsel %vm1012_vm2, %v5120_v14, 0 }
0x2ad5   : > { %8602 = vmatpush3.bf16.msra.mxu0 %v5122_v17 }
0x2ad6   : > { %8615 = vmatprep.subr.bf16.mxu0 %v9506_v0 }
0x2ad8   : > { %8604 = vmatmul.mubr.msk.bf16.vlgmr.msra.gmra.mxu0 %vm1210_vm5, %v10722_v3 }
0x2ad9   : > { %8617 = vmatprep.mubr.msk.bf16.mxu0 %vm9507_vm0, %v9506_v0 }
0x2b25   : > { %v10913_v59 = vpop.f32.mrf.mxu0 }
0x2b27   : > { %v8599_v61 = vpop.f32.mrf.mxu0 }
0x2b29   : > { %v10915_v1 = vpop.f32.mrf.mxu0 }
0x2b2b   : > { %v8600_v22 = vpop.f32.mrf.mxu0 }
0x2b98   : > { %v10917_v5 = vpop.f32.mrf.mxu0 }
0x2b99   : > { %v5165_v24 = vadd.f32 %v10917_v5, %v10903_v43 }
0x2b9a   : > { %v8605_v10 = vpop.f32.mrf.mxu0 }
0x2b9b   : > { %v5167_v27 = vmul.f32 %v5165_v24, %v10913_v59 }
0x2b9c   : > { %v10921_v49 = vpop.f32.mrf.mxu0 }
0x2b9d   : > { %v5166_v3 = vadd.f32 %v10921_v49, %v10905_v62  ;;  %v5169_v28 = vmul.f32 0.35355338, %v5167_v27 }
0x2b9e   : > { %v8606_v6 = vpop.f32.mrf.mxu0 }
0x2b9f   : > { %v5168_v57 = vmul.f32 %v5166_v3, %v10915_v1 }
0x2ba1   : > { %v5170_v15 = vmul.f32 0.35355338, %v5168_v57 }
0x2ba3   : > { %v5171_v23 = vpack.c.bf16 %v5170_v15, %v5169_v28 }
0x2ba5   : > { %8612 = vmatmul.mubr.msk.bf16.vlgmr.msra.gmra.mxu1 %vm924_vm1, %v5171_v23 }
0x2ba6   : > { %8623 = vmatprep.mubr.msk.bf16.mxu1 %vm9507_vm0, %v9506_v0 }
0x2c65   : > { %v10930_v25 = vpop.f32.mrf.mxu1 }
0x2c66   : > { %5273 = vperm.xlu0 %9004, %v10930_v25   ;;  %5218 = vperm.xlu1 %9002, %v10930_v25  }
0x2c67   : > { %v8613_v21 = vpop.f32.mrf.mxu1 }
0x2c69   : > { %v10934_v30 = vpop.f32.mrf.mxu1 }
0x2c6a   : > { %9005 = vset.pattern.permute.xlu0 %v9508_v8  ;;  %9003 = vset.pattern.permute.xlu1 %v9510_v9 }
0x2c6b   : > { %5246 = vperm.xlu1 %9003, %v10930_v25   ;;  %5223 = vperm.xlu0 %9005, %v10934_v30   ;;  %v8614_v31 = vpop.f32.mrf.mxu1 }
0x2c6f   : > { %5250 = vperm.xlu1 %9003, %v10934_v30   ;;  %9008 = vset.pattern.permute.xlu0 %v9512_v12 }
0x2c70   : > { %5304 = vperm.xlu0 %9008, %v10934_v30  }
0x2c73   : > { %9006 = vset.pattern.permute.xlu1 %v9511_v11 }
0x2c74   : > { %5277 = vperm.xlu1 %9006, %v10934_v30   ;;  %9011 = vset.pattern.permute.xlu0 %v9511_v11 }
0x2c78   : > { %9007 = vset.pattern.permute.xlu1 %v9512_v12 }
0x2c79   : > { %5300 = vperm.xlu1 %9007, %v10930_v25  }
0x2c7d   : > { %9009 = vset.pattern.permute.xlu1 %v9508_v8 }
0x2ce1   : > { %v5274_v32 = vpop.permute.xlu0 %5273  ;;  %v5219_v33 = vpop.permute.xlu1 %5218 }
0x2ce2   : > { %v5226_v20 = vsel %vm9985_vm6, %v5219_v33, -1e+30  ;;  %v5280_v50 = vsel %vm9985_vm6, %v5274_v32, -1e+30 }
0x2ce3   : > { %v5228_v36 = vsel %vm1210_vm5, %v5226_v20, -inf  ;;  %v5282_v42 = vsel %vm1210_vm5, %v5280_v50, -inf }
0x2ce6   : > { %v5247_v26 = vpop.permute.xlu1 %5246  ;;  %v5224_v34 = vpop.permute.xlu0 %5223 }
0x2ce7   : > { %v5227_v35 = vsel %vm9989_vm7, %v5224_v34, -1e+30  ;;  %v5253_v39 = vsel %vm9985_vm6, %v5247_v26, -1e+30 }
0x2ce8   : > { %v5229_v52 = vsel %vm1210_vm5, %v5227_v35, -inf  ;;  %v5255_v60 = vsel %vm1210_vm5, %v5253_v39, -inf }
0x2ce9   : > { %v5230_v56 = vmax.f32 %v5228_v36, %v5229_v52 }
0x2cea   : > { %v5251_v41 = vpop.permute.xlu1 %5250 }
0x2ceb   : > { %v5231_v40 = vrot.slane %v5230_v56, 4  ;;  %v5254_v46 = vsel %vm9989_vm7, %v5251_v41, -1e+30  ;;  %v5305_v63 = vpop.permute.xlu0 %5304 }
0x2cec   : > { %v5256_v13 = vsel %vm1210_vm5, %v5254_v46, -inf  ;;  %v5308_v2 = vsel %vm9989_vm7, %v5305_v63, -1e+30 }
0x2ced   : > { %v5232_v47 = vmax.f32 %v5230_v56, %v5231_v40  ;;  %v5257_v48 = vmax.f32 %v5255_v60, %v5256_v13  ;;  %v5310_v27 = vsel %vm1210_vm5, %v5308_v2, -inf }
0x2cef   : > { %v5233_v38 = vrot.slane %v5232_v47, 2  ;;  %v5258_v54 = vrot.slane %v5257_v48, 4  ;;  %v5278_v58 = vpop.permute.xlu1 %5277 }
0x2cf0   : > { %v5281_v44 = vsel %vm9989_vm7, %v5278_v58, -1e+30 }
0x2cf1   : > { %v5234_v4 = vmax.f32 %v5232_v47, %v5233_v38  ;;  %v5259_v55 = vmax.f32 %v5257_v48, %v5258_v54  ;;  %v5283_v53 = vsel %vm1210_vm5, %v5281_v44, -inf }
0x2cf2   : > { %v5284_v45 = vmax.f32 %v5282_v42, %v5283_v53 }
0x2cf3   : > { %v5260_v19 = vrot.slane %v5259_v55, 2  ;;  %v5235_v14 = vrot.slane %v5234_v4, 1 }
0x2cf4   : > { %v5285_v17 = vrot.slane %v5284_v45, 4  ;;  %v5301_v61 = vpop.permute.xlu1 %5300 }
0x2cf5   : > { %v5261_v22 = vmax.f32 %v5259_v55, %v5260_v19  ;;  %v5307_v24 = vsel %vm9985_vm6, %v5301_v61, -1e+30  ;;  %v5236_v10 = vmax.f32 %v5234_v4, %v5235_v14 }
0x2cf6   : > { %v5286_v3 = vmax.f32 %v5284_v45, %v5285_v17  ;;  %v5309_v6 = vsel %vm1210_vm5, %v5307_v24, -inf }
0x2cf7   : > { %v5311_v57 = vmax.f32 %v5309_v6, %v5310_v27  ;;  %v5238_v28 = vsel %vm9989_vm7, %v5236_v10, -1e+30  ;;  %v5237_v15 = vsel %vm9985_vm6, %v5236_v10, -1e+30  ;;  %v5262_v23 = vrot.slane %v5261_v22, 1 }
0x2cf8   : > { %v5287_v21 = vrot.slane %v5286_v3, 2  ;;  %v5242_v31 = vsel %vm1210_vm5, %v5238_v28, -inf  ;;  %v5239_v32 = vsel %vm1210_vm5, %v5237_v15, -inf }
0x2cf9   : > { %v5312_v33 = vrot.slane %v5311_v57, 4  ;;  %5243 = vmax.xlane.f32.xlu0 %v5242_v31  ;;  %5240 = vmax.xlane.f32.xlu1 %v5239_v32  ;;  %v5263_v20 = vmax.f32 %v5261_v22, %v5262_v23 }
0x2cfa   : > { %v5288_v26 = vmax.f32 %v5286_v3, %v5287_v21 }
0x2cfb   : > { %v5313_v34 = vmax.f32 %v5311_v57, %v5312_v33  ;;  %v5265_v35 = vsel %vm9989_vm7, %v5263_v20, -1e+30  ;;  %v5264_v36 = vsel %vm9985_vm6, %v5263_v20, -1e+30 }
0x2cfc   : > { %v5269_v52 = vsel %vm1210_vm5, %v5265_v35, -inf  ;;  %v5266_v39 = vsel %vm1210_vm5, %v5264_v36, -inf  ;;  %v5289_v56 = vrot.slane %v5288_v26, 1 }
0x2cfd   : > { %v5314_v41 = vrot.slane %v5313_v34, 2  ;;  %5270 = vmax.xlane.f32.xlu0 %v5269_v52  ;;  %5267 = vmax.xlane.f32.xlu1 %v5266_v39 }
0x2cfe   : > { %v5290_v40 = vmax.f32 %v5288_v26, %v5289_v56 }
0x2cff   : > { %v5315_v46 = vmax.f32 %v5313_v34, %v5314_v41 }
0x2d00   : > { %v5292_v60 = vsel %vm9989_vm7, %v5290_v40, -1e+30  ;;  %v5291_v13 = vsel %vm9985_vm6, %v5290_v40, -1e+30 }
0x2d01   : > { %v5296_v47 = vsel %vm1210_vm5, %v5292_v60, -inf  ;;  %v5293_v48 = vsel %vm1210_vm5, %v5291_v13, -inf  ;;  %v5316_v50 = vrot.slane %v5315_v46, 1 }
0x2d02   : > { %5297 = vmax.xlane.f32.xlu0 %v5296_v47  ;;  %5294 = vmax.xlane.f32.xlu1 %v5293_v48 }
0x2d03   : > { %v5317_v38 = vmax.f32 %v5315_v46, %v5316_v50 }
0x2d05   : > { %v5319_v54 = vsel %vm9989_vm7, %v5317_v38, -1e+30  ;;  %v5318_v58 = vsel %vm9985_vm6, %v5317_v38, -1e+30  ;;  %v9092_v38 = vld [vmem:[#allocation10 + $0x58] sm:$0xff]  }
0x2d06   : > { %v5323_v63 = vsel %vm1210_vm5, %v5319_v54, -inf  ;;  %v5320_v44 = vsel %vm1210_vm5, %v5318_v58, -inf }
0x2d07   : > { %5324 = vmax.xlane.f32.xlu0 %v5323_v63  ;;  %5321 = vmax.xlane.f32.xlu1 %v5320_v44 }
0x2d18   : > { %5475 = vrot.lane.b32.xlu1 %v10903_v43, %s9513_s21 }
0x2d1d   : > { %5477 = vrot.lane.b32.xlu0 %v10905_v62, %s9513_s21 }
0x2d82   : > { %v5241_v42 = vpop.xlane.xlu1 %5240  ;;  %v5244_v4 = vpop.xlane.xlu0 %5243 }
0x2d86   : > { %v5268_v55 = vpop.xlane.xlu1 %5267  ;;  %v5271_v53 = vpop.xlane.xlu0 %5270 }
0x2d87   : > { %v5326_v2 = vsel %vm1486_vm8, %v5241_v42, %v5268_v55  ;;  %v5327_v14 = vsel %vm1486_vm8, %v5244_v4, %v5271_v53 }
0x2d8b   : > { %v5295_v45 = vpop.xlane.xlu1 %5294  ;;  %v5298_v19 = vpop.xlane.xlu0 %5297 }
0x2d8c   : > { %v5328_v17 = vsel %vm1489_vm9, %v5326_v2, %v5295_v45  ;;  %v5329_v61 = vsel %vm1489_vm9, %v5327_v14, %v5298_v19  ;;  %v9090_v19 = vld [vmem:[#allocation13 + $0x58] sm:$0xff]   ;;  %v9091_v2 = vld [vmem:[#allocation13 + $0x50] sm:$0xff]   ;;  %v5607_v14 = vadd.f32 %v10921_v49, %v10915_v1 }
0x2d90   : > { %v5322_v22 = vpop.xlane.xlu1 %5321  ;;  %v5325_v24 = vpop.xlane.xlu0 %5324 }
0x2d91   : > { %v5330_v10 = vsel %vm1492_vm10, %v5328_v17, %v5322_v22  ;;  %v5331_v27 = vsel %vm1492_vm10, %v5329_v61, %v5325_v24  ;;  %v5606_v17 = vadd.f32 %v10917_v5, %v10913_v59  ;;  %v9093_v22 = vld [vmem:[#allocation10 + $0x50] sm:$0xff]  }
0x2d92   : > { %v5332_v3 = vsub.f32 %v10930_v25, %v5330_v10  ;;  %v5333_v6 = vsub.f32 %v10934_v30, %v5331_v27 }
0x2d93   : > { %v5608_v61 = vpack.c.bf16 %v5607_v14, %v5606_v17  ;;  %v11105_v14 = vld [vmem:[%s9883_s11] sm:$0xff]   ;;  %s868_s11 = scalar_lea.vmem [#allocation16], %s9812_s16 }
0x2d94   : > { %v5334_v57 = vmul.f32 1.442695, %v5332_v3  ;;  %v5336_v28 = vmul.f32 1.442695, %v5333_v6  ;;  %v5476_v15 = vpop.permute.xlu1 %5475  ;;  %v5478_v21 = vpop.permute.xlu0 %5477  ;;  %v7839_v3 = vld [vmem:[#allocation14 + $0x5] ss:$0 sm:$0xff] }
0x2d95   : > { %v5481_v23 = vadd.f32 %v5476_v15, %v10917_v5  ;;  %v5482_v31 = vadd.f32 %v5478_v21, %v10921_v49  ;;  %v9095_v15 = vld [vmem:[%s11529_s12 + $0x60] sm:$0xff]   ;;  %s7446_s15 = sshll.u32 %s868_s11, 4  ;;  %s7447_s15 = int_to_ptr.vmem [resolvable:$true] %s7446_s15 }
0x2d96   : > { %9163 = vpow2.f32 %v5334_v57  ;;  %v9097_v21 = vld [vmem:[#allocation8 + $0xd0] sm:$0xff]   ;;  %p9419_p7 = scmp.lt.s32.totalorder %s7447_s15, %s9417_s9 }
0x2d97   : > { %9165 = vpow2.f32 %v5336_v28  ;;  %5485 = vrot.lane.b32.xlu1 %v5481_v23, %s9509_s6  ;;  %v9094_v28 = vld [vmem:[%s11529_s12 + $0x68] sm:$0xff]  }
0x2d98   : > { %v9096_v23 = vld [vmem:[#allocation8 + $0xd8] sm:$0xff]  }
0x2d9b   : > { %5487 = vrot.lane.b32.xlu1 %v5482_v31, %s9509_s6  ;;  %v9098_v31 = vld [vmem:[#allocation8 + $0xc8] sm:$0xff]  }
0x2da3   : > { %v9164_v32 = vpop.eup %9163 }
0x2da4   : > { %v9166_v33 = vpop.eup %9165 }
0x2da5   : > { %v5338_v20 = vpack.c.bf16 %v9166_v33, %v9164_v32 }
0x2da7   : > { %8616 = vmatpush3.bf16.msra.mxu0 %v5338_v20 }
0x2da8   : > { %8627 = vmatprep.subr.bf16.mxu0 %v9506_v0 }
0x2daa   : > { %8618 = vmatmul.mubr.msk.bf16.vlgmr.msra.gmra.mxu0 %vm1519_vm11, %v10059_v7 }
0x2dab   : > { %8628 = vmatpush3.bf16.msra.mxu0 %v10072_v29  ;;  %8629 = vmatprep.mubr.msk.bf16.mxu0 %vm9507_vm0, %v9506_v0 }
0x2dac   : > { %8639 = vmatprep.subr.bf16.mxu0 %v9506_v0 }
0x2e09   : > { %v5486_v54 = vpop.permute.xlu1 %5485 }
0x2e0d   : > { %v5488_v44 = vpop.permute.xlu1 %5487 }
0x2e6a   : > { %v5373_v25 = vpop.f32.mrf.mxu0 }
0x2e6b   : > { %v5379_v30 = vpack.c.bf16 %v5373_v25, %v5373_v25 }
0x2e6c   : > { %v8619_v26 = vpop.f32.mrf.mxu0 }
0x2e6d   : > { %v5381_v34 = vsel %vm1012_vm2, %v5379_v30, 0 }
0x2e6e   : > { %v5376_v35 = vpop.f32.mrf.mxu0  ;;  %8622 = vmatpush3.bf16.msra.mxu1 %v5381_v34 }
0x2e6f   : > { %8633 = vmatprep.subr.bf16.mxu1 %v9506_v0 }
0x2e70   : > { %v8620_v36 = vpop.f32.mrf.mxu0 }
0x2e71   : > { %8624 = vmatmul.mubr.msk.bf16.vlgmr.msra.gmra.mxu1 %vm1210_vm5, %v9912_v37 }
0x2e72   : > { %8635 = vmatprep.mubr.msk.bf16.mxu1 %vm9507_vm0, %v9506_v0 }
0x2f31   : > { %v5417_v52 = vpop.f32.mrf.mxu1 }
0x2f32   : > { %v5418_v39 = vadd.f32 1e-30, %v5417_v52 }
0x2f33   : > { %v8625_v56 = vpop.f32.mrf.mxu1 }
0x2f34   : > { %9167 = vrcp.f32 %v5418_v39 }
0x2f35   : > { %v5420_v41 = vpop.f32.mrf.mxu1 }
0x2f36   : > { %v5421_v40 = vadd.f32 1e-30, %v5420_v41  ;;  %v7835_v41 = vld [vmem:[#allocation11 + $0x5] ss:$0 sm:$0xff] }
0x2f37   : > { %v8626_v46 = vpop.f32.mrf.mxu1 }
0x2f38   : > { %9169 = vrcp.f32 %v5421_v40 }
0x2f41   : > { %v9168_v60 = vpop.eup %9167 }
0x2f42   : > { %v5426_v47 = vmul.f32 %v9168_v60, %v9164_v32  ;;  %v9099_v32 = vld [vmem:[#allocation8 + $0xc0] sm:$0xff]  }
0x2f45   : > { %v9170_v13 = vpop.eup %9169 }
0x2f46   : > { %v5427_v48 = vmul.f32 %v9170_v13, %v9166_v33 }
0x2f48   : > { %v5428_v50 = vpack.c.bf16 %v5427_v48, %v5426_v47 }
0x2f4a   : > { %8630 = vmatmul.mubr.msk.bf16.vlgmr.msra.gmra.mxu0 %vm1613_vm13, %v5428_v50  ;;  %v11087_v50 = vld [vmem:[%s11527_s10] sm:$0xff]  }
0x2f4b   : > { %8643 = vmatprep.mubr.msk.bf16.mxu0 %vm9507_vm0, %v9506_v0  ;;  %8640 = vmatpush3.bf16.msra.mxu0 %v9092_v38 }
0x2f4c   : > { %8641 = vmatprep.subr.bf16.mxu0 %v9506_v0 }
0x2f4f   : > { %8642 = vmatpush3.bf16.msra.mxu0 %v9093_v22 }
0x2f50   : > { %8655 = vmatprep.subr.bf16.mxu0 %v9506_v0 }
0x300a   : > { %v5466_v58 = vpop.f32.mrf.mxu0 }
0x300b   : > { %v5491_v4 = vmul.f32 %v5486_v54, %v5466_v58 }
0x300c   : > { %v8631_v63 = vpop.f32.mrf.mxu0 }
0x300e   : > { %v5469_v42 = vpop.f32.mrf.mxu0 }
0x300f   : > { %v5492_v55 = vmul.f32 %v5488_v44, %v5469_v42 }
0x3010   : > { %v8632_v53 = vpop.f32.mrf.mxu0 }
0x3011   : > { %v5493_v45 = vpack.c.bf16 %v5492_v55, %v5491_v4 }
0x3013   : > { %8634 = vmatpush3.bf16.msra.mxu1 %v5493_v45 }
0x3014   : > { %8647 = vmatprep.subr.bf16.mxu1 %v9506_v0 }
0x3016   : > { %8636 = vmatmul.mubr.msk.bf16.vlgmr.msra.gmra.mxu1 %vm1519_vm11, %v10059_v7 }
0x3017   : > { %8648 = vmatpush3.bf16.msra.mxu1 %v9090_v19  ;;  %8651 = vmatprep.mubr.msk.bf16.mxu1 %vm9507_vm0, %v9506_v0 }
0x3018   : > { %8649 = vmatprep.subr.bf16.mxu1 %v9506_v0 }
0x301b   : > { %8650 = vmatpush3.bf16.msra.mxu1 %v9091_v2 }
0x301c   : > { %8663 = vmatprep.subr.bf16.mxu1 %v9506_v0 }
0x301e   : > { %8652 = vmatmul.mubr.msk.bf16.vlgmr.msra.gmra.mxu1 %vm924_vm1, %v5608_v61 }
0x301f   : > { %8671 = vmatprep.mubr.msk.bf16.mxu1 %vm9507_vm0, %v9506_v0  ;;  %8664 = vmatpush3.bf16.msra.mxu1 %v9096_v23 }
0x3020   : > { %8665 = vmatprep.subr.bf16.mxu1 %v9506_v0 }
0x3023   : > { %8666 = vmatpush3.bf16.msra.mxu1 %v9097_v21 }
0x3024   : > { %8667 = vmatprep.subr.bf16.mxu1 %v9506_v0 }
0x3027   : > { %8668 = vmatpush3.bf16.msra.mxu1 %v9098_v31 }
0x3028   : > { %8669 = vmatprep.subr.bf16.mxu1 %v9506_v0 }
0x302b   : > { %8670 = vmatpush3.bf16.msra.mxu1 %v9099_v32 }
0x302c   : > { %8687 = vmatprep.subr.bf16.mxu1 %v9506_v0 }
0x30d6   : > { %v5528_v24 = vpop.f32.mrf.mxu1 }
0x30d7   : > { %v5534_v1 = vpack.c.bf16 %v5528_v24, %v5528_v24 }
0x30d8   : > { %v8637_v49 = vpop.f32.mrf.mxu1 }
0x30d9   : > { %8644 = vmatmul.mubr.msk.bf16.vlgmr.msra.gmra.mxu0 %vm924_vm1, %v5534_v1 }
0x30da   : > { %v5531_v10 = vpop.f32.mrf.mxu1  ;;  %8659 = vmatprep.mubr.msk.bf16.mxu0 %vm9507_vm0, %v9506_v0  ;;  %8656 = vmatpush3.bf16.msra.mxu0 %v9094_v28 }
0x30db   : > { %8657 = vmatprep.subr.bf16.mxu0 %v9506_v0 }
0x30dc   : > { %v8638_v59 = vpop.f32.mrf.mxu1 }
0x30de   : > { %v5663_v5 = vpop.f32.mrf.mxu1  ;;  %8658 = vmatpush3.bf16.msra.mxu0 %v9095_v15 }
0x30df   : > { %5672 = vrot.lane.b32.xlu0 %v5663_v5, %s9513_s21  ;;  %8675 = vmatprep.subr.bf16.mxu0 %v9506_v0 }
0x30e0   : > { %v8653_v27 = vpop.f32.mrf.mxu1 }
0x30e2   : > { %v5666_v6 = vpop.f32.mrf.mxu1 }
0x30e3   : > { %5687 = vrot.lane.b32.xlu0 %v7839_v3, %s9513_s21  ;;  %5674 = vrot.lane.b32.xlu1 %v5666_v6, %s9513_s21 }
0x30e4   : > { %v8654_v57 = vpop.f32.mrf.mxu1 }
0x3151   : > { %v5673_v33 = vpop.permute.xlu0 %5672 }
0x3152   : > { %v5678_v20 = vadd.f32 %v5673_v33, %v10903_v43 }
0x3155   : > { %v5688_v25 = vpop.permute.xlu0 %5687  ;;  %v5675_v30 = vpop.permute.xlu1 %5674 }
0x3156   : > { %v5690_v26 = vadd.f32 %v5688_v25, %v5678_v20  ;;  %v5679_v34 = vadd.f32 %v5675_v30, %v10905_v62 }
0x3158   : > { %v5691_v35 = vadd.f32 %v5688_v25, %v5679_v34  ;;  %v5692_v36 = vmax.f32 %v5690_v26, 0.0 }
0x315a   : > { %v5693_v52 = vmax.f32 %v5691_v35, 0.0 }
0x315c   : > { %v5755_v39 = vpack.c.bf16 %v5693_v52, %v5692_v36 }
0x315e   : > { %5766 = vrot.lane.b32.xlu0 %v5755_v39, %s9509_s6 }
0x3199   : > { %v5589_v56 = vpop.f32.mrf.mxu0 }
0x319a   : > { %v5595_v40 = vadd.f32 %v5589_v56, %v10882_v51  ;;  %v11078_v51 = vld [vmem:[%s11527_s10 + $0x8] sm:$0xff]  }
0x319b   : > { %v8645_v46 = vpop.f32.mrf.mxu0 }
0x319c   : > { %v5604_v60 = vadd.f32 %v7835_v41, %v5595_v40 }
0x319d   : > { %v5592_v13 = vpop.f32.mrf.mxu0 }
0x319e   : > { %v11067_v47 = vmax.f32 %v5604_v60, 0.0 }
0x319f   : > { %v8646_v43 = vpop.f32.mrf.mxu0 }
0x31a0   : > { %v5694_v48 = vpack.c.bf16 %v11067_v47, %v11067_v47 }
0x31a2   : > { %8660 = vmatmul.mubr.msk.bf16.vlgmr.msra.gmra.mxu0 %vm924_vm1, %v5694_v48 }
0x31a3   : > { %8677 = vmatprep.mubr.msk.bf16.mxu0 %vm9507_vm0, %v9506_v0 }
0x31d0   : > { %v5767_v62 = vpop.permute.xlu0 %5766 }
0x31d1   : > { %8672 = vmatmul.mubr.msk.bf16.vlgmr.msra.gmra.mxu1 %vm1159_vm4, %v5767_v62 }
0x31d2   : > { %8688 = vmatpush3.bf16.msra.mxu1 %v11078_v51  ;;  %8691 = vmatprep.mubr.msk.bf16.mxu1 %vm9507_vm0, %v9506_v0 }
0x31d3   : > { %8689 = vmatprep.subr.bf16.mxu1 %v9506_v0 }
0x31d6   : > { %8690 = vmatpush3.bf16.msra.mxu1 %v11087_v50 }
0x31d7   : > { %8701 = vmatprep.subr.bf16.mxu1 %v9506_v0 }
0x3262   : > { %v5749_v38 = vpop.f32.mrf.mxu0 }
0x3263   : > { %v5836_v54 = vpack.c.bf16 %v5749_v38, %v5749_v38 }
0x3264   : > { %v8661_v58 = vpop.f32.mrf.mxu0 }
0x3265   : > { %v5838_v63 = vsel %vm1012_vm2, %v5836_v54, 0  ;;  %5882 = vrot.lane.b32.xlu1 %v5836_v54, %s9509_s6 }
0x3266   : > { %v5752_v44 = vpop.f32.mrf.mxu0  ;;  %8676 = vmatpush3.bf16.msra.mxu0 %v5838_v63 }
0x3267   : > { %8681 = vmatprep.subr.bf16.mxu0 %v9506_v0 }
0x3268   : > { %v8662_v42 = vpop.f32.mrf.mxu0 }
0x3269   : > { %8678 = vmatmul.mubr.msk.bf16.vlgmr.msra.gmra.mxu0 %vm1210_vm5, %v9912_v37 }
0x326a   : > { %8683 = vmatprep.mubr.msk.bf16.mxu0 %vm9507_vm0, %v9506_v0 }
0x3291   : > { %v11098_v4 = vpop.f32.mrf.mxu1 }
0x3293   : > { %v8673_v55 = vpop.f32.mrf.mxu1 }
0x3295   : > { %v11100_v53 = vpop.f32.mrf.mxu1 }
0x3297   : > { %v8674_v45 = vpop.f32.mrf.mxu1 }
0x32d7   : > { %v5883_v19 = vpop.permute.xlu1 %5882 }
0x32d8   : > { %v5885_v2 = vsel %vm1012_vm2, %v5883_v19, 0 }
0x32d9   : > { %8682 = vmatpush3.bf16.msra.mxu0 %v5885_v2 }
0x32da   : > { %8695 = vmatprep.subr.bf16.mxu0 %v9506_v0 }
0x32dc   : > { %8684 = vmatmul.mubr.msk.bf16.vlgmr.msra.gmra.mxu0 %vm1210_vm5, %v11105_v14 }
0x32dd   : > { %8697 = vmatprep.mubr.msk.bf16.mxu0 %vm9507_vm0, %v9506_v0 }
0x3329   : > { %v11111_v17 = vpop.f32.mrf.mxu0 }
0x332b   : > { %v8679_v61 = vpop.f32.mrf.mxu0 }
0x332d   : > { %v11113_v22 = vpop.f32.mrf.mxu0 }
0x332f   : > { %v8680_v24 = vpop.f32.mrf.mxu0 }
0x339c   : > { %v11115_v1 = vpop.f32.mrf.mxu0 }
0x339d   : > { %v5928_v49 = vadd.f32 %v11115_v1, %v11098_v4 }
0x339e   : > { %v8685_v10 = vpop.f32.mrf.mxu0 }
0x339f   : > { %v5930_v5 = vmul.f32 %v5928_v49, %v11111_v17 }
0x33a0   : > { %v11119_v59 = vpop.f32.mrf.mxu0 }
0x33a1   : > { %v5929_v27 = vadd.f32 %v11119_v59, %v11100_v53  ;;  %v5932_v57 = vmul.f32 0.35355338, %v5930_v5 }
0x33a2   : > { %v8686_v3 = vpop.f32.mrf.mxu0 }
0x33a3   : > { %v5931_v6 = vmul.f32 %v5929_v27, %v11113_v22 }
0x33a5   : > { %v5933_v28 = vmul.f32 0.35355338, %v5931_v6 }
0x33a7   : > { %v5934_v15 = vpack.c.bf16 %v5933_v28, %v5932_v57 }
0x33a9   : > { %8692 = vmatmul.mubr.msk.bf16.vlgmr.msra.gmra.mxu1 %vm924_vm1, %v5934_v15 }
0x33aa   : > { %8703 = vmatprep.mubr.msk.bf16.mxu1 %vm9507_vm0, %v9506_v0 }
0x3469   : > { %v11128_v23 = vpop.f32.mrf.mxu1 }
0x346a   : > { %6036 = vperm.xlu0 %9011, %v11128_v23   ;;  %5981 = vperm.xlu1 %9009, %v11128_v23  }
0x346b   : > { %v8693_v21 = vpop.f32.mrf.mxu1 }
0x346d   : > { %v11132_v31 = vpop.f32.mrf.mxu1 }
0x346e   : > { %9012 = vset.pattern.permute.xlu0 %v9508_v8  ;;  %9010 = vset.pattern.permute.xlu1 %v9510_v9 }
0x346f   : > { %6009 = vperm.xlu1 %9010, %v11128_v23   ;;  %5986 = vperm.xlu0 %9012, %v11132_v31   ;;  %v8694_v32 = vpop.f32.mrf.mxu1 }
0x3473   : > { %6013 = vperm.xlu1 %9010, %v11132_v31   ;;  %9015 = vset.pattern.permute.xlu0 %v9512_v12 }
0x3474   : > { %6067 = vperm.xlu0 %9015, %v11132_v31  }
0x3477   : > { %9013 = vset.pattern.permute.xlu1 %v9511_v11 }
0x3478   : > { %6040 = vperm.xlu1 %9013, %v11132_v31   ;;  %9018 = vset.pattern.permute.xlu0 %v9511_v11 }
0x347c   : > { %9014 = vset.pattern.permute.xlu1 %v9512_v12 }
0x347d   : > { %6063 = vperm.xlu1 %9014, %v11128_v23  }
0x3481   : > { %9016 = vset.pattern.permute.xlu1 %v9508_v8 }
0x34e5   : > { %v6037_v33 = vpop.permute.xlu0 %6036  ;;  %v5982_v20 = vpop.permute.xlu1 %5981 }
0x34e6   : > { %v5989_v25 = vsel %vm9985_vm6, %v5982_v20, -1e+30  ;;  %v6043_v48 = vsel %vm9985_vm6, %v6037_v33, -1e+30 }
0x34e7   : > { %v5991_v35 = vsel %vm1210_vm5, %v5989_v25, -inf  ;;  %v6045_v44 = vsel %vm1210_vm5, %v6043_v48, -inf }
0x34ea   : > { %v6010_v30 = vpop.permute.xlu1 %6009  ;;  %v5987_v26 = vpop.permute.xlu0 %5986 }
0x34eb   : > { %v5990_v34 = vsel %vm9989_vm7, %v5987_v26, -1e+30  ;;  %v6016_v52 = vsel %vm9985_vm6, %v6010_v30, -1e+30 }
0x34ec   : > { %v5992_v36 = vsel %vm1210_vm5, %v5990_v34, -inf  ;;  %v6018_v46 = vsel %vm1210_vm5, %v6016_v52, -inf }
0x34ed   : > { %v5993_v39 = vmax.f32 %v5991_v35, %v5992_v36 }
0x34ee   : > { %v6014_v56 = vpop.permute.xlu1 %6013 }
0x34ef   : > { %v5994_v41 = vrot.slane %v5993_v39, 4  ;;  %v6017_v40 = vsel %vm9989_vm7, %v6014_v56, -1e+30  ;;  %v6068_v58 = vpop.permute.xlu0 %6067 }
0x34f0   : > { %v6019_v60 = vsel %vm1210_vm5, %v6017_v40, -inf  ;;  %v6071_v61 = vsel %vm9989_vm7, %v6068_v58, -1e+30 }
0x34f1   : > { %v5995_v13 = vmax.f32 %v5993_v39, %v5994_v41  ;;  %v6020_v43 = vmax.f32 %v6018_v46, %v6019_v60  ;;  %v6073_v6 = vsel %vm1210_vm5, %v6071_v61, -inf }
0x34f3   : > { %v5996_v62 = vrot.slane %v5995_v13, 2  ;;  %v6021_v38 = vrot.slane %v6020_v43, 4  ;;  %v6041_v54 = vpop.permute.xlu1 %6040 }
0x34f4   : > { %v6044_v63 = vsel %vm9989_vm7, %v6041_v54, -1e+30 }
0x34f5   : > { %v5997_v42 = vmax.f32 %v5995_v13, %v5996_v62  ;;  %v6022_v55 = vmax.f32 %v6020_v43, %v6021_v38  ;;  %v6046_v45 = vsel %vm1210_vm5, %v6044_v63, -inf }
0x34f6   : > { %v6047_v19 = vmax.f32 %v6045_v44, %v6046_v45 }
0x34f7   : > { %v6023_v2 = vrot.slane %v6022_v55, 2  ;;  %v5998_v24 = vrot.slane %v5997_v42, 1 }
0x34f8   : > { %v6048_v49 = vrot.slane %v6047_v19, 4  ;;  %v6064_v10 = vpop.permute.xlu1 %6063 }
0x34f9   : > { %v6024_v5 = vmax.f32 %v6022_v55, %v6023_v2  ;;  %v6070_v27 = vsel %vm9985_vm6, %v6064_v10, -1e+30  ;;  %v5999_v3 = vmax.f32 %v5997_v42, %v5998_v24 }
0x34fa   : > { %v6049_v57 = vmax.f32 %v6047_v19, %v6048_v49  ;;  %v6072_v28 = vsel %vm1210_vm5, %v6070_v27, -inf }
0x34fb   : > { %v6074_v15 = vmax.f32 %v6072_v28, %v6073_v6  ;;  %v6001_v21 = vsel %vm9989_vm7, %v5999_v3, -1e+30  ;;  %v6000_v32 = vsel %vm9985_vm6, %v5999_v3, -1e+30  ;;  %v6025_v33 = vrot.slane %v6024_v5, 1 }
0x34fc   : > { %v6050_v20 = vrot.slane %v6049_v57, 2  ;;  %v6005_v25 = vsel %vm1210_vm5, %v6001_v21, -inf  ;;  %v6002_v30 = vsel %vm1210_vm5, %v6000_v32, -inf }
0x34fd   : > { %v6075_v26 = vrot.slane %v6074_v15, 4  ;;  %6006 = vmax.xlane.f32.xlu0 %v6005_v25  ;;  %6003 = vmax.xlane.f32.xlu1 %v6002_v30  ;;  %v6026_v34 = vmax.f32 %v6024_v5, %v6025_v33 }
0x34fe   : > { %v6051_v35 = vmax.f32 %v6049_v57, %v6050_v20 }
0x34ff   : > { %v6076_v36 = vmax.f32 %v6074_v15, %v6075_v26  ;;  %v6028_v52 = vsel %vm9989_vm7, %v6026_v34, -1e+30  ;;  %v6027_v39 = vsel %vm9985_vm6, %v6026_v34, -1e+30 }
0x3500   : > { %v6032_v56 = vsel %vm1210_vm5, %v6028_v52, -inf  ;;  %v6029_v41 = vsel %vm1210_vm5, %v6027_v39, -inf  ;;  %v6052_v40 = vrot.slane %v6051_v35, 1 }
0x3501   : > { %v6077_v46 = vrot.slane %v6076_v36, 2  ;;  %6033 = vmax.xlane.f32.xlu0 %v6032_v56  ;;  %6030 = vmax.xlane.f32.xlu1 %v6029_v41 }
0x3502   : > { %v6053_v60 = vmax.f32 %v6051_v35, %v6052_v40 }
0x3503   : > { %v6078_v13 = vmax.f32 %v6076_v36, %v6077_v46 }
0x3504   : > { %v6055_v43 = vsel %vm9989_vm7, %v6053_v60, -1e+30  ;;  %v6054_v48 = vsel %vm9985_vm6, %v6053_v60, -1e+30 }
0x3505   : > { %v6059_v62 = vsel %vm1210_vm5, %v6055_v43, -inf  ;;  %v6056_v38 = vsel %vm1210_vm5, %v6054_v48, -inf  ;;  %v6079_v54 = vrot.slane %v6078_v13, 1 }
0x3506   : > { %6060 = vmax.xlane.f32.xlu0 %v6059_v62  ;;  %6057 = vmax.xlane.f32.xlu1 %v6056_v38 }
0x3507   : > { %v6080_v58 = vmax.f32 %v6078_v13, %v6079_v54 }
0x3509   : > { %v6082_v63 = vsel %vm9989_vm7, %v6080_v58, -1e+30  ;;  %v6081_v44 = vsel %vm9985_vm6, %v6080_v58, -1e+30 }
0x350a   : > { %v6086_v42 = vsel %vm1210_vm5, %v6082_v63, -inf  ;;  %v6083_v55 = vsel %vm1210_vm5, %v6081_v44, -inf }
0x350b   : > { %6087 = vmax.xlane.f32.xlu0 %v6086_v42  ;;  %6084 = vmax.xlane.f32.xlu1 %v6083_v55  ;;  %v9102_v42 = vld [vmem:[#allocation10 + $0x68] sm:$0xff]  }
0x351c   : > { %6238 = vrot.lane.b32.xlu1 %v11098_v4, %s9513_s21 }
0x3521   : > { %6240 = vrot.lane.b32.xlu0 %v11100_v53, %s9513_s21 }
0x3586   : > { %v6004_v45 = vpop.xlane.xlu1 %6003  ;;  %v6007_v19 = vpop.xlane.xlu0 %6006 }
0x358a   : > { %v6031_v2 = vpop.xlane.xlu1 %6030  ;;  %v6034_v61 = vpop.xlane.xlu0 %6033 }
0x358b   : > { %v6089_v10 = vsel %vm1486_vm8, %v6004_v45, %v6031_v2  ;;  %v6090_v5 = vsel %vm1486_vm8, %v6007_v19, %v6034_v61 }
0x358f   : > { %v6058_v24 = vpop.xlane.xlu1 %6057  ;;  %v6061_v49 = vpop.xlane.xlu0 %6060 }
0x3590   : > { %v6091_v27 = vsel %vm1489_vm9, %v6089_v10, %v6058_v24  ;;  %v6092_v3 = vsel %vm1489_vm9, %v6090_v5, %v6061_v49 }
0x3594   : > { %v6085_v6 = vpop.xlane.xlu1 %6084  ;;  %v6088_v57 = vpop.xlane.xlu0 %6087 }
0x3595   : > { %v6093_v28 = vsel %vm1492_vm10, %v6091_v27, %v6085_v6  ;;  %v6094_v15 = vsel %vm1492_vm10, %v6092_v3, %v6088_v57  ;;  %v9100_v27 = vld [vmem:[#allocation13 + $0x68] sm:$0xff]   ;;  %v9101_v3 = vld [vmem:[#allocation13 + $0x60] sm:$0xff]   ;;  %v6370_v6 = vadd.f32 %v11119_v59, %v11113_v22  ;;  %v6369_v57 = vadd.f32 %v11115_v1, %v11111_v17 }
0x3596   : > { %v6095_v21 = vsub.f32 %v11128_v23, %v6093_v28  ;;  %v6096_v32 = vsub.f32 %v11132_v31, %v6094_v15  ;;  %v9103_v15 = vld [vmem:[#allocation10 + $0x60] sm:$0xff]  }
0x3597   : > { %v6371_v28 = vpack.c.bf16 %v6370_v6, %v6369_v57 }
0x3598   : > { %v6097_v33 = vmul.f32 1.442695, %v6095_v21  ;;  %v6099_v20 = vmul.f32 1.442695, %v6096_v32  ;;  %v6239_v25 = vpop.permute.xlu1 %6238  ;;  %v6241_v26 = vpop.permute.xlu0 %6240 }
0x3599   : > { %v6244_v30 = vadd.f32 %v6239_v25, %v11115_v1  ;;  %v6245_v34 = vadd.f32 %v6241_v26, %v11119_v59  ;;  %v9104_v26 = vld [vmem:[%s11529_s12 + $0x78] sm:$0xff]  }
0x359a   : > { %9171 = vpow2.f32 %v6097_v33 }
0x359b   : > { %9173 = vpow2.f32 %v6099_v20  ;;  %6248 = vrot.lane.b32.xlu1 %v6244_v30, %s9509_s6  ;;  %v7866_v20 = vld [vmem:[#allocation14 + $0x6] ss:$0 sm:$0xff] }
0x359f   : > { %6250 = vrot.lane.b32.xlu1 %v6245_v34, %s9509_s6  ;;  %v9105_v34 = vld [vmem:[%s11529_s12 + $0x70] sm:$0xff]  }
0x35a7   : > { %v9172_v35 = vpop.eup %9171 }
0x35a8   : > { %v9174_v36 = vpop.eup %9173 }
0x35a9   : > { %v6101_v52 = vpack.c.bf16 %v9174_v36, %v9172_v35 }
0x35ab   : > { %8696 = vmatpush3.bf16.msra.mxu0 %v6101_v52  ;;  %v9108_v52 = vld [vmem:[#allocation8 + $0xe8] sm:$0xff]  }
0x35ac   : > { %8707 = vmatprep.subr.bf16.mxu0 %v9506_v0 }
0x35ae   : > { %8698 = vmatmul.mubr.msk.bf16.vlgmr.msra.gmra.mxu0 %vm1519_vm11, %v10059_v7 }
0x35af   : > { %8708 = vmatpush3.bf16.msra.mxu0 %v10072_v29  ;;  %8709 = vmatprep.mubr.msk.bf16.mxu0 %vm9507_vm0, %v9506_v0 }
0x35b0   : > { %8719 = vmatprep.subr.bf16.mxu0 %v9506_v0 }
0x360d   : > { %v6249_v55 = vpop.permute.xlu1 %6248 }
0x3611   : > { %v6251_v2 = vpop.permute.xlu1 %6250 }
0x366e   : > { %v6136_v23 = vpop.f32.mrf.mxu0 }
0x366f   : > { %v6142_v31 = vpack.c.bf16 %v6136_v23, %v6136_v23  ;;  %v9109_v23 = vld [vmem:[#allocation8 + $0xe0] sm:$0xff]  }
0x3670   : > { %v8699_v39 = vpop.f32.mrf.mxu0 }
0x3671   : > { %v6144_v56 = vsel %vm1012_vm2, %v6142_v31, 0 }
0x3672   : > { %v6139_v41 = vpop.f32.mrf.mxu0  ;;  %8702 = vmatpush3.bf16.msra.mxu1 %v6144_v56 }
0x3673   : > { %8713 = vmatprep.subr.bf16.mxu1 %v9506_v0 }
0x3674   : > { %v8700_v40 = vpop.f32.mrf.mxu0 }
0x3675   : > { %8704 = vmatmul.mubr.msk.bf16.vlgmr.msra.gmra.mxu1 %vm1210_vm5, %v9912_v37 }
0x3676   : > { %8715 = vmatprep.mubr.msk.bf16.mxu1 %vm9507_vm0, %v9506_v0 }
0x3735   : > { %v6180_v46 = vpop.f32.mrf.mxu1 }
0x3736   : > { %v6181_v60 = vadd.f32 1e-30, %v6180_v46 }
0x3737   : > { %v8705_v13 = vpop.f32.mrf.mxu1 }
0x3738   : > { %9175 = vrcp.f32 %v6181_v60 }
0x3739   : > { %v6183_v43 = vpop.f32.mrf.mxu1 }
0x373a   : > { %v6184_v48 = vadd.f32 1e-30, %v6183_v43 }
0x373b   : > { %v8706_v62 = vpop.f32.mrf.mxu1 }
0x373c   : > { %9177 = vrcp.f32 %v6184_v48 }
0x3745   : > { %v9176_v38 = vpop.eup %9175 }
0x3746   : > { %v6189_v58 = vmul.f32 %v9176_v38, %v9172_v35  ;;  %v9106_v35 = vld [vmem:[#allocation8 + $0xf8] sm:$0xff]   ;;  %v7862_v38 = vld [vmem:[#allocation11 + $0x6] ss:$0 sm:$0xff] }
0x3749   : > { %v9178_v54 = vpop.eup %9177 }
0x374a   : > { %v6190_v63 = vmul.f32 %v9178_v54, %v9174_v36  ;;  %v9107_v36 = vld [vmem:[#allocation8 + $0xf0] sm:$0xff]  }
0x374c   : > { %v6191_v44 = vpack.c.bf16 %v6190_v63, %v6189_v58 }
0x374e   : > { %8710 = vmatmul.mubr.msk.bf16.vlgmr.msra.gmra.mxu0 %vm1613_vm13, %v6191_v44 }
0x374f   : > { %8723 = vmatprep.mubr.msk.bf16.mxu0 %vm9507_vm0, %v9506_v0  ;;  %8720 = vmatpush3.bf16.msra.mxu0 %v9102_v42 }
0x3750   : > { %8721 = vmatprep.subr.bf16.mxu0 %v9506_v0 }
0x3753   : > { %8722 = vmatpush3.bf16.msra.mxu0 %v9103_v15 }
0x3754   : > { %8735 = vmatprep.subr.bf16.mxu0 %v9506_v0 }
0x380e   : > { %v6229_v45 = vpop.f32.mrf.mxu0 }
0x380f   : > { %v6254_v24 = vmul.f32 %v6249_v55, %v6229_v45 }
0x3810   : > { %v8711_v19 = vpop.f32.mrf.mxu0 }
0x3812   : > { %v6232_v61 = vpop.f32.mrf.mxu0 }
0x3813   : > { %v6255_v49 = vmul.f32 %v6251_v2, %v6232_v61 }
0x3814   : > { %v8712_v10 = vpop.f32.mrf.mxu0 }
0x3815   : > { %v6256_v5 = vpack.c.bf16 %v6255_v49, %v6254_v24 }
0x3817   : > { %8714 = vmatpush3.bf16.msra.mxu1 %v6256_v5 }
0x3818   : > { %8727 = vmatprep.subr.bf16.mxu1 %v9506_v0 }
0x381a   : > { %8716 = vmatmul.mubr.msk.bf16.vlgmr.msra.gmra.mxu1 %vm1519_vm11, %v10059_v7 }
0x381b   : > { %8728 = vmatpush3.bf16.msra.mxu1 %v9100_v27  ;;  %8731 = vmatprep.mubr.msk.bf16.mxu1 %vm9507_vm0, %v9506_v0 }
0x381c   : > { %8729 = vmatprep.subr.bf16.mxu1 %v9506_v0 }
0x381f   : > { %8730 = vmatpush3.bf16.msra.mxu1 %v9101_v3 }
0x3820   : > { %8743 = vmatprep.subr.bf16.mxu1 %v9506_v0 }
0x3822   : > { %8732 = vmatmul.mubr.msk.bf16.vlgmr.msra.gmra.mxu1 %vm924_vm1, %v6371_v28 }
0x3823   : > { %8751 = vmatprep.mubr.msk.bf16.mxu1 %vm9507_vm0, %v9506_v0  ;;  %8744 = vmatpush3.bf16.msra.mxu1 %v9106_v35 }
0x3824   : > { %8745 = vmatprep.subr.bf16.mxu1 %v9506_v0 }
0x3827   : > { %8746 = vmatpush3.bf16.msra.mxu1 %v9107_v36 }
0x3828   : > { %8747 = vmatprep.subr.bf16.mxu1 %v9506_v0 }
0x382b   : > { %8748 = vmatpush3.bf16.msra.mxu1 %v9108_v52 }
0x382c   : > { %8749 = vmatprep.subr.bf16.mxu1 %v9506_v0 }
0x382f   : > { %8750 = vmatpush3.bf16.msra.mxu1 %v9109_v23 }
0x3830   : > { %8767 = vmatprep.subr.bf16.mxu1 %v9506_v0 }
0x38da   : > { %v6291_v21 = vpop.f32.mrf.mxu1 }
0x38db   : > { %v6297_v22 = vpack.c.bf16 %v6291_v21, %v6291_v21 }
0x38dc   : > { %v8717_v59 = vpop.f32.mrf.mxu1 }
0x38dd   : > { %8724 = vmatmul.mubr.msk.bf16.vlgmr.msra.gmra.mxu0 %vm924_vm1, %v6297_v22 }
0x38de   : > { %v6294_v32 = vpop.f32.mrf.mxu1  ;;  %8739 = vmatprep.mubr.msk.bf16.mxu0 %vm9507_vm0, %v9506_v0  ;;  %8736 = vmatpush3.bf16.msra.mxu0 %v9104_v26 }
0x38df   : > { %8737 = vmatprep.subr.bf16.mxu0 %v9506_v0 }
0x38e0   : > { %v8718_v17 = vpop.f32.mrf.mxu1 }
0x38e2   : > { %v6426_v1 = vpop.f32.mrf.mxu1  ;;  %8738 = vmatpush3.bf16.msra.mxu0 %v9105_v34 }
0x38e3   : > { %6435 = vrot.lane.b32.xlu0 %v6426_v1, %s9513_s21  ;;  %8755 = vmatprep.subr.bf16.mxu0 %v9506_v0 }
0x38e4   : > { %v8733_v33 = vpop.f32.mrf.mxu1 }
0x38e6   : > { %v6429_v25 = vpop.f32.mrf.mxu1 }
0x38e7   : > { %6450 = vrot.lane.b32.xlu0 %v7866_v20, %s9513_s21  ;;  %6437 = vrot.lane.b32.xlu1 %v6429_v25, %s9513_s21 }
0x38e8   : > { %v8734_v30 = vpop.f32.mrf.mxu1 }
0x3955   : > { %v6436_v31 = vpop.permute.xlu0 %6435 }
0x3956   : > { %v6441_v39 = vadd.f32 %v6436_v31, %v11098_v4 }
0x3959   : > { %v6451_v56 = vpop.permute.xlu0 %6450  ;;  %v6438_v41 = vpop.permute.xlu1 %6437 }
0x395a   : > { %v6453_v40 = vadd.f32 %v6451_v56, %v6441_v39  ;;  %v6442_v46 = vadd.f32 %v6438_v41, %v11100_v53 }
0x395c   : > { %v6454_v60 = vadd.f32 %v6451_v56, %v6442_v46  ;;  %v6455_v13 = vmax.f32 %v6453_v40, 0.0 }
0x395e   : > { %v6456_v43 = vmax.f32 %v6454_v60, 0.0 }
0x3960   : > { %v6518_v48 = vpack.c.bf16 %v6456_v43, %v6455_v13 }
0x3962   : > { %6529 = vrot.lane.b32.xlu0 %v6518_v48, %s9509_s6 }
0x399d   : > { %v6352_v62 = vpop.f32.mrf.mxu0 }
0x399e   : > { %v6358_v54 = vadd.f32 %v6352_v62, %v11067_v47 }
0x399f   : > { %v8725_v58 = vpop.f32.mrf.mxu0 }
0x39a0   : > { %v6367_v63 = vadd.f32 %v7862_v38, %v6358_v54 }
0x39a1   : > { %v6355_v44 = vpop.f32.mrf.mxu0 }
0x39a2   : > { %v11265_v42 = vmax.f32 %v6367_v63, 0.0 }
0x39a3   : > { %v8726_v4 = vpop.f32.mrf.mxu0 }
0x39a4   : > { %v6457_v55 = vpack.c.bf16 %v11265_v42, %v11265_v42 }
0x39a6   : > { %8740 = vmatmul.mubr.msk.bf16.vlgmr.msra.gmra.mxu0 %vm924_vm1, %v6457_v55 }
0x39a7   : > { %8757 = vmatprep.mubr.msk.bf16.mxu0 %vm9507_vm0, %v9506_v0 }
0x39d4   : > { %v6530_v53 = vpop.permute.xlu0 %6529 }
0x39d5   : > { %8752 = vmatmul.mubr.msk.bf16.vlgmr.msra.gmra.mxu1 %vm1159_vm4, %v6530_v53 }
0x39d6   : > { %8768 = vmatpush3.bf16.msra.mxu1 %v11078_v51  ;;  %8771 = vmatprep.mubr.msk.bf16.mxu1 %vm9507_vm0, %v9506_v0 }
0x39d7   : > { %8769 = vmatprep.subr.bf16.mxu1 %v9506_v0 }
0x39da   : > { %8770 = vmatpush3.bf16.msra.mxu1 %v11087_v50 }
0x39db   : > { %8781 = vmatprep.subr.bf16.mxu1 %v9506_v0 }
0x3a66   : > { %v6512_v47 = vpop.f32.mrf.mxu0 }
0x3a67   : > { %v6599_v45 = vpack.c.bf16 %v6512_v47, %v6512_v47 }
0x3a68   : > { %v8741_v19 = vpop.f32.mrf.mxu0 }
0x3a69   : > { %v6601_v2 = vsel %vm1012_vm2, %v6599_v45, 0  ;;  %6645 = vrot.lane.b32.xlu1 %v6599_v45, %s9509_s6 }
0x3a6a   : > { %v6515_v61 = vpop.f32.mrf.mxu0  ;;  %8756 = vmatpush3.bf16.msra.mxu0 %v6601_v2 }
0x3a6b   : > { %8761 = vmatprep.subr.bf16.mxu0 %v9506_v0 }
0x3a6c   : > { %v8742_v51 = vpop.f32.mrf.mxu0 }
0x3a6d   : > { %8758 = vmatmul.mubr.msk.bf16.vlgmr.msra.gmra.mxu0 %vm1210_vm5, %v9912_v37 }
0x3a6e   : > { %8763 = vmatprep.mubr.msk.bf16.mxu0 %vm9507_vm0, %v9506_v0 }
0x3a95   : > { %v11286_v50 = vpop.f32.mrf.mxu1 }
0x3a97   : > { %v8753_v24 = vpop.f32.mrf.mxu1 }
0x3a99   : > { %v11288_v49 = vpop.f32.mrf.mxu1 }
0x3a9b   : > { %v8754_v10 = vpop.f32.mrf.mxu1 }
0x3adb   : > { %v6646_v5 = vpop.permute.xlu1 %6645 }
0x3adc   : > { %v6648_v27 = vsel %vm1012_vm2, %v6646_v5, 0 }
0x3add   : > { %8762 = vmatpush3.bf16.msra.mxu0 %v6648_v27 }
0x3ade   : > { %8775 = vmatprep.subr.bf16.mxu0 %v9506_v0 }
0x3ae0   : > { %8764 = vmatmul.mubr.msk.bf16.vlgmr.msra.gmra.mxu0 %vm1210_vm5, %v11105_v14 }
0x3ae1   : > { %8777 = vmatprep.mubr.msk.bf16.mxu0 %vm9507_vm0, %v9506_v0 }
0x3b2d   : > { %v11296_v3 = vpop.f32.mrf.mxu0 }
0x3b2f   : > { %v8759_v6 = vpop.f32.mrf.mxu0 }
0x3b31   : > { %v11298_v57 = vpop.f32.mrf.mxu0 }
0x3b33   : > { %v8760_v28 = vpop.f32.mrf.mxu0 }
0x3ba0   : > { %v11300_v15 = vpop.f32.mrf.mxu0 }
0x3ba1   : > { %v6691_v21 = vadd.f32 %v11300_v15, %v11286_v50 }
0x3ba2   : > { %v8765_v22 = vpop.f32.mrf.mxu0 }
0x3ba3   : > { %v6693_v32 = vmul.f32 %v6691_v21, %v11296_v3 }
0x3ba4   : > { %v11304_v59 = vpop.f32.mrf.mxu0 }
0x3ba5   : > { %v6692_v14 = vadd.f32 %v11304_v59, %v11288_v49  ;;  %v6695_v33 = vmul.f32 0.35355338, %v6693_v32 }
0x3ba6   : > { %v8766_v17 = vpop.f32.mrf.mxu0 }
0x3ba7   : > { %v6694_v1 = vmul.f32 %v6692_v14, %v11298_v57 }
0x3ba9   : > { %v6696_v20 = vmul.f32 0.35355338, %v6694_v1 }
0x3bab   : > { %v6697_v25 = vpack.c.bf16 %v6696_v20, %v6695_v33 }
0x3bad   : > { %8772 = vmatmul.mubr.msk.bf16.vlgmr.msra.gmra.mxu1 %vm924_vm1, %v6697_v25 }
0x3bae   : > { %8783 = vmatprep.mubr.msk.bf16.mxu1 %vm9507_vm0, %v9506_v0 }
0x3c6d   : > { %v11313_v30 = vpop.f32.mrf.mxu1 }
0x3c6e   : > { %6799 = vperm.xlu0 %9018, %v11313_v30   ;;  %6744 = vperm.xlu1 %9016, %v11313_v30  }
0x3c6f   : > { %v8773_v26 = vpop.f32.mrf.mxu1 }
0x3c71   : > { %v11317_v34 = vpop.f32.mrf.mxu1 }
0x3c72   : > { %9019 = vset.pattern.permute.xlu0 %v9508_v8  ;;  %9017 = vset.pattern.permute.xlu1 %v9510_v9 }
0x3c73   : > { %6772 = vperm.xlu1 %9017, %v11313_v30   ;;  %6749 = vperm.xlu0 %9019, %v11317_v34   ;;  %v8774_v35 = vpop.f32.mrf.mxu1 }
0x3c77   : > { %6776 = vperm.xlu1 %9017, %v11317_v34   ;;  %9022 = vset.pattern.permute.xlu0 %v9512_v12 }
0x3c78   : > { %6830 = vperm.xlu0 %9022, %v11317_v34  }
0x3c7b   : > { %9020 = vset.pattern.permute.xlu1 %v9511_v11 }
0x3c7c   : > { %6803 = vperm.xlu1 %9020, %v11317_v34   ;;  %9024 = vset.pattern.permute.xlu0 %v9508_v8 }
0x3c80   : > { %9021 = vset.pattern.permute.xlu1 %v9512_v12 }
0x3c81   : > { %6826 = vperm.xlu1 %9021, %v11313_v30  }
0x3c85   : > { %9023 = vset.pattern.permute.xlu1 %v9508_v8 }
0x3ce9   : > { %v6800_v9 = vpop.permute.xlu0 %6799  ;;  %v6745_v36 = vpop.permute.xlu1 %6744 }
0x3cea   : > { %v6752_v52 = vsel %vm9985_vm6, %v6745_v36, -1e+30  ;;  %v6806_v62 = vsel %vm9985_vm6, %v6800_v9, -1e+30 }
0x3ceb   : > { %v6754_v39 = vsel %vm1210_vm5, %v6752_v52, -inf  ;;  %v6808_v4 = vsel %vm1210_vm5, %v6806_v62, -inf }
0x3cee   : > { %v6773_v23 = vpop.permute.xlu1 %6772  ;;  %v6750_v31 = vpop.permute.xlu0 %6749 }
0x3cef   : > { %v6753_v11 = vsel %vm9989_vm7, %v6750_v31, -1e+30  ;;  %v6779_v12 = vsel %vm9985_vm6, %v6773_v23, -1e+30 }
0x3cf0   : > { %v6755_v56 = vsel %vm1210_vm5, %v6753_v11, -inf  ;;  %v6781_v60 = vsel %vm1210_vm5, %v6779_v12, -inf }
0x3cf1   : > { %v6756_v41 = vmax.f32 %v6754_v39, %v6755_v56 }
0x3cf2   : > { %v6777_v40 = vpop.permute.xlu1 %6776 }
0x3cf3   : > { %v6757_v8 = vrot.slane %v6756_v41, 4  ;;  %v6780_v46 = vsel %vm9989_vm7, %v6777_v40, -1e+30  ;;  %v6831_v63 = vpop.permute.xlu0 %6830 }
0x3cf4   : > { %v6782_v13 = vsel %vm1210_vm5, %v6780_v46, -inf  ;;  %v6834_v2 = vsel %vm9989_vm7, %v6831_v63, -1e+30 }
0x3cf5   : > { %v6758_v43 = vmax.f32 %v6756_v41, %v6757_v8  ;;  %v6783_v48 = vmax.f32 %v6781_v60, %v6782_v13  ;;  %v6836_v6 = vsel %vm1210_vm5, %v6834_v2, -inf }
0x3cf7   : > { %v6759_v38 = vrot.slane %v6758_v43, 2  ;;  %v6784_v54 = vrot.slane %v6783_v48, 4  ;;  %v6804_v58 = vpop.permute.xlu1 %6803 }
0x3cf8   : > { %v6807_v44 = vsel %vm9989_vm7, %v6804_v58, -1e+30 }
0x3cf9   : > { %v6760_v55 = vmax.f32 %v6758_v43, %v6759_v38  ;;  %v6785_v53 = vmax.f32 %v6783_v48, %v6784_v54  ;;  %v6809_v47 = vsel %vm1210_vm5, %v6807_v44, -inf }
0x3cfa   : > { %v6810_v45 = vmax.f32 %v6808_v4, %v6809_v47 }
0x3cfb   : > { %v6786_v19 = vrot.slane %v6785_v53, 2  ;;  %v6761_v61 = vrot.slane %v6760_v55, 1 }
0x3cfc   : > { %v6811_v51 = vrot.slane %v6810_v45, 4  ;;  %v6827_v24 = vpop.permute.xlu1 %6826 }
0x3cfd   : > { %v6787_v10 = vmax.f32 %v6785_v53, %v6786_v19  ;;  %v6833_v5 = vsel %vm9985_vm6, %v6827_v24, -1e+30  ;;  %v6762_v27 = vmax.f32 %v6760_v55, %v6761_v61 }
0x3cfe   : > { %v6812_v28 = vmax.f32 %v6810_v45, %v6811_v51  ;;  %v6835_v21 = vsel %vm1210_vm5, %v6833_v5, -inf }
0x3cff   : > { %v6837_v22 = vmax.f32 %v6835_v21, %v6836_v6  ;;  %v6764_v32 = vsel %vm9989_vm7, %v6762_v27, -1e+30  ;;  %v6763_v14 = vsel %vm9985_vm6, %v6762_v27, -1e+30  ;;  %v6788_v17 = vrot.slane %v6787_v10, 1 }
0x3d00   : > { %v6813_v1 = vrot.slane %v6812_v28, 2  ;;  %v6768_v33 = vsel %vm1210_vm5, %v6764_v32, -inf  ;;  %v6765_v20 = vsel %vm1210_vm5, %v6763_v14, -inf }
0x3d01   : > { %v6838_v25 = vrot.slane %v6837_v22, 4  ;;  %6769 = vmax.xlane.f32.xlu0 %v6768_v33  ;;  %6766 = vmax.xlane.f32.xlu1 %v6765_v20  ;;  %v6789_v26 = vmax.f32 %v6787_v10, %v6788_v17 }
0x3d02   : > { %v6814_v35 = vmax.f32 %v6812_v28, %v6813_v1 }
0x3d03   : > { %v6839_v9 = vmax.f32 %v6837_v22, %v6838_v25  ;;  %v6791_v36 = vsel %vm9989_vm7, %v6789_v26, -1e+30  ;;  %v6790_v52 = vsel %vm9985_vm6, %v6789_v26, -1e+30 }
0x3d04   : > { %v6795_v23 = vsel %vm1210_vm5, %v6791_v36, -inf  ;;  %v6792_v31 = vsel %vm1210_vm5, %v6790_v52, -inf  ;;  %v6815_v11 = vrot.slane %v6814_v35, 1 }
0x3d05   : > { %v6840_v39 = vrot.slane %v6839_v9, 2  ;;  %6796 = vmax.xlane.f32.xlu0 %v6795_v23  ;;  %6793 = vmax.xlane.f32.xlu1 %v6792_v31 }
0x3d06   : > { %v6816_v56 = vmax.f32 %v6814_v35, %v6815_v11 }
0x3d07   : > { %v6841_v12 = vmax.f32 %v6839_v9, %v6840_v39 }
0x3d08   : > { %v6818_v41 = vsel %vm9989_vm7, %v6816_v56, -1e+30  ;;  %v6817_v40 = vsel %vm9985_vm6, %v6816_v56, -1e+30 }
0x3d09   : > { %v6822_v8 = vsel %vm1210_vm5, %v6818_v41, -inf  ;;  %v6819_v46 = vsel %vm1210_vm5, %v6817_v40, -inf  ;;  %v6842_v60 = vrot.slane %v6841_v12, 1 }
0x3d0a   : > { %6823 = vmax.xlane.f32.xlu0 %v6822_v8  ;;  %6820 = vmax.xlane.f32.xlu1 %v6819_v46 }
0x3d0b   : > { %v6843_v13 = vmax.f32 %v6841_v12, %v6842_v60 }
0x3d0d   : > { %v6845_v43 = vsel %vm9989_vm7, %v6843_v13, -1e+30  ;;  %v6844_v48 = vsel %vm9985_vm6, %v6843_v13, -1e+30 }
0x3d0e   : > { %v6849_v62 = vsel %vm1210_vm5, %v6845_v43, -inf  ;;  %v6846_v38 = vsel %vm1210_vm5, %v6844_v48, -inf  ;;  %v9110_v48 = vld [vmem:[#allocation13 + $0x78] sm:$0xff]  }
0x3d0f   : > { %6850 = vmax.xlane.f32.xlu0 %v6849_v62  ;;  %6847 = vmax.xlane.f32.xlu1 %v6846_v38  ;;  %v9111_v62 = vld [vmem:[#allocation13 + $0x70] sm:$0xff]   ;;  %v7133_v38 = vadd.f32 %v11304_v59, %v11298_v57 }
0x3d20   : > { %7001 = vrot.lane.b32.xlu1 %v11286_v50, %s9513_s21 }
0x3d25   : > { %7003 = vrot.lane.b32.xlu0 %v11288_v49, %s9513_s21 }
0x3d8a   : > { %v6767_v54 = vpop.xlane.xlu1 %6766  ;;  %v6770_v58 = vpop.xlane.xlu0 %6769 }
0x3d8e   : > { %v6794_v63 = vpop.xlane.xlu1 %6793  ;;  %v6797_v18 = vpop.xlane.xlu0 %6796 }
0x3d8f   : > { %v6852_v16 = vsel %vm1486_vm8, %v6767_v54, %v6794_v63  ;;  %v6853_v55 = vsel %vm1486_vm8, %v6770_v58, %v6797_v18  ;;  %v7132_v54 = vadd.f32 %v11300_v15, %v11296_v3  ;;  %v7893_v63 = vld [vmem:[#allocation14 + $0x7] ss:$0 sm:$0xff]  ;;  %v7220_v3 = vld [vmem:[%s892_s24] sm:$0xff]  ;;  %s9412_s24 = scalar_lea.vmem %s7447_s15, 16 }
0x3d90   : > { %7213 = vrot.lane.b32.xlu0 %v7893_v63, %s9513_s21  ;;  %v7221_v57 = vsel %vm1486_vm8, %v7220_v3, 0.0  ;;  %p9413_p10 = scmp.ne.s32.totalorder %s7447_s15, %s9412_s24 }
0x3d91   : > { %v7134_v58 = vpack.c.bf16 %v7133_v38, %v7132_v54 }
0x3d92   : > { %p9414_p3 = pnand %p9413_p10, %p11616_p1 }
0x3d93   : > { %v6821_v44 = vpop.xlane.xlu1 %6820  ;;  %v6824_v4 = vpop.xlane.xlu0 %6823 }
0x3d94   : > { %v6854_v53 = vsel %vm1489_vm9, %v6852_v16, %v6821_v44  ;;  %v6855_v47 = vsel %vm1489_vm9, %v6853_v55, %v6824_v4  ;;  %p9415_p4 = pneg %p9414_p3 }
0x3d98   : > { %v6848_v45 = vpop.xlane.xlu1 %6847  ;;  %v6851_v19 = vpop.xlane.xlu0 %6850 }
0x3d99   : > { %v6856_v2 = vsel %vm1492_vm10, %v6854_v53, %v6848_v45  ;;  %v6857_v61 = vsel %vm1492_vm10, %v6855_v47, %v6851_v19 }
0x3d9a   : > { %v6858_v51 = vsub.f32 %v11313_v30, %v6856_v2  ;;  %v6859_v24 = vsub.f32 %v11317_v34, %v6857_v61 }
0x3d9c   : > { %v6860_v10 = vmul.f32 1.442695, %v6858_v51  ;;  %v6862_v5 = vmul.f32 1.442695, %v6859_v24  ;;  %v7002_v27 = vpop.permute.xlu1 %7001  ;;  %v7004_v28 = vpop.permute.xlu0 %7003 }
0x3d9d   : > { %v7007_v6 = vadd.f32 %v7002_v27, %v11300_v15  ;;  %v7008_v21 = vadd.f32 %v7004_v28, %v11304_v59  ;;  %v7222_v15 = vrot.slane %v7221_v57, 4  ;;  %v9115_v27 = vld [vmem:[%s11535_s18 + $0x20] sm:$0xff]   ;;  %v9117_v28 = vld [vmem:[%s11535_s18 + $0x10] sm:$0xff]  }
0x3d9e   : > { %9179 = vpow2.f32 %v6860_v10 }
0x3d9f   : > { %9181 = vpow2.f32 %v6862_v5  ;;  %7011 = vrot.lane.b32.xlu1 %v7007_v6, %s9509_s6  ;;  %v7223_v59 = vadd.f32 %v7222_v15, %v7221_v57  ;;  %v9114_v5 = vld [vmem:[%s11535_s18 + $0x28] sm:$0xff]   ;;  %v9116_v6 = vld [vmem:[%s11535_s18 + $0x18] sm:$0xff]  }
0x3da0   : > { %v9120_v15 = vld [vmem:[%s11537_s20 + $0x8] sm:$0xff]  }
0x3da1   : > { %v7224_v18 = vrot.slane %v7223_v59, 2 }
0x3da3   : > { %7013 = vrot.lane.b32.xlu1 %v7008_v21, %s9509_s6  ;;  %v7225_v44 = vadd.f32 %v7224_v18, %v7223_v59  ;;  %v9118_v21 = vld [vmem:[%s11535_s18 + $0x8] sm:$0xff]   ;;  %v9121_v59 = vld [vmem:[%s11537_s20] sm:$0xff]   ;;  %s11615_s6 = sld [smem:[#allocation40_spill]] }
0x3da4   : > { %v7275_v18 = vld [vmem:[%s11536_s19] sm:$0x1] }
0x3da5   : > { %v7226_v55 = vrot.slane %v7225_v44, 1 }
0x3da7   : > { %v7227_v45 = vadd.f32 %v7226_v55, %v7225_v44 }
0x3da9   : > { %v7228_v61 = vmax.f32 %v7227_v45, 1.0 }
0x3dab   : > { %v9180_v22 = vpop.eup %9179 }
0x3dac   : > { %v9182_v32 = vpop.eup %9181 }
0x3dad   : > { %v6864_v14 = vpack.c.bf16 %v9182_v32, %v9180_v22 }
0x3daf   : > { %8776 = vmatpush3.bf16.msra.mxu0 %v6864_v14 }
0x3db0   : > { %8787 = vmatprep.subr.bf16.mxu0 %v9506_v0 }
0x3db2   : > { %8778 = vmatmul.mubr.msk.bf16.vlgmr.msra.gmra.mxu0 %vm1519_vm11, %v10059_v7 }
0x3db3   : > { %8788 = vmatpush3.bf16.msra.mxu0 %v10072_v29  ;;  %8789 = vmatprep.mubr.msk.bf16.mxu0 %vm9507_vm0, %v9506_v0 }
0x3db4   : > { %8799 = vmatprep.subr.bf16.mxu0 %v9506_v0 }
0x3e11   : > { %v7012_v56 = vpop.permute.xlu1 %7011 }
0x3e15   : > { %v7014_v40 = vpop.permute.xlu1 %7013 }
0x3e72   : > { %v6899_v30 = vpop.f32.mrf.mxu0 }
0x3e73   : > { %v6905_v34 = vpack.c.bf16 %v6899_v30, %v6899_v30 }
0x3e74   : > { %v8779_v17 = vpop.f32.mrf.mxu0 }
0x3e75   : > { %v6907_v1 = vsel %vm1012_vm2, %v6905_v34, 0 }
0x3e76   : > { %v6902_v33 = vpop.f32.mrf.mxu0  ;;  %8782 = vmatpush3.bf16.msra.mxu1 %v6907_v1 }
0x3e77   : > { %8793 = vmatprep.subr.bf16.mxu1 %v9506_v0 }
0x3e78   : > { %v8780_v20 = vpop.f32.mrf.mxu0 }
0x3e79   : > { %8784 = vmatmul.mubr.msk.bf16.vlgmr.msra.gmra.mxu1 %vm1210_vm5, %v9912_v37  ;;  %v9112_v37 = vld [vmem:[#allocation10 + $0x78] sm:$0xff]  }
0x3e7a   : > { %8795 = vmatprep.mubr.msk.bf16.mxu1 %vm9507_vm0, %v9506_v0 }
0x3f39   : > { %v6943_v29 = vpop.f32.mrf.mxu1 }
0x3f3a   : > { %v6944_v25 = vadd.f32 1e-30, %v6943_v29 }
0x3f3b   : > { %v8785_v26 = vpop.f32.mrf.mxu1 }
0x3f3c   : > { %9183 = vrcp.f32 %v6944_v25 }
0x3f3d   : > { %v6946_v35 = vpop.f32.mrf.mxu1 }
0x3f3e   : > { %v6947_v9 = vadd.f32 1e-30, %v6946_v35 }
0x3f3f   : > { %v8786_v36 = vpop.f32.mrf.mxu1 }
0x3f40   : > { %9185 = vrcp.f32 %v6947_v9 }
0x3f49   : > { %v9184_v52 = vpop.eup %9183 }
0x3f4a   : > { %v6952_v31 = vmul.f32 %v9184_v52, %v9180_v22  ;;  %v9119_v22 = vld [vmem:[%s11535_s18] sm:$0xff]   ;;  %v7889_v52 = vld [vmem:[#allocation11 + $0x7] ss:$0 sm:$0xff] }
0x3f4d   : > { %v9186_v23 = vpop.eup %9185 }
0x3f4e   : > { %v6953_v11 = vmul.f32 %v9186_v23, %v9182_v32  ;;  %v7214_v32 = vpop.permute.xlu0 %7213 }
0x3f50   : > { %v6954_v39 = vpack.c.bf16 %v6953_v11, %v6952_v31 }
0x3f52   : > { %8790 = vmatmul.mubr.msk.bf16.vlgmr.msra.gmra.mxu0 %vm1613_vm13, %v6954_v39 }
0x3f53   : > { %8803 = vmatprep.mubr.msk.bf16.mxu0 %vm9507_vm0, %v9506_v0  ;;  %8800 = vmatpush3.bf16.msra.mxu0 %v9112_v37 }
0x3f54   : > { %8801 = vmatprep.subr.bf16.mxu0 %v9506_v0 }
0x4012   : > { %v6992_v12 = vpop.f32.mrf.mxu0 }
0x4013   : > { %v7017_v46 = vmul.f32 %v7012_v56, %v6992_v12 }
0x4014   : > { %v8791_v41 = vpop.f32.mrf.mxu0 }
0x4016   : > { %v6995_v8 = vpop.f32.mrf.mxu0 }
0x4017   : > { %v7018_v60 = vmul.f32 %v7014_v40, %v6995_v8 }
0x4018   : > { %v8792_v13 = vpop.f32.mrf.mxu0 }
0x4019   : > { %v7019_v43 = vpack.c.bf16 %v7018_v60, %v7017_v46 }
0x401b   : > { %8794 = vmatpush3.bf16.msra.mxu1 %v7019_v43 }
0x401c   : > { %8807 = vmatprep.subr.bf16.mxu1 %v9506_v0 }
0x401e   : > { %8796 = vmatmul.mubr.msk.bf16.vlgmr.msra.gmra.mxu1 %vm1519_vm11, %v10059_v7  ;;  %v9113_v7 = vld [vmem:[#allocation10 + $0x70] sm:$0xff]  }
0x401f   : > { %8808 = vmatpush3.bf16.msra.mxu1 %v9110_v48  ;;  %8811 = vmatprep.mubr.msk.bf16.mxu1 %vm9507_vm0, %v9506_v0 }
0x4020   : > { %8809 = vmatprep.subr.bf16.mxu1 %v9506_v0  ;;  %8802 = vmatpush3.bf16.msra.mxu0 %v9113_v7 }
0x4021   : > { %8815 = vmatprep.subr.bf16.mxu0 %v9506_v0 }
0x4023   : > { %8810 = vmatpush3.bf16.msra.mxu1 %v9111_v62 }
0x4024   : > { %8831 = vmatprep.subr.bf16.mxu1 %v9506_v0 }
0x4026   : > { %8812 = vmatmul.mubr.msk.bf16.vlgmr.msra.gmra.mxu1 %vm924_vm1, %v7134_v58 }
0x4027   : > { %8835 = vmatprep.mubr.msk.bf16.mxu1 %vm9507_vm0, %v9506_v0  ;;  %8832 = vmatpush3.bf16.msra.mxu1 %v9120_v15 }
0x4028   : > { %8833 = vmatprep.subr.bf16.mxu1 %v9506_v0 }
0x402b   : > { %8834 = vmatpush3.bf16.msra.mxu1 %v9121_v59 }
0x40de   : > { %v7054_v4 = vpop.f32.mrf.mxu1 }
0x40df   : > { %v7060_v16 = vpack.c.bf16 %v7054_v4, %v7054_v4 }
0x40e0   : > { %v8797_v53 = vpop.f32.mrf.mxu1 }
0x40e1   : > { %8804 = vmatmul.mubr.msk.bf16.vlgmr.msra.gmra.mxu0 %vm924_vm1, %v7060_v16 }
0x40e2   : > { %v7057_v47 = vpop.f32.mrf.mxu1  ;;  %8827 = vmatprep.mubr.msk.bf16.mxu0 %vm9507_vm0, %v9506_v0  ;;  %8816 = vmatpush3.bf16.msra.mxu0 %v9114_v5  ;;  %vm7418_vm0 = vcmask 1040384  }
0x40e3   : > { %8817 = vmatprep.subr.bf16.mxu0 %v9506_v0 }
0x40e4   : > { %v8798_v19 = vpop.f32.mrf.mxu1 }
0x40e6   : > { %v7189_v2 = vpop.f32.mrf.mxu1  ;;  %8818 = vmatpush3.bf16.msra.mxu0 %v9115_v27 }
0x40e7   : > { %7198 = vrot.lane.b32.xlu0 %v7189_v2, %s9513_s21  ;;  %8819 = vmatprep.subr.bf16.mxu0 %v9506_v0 }
0x40e8   : > { %v8813_v51 = vpop.f32.mrf.mxu1 }
0x40ea   : > { %v7192_v24 = vpop.f32.mrf.mxu1  ;;  %8820 = vmatpush3.bf16.msra.mxu0 %v9116_v6 }
0x40eb   : > { %7200 = vrot.lane.b32.xlu1 %v7192_v24, %s9513_s21  ;;  %7244 = vperm.xlu0 %9024, %v7228_v61   ;;  %s7904_s21 = sshll.u32 %s9651_s23, 4  ;;  %s9418_s23 = scalar_lea.vmem %s9417_s9, 32 }
0x40ec   : > { %v8814_v10 = vpop.f32.mrf.mxu1  ;;  %8821 = vmatprep.subr.bf16.mxu0 %v9506_v0  ;;  %s7444_s0 = scalar_lea.hbm %s11615_s6, %s7904_s21  ;;  %p9420_p9 = scmp.lt.s32.totalorder %s9418_s23, %s9412_s24 }
0x40ee   : > { %8822 = vmatpush3.bf16.msra.mxu0 %v9117_v28  ;;  %p9421_p6 = por %p9420_p9, %p9419_p7 }
0x40ef   : > { %7231 = vperm.xlu1 %9023, %v7220_v3   ;;  %8823 = vmatprep.subr.bf16.mxu0 %v9506_v0 }
0x40f0   : > { %p9422_p12 = pnand %p9421_p6, %p9415_p4 }
0x40f2   : > { %8824 = vmatpush3.bf16.msra.mxu0 %v9118_v21 }
0x40f3   : > { %8825 = vmatprep.subr.bf16.mxu0 %v9506_v0  ;;  %v7362_v0 = vld [vmem:[%s11614_s17] sm:$0x1] }
0x40f6   : > { %8826 = vmatpush3.bf16.msra.mxu0 %v9119_v22 }
0x4159   : > { %v7199_v30 = vpop.permute.xlu0 %7198 }
0x415a   : > { %v7204_v17 = vadd.f32 %v7199_v30, %v11286_v50 }
0x415c   : > { %v7216_v33 = vadd.f32 %v7214_v32, %v7204_v17 }
0x415d   : > { %v7201_v14 = vpop.permute.xlu1 %7200 }
0x415e   : > { %v7205_v34 = vadd.f32 %v7201_v14, %v11288_v49  ;;  %v7218_v29 = vmax.f32 %v7216_v33, 0.0 }
0x4160   : > { %v7217_v1 = vadd.f32 %v7214_v32, %v7205_v34  ;;  %v7250_v26 = vsel %vm7249_vm14, %v7218_v29, 0.0 }
0x4162   : > { %v7219_v20 = vmax.f32 %v7217_v1, 0.0 }
0x4164   : > { %v7251_v25 = vsel %vm7249_vm14, %v7219_v20, 0.0 }
0x4165   : > { %v7252_v35 = vadd.f32 %v7251_v25, %v7250_v26 }
0x4166   : > { %v7245_v37 = vpop.permute.xlu0 %7244 }
0x4167   : > { %v7253_v9 = vrot.slane %v7252_v35, 4  ;;  %9187 = vrcp.f32 %v7245_v37 }
0x4169   : > { %v7254_v31 = vadd.f32 %v7253_v9, %v7252_v35 }
0x416a   : > { %v7232_v56 = vpop.permute.xlu1 %7231 }
0x416b   : > { %v7255_v12 = vrot.slane %v7254_v31, 2 }
0x416d   : > { %v7256_v46 = vadd.f32 %v7255_v12, %v7254_v31 }
0x416f   : > { %v7257_v43 = vrot.slane %v7256_v46, 1 }
0x4174   : > { %v9188_v54 = vpop.eup %9187 }
0x41a1   : > { %v7115_v36 = vpop.f32.mrf.mxu0 }
0x41a2   : > { %v7121_v23 = vadd.f32 %v7115_v36, %v11265_v42  ;;  %v7258_v42 = vadd.f32 %v7257_v43, %v7256_v46 }
0x41a3   : > { %v8805_v11 = vpop.f32.mrf.mxu0 }
0x41a4   : > { %v7130_v39 = vadd.f32 %v7889_v52, %v7121_v23  ;;  %v7260_v7 = vmul.f32 0.0625, %v7258_v42 }
0x41a5   : > { %v7118_v49 = vpop.f32.mrf.mxu0 }
0x41a6   : > { %v7131_v50 = vmax.f32 %v7130_v39, 0.0 }
0x41a7   : > { %v8806_v41 = vpop.f32.mrf.mxu0 }
0x41a8   : > { %v7234_v40 = vmul.f32 %v7232_v56, %v7131_v50 }
0x41aa   : > { %v7235_v8 = vsel %vm924_vm1, %v7234_v40, 0.0 }
0x41ab   : > { %v7236_v60 = vrot.slane %v7235_v8, 4 }
0x41ad   : > { %v7237_v13 = vadd.f32 %v7236_v60, %v7235_v8 }
0x41af   : > { %v7238_v48 = vrot.slane %v7237_v13, 2 }
0x41b1   : > { %v7239_v62 = vadd.f32 %v7238_v48, %v7237_v13 }
0x41b3   : > { %v7240_v38 = vrot.slane %v7239_v62, 1 }
0x41b5   : > { %v7241_v58 = vadd.f32 %v7240_v38, %v7239_v62 }
0x41b7   : > { %v7248_v63 = vmul.f32 %v9188_v54, %v7241_v58 }
0x41b9   : > { %v7261_v3 = vsel %vm924_vm1, %v7248_v63, %v7260_v7 }
0x41ba   : > { %v7262_v57 = vpack.c.bf16 %v7261_v3, %v7261_v3 }
0x41bc   : > { %8828 = vmatmul.mubr.msk.bf16.vlgmr.msra.gmra.mxu0 %vm7312_vm15, %v7262_v57 }
0x427c   : > { %v7350_v44 = vpop.f32.mrf.mxu0 }
0x427d   : > { %v7351_v4 = vadd.f32 %v7350_v44, %v7275_v18 }
0x427e   : > { %v8829_v16 = vpop.f32.mrf.mxu0 }
0x427f   : > { %v7356_v55 = vmax.f32 %v7351_v4, 0.0 }
0x4280   : > { %v7353_v53 = vpop.f32.mrf.mxu0 }
0x4281   : > { %v7357_v47 = vpack.c.bf16 %v7356_v55, %v7356_v55 }
0x4282   : > { %v8830_v45 = vpop.f32.mrf.mxu0 }
0x4283   : > { %8836 = vmatmul.mubr.msk.bf16.vlgmr.msra.gmra.mxu1 %vm924_vm1, %v7357_v47 }
0x4343   : > { %v7412_v19 = vpop.f32.mrf.mxu1 }
0x4344   : > { %v7413_v2 = vadd.f32 %v7412_v19, %v7362_v0 }
0x4345   : > { %v8837_v61 = vpop.f32.mrf.mxu1 }
0x4346   : > { %v7419_v51 = vsel %vm7418_vm0, %v7413_v2, -inf }
0x4347   : > { %7420 = vmax.xlane.f32.xlu1 %v7419_v51  ;;  %v7415_v24 = vpop.f32.mrf.mxu1 }
0x4349   : > { %v8838_v10 = vpop.f32.mrf.mxu1 }
0x43d0   : > { %v7421_v5 = vpop.xlane.xlu1 %7420 }
0x43d1   : > { %v7422_v27 = vsub.f32 %v7413_v2, %v7421_v5 }
0x43d3   : > { %v7423_v6 = vmul.f32 1.442695, %v7422_v27 }
0x43d5   : > { %9189 = vpow2.f32 %v7423_v6 }
0x43e2   : > { %v9190_v28 = vpop.eup %9189 }
0x43e3   : > { %v7425_v21 = vsel %vm7418_vm0, %v9190_v28, 0.0 }
0x43e4   : > { %7426 = vadd.xlane.f32.xlu0 %v7425_v21 }
0x446d   : > { %v7427_v22 = vpop.xlane.xlu0 %7426 }
0x446e   : > { %9191 = vlog2.f32 %v7427_v22 }
0x447b   : > { %v9192_v32 = vpop.eup %9191 }
0x447c   : > { %v7429_v14 = vmul.f32 0.6931472, %v9192_v32 }
0x447e   : > { %v7430_v30 = vadd.f32 %v7429_v14, %v7421_v5 }
0x4480   : > { %v7431_v34 = vsub.f32 %v7413_v2, %v7430_v30 }
0x4482   : > { %7432 = vst [vmem:[%s868_s11] sm:$0x1] %v7431_v34 }
0x4483   : > { %9425 = shalt.err (!%p9422_p12)
}
0x4484   : > { %s9426_s26 = scalar_lea.hbm %s7444_s0, 16  ;;  %s9430_s1 = scalar_lea.hbm %s11615_s6, 32 }
0x4485   : > { %p9427_p13 = scmp.ne.s32.totalorder %s7444_s0, %s9426_s26  ;;  %p9431_p5 = scmp.lt.s32.totalorder %s7444_s0, %s11615_s6 }
0x4486   : > { %p9432_p8 = scmp.lt.s32.totalorder %s9430_s1, %s9426_s26 }
0x4487   : > { %p9428_p0 = pnand %p9427_p13, %p11616_p1 }
0x4488   : > { %p9433_p11 = por %p9432_p8, %p9431_p5 }
0x4489   : > { %p9429_p2 = pneg %p9428_p0 }
0x448b   : > { %p9434_p10 = pnand %p9433_p11, %p9429_p2 }
0x448d   : > { %9437 = shalt.err (!%p9434_p10)
}
0x448e   : > { %8869 = dma.vmem_to_hbm [thread:$0]  (%p11616_p1), %s7447_s15, 16, %s7444_s0, %s7434_s27  }
0x448f PF: > { %s7458_s11 = sand.u32 1, %s9480_s3   ;;  %p11617_p3 = scmp.ne.s32.totalorder %s11590_s5, 0 }
0x4490   : > { %p11618_p4 = scmp.ge.s32.totalorder %s9492_s30, 2  ;;  %s7459_s29 = scalar_lea.sflag [#allocation4], %s7458_s11 }
0x4492   : > { %p8898_p7 = pnand %p11618_p4, %p11617_p3 }
0x4494   : > { %p8899_p9 = pneg %p8898_p7 }
0x4496   : > { %9475 = dma.done.wait (%p8899_p9), %s7459_s29, 16  }
0x4497   : > { %9477 = vsyncadd (%p8899_p9), %s7459_s29, 4294967280  ;;  %s11619_s4 = sld [smem:[#allocation23_spill]]  ;;  %p39_p6 = scmp.ge.s32.totalorder %s9755_s2, 4  }
0x4498   : > { %s11620_s29 = sld [smem:[#allocation24_spill]]  ;;  %s11621_s3 = smov %s9484_s28 }
0x4499   : > { %s11623_s30 = smov %s9755_s2  ;;  %41 = sbr.rel (!%p39_p6) target bundleno = 26 (0x1a), region = 238 }
0x449d   : > { %s11622_s28 = smov %s11619_s4 }
0x449e   :  { %7463 = vsyncpa [#allocation3], 1 }
0x449f   :  { %7465 = vsyncpa [#allocation3 + $0x1], 1 }
0x44a0   :  { %7466 = vsyncpa [#allocation6], 1 }
0x44a1   :  { %7467 = vsyncpa [#allocation9], 1 }
0x44a2   :  { %7468 = vsyncpa [#allocation12], 1 }
0x44a3   :  { %7469 = vsyncpa [#allocation15], 1 }
0x44a4   :  { %7470 = vsyncpa [#allocation4], 1 }
0x44a5   :  { %7472 = vsyncpa [#allocation4 + $0x1], 1 }

</bundles_post_ra>
